<compile_context>
chip_gen: v6e
topology: v6e:2x2x1
jax: 0.10.0
libtpu: 0.0.40
codegen_flags: <defaults>
</compile_context>

<pallas_src>
import math
import functools

import jax
import jax.numpy as jnp
from jax.experimental import pallas as pl
from jax.experimental.pallas import tpu as pltpu


# ----------------------------------------------------------------------------
# helpers
# ----------------------------------------------------------------------------
def _round_up(x, m):
    return ((x + m - 1) // m) * m


def _row_tiling(M, cap=512):
    """Pick (padded_rows, row_tile): tile is a multiple of 8 and divides padding."""
    Mp = _round_up(max(M, 8), 8)
    if Mp <= cap:
        return Mp, Mp
    Mp = _round_up(Mp, cap)
    return Mp, cap


def _block_diag3(a, b, c):
    n = a.shape[0]
    z = jnp.zeros((3 * n, 3 * n), jnp.float32)
    z = z.at[:n, :n].set(a)
    z = z.at[n:2 * n, n:2 * n].set(b)
    z = z.at[2 * n:, 2 * n:].set(c)
    return z


def positional_encoding(L, d_model):
    pos = jnp.arange(L, dtype=jnp.float32)[:, None]
    div = jnp.exp(jnp.arange(0, d_model, 2, dtype=jnp.float32) *
                  (-math.log(10000.0) / d_model))
    ang = pos * div
    return jnp.stack([jnp.sin(ang), jnp.cos(ang)], axis=-1).reshape(L, d_model)


# ----------------------------------------------------------------------------
# Pallas kernels
# ----------------------------------------------------------------------------
def _gmm_kernel(a_ref, b_ref, bias_ref, o_ref, *, act, softmax_last):
    """One (tm,K)@(K,N)+bias tile of a grouped matmul with fused epilogue."""
    acc = jnp.dot(a_ref[0], b_ref[0], preferred_element_type=jnp.float32) + bias_ref[0]
    if act == "relu":
        acc = jnp.maximum(acc, 0.0)
    elif act == "sigmoid":
        acc = jax.nn.sigmoid(acc)
    if softmax_last:
        m = jnp.max(acc, axis=-1, keepdims=True)
        e = jnp.exp(acc - m)
        acc = e * pl.reciprocal(jnp.sum(e, axis=-1, keepdims=True), approx=True)
    o_ref[0] = acc


def grouped_matmul(a, b, bias=None, act="none", softmax_last=False):
    """(G,M,K) @ (G,K,N) + bias(G,N), tiled over M, fused relu/sigmoid/row-softmax."""
    G, M, K = a.shape
    Nout = b.shape[2]
    if bias is None:
        bias = jnp.zeros((G, Nout), jnp.float32)
    Mp, tm = _row_tiling(M)
    if Mp != M:
        a = jnp.pad(a, ((0, 0), (0, Mp - M), (0, 0)))
    out = pl.pallas_call(
        functools.partial(_gmm_kernel, act=act, softmax_last=softmax_last),
        out_shape=jax.ShapeDtypeStruct((G, Mp, Nout), jnp.float32),
        grid=(G, Mp // tm),
        in_specs=[
            pl.BlockSpec((1, tm, K), lambda g, i: (g, i, 0)),
            pl.BlockSpec((1, K, Nout), lambda g, i: (g, 0, 0)),
            pl.BlockSpec((1, 1, Nout), lambda g, i: (g, 0, 0)),
        ],
        out_specs=pl.BlockSpec((1, tm, Nout), lambda g, i: (g, i, 0)),
        compiler_params=pltpu.CompilerParams(
            dimension_semantics=("parallel", "parallel")),
    )(a, b, bias.reshape(G, 1, Nout))
    if Mp != M:
        out = out[:, :M]
    return out


def _proxy_kernel(obs_ref, era_ref, pan_ref, bias_ref, wq_ref, bq_ref, wk_ref, bk_ref,
                  tp_ref, te_ref, *, k, L):
    """Fused proxy-site alignment for a tile of (b,c,n) rows.

    q = obs @ Wq + bq ; score_j = <K_j, q> computed via the identity
    <era_j @ Wk^T + bk, q> = <era_j, q @ Wk> + <bk, q>  (keeps everything 2-D).
    Then softmax over the k proxy sites and both weighted sums (pan -> tilde_P,
    era -> tilde_E) without leaving VMEM.
    """
    obs = obs_ref[...]                                              # (tr, L)
    q = jnp.dot(obs, wq_ref[...], preferred_element_type=jnp.float32) + bq_ref[...]
    qk = jnp.dot(q, wk_ref[...], preferred_element_type=jnp.float32)   # (tr, L)
    bdot = jnp.sum(q * bk_ref[...], axis=-1, keepdims=True)            # (tr, 1)
    era = era_ref[...]                                              # (tr, k*L)
    pan = pan_ref[...]
    bias = bias_ref[...]                                            # (tr, k)

    s = [jnp.sum(era[:, j * L:(j + 1) * L] * qk, axis=-1, keepdims=True)
         + bdot + bias[:, j:j + 1] for j in range(k)]
    m = s[0]
    for j in range(1, k):
        m = jnp.maximum(m, s[j])
    e = [jnp.exp(sj - m) for sj in s]
    denom = e[0]
    for j in range(1, k):
        denom = denom + e[j]
    inv = pl.reciprocal(denom, approx=True)

    tp = jnp.zeros_like(qk)
    te = jnp.zeros_like(qk)
    for j in range(k):
        a = e[j] * inv
        tp = tp + a * pan[:, j * L:(j + 1) * L]
        te = te + a * era[:, j * L:(j + 1) * L]
    tp_ref[...] = tp
    te_ref[...] = te


def proxy_alignment(obs2, era2, pan2, bias2, wq_t, bq, wk, bk, *, k, L):
    R = obs2.shape[0]
    da = wq_t.shape[1]
    Rp, tr = _row_tiling(R)
    if Rp != R:
        pr = ((0, Rp - R), (0, 0))
        obs2 = jnp.pad(obs2, pr)
        era2 = jnp.pad(era2, pr)
        pan2 = jnp.pad(pan2, pr)
        bias2 = jnp.pad(bias2, pr)
    tp, te = pl.pallas_call(
        functools.partial(_proxy_kernel, k=k, L=L),
        out_shape=(jax.ShapeDtypeStruct((Rp, L), jnp.float32),
                   jax.ShapeDtypeStruct((Rp, L), jnp.float32)),
        grid=(Rp // tr,),
        in_specs=[
            pl.BlockSpec((tr, L), lambda i: (i, 0)),
            pl.BlockSpec((tr, k * L), lambda i: (i, 0)),
            pl.BlockSpec((tr, k * L), lambda i: (i, 0)),
            pl.BlockSpec((tr, k), lambda i: (i, 0)),
            pl.BlockSpec((L, da), lambda i: (0, 0)),
            pl.BlockSpec((1, da), lambda i: (0, 0)),
            pl.BlockSpec((da, L), lambda i: (0, 0)),
            pl.BlockSpec((1, da), lambda i: (0, 0)),
        ],
        out_specs=(pl.BlockSpec((tr, L), lambda i: (i, 0)),
                   pl.BlockSpec((tr, L), lambda i: (i, 0))),
        compiler_params=pltpu.CompilerParams(dimension_semantics=("parallel",)),
    )(obs2, era2, pan2, bias2, wq_t, bq, wk, bk)
    return tp[:R], te[:R]


def _tcn_layer_kernel(x0_ref, x1_ref, x2_ref, w_ref, b_ref, o_ref, *, D):
    """3 dilated-conv taps + (BN-folded) bias + ReLU + residual, fused."""
    x0 = x0_ref[0]
    x1 = x1_ref[0]          # center tap == layer input == residual
    x2 = x2_ref[0]
    w = w_ref[0]            # (3*D, D), tap-major
    acc = jnp.dot(x0, w[0:D], preferred_element_type=jnp.float32)
    acc = acc + jnp.dot(x1, w[D:2 * D], preferred_element_type=jnp.float32)
    acc = acc + jnp.dot(x2, w[2 * D:3 * D], preferred_element_type=jnp.float32)
    acc = acc + b_ref[0]
    o_ref[0] = jnp.maximum(acc, 0.0) + x1


def tcn_layer(x, w, b, dil):
    """One TCN layer for both branches. x: (G, BN, L, D); w: (G, 3D, D); b: (G, D)."""
    G, BN, L, D = x.shape
    xpad = jnp.pad(x, ((0, 0), (0, 0), (dil, dil), (0, 0)))
    x0 = xpad[:, :, 0:L, :].reshape(G, BN * L, D)
    x1 = x.reshape(G, BN * L, D)
    x2 = xpad[:, :, 2 * dil:2 * dil + L, :].reshape(G, BN * L, D)
    M = BN * L
    Mp, tm = _row_tiling(M)
    if Mp != M:
        pr = ((0, 0), (0, Mp - M), (0, 0))
        x0 = jnp.pad(x0, pr)
        x1 = jnp.pad(x1, pr)
        x2 = jnp.pad(x2, pr)
    out = pl.pallas_call(
        functools.partial(_tcn_layer_kernel, D=D),
        out_shape=jax.ShapeDtypeStruct((G, Mp, D), jnp.float32),
        grid=(G, Mp // tm),
        in_specs=[
            pl.BlockSpec((1, tm, D), lambda g, i: (g, i, 0)),
            pl.BlockSpec((1, tm, D), lambda g, i: (g, i, 0)),
            pl.BlockSpec((1, tm, D), lambda g, i: (g, i, 0)),
            pl.BlockSpec((1, 3 * D, D), lambda g, i: (g, 0, 0)),
            pl.BlockSpec((1, 1, D), lambda g, i: (g, 0, 0)),
        ],
        out_specs=pl.BlockSpec((1, tm, D), lambda g, i: (g, i, 0)),
        compiler_params=pltpu.CompilerParams(
            dimension_semantics=("parallel", "parallel")),
    )(x0, x1, x2, w, b.reshape(G, 1, D))
    if Mp != M:
        out = out[:, :M]
    return out.reshape(G, BN, L, D)


def _attn_kernel(q_ref, k_ref, v_ref, o_ref, *, scale):
    q = q_ref[...]
    k = k_ref[...]
    v = v_ref[...]
    s = jnp.einsum("bld,bmd->blm", q, k, preferred_element_type=jnp.float32) * scale
    m = jnp.max(s, axis=-1, keepdims=True)
    p = jnp.exp(s - m)
    p = p * pl.reciprocal(jnp.sum(p, axis=-1, keepdims=True), approx=True)
    o_ref[...] = jnp.einsum("blm,bmd->bld", p, v, preferred_element_type=jnp.float32)


def fused_attention(q, k, v, scale):
    """softmax(q @ k^T * scale) @ v over stacked batches (BT, L, D)."""
    BT, L, Dh = q.shape
    BTp, tb = _row_tiling(BT, cap=256)
    if BTp != BT:
        pr = ((0, BTp - BT), (0, 0), (0, 0))
        q = jnp.pad(q, pr)
        k = jnp.pad(k, pr)
        v = jnp.pad(v, pr)
    out = pl.pallas_call(
        functools.partial(_attn_kernel, scale=scale),
        out_shape=jax.ShapeDtypeStruct((BTp, L, Dh), jnp.float32),
        grid=(BTp // tb,),
        in_specs=[pl.BlockSpec((tb, L, Dh), lambda i: (i, 0, 0))] * 3,
        out_specs=pl.BlockSpec((tb, L, Dh), lambda i: (i, 0, 0)),
        compiler_params=pltpu.CompilerParams(dimension_semantics=("parallel",)),
    )(q, k, v)
    return out[:BT]


def _gate_pred_kernel(h_ref, f_ref, e_ref, w1_ref, b1_ref, wp_ref, bp_ref, o_ref):
    """Adaptive-combiner gate + prediction head fused."""
    h = h_ref[...]
    f = f_ref[...]
    e = e_ref[...]
    g = jax.nn.sigmoid(
        jnp.dot(h + f + e, w1_ref[...], preferred_element_type=jnp.float32) + b1_ref[...])
    comb = h + g * f
    o_ref[...] = jnp.dot(comb, wp_ref[...], preferred_element_type=jnp.float32) + bp_ref[...]


def gate_and_predict(h, f, e, w1_t, b1, wp_t, bp):
    M, D = h.shape
    Mp, tm = _row_tiling(M)
    if Mp != M:
        pr = ((0, Mp - M), (0, 0))
        h = jnp.pad(h, pr)
        f = jnp.pad(f, pr)
        e = jnp.pad(e, pr)
    out = pl.pallas_call(
        _gate_pred_kernel,
        out_shape=jax.ShapeDtypeStruct((Mp, 1), jnp.float32),
        grid=(Mp // tm,),
        in_specs=[
            pl.BlockSpec((tm, D), lambda i: (i, 0)),
            pl.BlockSpec((tm, D), lambda i: (i, 0)),
            pl.BlockSpec((tm, D), lambda i: (i, 0)),
            pl.BlockSpec((D, D), lambda i: (0, 0)),
            pl.BlockSpec((1, D), lambda i: (0, 0)),
            pl.BlockSpec((D, 1), lambda i: (0, 0)),
            pl.BlockSpec((1, 1), lambda i: (0, 0)),
        ],
        out_specs=pl.BlockSpec((tm, 1), lambda i: (i, 0)),
        compiler_params=pltpu.CompilerParams(dimension_semantics=("parallel",)),
    )(h, f, e, w1_t, b1, wp_t, bp)
    return out[:M]


# ----------------------------------------------------------------------------
# model forward
# ----------------------------------------------------------------------------
def model_forward(params, cfg, obs_his, era_his, pan_fut, csta, cera, cpan):
    B, C, N, L = obs_his.shape
    D = cfg["d_model"]
    k = cfg["k"]
    nl = cfg["num_layers"]
    P = cfg["pre_len"]
    ad = D // nl
    dn = cfg["d_node"]
    target = cfg["target"]
    BN = B * N

    # ---- k nearest proxy sites (sklearn ball-tree -> exact top_k of distances) ----
    cera_s = cera[:, :-1, :].reshape(-1, 2)
    era_flat = era_his[:, :, :, :-1, :].reshape(B, C, -1, L)
    pan_flat = pan_fut.reshape(B, C, -1, L)
    d2 = jnp.sum((csta[:, None, :] - cera_s[None, :, :]) ** 2, axis=-1)
    _, idx = jax.lax.top_k(-d2, k)                              # (N, k) nearest ERA sites
    era_k = era_flat[:, :, idx, :]                              # (B, C, N, k, L)
    pan_k = pan_flat[:, :, idx, :]                              # ERA indices, as in reference

    # ---- fused proxy alignment: projections + scores + softmax + tilde_P/tilde_E ----
    R = B * C * N
    obs2 = obs_his.reshape(R, L)
    era2 = era_k.reshape(R, k * L)
    pan2 = pan_k.reshape(R, k * L)
    bias2 = jnp.broadcast_to(params["psa_bias"], (B, C, N, k)).reshape(R, k)
    tp2, te2 = proxy_alignment(obs2, era2, pan2, bias2,
                               params["psa_Wq_t"], params["psa_bq"],
                               params["psa_Wk"], params["psa_bk"], k=k, L=L)
    tilde_P = tp2.reshape(B, C, N, L)
    tilde_E = te2.reshape(B, C, N, L)

    # ---- value embeddings + positional encoding (his/fut grouped, dropout = identity) ----
    obs_cl = jnp.transpose(obs_his, (0, 2, 3, 1)).reshape(BN * L, C)
    tilP_cl = jnp.transpose(tilde_P, (0, 2, 3, 1)).reshape(BN * L, C)
    emb = grouped_matmul(jnp.stack([obs_cl, tilP_cl]), params["emb_W"], params["emb_b"])
    emb = emb.reshape(2, B, N, L, D) + positional_encoding(L, D)[None, None, None]

    # ---- adaptive adjacency (nodevec pairs packed; relu+row-softmax fused) ----
    obs_mean = jnp.mean(obs_his, axis=(0, 3)).T                 # (N, C); conv is affine
    til_mean = jnp.mean(tilde_P, axis=(0, 3)).T
    nv = grouped_matmul(jnp.stack([obs_mean, til_mean]), params["node_W"], params["node_b"])
    nv1, nv2 = nv[0, :, :dn], nv[0, :, dn:]
    nv3, nv4 = nv[1, :, :dn], nv[1, :, dn:]
    adp = grouped_matmul(jnp.stack([nv1, nv3]), jnp.stack([nv2.T, nv4.T]),
                         act="relu", softmax_last=True)          # (2, N, N)
    sup = params["supports"]
    A_all = jnp.stack([jnp.concatenate([sup[0], sup[1], adp[0]], axis=1),
                       jnp.concatenate([sup[0], sup[1], adp[1]], axis=1)])   # (2, N, 3N)
    A_diag = jnp.stack([_block_diag3(sup[0], sup[1], adp[0]),
                        _block_diag3(sup[0], sup[1], adp[1])])               # (2, 3N, 3N)

    # ---- TCN (his & fut as one grouped computation; BN folded, ReLU+residual fused) ----
    bn_scale = jnp.float32(1.0 / math.sqrt(1.0 + 1e-5))
    x = emb.reshape(2, BN, L, D)
    h_levels = []
    dil = 1
    for i in range(nl):
        x = tcn_layer(x, params["tcn_W"][i] * bn_scale, params["tcn_b"][i] * bn_scale, dil)
        h_levels.append(x)
        dil = min(dil * 2, 16)
    time_emb = grouped_matmul(x.reshape(2, BN * L, D), params["tcn_fW"], params["tcn_fb"])
    time_emb = time_emb.reshape(2, B, N, L, D)
    xtime_emb, ytime_emb = time_emb[0], time_emb[1]

    # ---- hierarchical GCN: 3 grouped matmuls for all levels & both branches ----
    h_all = jnp.stack(h_levels, axis=1).reshape(2, nl, B, N, L, D)
    M0 = jnp.transpose(h_all, (0, 1, 2, 4, 5, 3)).reshape(2, nl * B * L * D, N)
    M1 = grouped_matmul(M0, A_all)                               # first order  [A1x|A2x|Aadp x]
    M2 = grouped_matmul(M1, A_diag)                              # second order [A1^2x|A2^2x|Aadp^2x]
    M0r = M0.reshape(2, nl, B, L, D, 1, N)
    M1r = M1.reshape(2, nl, B, L, D, 3, N)
    M2r = M2.reshape(2, nl, B, L, D, 3, N)
    # term order matches torch gcn concat: [x, A1x, A1^2x, A2x, A2^2x, Aadp x, Aadp^2 x]
    terms = jnp.concatenate(
        [M0r, M1r[..., 0:1, :], M2r[..., 0:1, :], M1r[..., 1:2, :], M2r[..., 1:2, :],
         M1r[..., 2:3, :], M2r[..., 2:3, :]], axis=-2)           # (2, nl, B, L, D, 7, N)
    feat = jnp.transpose(terms, (0, 1, 2, 6, 4, 5, 3)).reshape(2, nl * B * N * D, 7 * L)
    spa = grouped_matmul(feat, params["gcn_W"], params["gcn_b"])
    spa = jnp.transpose(spa.reshape(2, nl, B, N, D, P), (0, 1, 2, 3, 5, 4))  # (2,nl,B,N,P,D)
    xspa, yspa = spa[0], spa[1]

    # ---- cross-domain attention (levels & both directions batched) ----
    Xrows = xspa.reshape(nl * B * N * P, D)
    Yrows = yspa.reshape(nl * B * N * P, D)
    proj = grouped_matmul(jnp.stack([Xrows, Yrows]), params["cross_W"], params["cross_b"])
    px, py = proj[0], proj[1]                                    # columns: [q1|k2|v2], [k1|v1|q2]

    def _head(a, j):
        return a[:, j * ad:(j + 1) * ad].reshape(nl * B * N, P, ad)

    q1, k2, v2 = _head(px, 0), _head(px, 1), _head(px, 2)
    k1, v1, q2 = _head(py, 0), _head(py, 1), _head(py, 2)
    Z = fused_attention(jnp.concatenate([q1, q2], axis=0),
                        jnp.concatenate([k1, k2], axis=0),
                        jnp.concatenate([v1, v2], axis=0),
                        1.0 / math.sqrt(ad))
    nb = nl * B * N
    z1 = Z[:nb].reshape(nl, B, N, P, ad)
    z2 = Z[nb:].reshape(nl, B, N, P, ad)
    spatio_attn_f = jnp.moveaxis(z1, 0, 3).reshape(B, N, P, D)
    spatio_attn_h = jnp.moveaxis(z2, 0, 3).reshape(B, N, P, D)

    fuse_h = xtime_emb + spatio_attn_h
    fuse_f = ytime_emb + spatio_attn_f

    # ---- adaptive combiner + prediction head ----
    error = (tilde_E[:, target] * obs_his[:, target]).reshape(BN, L)          # (B*N, L)
    err_emb = grouped_matmul(error[None], params["ac_W2_t"][None], params["ac_b2"])[0]
    err_nchw = err_emb.reshape(B, D, N, L)                        # raw reshape == torch .reshape
    err_cl = jnp.transpose(err_nchw, (0, 2, 3, 1)).reshape(BN * L, D)
    out = gate_and_predict(fuse_h.reshape(-1, D), fuse_f.reshape(-1, D), err_cl,
                           params["ac_W1_t"], params["ac_b1"],
                           params["pred_W_t"], params["pred_b"])
    return jnp.transpose(out.reshape(B, N, L, 1), (0, 3, 1, 2))   # (B, 1, N, L) NCHW


# ----------------------------------------------------------------------------
# deterministic synthetic parameters (shapes from the module, pre-packed/transposed)
# ----------------------------------------------------------------------------
def init_params(key, cfg, N):
    C, D, L = cfg["in_dim"], cfg["d_model"], cfg["seq_len"]
    k, da, dn = cfg["k"], cfg["d_align"], cfg["d_node"]
    nl, P = cfg["num_layers"], cfg["pre_len"]
    ad = D // nl
    keys = iter(jax.random.split(key, 64))

    def nrm(*shape, s=0.2):
        return (s * jax.random.normal(next(keys), shape)).astype(jnp.float32)

    params = {
        # proxy-site alignment (orientations chosen for the fused kernel)
        "psa_Wq_t": nrm(L, da), "psa_bq": nrm(1, da, s=0.05),
        "psa_Wk": nrm(da, L), "psa_bk": nrm(1, da, s=0.05),
        "psa_bias": jnp.zeros((1, C, N, k), jnp.float32),         # torch init: zeros
        # value embeddings, group axis = (his, fut)
        "emb_W": nrm(2, C, D), "emb_b": nrm(2, D, s=0.05),
        # node-embedding generators: [Wn1|Wn2] on obs mean, [Wn3|Wn4] on tilde_P mean
        "node_W": nrm(2, C, 2 * dn), "node_b": nrm(2, 2 * dn, s=0.05),
        # TCN (his, fut): per layer tap-major (3D, D) weight
        "tcn_W": [nrm(2, 3 * D, D, s=0.05) for _ in range(nl)],
        "tcn_b": [nrm(2, D, s=0.05) for _ in range(nl)],
        "tcn_fW": nrm(2, D, D, s=0.1), "tcn_fb": nrm(2, D, s=0.1),
        # hierarchical GCN mix (his, fut): (7L, pre_len)
        "gcn_W": nrm(2, 7 * L, P, s=0.05), "gcn_b": nrm(2, P, s=0.05),
        # cross-domain attention: source-x -> [Wq1|Wk2|Wv2], source-y -> [Wk1|Wv1|Wq2]
        "cross_W": nrm(2, D, 3 * ad), "cross_b": nrm(2, 3 * ad, s=0.1),
        # adaptive combiner + prediction head
        "ac_W2_t": nrm(L, D * L, s=0.1), "ac_b2": nrm(1, D * L, s=0.05),
        "ac_W1_t": nrm(D, D, s=0.1), "ac_b1": nrm(1, D, s=0.05),
        "pred_W_t": nrm(D, 1), "pred_b": nrm(1, 1, s=0.05),
        # predefined supports
        "supports": [jax.nn.softmax(nrm(N, N, s=1.0), axis=1) for _ in range(2)],
    }
    return params


# ----------------------------------------------------------------------------
if __name__ == "__main__":
    cfg = dict(in_dim=3, d_model=16, d_align=8, num_layers=2,
               seq_len=8, pre_len=8, k=3, target=0, d_node=10)
    B, C, N, L = 2, cfg["in_dim"], 4, cfg["seq_len"]
    lat, lon_era, lon_pan = 5, 5, 4

    key = jax.random.PRNGKey(0)
    k1, k2, k3, k4, k5, k6 = jax.random.split(key, 6)
    obs_his = jax.random.normal(k1, (B, C, N, L), jnp.float32)
    era_his = jax.random.normal(k2, (B, C, lat, lon_era, L), jnp.float32)
    pan_fut = jax.random.normal(k3, (B, C, lat, lon_pan, L), jnp.float32)
    csta = jax.random.uniform(k4, (N, 2), jnp.float32)
    cera = jax.random.uniform(k5, (lat, lon_era, 2), jnp.float32)
    cpan = jax.random.uniform(k6, (lat, lon_pan, 2), jnp.float32)

    params = init_params(jax.random.PRNGKey(42), cfg, N)

    fwd = jax.jit(lambda p, a, b, c, d, e, f: model_forward(p, cfg, a, b, c, d, e, f))
    out = fwd(params, obs_his, era_his, pan_fut, csta, cera, cpan)
    out = jax.block_until_ready(out)
    assert out.shape == (B, 1, N, L), out.shape
    assert bool(jnp.all(jnp.isfinite(out)))
    print("KERNEL_OK")
</pallas_src>

<mosaic_0001>
module attributes {stable_mosaic.version = 11 : i64} {
  func.func @_proxy_kernel(%arg0: i32, %arg1: memref<24x8xf32, #tpu.memory_space<vmem>>, %arg2: memref<24x24xf32, #tpu.memory_space<vmem>>, %arg3: memref<24x24xf32, #tpu.memory_space<vmem>>, %arg4: memref<24x3xf32, #tpu.memory_space<vmem>>, %arg5: memref<8x8xf32, #tpu.memory_space<vmem>>, %arg6: memref<1x8xf32, #tpu.memory_space<vmem>>, %arg7: memref<8x8xf32, #tpu.memory_space<vmem>>, %arg8: memref<1x8xf32, #tpu.memory_space<vmem>>, %arg9: memref<24x8xf32, #tpu.memory_space<vmem>>, %arg10: memref<24x8xf32, #tpu.memory_space<vmem>>) attributes {dimension_semantics = [#tpu.dimension_semantics<parallel>], iteration_bounds = array<i64: 1>, scalar_prefetch = 0 : i64, scratch_operands = 0 : i64, tpu.core_type = #tpu.core_type<tc>, window_params = [{transform_indices = @transform_0, window_bounds = array<i64: 24, 8>}, {transform_indices = @transform_1, window_bounds = array<i64: 24, 24>}, {transform_indices = @transform_2, window_bounds = array<i64: 24, 24>}, {transform_indices = @transform_3, window_bounds = array<i64: 24, 3>}, {pipeline_mode = #tpu.pipeline_mode<synchronous>, transform_indices = @transform_4, window_bounds = array<i64: 8, 8>}, {pipeline_mode = #tpu.pipeline_mode<synchronous>, transform_indices = @transform_5, window_bounds = array<i64: 1, 8>}, {pipeline_mode = #tpu.pipeline_mode<synchronous>, transform_indices = @transform_6, window_bounds = array<i64: 8, 8>}, {pipeline_mode = #tpu.pipeline_mode<synchronous>, transform_indices = @transform_7, window_bounds = array<i64: 1, 8>}, {transform_indices = @transform_8, window_bounds = array<i64: 24, 8>}, {transform_indices = @transform_9, window_bounds = array<i64: 24, 8>}]} {
    %c0 = arith.constant 0 : index
    %c0_0 = arith.constant 0 : index
    %0 = vector.load %arg1[%c0, %c0_0] : memref<24x8xf32, #tpu.memory_space<vmem>>, vector<24x8xf32>
    %c0_1 = arith.constant 0 : index
    %c0_2 = arith.constant 0 : index
    %1 = vector.load %arg5[%c0_1, %c0_2] : memref<8x8xf32, #tpu.memory_space<vmem>>, vector<8x8xf32>
    %cst = arith.constant dense<0.000000e+00> : vector<24x8xf32>
    %2 = tpu.matmul %0, %1, %cst {dimension_numbers = #tpu.dot_dimension_numbers<[1], [0], [0], [1], [0, 0, 1, 1], [], []>} : vector<24x8xf32>, vector<8x8xf32>, vector<24x8xf32> -> vector<24x8xf32>
    %c0_3 = arith.constant 0 : index
    %c0_4 = arith.constant 0 : index
    %3 = vector.load %arg6[%c0_3, %c0_4] : memref<1x8xf32, #tpu.memory_space<vmem>>, vector<1x8xf32>
    %4 = vector.broadcast %3 : vector<1x8xf32> to vector<24x8xf32>
    %5 = arith.addf %2, %4 : vector<24x8xf32>
    %c0_5 = arith.constant 0 : index
    %c0_6 = arith.constant 0 : index
    %6 = vector.load %arg7[%c0_5, %c0_6] : memref<8x8xf32, #tpu.memory_space<vmem>>, vector<8x8xf32>
    %cst_7 = arith.constant dense<0.000000e+00> : vector<24x8xf32>
    %7 = tpu.matmul %5, %6, %cst_7 {dimension_numbers = #tpu.dot_dimension_numbers<[1], [0], [0], [1], [0, 0, 1, 1], [], []>} : vector<24x8xf32>, vector<8x8xf32>, vector<24x8xf32> -> vector<24x8xf32>
    %c0_8 = arith.constant 0 : index
    %c0_9 = arith.constant 0 : index
    %8 = vector.load %arg8[%c0_8, %c0_9] : memref<1x8xf32, #tpu.memory_space<vmem>>, vector<1x8xf32>
    %9 = vector.broadcast %8 : vector<1x8xf32> to vector<24x8xf32>
    %10 = arith.mulf %5, %9 : vector<24x8xf32>
    %cst_10 = arith.constant dense<0.000000e+00> : vector<24xf32>
    %11 = vector.multi_reduction <add>, %10, %cst_10 [1] : vector<24x8xf32> to vector<24xf32>
    %12 = vector.shape_cast %11 : vector<24xf32> to vector<24x1xf32>
    %c0_11 = arith.constant 0 : index
    %c0_12 = arith.constant 0 : index
    %13 = vector.load %arg2[%c0_11, %c0_12] : memref<24x24xf32, #tpu.memory_space<vmem>>, vector<24x24xf32>
    %c0_13 = arith.constant 0 : index
    %c0_14 = arith.constant 0 : index
    %14 = vector.load %arg3[%c0_13, %c0_14] : memref<24x24xf32, #tpu.memory_space<vmem>>, vector<24x24xf32>
    %c0_15 = arith.constant 0 : index
    %c0_16 = arith.constant 0 : index
    %15 = vector.load %arg4[%c0_15, %c0_16] : memref<24x3xf32, #tpu.memory_space<vmem>>, vector<24x3xf32>
    %16 = vector.extract_strided_slice %13 {offsets = [0, 0], sizes = [24, 8], strides = [1, 1]} : vector<24x24xf32> to vector<24x8xf32>
    %17 = arith.mulf %16, %7 : vector<24x8xf32>
    %cst_17 = arith.constant dense<0.000000e+00> : vector<24xf32>
    %18 = vector.multi_reduction <add>, %17, %cst_17 [1] : vector<24x8xf32> to vector<24xf32>
    %19 = vector.shape_cast %18 : vector<24xf32> to vector<24x1xf32>
    %20 = arith.addf %19, %12 : vector<24x1xf32>
    %21 = vector.extract_strided_slice %15 {offsets = [0, 0], sizes = [24, 1], strides = [1, 1]} : vector<24x3xf32> to vector<24x1xf32>
    %22 = arith.addf %20, %21 : vector<24x1xf32>
    %23 = vector.extract_strided_slice %13 {offsets = [0, 8], sizes = [24, 8], strides = [1, 1]} : vector<24x24xf32> to vector<24x8xf32>
    %24 = arith.mulf %23, %7 : vector<24x8xf32>
    %cst_18 = arith.constant dense<0.000000e+00> : vector<24xf32>
    %25 = vector.multi_reduction <add>, %24, %cst_18 [1] : vector<24x8xf32> to vector<24xf32>
    %26 = vector.shape_cast %25 : vector<24xf32> to vector<24x1xf32>
    %27 = arith.addf %26, %12 : vector<24x1xf32>
    %28 = vector.extract_strided_slice %15 {offsets = [0, 1], sizes = [24, 1], strides = [1, 1]} : vector<24x3xf32> to vector<24x1xf32>
    %29 = arith.addf %27, %28 : vector<24x1xf32>
    %30 = vector.extract_strided_slice %13 {offsets = [0, 16], sizes = [24, 8], strides = [1, 1]} : vector<24x24xf32> to vector<24x8xf32>
    %31 = arith.mulf %30, %7 : vector<24x8xf32>
    %cst_19 = arith.constant dense<0.000000e+00> : vector<24xf32>
    %32 = vector.multi_reduction <add>, %31, %cst_19 [1] : vector<24x8xf32> to vector<24xf32>
    %33 = vector.shape_cast %32 : vector<24xf32> to vector<24x1xf32>
    %34 = arith.addf %33, %12 : vector<24x1xf32>
    %35 = vector.extract_strided_slice %15 {offsets = [0, 2], sizes = [24, 1], strides = [1, 1]} : vector<24x3xf32> to vector<24x1xf32>
    %36 = arith.addf %34, %35 : vector<24x1xf32>
    %37 = arith.maximumf %22, %29 : vector<24x1xf32>
    %38 = arith.maximumf %37, %36 : vector<24x1xf32>
    %39 = arith.subf %22, %38 : vector<24x1xf32>
    %40 = math.exp %39 : vector<24x1xf32>
    %41 = arith.subf %29, %38 : vector<24x1xf32>
    %42 = math.exp %41 : vector<24x1xf32>
    %43 = arith.subf %36, %38 : vector<24x1xf32>
    %44 = math.exp %43 : vector<24x1xf32>
    %45 = arith.addf %40, %42 : vector<24x1xf32>
    %46 = arith.addf %45, %44 : vector<24x1xf32>
    %47 = tpu.reciprocal %46 {approx = true} : vector<24x1xf32> -> vector<24x1xf32>
    %cst_20 = arith.constant 0.000000e+00 : f32
    %48 = vector.broadcast %cst_20 : f32 to vector<24x8xf32>
    %cst_21 = arith.constant 0.000000e+00 : f32
    %49 = vector.broadcast %cst_21 : f32 to vector<24x8xf32>
    %50 = arith.mulf %40, %47 : vector<24x1xf32>
    %51 = vector.extract_strided_slice %14 {offsets = [0, 0], sizes = [24, 8], strides = [1, 1]} : vector<24x24xf32> to vector<24x8xf32>
    %52 = vector.broadcast %50 : vector<24x1xf32> to vector<24x8xf32>
    %53 = arith.mulf %52, %51 : vector<24x8xf32>
    %54 = arith.addf %48, %53 : vector<24x8xf32>
    %55 = vector.extract_strided_slice %13 {offsets = [0, 0], sizes = [24, 8], strides = [1, 1]} : vector<24x24xf32> to vector<24x8xf32>
    %56 = vector.broadcast %50 : vector<24x1xf32> to vector<24x8xf32>
    %57 = arith.mulf %56, %55 : vector<24x8xf32>
    %58 = arith.addf %49, %57 : vector<24x8xf32>
    %59 = arith.mulf %42, %47 : vector<24x1xf32>
    %60 = vector.extract_strided_slice %14 {offsets = [0, 8], sizes = [24, 8], strides = [1, 1]} : vector<24x24xf32> to vector<24x8xf32>
    %61 = vector.broadcast %59 : vector<24x1xf32> to vector<24x8xf32>
    %62 = arith.mulf %61, %60 : vector<24x8xf32>
    %63 = arith.addf %54, %62 : vector<24x8xf32>
    %64 = vector.extract_strided_slice %13 {offsets = [0, 8], sizes = [24, 8], strides = [1, 1]} : vector<24x24xf32> to vector<24x8xf32>
    %65 = vector.broadcast %59 : vector<24x1xf32> to vector<24x8xf32>
    %66 = arith.mulf %65, %64 : vector<24x8xf32>
    %67 = arith.addf %58, %66 : vector<24x8xf32>
    %68 = arith.mulf %44, %47 : vector<24x1xf32>
    %69 = vector.extract_strided_slice %14 {offsets = [0, 16], sizes = [24, 8], strides = [1, 1]} : vector<24x24xf32> to vector<24x8xf32>
    %70 = vector.broadcast %68 : vector<24x1xf32> to vector<24x8xf32>
    %71 = arith.mulf %70, %69 : vector<24x8xf32>
    %72 = arith.addf %63, %71 : vector<24x8xf32>
    %73 = vector.extract_strided_slice %13 {offsets = [0, 16], sizes = [24, 8], strides = [1, 1]} : vector<24x24xf32> to vector<24x8xf32>
    %74 = vector.broadcast %68 : vector<24x1xf32> to vector<24x8xf32>
    %75 = arith.mulf %74, %73 : vector<24x8xf32>
    %76 = arith.addf %67, %75 : vector<24x8xf32>
    %c0_22 = arith.constant 0 : index
    %c0_23 = arith.constant 0 : index
    %77 = vector.load %arg9[%c0_22, %c0_23] : memref<24x8xf32, #tpu.memory_space<vmem>>, vector<24x8xf32>
    tpu.vector_store %arg9[%c0_22, %c0_23], %72 {strides = array<i32>} : memref<24x8xf32, #tpu.memory_space<vmem>>, vector<24x8xf32>,
    %c0_24 = arith.constant 0 : index
    %c0_25 = arith.constant 0 : index
    %78 = vector.load %arg10[%c0_24, %c0_25] : memref<24x8xf32, #tpu.memory_space<vmem>>, vector<24x8xf32>
    tpu.vector_store %arg10[%c0_24, %c0_25], %76 {strides = array<i32>} : memref<24x8xf32, #tpu.memory_space<vmem>>, vector<24x8xf32>,
    return
  }
  func.func @transform_0(%arg0: i32) -> (i32, i32) {
    %c0_i32 = arith.constant 0 : i32
    %c0_i32_0 = arith.constant 0 : i32
    return %arg0, %c0_i32 : i32, i32
  }
  func.func @transform_1(%arg0: i32) -> (i32, i32) {
    %c0_i32 = arith.constant 0 : i32
    %c0_i32_0 = arith.constant 0 : i32
    return %arg0, %c0_i32 : i32, i32
  }
  func.func @transform_2(%arg0: i32) -> (i32, i32) {
    %c0_i32 = arith.constant 0 : i32
    %c0_i32_0 = arith.constant 0 : i32
    return %arg0, %c0_i32 : i32, i32
  }
  func.func @transform_3(%arg0: i32) -> (i32, i32) {
    %c0_i32 = arith.constant 0 : i32
    %c0_i32_0 = arith.constant 0 : i32
    return %arg0, %c0_i32 : i32, i32
  }
  func.func @transform_4(%arg0: i32) -> (i32, i32) {
    %c0_i32 = arith.constant 0 : i32
    %c0_i32_0 = arith.constant 0 : i32
    %c0_i32_1 = arith.constant 0 : i32
    return %c0_i32, %c0_i32_0 : i32, i32
  }
  func.func @transform_5(%arg0: i32) -> (i32, i32) {
    %c0_i32 = arith.constant 0 : i32
    %c0_i32_0 = arith.constant 0 : i32
    %c0_i32_1 = arith.constant 0 : i32
    return %c0_i32, %c0_i32_0 : i32, i32
  }
  func.func @transform_6(%arg0: i32) -> (i32, i32) {
    %c0_i32 = arith.constant 0 : i32
    %c0_i32_0 = arith.constant 0 : i32
    %c0_i32_1 = arith.constant 0 : i32
    return %c0_i32, %c0_i32_0 : i32, i32
  }
  func.func @transform_7(%arg0: i32) -> (i32, i32) {
    %c0_i32 = arith.constant 0 : i32
    %c0_i32_0 = arith.constant 0 : i32
    %c0_i32_1 = arith.constant 0 : i32
    return %c0_i32, %c0_i32_0 : i32, i32
  }
  func.func @transform_8(%arg0: i32) -> (i32, i32) {
    %c0_i32 = arith.constant 0 : i32
    %c0_i32_0 = arith.constant 0 : i32
    return %arg0, %c0_i32 : i32, i32
  }
  func.func @transform_9(%arg0: i32) -> (i32, i32) {
    %c0_i32 = arith.constant 0 : i32
    %c0_i32_0 = arith.constant 0 : i32
    return %arg0, %c0_i32 : i32, i32
  }
}

module attributes {stable_mosaic.version = 11 : i64} {
  func.func @_gmm_kernel(%arg0: i32, %arg1: i32, %arg2: memref<1x64x3xf32, #tpu.memory_space<vmem>>, %arg3: memref<1x3x16xf32, #tpu.memory_space<vmem>>, %arg4: memref<1x1x16xf32, #tpu.memory_space<vmem>>, %arg5: memref<1x64x16xf32, #tpu.memory_space<vmem>>) attributes {dimension_semantics = [#tpu.dimension_semantics<parallel>, #tpu.dimension_semantics<parallel>], iteration_bounds = array<i64: 2, 1>, scalar_prefetch = 0 : i64, scratch_operands = 0 : i64, tpu.core_type = #tpu.core_type<tc>, window_params = [{transform_indices = @transform_0, window_bounds = array<i64: 1, 64, 3>}, {transform_indices = @transform_1, window_bounds = array<i64: 1, 3, 16>}, {transform_indices = @transform_2, window_bounds = array<i64: 1, 1, 16>}, {transform_indices = @transform_3, window_bounds = array<i64: 1, 64, 16>}]} {
    %c0 = arith.constant 0 : index
    %c0_0 = arith.constant 0 : index
    %c0_1 = arith.constant 0 : index
    %0 = vector.load %arg2[%c0, %c0_0, %c0_1] : memref<1x64x3xf32, #tpu.memory_space<vmem>>, vector<1x64x3xf32>
    %1 = vector.shape_cast %0 : vector<1x64x3xf32> to vector<64x3xf32>
    %c0_2 = arith.constant 0 : index
    %c0_3 = arith.constant 0 : index
    %c0_4 = arith.constant 0 : index
    %2 = vector.load %arg3[%c0_2, %c0_3, %c0_4] : memref<1x3x16xf32, #tpu.memory_space<vmem>>, vector<1x3x16xf32>
    %3 = vector.shape_cast %2 : vector<1x3x16xf32> to vector<3x16xf32>
    %cst = arith.constant dense<0.000000e+00> : vector<64x16xf32>
    %4 = tpu.matmul %1, %3, %cst {dimension_numbers = #tpu.dot_dimension_numbers<[1], [0], [0], [1], [0, 0, 1, 1], [], []>} : vector<64x3xf32>, vector<3x16xf32>, vector<64x16xf32> -> vector<64x16xf32>
    %c0_5 = arith.constant 0 : index
    %c0_6 = arith.constant 0 : index
    %c0_7 = arith.constant 0 : index
    %5 = vector.load %arg4[%c0_5, %c0_6, %c0_7] : memref<1x1x16xf32, #tpu.memory_space<vmem>>, vector<1x1x16xf32>
    %6 = vector.shape_cast %5 : vector<1x1x16xf32> to vector<1x16xf32>
    %7 = vector.broadcast %6 : vector<1x16xf32> to vector<64x16xf32>
    %8 = arith.addf %4, %7 : vector<64x16xf32>
    %c0_8 = arith.constant 0 : index
    %c0_9 = arith.constant 0 : index
    %c0_10 = arith.constant 0 : index
    %9 = vector.load %arg5[%c0_8, %c0_9, %c0_10] : memref<1x64x16xf32, #tpu.memory_space<vmem>>, vector<1x64x16xf32>
    %10 = vector.shape_cast %9 : vector<1x64x16xf32> to vector<64x16xf32>
    %11 = vector.shape_cast %8 : vector<64x16xf32> to vector<1x64x16xf32>
    tpu.vector_store %arg5[%c0_8, %c0_9, %c0_10], %11 {strides = array<i32>} : memref<1x64x16xf32, #tpu.memory_space<vmem>>, vector<1x64x16xf32>,
    return
  }
  func.func @transform_0(%arg0: i32, %arg1: i32) -> (i32, i32, i32) {
    %c0_i32 = arith.constant 0 : i32
    %c0_i32_0 = arith.constant 0 : i32
    return %arg0, %arg1, %c0_i32 : i32, i32, i32
  }
  func.func @transform_1(%arg0: i32, %arg1: i32) -> (i32, i32, i32) {
    %c0_i32 = arith.constant 0 : i32
    %c0_i32_0 = arith.constant 0 : i32
    %c0_i32_1 = arith.constant 0 : i32
    return %arg0, %c0_i32, %c0_i32_0 : i32, i32, i32
  }
  func.func @transform_2(%arg0: i32, %arg1: i32) -> (i32, i32, i32) {
    %c0_i32 = arith.constant 0 : i32
    %c0_i32_0 = arith.constant 0 : i32
    %c0_i32_1 = arith.constant 0 : i32
    return %arg0, %c0_i32, %c0_i32_0 : i32, i32, i32
  }
  func.func @transform_3(%arg0: i32, %arg1: i32) -> (i32, i32, i32) {
    %c0_i32 = arith.constant 0 : i32
    %c0_i32_0 = arith.constant 0 : i32
    return %arg0, %arg1, %c0_i32 : i32, i32, i32
  }
}

module attributes {stable_mosaic.version = 11 : i64} {
  func.func @_tcn_layer_kernel(%arg0: i32, %arg1: i32, %arg2: memref<1x64x16xf32, #tpu.memory_space<vmem>>, %arg3: memref<1x64x16xf32, #tpu.memory_space<vmem>>, %arg4: memref<1x64x16xf32, #tpu.memory_space<vmem>>, %arg5: memref<1x48x16xf32, #tpu.memory_space<vmem>>, %arg6: memref<1x1x16xf32, #tpu.memory_space<vmem>>, %arg7: memref<1x64x16xf32, #tpu.memory_space<vmem>>) attributes {dimension_semantics = [#tpu.dimension_semantics<parallel>, #tpu.dimension_semantics<parallel>], iteration_bounds = array<i64: 2, 1>, scalar_prefetch = 0 : i64, scratch_operands = 0 : i64, tpu.core_type = #tpu.core_type<tc>, window_params = [{transform_indices = @transform_0, window_bounds = array<i64: 1, 64, 16>}, {transform_indices = @transform_1, window_bounds = array<i64: 1, 64, 16>}, {transform_indices = @transform_2, window_bounds = array<i64: 1, 64, 16>}, {transform_indices = @transform_3, window_bounds = array<i64: 1, 48, 16>}, {transform_indices = @transform_4, window_bounds = array<i64: 1, 1, 16>}, {transform_indices = @transform_5, window_bounds = array<i64: 1, 64, 16>}]} {
    %c0 = arith.constant 0 : index
    %c0_0 = arith.constant 0 : index
    %c0_1 = arith.constant 0 : index
    %0 = vector.load %arg2[%c0, %c0_0, %c0_1] : memref<1x64x16xf32, #tpu.memory_space<vmem>>, vector<1x64x16xf32>
    %1 = vector.shape_cast %0 : vector<1x64x16xf32> to vector<64x16xf32>
    %c0_2 = arith.constant 0 : index
    %c0_3 = arith.constant 0 : index
    %c0_4 = arith.constant 0 : index
    %2 = vector.load %arg3[%c0_2, %c0_3, %c0_4] : memref<1x64x16xf32, #tpu.memory_space<vmem>>, vector<1x64x16xf32>
    %3 = vector.shape_cast %2 : vector<1x64x16xf32> to vector<64x16xf32>
    %c0_5 = arith.constant 0 : index
    %c0_6 = arith.constant 0 : index
    %c0_7 = arith.constant 0 : index
    %4 = vector.load %arg4[%c0_5, %c0_6, %c0_7] : memref<1x64x16xf32, #tpu.memory_space<vmem>>, vector<1x64x16xf32>
    %5 = vector.shape_cast %4 : vector<1x64x16xf32> to vector<64x16xf32>
    %c0_8 = arith.constant 0 : index
    %c0_9 = arith.constant 0 : index
    %c0_10 = arith.constant 0 : index
    %6 = vector.load %arg5[%c0_8, %c0_9, %c0_10] : memref<1x48x16xf32, #tpu.memory_space<vmem>>, vector<1x48x16xf32>
    %7 = vector.shape_cast %6 : vector<1x48x16xf32> to vector<48x16xf32>
    %8 = vector.extract_strided_slice %7 {offsets = [0, 0], sizes = [16, 16], strides = [1, 1]} : vector<48x16xf32> to vector<16x16xf32>
    %cst = arith.constant dense<0.000000e+00> : vector<64x16xf32>
    %9 = tpu.matmul %1, %8, %cst {dimension_numbers = #tpu.dot_dimension_numbers<[1], [0], [0], [1], [0, 0, 1, 1], [], []>} : vector<64x16xf32>, vector<16x16xf32>, vector<64x16xf32> -> vector<64x16xf32>
    %10 = vector.extract_strided_slice %7 {offsets = [16, 0], sizes = [16, 16], strides = [1, 1]} : vector<48x16xf32> to vector<16x16xf32>
    %cst_11 = arith.constant dense<0.000000e+00> : vector<64x16xf32>
    %11 = tpu.matmul %3, %10, %cst_11 {dimension_numbers = #tpu.dot_dimension_numbers<[1], [0], [0], [1], [0, 0, 1, 1], [], []>} : vector<64x16xf32>, vector<16x16xf32>, vector<64x16xf32> -> vector<64x16xf32>
    %12 = arith.addf %9, %11 : vector<64x16xf32>
    %13 = vector.extract_strided_slice %7 {offsets = [32, 0], sizes = [16, 16], strides = [1, 1]} : vector<48x16xf32> to vector<16x16xf32>
    %cst_12 = arith.constant dense<0.000000e+00> : vector<64x16xf32>
    %14 = tpu.matmul %5, %13, %cst_12 {dimension_numbers = #tpu.dot_dimension_numbers<[1], [0], [0], [1], [0, 0, 1, 1], [], []>} : vector<64x16xf32>, vector<16x16xf32>, vector<64x16xf32> -> vector<64x16xf32>
    %15 = arith.addf %12, %14 : vector<64x16xf32>
    %c0_13 = arith.constant 0 : index
    %c0_14 = arith.constant 0 : index
    %c0_15 = arith.constant 0 : index
    %16 = vector.load %arg6[%c0_13, %c0_14, %c0_15] : memref<1x1x16xf32, #tpu.memory_space<vmem>>, vector<1x1x16xf32>
    %17 = vector.shape_cast %16 : vector<1x1x16xf32> to vector<1x16xf32>
    %18 = vector.broadcast %17 : vector<1x16xf32> to vector<64x16xf32>
    %19 = arith.addf %15, %18 : vector<64x16xf32>
    %cst_16 = arith.constant 0.000000e+00 : f32
    %20 = vector.broadcast %cst_16 : f32 to vector<64x16xf32>
    %21 = arith.maximumf %19, %20 : vector<64x16xf32>
    %22 = arith.addf %21, %3 : vector<64x16xf32>
    %c0_17 = arith.constant 0 : index
    %c0_18 = arith.constant 0 : index
    %c0_19 = arith.constant 0 : index
    %23 = vector.load %arg7[%c0_17, %c0_18, %c0_19] : memref<1x64x16xf32, #tpu.memory_space<vmem>>, vector<1x64x16xf32>
    %24 = vector.shape_cast %23 : vector<1x64x16xf32> to vector<64x16xf32>
    %25 = vector.shape_cast %22 : vector<64x16xf32> to vector<1x64x16xf32>
    tpu.vector_store %arg7[%c0_17, %c0_18, %c0_19], %25 {strides = array<i32>} : memref<1x64x16xf32, #tpu.memory_space<vmem>>, vector<1x64x16xf32>,
    return
  }
  func.func @transform_0(%arg0: i32, %arg1: i32) -> (i32, i32, i32) {
    %c0_i32 = arith.constant 0 : i32
    %c0_i32_0 = arith.constant 0 : i32
    return %arg0, %arg1, %c0_i32 : i32, i32, i32
  }
  func.func @transform_1(%arg0: i32, %arg1: i32) -> (i32, i32, i32) {
    %c0_i32 = arith.constant 0 : i32
    %c0_i32_0 = arith.constant 0 : i32
    return %arg0, %arg1, %c0_i32 : i32, i32, i32
  }
  func.func @transform_2(%arg0: i32, %arg1: i32) -> (i32, i32, i32) {
    %c0_i32 = arith.constant 0 : i32
    %c0_i32_0 = arith.constant 0 : i32
    return %arg0, %arg1, %c0_i32 : i32, i32, i32
  }
  func.func @transform_3(%arg0: i32, %arg1: i32) -> (i32, i32, i32) {
    %c0_i32 = arith.constant 0 : i32
    %c0_i32_0 = arith.constant 0 : i32
    %c0_i32_1 = arith.constant 0 : i32
    return %arg0, %c0_i32, %c0_i32_0 : i32, i32, i32
  }
  func.func @transform_4(%arg0: i32, %arg1: i32) -> (i32, i32, i32) {
    %c0_i32 = arith.constant 0 : i32
    %c0_i32_0 = arith.constant 0 : i32
    %c0_i32_1 = arith.constant 0 : i32
    return %arg0, %c0_i32, %c0_i32_0 : i32, i32, i32
  }
  func.func @transform_5(%arg0: i32, %arg1: i32) -> (i32, i32, i32) {
    %c0_i32 = arith.constant 0 : i32
    %c0_i32_0 = arith.constant 0 : i32
    return %arg0, %arg1, %c0_i32 : i32, i32, i32
  }
}

module attributes {stable_mosaic.version = 11 : i64} {
  func.func @_gmm_kernel(%arg0: i32, %arg1: i32, %arg2: memref<1x8x3xf32, #tpu.memory_space<vmem>>, %arg3: memref<1x3x20xf32, #tpu.memory_space<vmem>>, %arg4: memref<1x1x20xf32, #tpu.memory_space<vmem>>, %arg5: memref<1x8x20xf32, #tpu.memory_space<vmem>>) attributes {dimension_semantics = [#tpu.dimension_semantics<parallel>, #tpu.dimension_semantics<parallel>], iteration_bounds = array<i64: 2, 1>, scalar_prefetch = 0 : i64, scratch_operands = 0 : i64, tpu.core_type = #tpu.core_type<tc>, window_params = [{transform_indices = @transform_0, window_bounds = array<i64: 1, 8, 3>}, {transform_indices = @transform_1, window_bounds = array<i64: 1, 3, 20>}, {transform_indices = @transform_2, window_bounds = array<i64: 1, 1, 20>}, {transform_indices = @transform_3, window_bounds = array<i64: 1, 8, 20>}]} {
    %c0 = arith.constant 0 : index
    %c0_0 = arith.constant 0 : index
    %c0_1 = arith.constant 0 : index
    %0 = vector.load %arg2[%c0, %c0_0, %c0_1] : memref<1x8x3xf32, #tpu.memory_space<vmem>>, vector<1x8x3xf32>
    %1 = vector.shape_cast %0 : vector<1x8x3xf32> to vector<8x3xf32>
    %c0_2 = arith.constant 0 : index
    %c0_3 = arith.constant 0 : index
    %c0_4 = arith.constant 0 : index
    %2 = vector.load %arg3[%c0_2, %c0_3, %c0_4] : memref<1x3x20xf32, #tpu.memory_space<vmem>>, vector<1x3x20xf32>
    %3 = vector.shape_cast %2 : vector<1x3x20xf32> to vector<3x20xf32>
    %cst = arith.constant dense<0.000000e+00> : vector<8x20xf32>
    %4 = tpu.matmul %1, %3, %cst {dimension_numbers = #tpu.dot_dimension_numbers<[1], [0], [0], [1], [0, 0, 1, 1], [], []>} : vector<8x3xf32>, vector<3x20xf32>, vector<8x20xf32> -> vector<8x20xf32>
    %c0_5 = arith.constant 0 : index
    %c0_6 = arith.constant 0 : index
    %c0_7 = arith.constant 0 : index
    %5 = vector.load %arg4[%c0_5, %c0_6, %c0_7] : memref<1x1x20xf32, #tpu.memory_space<vmem>>, vector<1x1x20xf32>
    %6 = vector.shape_cast %5 : vector<1x1x20xf32> to vector<1x20xf32>
    %7 = vector.broadcast %6 : vector<1x20xf32> to vector<8x20xf32>
    %8 = arith.addf %4, %7 : vector<8x20xf32>
    %c0_8 = arith.constant 0 : index
    %c0_9 = arith.constant 0 : index
    %c0_10 = arith.constant 0 : index
    %9 = vector.load %arg5[%c0_8, %c0_9, %c0_10] : memref<1x8x20xf32, #tpu.memory_space<vmem>>, vector<1x8x20xf32>
    %10 = vector.shape_cast %9 : vector<1x8x20xf32> to vector<8x20xf32>
    %11 = vector.shape_cast %8 : vector<8x20xf32> to vector<1x8x20xf32>
    tpu.vector_store %arg5[%c0_8, %c0_9, %c0_10], %11 {strides = array<i32>} : memref<1x8x20xf32, #tpu.memory_space<vmem>>, vector<1x8x20xf32>,
    return
  }
  func.func @transform_0(%arg0: i32, %arg1: i32) -> (i32, i32, i32) {
    %c0_i32 = arith.constant 0 : i32
    %c0_i32_0 = arith.constant 0 : i32
    return %arg0, %arg1, %c0_i32 : i32, i32, i32
  }
  func.func @transform_1(%arg0: i32, %arg1: i32) -> (i32, i32, i32) {
    %c0_i32 = arith.constant 0 : i32
    %c0_i32_0 = arith.constant 0 : i32
    %c0_i32_1 = arith.constant 0 : i32
    return %arg0, %c0_i32, %c0_i32_0 : i32, i32, i32
  }
  func.func @transform_2(%arg0: i32, %arg1: i32) -> (i32, i32, i32) {
    %c0_i32 = arith.constant 0 : i32
    %c0_i32_0 = arith.constant 0 : i32
    %c0_i32_1 = arith.constant 0 : i32
    return %arg0, %c0_i32, %c0_i32_0 : i32, i32, i32
  }
  func.func @transform_3(%arg0: i32, %arg1: i32) -> (i32, i32, i32) {
    %c0_i32 = arith.constant 0 : i32
    %c0_i32_0 = arith.constant 0 : i32
    return %arg0, %arg1, %c0_i32 : i32, i32, i32
  }
}

module attributes {stable_mosaic.version = 11 : i64} {
  func.func @_gmm_kernel(%arg0: i32, %arg1: i32, %arg2: memref<1x8x10xf32, #tpu.memory_space<vmem>>, %arg3: memref<1x10x4xf32, #tpu.memory_space<vmem>>, %arg4: memref<1x1x4xf32, #tpu.memory_space<vmem>>, %arg5: memref<1x8x4xf32, #tpu.memory_space<vmem>>) attributes {dimension_semantics = [#tpu.dimension_semantics<parallel>, #tpu.dimension_semantics<parallel>], iteration_bounds = array<i64: 2, 1>, scalar_prefetch = 0 : i64, scratch_operands = 0 : i64, tpu.core_type = #tpu.core_type<tc>, window_params = [{transform_indices = @transform_0, window_bounds = array<i64: 1, 8, 10>}, {transform_indices = @transform_1, window_bounds = array<i64: 1, 10, 4>}, {transform_indices = @transform_2, window_bounds = array<i64: 1, 1, 4>}, {transform_indices = @transform_3, window_bounds = array<i64: 1, 8, 4>}]} {
    %c0 = arith.constant 0 : index
    %c0_0 = arith.constant 0 : index
    %c0_1 = arith.constant 0 : index
    %0 = vector.load %arg2[%c0, %c0_0, %c0_1] : memref<1x8x10xf32, #tpu.memory_space<vmem>>, vector<1x8x10xf32>
    %1 = vector.shape_cast %0 : vector<1x8x10xf32> to vector<8x10xf32>
    %c0_2 = arith.constant 0 : index
    %c0_3 = arith.constant 0 : index
    %c0_4 = arith.constant 0 : index
    %2 = vector.load %arg3[%c0_2, %c0_3, %c0_4] : memref<1x10x4xf32, #tpu.memory_space<vmem>>, vector<1x10x4xf32>
    %3 = vector.shape_cast %2 : vector<1x10x4xf32> to vector<10x4xf32>
    %cst = arith.constant dense<0.000000e+00> : vector<8x4xf32>
    %4 = tpu.matmul %1, %3, %cst {dimension_numbers = #tpu.dot_dimension_numbers<[1], [0], [0], [1], [0, 0, 1, 1], [], []>} : vector<8x10xf32>, vector<10x4xf32>, vector<8x4xf32> -> vector<8x4xf32>
    %c0_5 = arith.constant 0 : index
    %c0_6 = arith.constant 0 : index
    %c0_7 = arith.constant 0 : index
    %5 = vector.load %arg4[%c0_5, %c0_6, %c0_7] : memref<1x1x4xf32, #tpu.memory_space<vmem>>, vector<1x1x4xf32>
    %6 = vector.shape_cast %5 : vector<1x1x4xf32> to vector<1x4xf32>
    %7 = vector.broadcast %6 : vector<1x4xf32> to vector<8x4xf32>
    %8 = arith.addf %4, %7 : vector<8x4xf32>
    %cst_8 = arith.constant 0.000000e+00 : f32
    %9 = vector.broadcast %cst_8 : f32 to vector<8x4xf32>
    %10 = arith.maximumf %8, %9 : vector<8x4xf32>
    %cst_9 = arith.constant dense<0xFF800000> : vector<8xf32>
    %11 = vector.multi_reduction <maximumf>, %10, %cst_9 [1] : vector<8x4xf32> to vector<8xf32>
    %12 = vector.shape_cast %11 : vector<8xf32> to vector<8x1xf32>
    %13 = vector.broadcast %12 : vector<8x1xf32> to vector<8x4xf32>
    %14 = arith.subf %10, %13 : vector<8x4xf32>
    %15 = math.exp %14 : vector<8x4xf32>
    %cst_10 = arith.constant dense<0.000000e+00> : vector<8xf32>
    %16 = vector.multi_reduction <add>, %15, %cst_10 [1] : vector<8x4xf32> to vector<8xf32>
    %17 = vector.shape_cast %16 : vector<8xf32> to vector<8x1xf32>
    %18 = tpu.reciprocal %17 {approx = true} : vector<8x1xf32> -> vector<8x1xf32>
    %19 = vector.broadcast %18 : vector<8x1xf32> to vector<8x4xf32>
    %20 = arith.mulf %15, %19 : vector<8x4xf32>
    %c0_11 = arith.constant 0 : index
    %c0_12 = arith.constant 0 : index
    %c0_13 = arith.constant 0 : index
    %21 = vector.load %arg5[%c0_11, %c0_12, %c0_13] : memref<1x8x4xf32, #tpu.memory_space<vmem>>, vector<1x8x4xf32>
    %22 = vector.shape_cast %21 : vector<1x8x4xf32> to vector<8x4xf32>
    %23 = vector.shape_cast %20 : vector<8x4xf32> to vector<1x8x4xf32>
    tpu.vector_store %arg5[%c0_11, %c0_12, %c0_13], %23 {strides = array<i32>} : memref<1x8x4xf32, #tpu.memory_space<vmem>>, vector<1x8x4xf32>,
    return
  }
  func.func @transform_0(%arg0: i32, %arg1: i32) -> (i32, i32, i32) {
    %c0_i32 = arith.constant 0 : i32
    %c0_i32_0 = arith.constant 0 : i32
    return %arg0, %arg1, %c0_i32 : i32, i32, i32
  }
  func.func @transform_1(%arg0: i32, %arg1: i32) -> (i32, i32, i32) {
    %c0_i32 = arith.constant 0 : i32
    %c0_i32_0 = arith.constant 0 : i32
    %c0_i32_1 = arith.constant 0 : i32
    return %arg0, %c0_i32, %c0_i32_0 : i32, i32, i32
  }
  func.func @transform_2(%arg0: i32, %arg1: i32) -> (i32, i32, i32) {
    %c0_i32 = arith.constant 0 : i32
    %c0_i32_0 = arith.constant 0 : i32
    %c0_i32_1 = arith.constant 0 : i32
    return %arg0, %c0_i32, %c0_i32_0 : i32, i32, i32
  }
  func.func @transform_3(%arg0: i32, %arg1: i32) -> (i32, i32, i32) {
    %c0_i32 = arith.constant 0 : i32
    %c0_i32_0 = arith.constant 0 : i32
    return %arg0, %arg1, %c0_i32 : i32, i32, i32
  }
}

module attributes {stable_mosaic.version = 11 : i64} {
  func.func @_gmm_kernel(%arg0: i32, %arg1: i32, %arg2: memref<1x512x4xf32, #tpu.memory_space<vmem>>, %arg3: memref<1x4x12xf32, #tpu.memory_space<vmem>>, %arg4: memref<1x1x12xf32, #tpu.memory_space<vmem>>, %arg5: memref<1x512x12xf32, #tpu.memory_space<vmem>>) attributes {dimension_semantics = [#tpu.dimension_semantics<parallel>, #tpu.dimension_semantics<parallel>], iteration_bounds = array<i64: 2, 1>, scalar_prefetch = 0 : i64, scratch_operands = 0 : i64, tpu.core_type = #tpu.core_type<tc>, window_params = [{transform_indices = @transform_0, window_bounds = array<i64: 1, 512, 4>}, {transform_indices = @transform_1, window_bounds = array<i64: 1, 4, 12>}, {transform_indices = @transform_2, window_bounds = array<i64: 1, 1, 12>}, {transform_indices = @transform_3, window_bounds = array<i64: 1, 512, 12>}]} {
    %c0 = arith.constant 0 : index
    %c0_0 = arith.constant 0 : index
    %c0_1 = arith.constant 0 : index
    %0 = vector.load %arg2[%c0, %c0_0, %c0_1] : memref<1x512x4xf32, #tpu.memory_space<vmem>>, vector<1x512x4xf32>
    %1 = vector.shape_cast %0 : vector<1x512x4xf32> to vector<512x4xf32>
    %c0_2 = arith.constant 0 : index
    %c0_3 = arith.constant 0 : index
    %c0_4 = arith.constant 0 : index
    %2 = vector.load %arg3[%c0_2, %c0_3, %c0_4] : memref<1x4x12xf32, #tpu.memory_space<vmem>>, vector<1x4x12xf32>
    %3 = vector.shape_cast %2 : vector<1x4x12xf32> to vector<4x12xf32>
    %cst = arith.constant dense<0.000000e+00> : vector<512x12xf32>
    %4 = tpu.matmul %1, %3, %cst {dimension_numbers = #tpu.dot_dimension_numbers<[1], [0], [0], [1], [0, 0, 1, 1], [], []>} : vector<512x4xf32>, vector<4x12xf32>, vector<512x12xf32> -> vector<512x12xf32>
    %c0_5 = arith.constant 0 : index
    %c0_6 = arith.constant 0 : index
    %c0_7 = arith.constant 0 : index
    %5 = vector.load %arg4[%c0_5, %c0_6, %c0_7] : memref<1x1x12xf32, #tpu.memory_space<vmem>>, vector<1x1x12xf32>
    %6 = vector.shape_cast %5 : vector<1x1x12xf32> to vector<1x12xf32>
    %7 = vector.broadcast %6 : vector<1x12xf32> to vector<512x12xf32>
    %8 = arith.addf %4, %7 : vector<512x12xf32>
    %c0_8 = arith.constant 0 : index
    %c0_9 = arith.constant 0 : index
    %c0_10 = arith.constant 0 : index
    %9 = vector.load %arg5[%c0_8, %c0_9, %c0_10] : memref<1x512x12xf32, #tpu.memory_space<vmem>>, vector<1x512x12xf32>
    %10 = vector.shape_cast %9 : vector<1x512x12xf32> to vector<512x12xf32>
    %11 = vector.shape_cast %8 : vector<512x12xf32> to vector<1x512x12xf32>
    tpu.vector_store %arg5[%c0_8, %c0_9, %c0_10], %11 {strides = array<i32>} : memref<1x512x12xf32, #tpu.memory_space<vmem>>, vector<1x512x12xf32>,
    return
  }
  func.func @transform_0(%arg0: i32, %arg1: i32) -> (i32, i32, i32) {
    %c0_i32 = arith.constant 0 : i32
    %c0_i32_0 = arith.constant 0 : i32
    return %arg0, %arg1, %c0_i32 : i32, i32, i32
  }
  func.func @transform_1(%arg0: i32, %arg1: i32) -> (i32, i32, i32) {
    %c0_i32 = arith.constant 0 : i32
    %c0_i32_0 = arith.constant 0 : i32
    %c0_i32_1 = arith.constant 0 : i32
    return %arg0, %c0_i32, %c0_i32_0 : i32, i32, i32
  }
  func.func @transform_2(%arg0: i32, %arg1: i32) -> (i32, i32, i32) {
    %c0_i32 = arith.constant 0 : i32
    %c0_i32_0 = arith.constant 0 : i32
    %c0_i32_1 = arith.constant 0 : i32
    return %arg0, %c0_i32, %c0_i32_0 : i32, i32, i32
  }
  func.func @transform_3(%arg0: i32, %arg1: i32) -> (i32, i32, i32) {
    %c0_i32 = arith.constant 0 : i32
    %c0_i32_0 = arith.constant 0 : i32
    return %arg0, %arg1, %c0_i32 : i32, i32, i32
  }
}

module attributes {stable_mosaic.version = 11 : i64} {
  func.func @_gmm_kernel(%arg0: i32, %arg1: i32, %arg2: memref<1x512x12xf32, #tpu.memory_space<vmem>>, %arg3: memref<1x12x12xf32, #tpu.memory_space<vmem>>, %arg4: memref<1x1x12xf32, #tpu.memory_space<vmem>>, %arg5: memref<1x512x12xf32, #tpu.memory_space<vmem>>) attributes {dimension_semantics = [#tpu.dimension_semantics<parallel>, #tpu.dimension_semantics<parallel>], iteration_bounds = array<i64: 2, 1>, scalar_prefetch = 0 : i64, scratch_operands = 0 : i64, tpu.core_type = #tpu.core_type<tc>, window_params = [{transform_indices = @transform_0, window_bounds = array<i64: 1, 512, 12>}, {transform_indices = @transform_1, window_bounds = array<i64: 1, 12, 12>}, {transform_indices = @transform_2, window_bounds = array<i64: 1, 1, 12>}, {transform_indices = @transform_3, window_bounds = array<i64: 1, 512, 12>}]} {
    %c0 = arith.constant 0 : index
    %c0_0 = arith.constant 0 : index
    %c0_1 = arith.constant 0 : index
    %0 = vector.load %arg2[%c0, %c0_0, %c0_1] : memref<1x512x12xf32, #tpu.memory_space<vmem>>, vector<1x512x12xf32>
    %1 = vector.shape_cast %0 : vector<1x512x12xf32> to vector<512x12xf32>
    %c0_2 = arith.constant 0 : index
    %c0_3 = arith.constant 0 : index
    %c0_4 = arith.constant 0 : index
    %2 = vector.load %arg3[%c0_2, %c0_3, %c0_4] : memref<1x12x12xf32, #tpu.memory_space<vmem>>, vector<1x12x12xf32>
    %3 = vector.shape_cast %2 : vector<1x12x12xf32> to vector<12x12xf32>
    %cst = arith.constant dense<0.000000e+00> : vector<512x12xf32>
    %4 = tpu.matmul %1, %3, %cst {dimension_numbers = #tpu.dot_dimension_numbers<[1], [0], [0], [1], [0, 0, 1, 1], [], []>} : vector<512x12xf32>, vector<12x12xf32>, vector<512x12xf32> -> vector<512x12xf32>
    %c0_5 = arith.constant 0 : index
    %c0_6 = arith.constant 0 : index
    %c0_7 = arith.constant 0 : index
    %5 = vector.load %arg4[%c0_5, %c0_6, %c0_7] : memref<1x1x12xf32, #tpu.memory_space<vmem>>, vector<1x1x12xf32>
    %6 = vector.shape_cast %5 : vector<1x1x12xf32> to vector<1x12xf32>
    %7 = vector.broadcast %6 : vector<1x12xf32> to vector<512x12xf32>
    %8 = arith.addf %4, %7 : vector<512x12xf32>
    %c0_8 = arith.constant 0 : index
    %c0_9 = arith.constant 0 : index
    %c0_10 = arith.constant 0 : index
    %9 = vector.load %arg5[%c0_8, %c0_9, %c0_10] : memref<1x512x12xf32, #tpu.memory_space<vmem>>, vector<1x512x12xf32>
    %10 = vector.shape_cast %9 : vector<1x512x12xf32> to vector<512x12xf32>
    %11 = vector.shape_cast %8 : vector<512x12xf32> to vector<1x512x12xf32>
    tpu.vector_store %arg5[%c0_8, %c0_9, %c0_10], %11 {strides = array<i32>} : memref<1x512x12xf32, #tpu.memory_space<vmem>>, vector<1x512x12xf32>,
    return
  }
  func.func @transform_0(%arg0: i32, %arg1: i32) -> (i32, i32, i32) {
    %c0_i32 = arith.constant 0 : i32
    %c0_i32_0 = arith.constant 0 : i32
    return %arg0, %arg1, %c0_i32 : i32, i32, i32
  }
  func.func @transform_1(%arg0: i32, %arg1: i32) -> (i32, i32, i32) {
    %c0_i32 = arith.constant 0 : i32
    %c0_i32_0 = arith.constant 0 : i32
    %c0_i32_1 = arith.constant 0 : i32
    return %arg0, %c0_i32, %c0_i32_0 : i32, i32, i32
  }
  func.func @transform_2(%arg0: i32, %arg1: i32) -> (i32, i32, i32) {
    %c0_i32 = arith.constant 0 : i32
    %c0_i32_0 = arith.constant 0 : i32
    %c0_i32_1 = arith.constant 0 : i32
    return %arg0, %c0_i32, %c0_i32_0 : i32, i32, i32
  }
  func.func @transform_3(%arg0: i32, %arg1: i32) -> (i32, i32, i32) {
    %c0_i32 = arith.constant 0 : i32
    %c0_i32_0 = arith.constant 0 : i32
    return %arg0, %arg1, %c0_i32 : i32, i32, i32
  }
}

module attributes {stable_mosaic.version = 11 : i64} {
  func.func @_gmm_kernel(%arg0: i32, %arg1: i32, %arg2: memref<1x256x56xf32, #tpu.memory_space<vmem>>, %arg3: memref<1x56x8xf32, #tpu.memory_space<vmem>>, %arg4: memref<1x1x8xf32, #tpu.memory_space<vmem>>, %arg5: memref<1x256x8xf32, #tpu.memory_space<vmem>>) attributes {dimension_semantics = [#tpu.dimension_semantics<parallel>, #tpu.dimension_semantics<parallel>], iteration_bounds = array<i64: 2, 1>, scalar_prefetch = 0 : i64, scratch_operands = 0 : i64, tpu.core_type = #tpu.core_type<tc>, window_params = [{transform_indices = @transform_0, window_bounds = array<i64: 1, 256, 56>}, {transform_indices = @transform_1, window_bounds = array<i64: 1, 56, 8>}, {transform_indices = @transform_2, window_bounds = array<i64: 1, 1, 8>}, {transform_indices = @transform_3, window_bounds = array<i64: 1, 256, 8>}]} {
    %c0 = arith.constant 0 : index
    %c0_0 = arith.constant 0 : index
    %c0_1 = arith.constant 0 : index
    %0 = vector.load %arg2[%c0, %c0_0, %c0_1] : memref<1x256x56xf32, #tpu.memory_space<vmem>>, vector<1x256x56xf32>
    %1 = vector.shape_cast %0 : vector<1x256x56xf32> to vector<256x56xf32>
    %c0_2 = arith.constant 0 : index
    %c0_3 = arith.constant 0 : index
    %c0_4 = arith.constant 0 : index
    %2 = vector.load %arg3[%c0_2, %c0_3, %c0_4] : memref<1x56x8xf32, #tpu.memory_space<vmem>>, vector<1x56x8xf32>
    %3 = vector.shape_cast %2 : vector<1x56x8xf32> to vector<56x8xf32>
    %cst = arith.constant dense<0.000000e+00> : vector<256x8xf32>
    %4 = tpu.matmul %1, %3, %cst {dimension_numbers = #tpu.dot_dimension_numbers<[1], [0], [0], [1], [0, 0, 1, 1], [], []>} : vector<256x56xf32>, vector<56x8xf32>, vector<256x8xf32> -> vector<256x8xf32>
    %c0_5 = arith.constant 0 : index
    %c0_6 = arith.constant 0 : index
    %c0_7 = arith.constant 0 : index
    %5 = vector.load %arg4[%c0_5, %c0_6, %c0_7] : memref<1x1x8xf32, #tpu.memory_space<vmem>>, vector<1x1x8xf32>
    %6 = vector.shape_cast %5 : vector<1x1x8xf32> to vector<1x8xf32>
    %7 = vector.broadcast %6 : vector<1x8xf32> to vector<256x8xf32>
    %8 = arith.addf %4, %7 : vector<256x8xf32>
    %c0_8 = arith.constant 0 : index
    %c0_9 = arith.constant 0 : index
    %c0_10 = arith.constant 0 : index
    %9 = vector.load %arg5[%c0_8, %c0_9, %c0_10] : memref<1x256x8xf32, #tpu.memory_space<vmem>>, vector<1x256x8xf32>
    %10 = vector.shape_cast %9 : vector<1x256x8xf32> to vector<256x8xf32>
    %11 = vector.shape_cast %8 : vector<256x8xf32> to vector<1x256x8xf32>
    tpu.vector_store %arg5[%c0_8, %c0_9, %c0_10], %11 {strides = array<i32>} : memref<1x256x8xf32, #tpu.memory_space<vmem>>, vector<1x256x8xf32>,
    return
  }
  func.func @transform_0(%arg0: i32, %arg1: i32) -> (i32, i32, i32) {
    %c0_i32 = arith.constant 0 : i32
    %c0_i32_0 = arith.constant 0 : i32
    return %arg0, %arg1, %c0_i32 : i32, i32, i32
  }
  func.func @transform_1(%arg0: i32, %arg1: i32) -> (i32, i32, i32) {
    %c0_i32 = arith.constant 0 : i32
    %c0_i32_0 = arith.constant 0 : i32
    %c0_i32_1 = arith.constant 0 : i32
    return %arg0, %c0_i32, %c0_i32_0 : i32, i32, i32
  }
  func.func @transform_2(%arg0: i32, %arg1: i32) -> (i32, i32, i32) {
    %c0_i32 = arith.constant 0 : i32
    %c0_i32_0 = arith.constant 0 : i32
    %c0_i32_1 = arith.constant 0 : i32
    return %arg0, %c0_i32, %c0_i32_0 : i32, i32, i32
  }
  func.func @transform_3(%arg0: i32, %arg1: i32) -> (i32, i32, i32) {
    %c0_i32 = arith.constant 0 : i32
    %c0_i32_0 = arith.constant 0 : i32
    return %arg0, %arg1, %c0_i32 : i32, i32, i32
  }
}

module attributes {stable_mosaic.version = 11 : i64} {
  func.func @_gmm_kernel(%arg0: i32, %arg1: i32, %arg2: memref<1x128x16xf32, #tpu.memory_space<vmem>>, %arg3: memref<1x16x24xf32, #tpu.memory_space<vmem>>, %arg4: memref<1x1x24xf32, #tpu.memory_space<vmem>>, %arg5: memref<1x128x24xf32, #tpu.memory_space<vmem>>) attributes {dimension_semantics = [#tpu.dimension_semantics<parallel>, #tpu.dimension_semantics<parallel>], iteration_bounds = array<i64: 2, 1>, scalar_prefetch = 0 : i64, scratch_operands = 0 : i64, tpu.core_type = #tpu.core_type<tc>, window_params = [{transform_indices = @transform_0, window_bounds = array<i64: 1, 128, 16>}, {transform_indices = @transform_1, window_bounds = array<i64: 1, 16, 24>}, {transform_indices = @transform_2, window_bounds = array<i64: 1, 1, 24>}, {transform_indices = @transform_3, window_bounds = array<i64: 1, 128, 24>}]} {
    %c0 = arith.constant 0 : index
    %c0_0 = arith.constant 0 : index
    %c0_1 = arith.constant 0 : index
    %0 = vector.load %arg2[%c0, %c0_0, %c0_1] : memref<1x128x16xf32, #tpu.memory_space<vmem>>, vector<1x128x16xf32>
    %1 = vector.shape_cast %0 : vector<1x128x16xf32> to vector<128x16xf32>
    %c0_2 = arith.constant 0 : index
    %c0_3 = arith.constant 0 : index
    %c0_4 = arith.constant 0 : index
    %2 = vector.load %arg3[%c0_2, %c0_3, %c0_4] : memref<1x16x24xf32, #tpu.memory_space<vmem>>, vector<1x16x24xf32>
    %3 = vector.shape_cast %2 : vector<1x16x24xf32> to vector<16x24xf32>
    %cst = arith.constant dense<0.000000e+00> : vector<128x24xf32>
    %4 = tpu.matmul %1, %3, %cst {dimension_numbers = #tpu.dot_dimension_numbers<[1], [0], [0], [1], [0, 0, 1, 1], [], []>} : vector<128x16xf32>, vector<16x24xf32>, vector<128x24xf32> -> vector<128x24xf32>
    %c0_5 = arith.constant 0 : index
    %c0_6 = arith.constant 0 : index
    %c0_7 = arith.constant 0 : index
    %5 = vector.load %arg4[%c0_5, %c0_6, %c0_7] : memref<1x1x24xf32, #tpu.memory_space<vmem>>, vector<1x1x24xf32>
    %6 = vector.shape_cast %5 : vector<1x1x24xf32> to vector<1x24xf32>
    %7 = vector.broadcast %6 : vector<1x24xf32> to vector<128x24xf32>
    %8 = arith.addf %4, %7 : vector<128x24xf32>
    %c0_8 = arith.constant 0 : index
    %c0_9 = arith.constant 0 : index
    %c0_10 = arith.constant 0 : index
    %9 = vector.load %arg5[%c0_8, %c0_9, %c0_10] : memref<1x128x24xf32, #tpu.memory_space<vmem>>, vector<1x128x24xf32>
    %10 = vector.shape_cast %9 : vector<1x128x24xf32> to vector<128x24xf32>
    %11 = vector.shape_cast %8 : vector<128x24xf32> to vector<1x128x24xf32>
    tpu.vector_store %arg5[%c0_8, %c0_9, %c0_10], %11 {strides = array<i32>} : memref<1x128x24xf32, #tpu.memory_space<vmem>>, vector<1x128x24xf32>,
    return
  }
  func.func @transform_0(%arg0: i32, %arg1: i32) -> (i32, i32, i32) {
    %c0_i32 = arith.constant 0 : i32
    %c0_i32_0 = arith.constant 0 : i32
    return %arg0, %arg1, %c0_i32 : i32, i32, i32
  }
  func.func @transform_1(%arg0: i32, %arg1: i32) -> (i32, i32, i32) {
    %c0_i32 = arith.constant 0 : i32
    %c0_i32_0 = arith.constant 0 : i32
    %c0_i32_1 = arith.constant 0 : i32
    return %arg0, %c0_i32, %c0_i32_0 : i32, i32, i32
  }
  func.func @transform_2(%arg0: i32, %arg1: i32) -> (i32, i32, i32) {
    %c0_i32 = arith.constant 0 : i32
    %c0_i32_0 = arith.constant 0 : i32
    %c0_i32_1 = arith.constant 0 : i32
    return %arg0, %c0_i32, %c0_i32_0 : i32, i32, i32
  }
  func.func @transform_3(%arg0: i32, %arg1: i32) -> (i32, i32, i32) {
    %c0_i32 = arith.constant 0 : i32
    %c0_i32_0 = arith.constant 0 : i32
    return %arg0, %arg1, %c0_i32 : i32, i32, i32
  }
}

module attributes {stable_mosaic.version = 11 : i64} {
  func.func @_attn_kernel(%arg0: i32, %arg1: memref<32x8x8xf32, #tpu.memory_space<vmem>>, %arg2: memref<32x8x8xf32, #tpu.memory_space<vmem>>, %arg3: memref<32x8x8xf32, #tpu.memory_space<vmem>>, %arg4: memref<32x8x8xf32, #tpu.memory_space<vmem>>) attributes {dimension_semantics = [#tpu.dimension_semantics<parallel>], iteration_bounds = array<i64: 1>, scalar_prefetch = 0 : i64, scratch_operands = 0 : i64, tpu.core_type = #tpu.core_type<tc>, window_params = [{transform_indices = @transform_0, window_bounds = array<i64: 32, 8, 8>}, {transform_indices = @transform_1, window_bounds = array<i64: 32, 8, 8>}, {transform_indices = @transform_2, window_bounds = array<i64: 32, 8, 8>}, {transform_indices = @transform_3, window_bounds = array<i64: 32, 8, 8>}]} {
    %c0 = arith.constant 0 : index
    %c0_0 = arith.constant 0 : index
    %c0_1 = arith.constant 0 : index
    %0 = vector.load %arg1[%c0, %c0_0, %c0_1] : memref<32x8x8xf32, #tpu.memory_space<vmem>>, vector<32x8x8xf32>
    %c0_2 = arith.constant 0 : index
    %c0_3 = arith.constant 0 : index
    %c0_4 = arith.constant 0 : index
    %1 = vector.load %arg2[%c0_2, %c0_3, %c0_4] : memref<32x8x8xf32, #tpu.memory_space<vmem>>, vector<32x8x8xf32>
    %c0_5 = arith.constant 0 : index
    %c0_6 = arith.constant 0 : index
    %c0_7 = arith.constant 0 : index
    %2 = vector.load %arg3[%c0_5, %c0_6, %c0_7] : memref<32x8x8xf32, #tpu.memory_space<vmem>>, vector<32x8x8xf32>
    "tpu.trace_start"() <{level = 10 : i32, message = "bld,bmd->blm"}> : () -> ()
    %cst = arith.constant dense<0.000000e+00> : vector<32x8x8xf32>
    %3 = tpu.matmul %0, %1, %cst {dimension_numbers = #tpu.dot_dimension_numbers<[2], [2], [1], [1], [0, 0, 0, 1, 1, 1], [0], [0]>} : vector<32x8x8xf32>, vector<32x8x8xf32>, vector<32x8x8xf32> -> vector<32x8x8xf32>
    "tpu.trace_stop"() : () -> ()
    %cst_8 = arith.constant 0.353553385 : f32
    %4 = vector.broadcast %cst_8 : f32 to vector<32x8x8xf32>
    %5 = arith.mulf %3, %4 : vector<32x8x8xf32>
    %cst_9 = arith.constant dense<0xFF800000> : vector<32x8xf32>
    %6 = vector.multi_reduction <maximumf>, %5, %cst_9 [2] : vector<32x8x8xf32> to vector<32x8xf32>
    %7 = vector.shape_cast %6 : vector<32x8xf32> to vector<32x8x1xf32>
    %8 = vector.broadcast %7 : vector<32x8x1xf32> to vector<32x8x8xf32>
    %9 = arith.subf %5, %8 : vector<32x8x8xf32>
    %10 = math.exp %9 : vector<32x8x8xf32>
    %cst_10 = arith.constant dense<0.000000e+00> : vector<32x8xf32>
    %11 = vector.multi_reduction <add>, %10, %cst_10 [2] : vector<32x8x8xf32> to vector<32x8xf32>
    %12 = vector.shape_cast %11 : vector<32x8xf32> to vector<32x8x1xf32>
    %13 = tpu.reciprocal %12 {approx = true} : vector<32x8x1xf32> -> vector<32x8x1xf32>
    %14 = vector.broadcast %13 : vector<32x8x1xf32> to vector<32x8x8xf32>
    %15 = arith.mulf %10, %14 : vector<32x8x8xf32>
    "tpu.trace_start"() <{level = 10 : i32, message = "blm,bmd->bld"}> : () -> ()
    %cst_11 = arith.constant dense<0.000000e+00> : vector<32x8x8xf32>
    %16 = tpu.matmul %15, %2, %cst_11 {dimension_numbers = #tpu.dot_dimension_numbers<[2], [1], [1], [2], [0, 0, 0, 1, 1, 2], [0], [0]>} : vector<32x8x8xf32>, vector<32x8x8xf32>, vector<32x8x8xf32> -> vector<32x8x8xf32>
    "tpu.trace_stop"() : () -> ()
    %c0_12 = arith.constant 0 : index
    %c0_13 = arith.constant 0 : index
    %c0_14 = arith.constant 0 : index
    %17 = vector.load %arg4[%c0_12, %c0_13, %c0_14] : memref<32x8x8xf32, #tpu.memory_space<vmem>>, vector<32x8x8xf32>
    tpu.vector_store %arg4[%c0_12, %c0_13, %c0_14], %16 {strides = array<i32>} : memref<32x8x8xf32, #tpu.memory_space<vmem>>, vector<32x8x8xf32>,
    return
  }
  func.func @transform_0(%arg0: i32) -> (i32, i32, i32) {
    %c0_i32 = arith.constant 0 : i32
    %c0_i32_0 = arith.constant 0 : i32
    %c0_i32_1 = arith.constant 0 : i32
    return %arg0, %c0_i32, %c0_i32_0 : i32, i32, i32
  }
  func.func @transform_1(%arg0: i32) -> (i32, i32, i32) {
    %c0_i32 = arith.constant 0 : i32
    %c0_i32_0 = arith.constant 0 : i32
    %c0_i32_1 = arith.constant 0 : i32
    return %arg0, %c0_i32, %c0_i32_0 : i32, i32, i32
  }
  func.func @transform_2(%arg0: i32) -> (i32, i32, i32) {
    %c0_i32 = arith.constant 0 : i32
    %c0_i32_0 = arith.constant 0 : i32
    %c0_i32_1 = arith.constant 0 : i32
    return %arg0, %c0_i32, %c0_i32_0 : i32, i32, i32
  }
  func.func @transform_3(%arg0: i32) -> (i32, i32, i32) {
    %c0_i32 = arith.constant 0 : i32
    %c0_i32_0 = arith.constant 0 : i32
    %c0_i32_1 = arith.constant 0 : i32
    return %arg0, %c0_i32, %c0_i32_0 : i32, i32, i32
  }
}

module attributes {stable_mosaic.version = 11 : i64} {
  func.func @_gmm_kernel(%arg0: i32, %arg1: i32, %arg2: memref<1x64x16xf32, #tpu.memory_space<vmem>>, %arg3: memref<1x16x16xf32, #tpu.memory_space<vmem>>, %arg4: memref<1x1x16xf32, #tpu.memory_space<vmem>>, %arg5: memref<1x64x16xf32, #tpu.memory_space<vmem>>) attributes {dimension_semantics = [#tpu.dimension_semantics<parallel>, #tpu.dimension_semantics<parallel>], iteration_bounds = array<i64: 2, 1>, scalar_prefetch = 0 : i64, scratch_operands = 0 : i64, tpu.core_type = #tpu.core_type<tc>, window_params = [{transform_indices = @transform_0, window_bounds = array<i64: 1, 64, 16>}, {transform_indices = @transform_1, window_bounds = array<i64: 1, 16, 16>}, {transform_indices = @transform_2, window_bounds = array<i64: 1, 1, 16>}, {transform_indices = @transform_3, window_bounds = array<i64: 1, 64, 16>}]} {
    %c0 = arith.constant 0 : index
    %c0_0 = arith.constant 0 : index
    %c0_1 = arith.constant 0 : index
    %0 = vector.load %arg2[%c0, %c0_0, %c0_1] : memref<1x64x16xf32, #tpu.memory_space<vmem>>, vector<1x64x16xf32>
    %1 = vector.shape_cast %0 : vector<1x64x16xf32> to vector<64x16xf32>
    %c0_2 = arith.constant 0 : index
    %c0_3 = arith.constant 0 : index
    %c0_4 = arith.constant 0 : index
    %2 = vector.load %arg3[%c0_2, %c0_3, %c0_4] : memref<1x16x16xf32, #tpu.memory_space<vmem>>, vector<1x16x16xf32>
    %3 = vector.shape_cast %2 : vector<1x16x16xf32> to vector<16x16xf32>
    %cst = arith.constant dense<0.000000e+00> : vector<64x16xf32>
    %4 = tpu.matmul %1, %3, %cst {dimension_numbers = #tpu.dot_dimension_numbers<[1], [0], [0], [1], [0, 0, 1, 1], [], []>} : vector<64x16xf32>, vector<16x16xf32>, vector<64x16xf32> -> vector<64x16xf32>
    %c0_5 = arith.constant 0 : index
    %c0_6 = arith.constant 0 : index
    %c0_7 = arith.constant 0 : index
    %5 = vector.load %arg4[%c0_5, %c0_6, %c0_7] : memref<1x1x16xf32, #tpu.memory_space<vmem>>, vector<1x1x16xf32>
    %6 = vector.shape_cast %5 : vector<1x1x16xf32> to vector<1x16xf32>
    %7 = vector.broadcast %6 : vector<1x16xf32> to vector<64x16xf32>
    %8 = arith.addf %4, %7 : vector<64x16xf32>
    %c0_8 = arith.constant 0 : index
    %c0_9 = arith.constant 0 : index
    %c0_10 = arith.constant 0 : index
    %9 = vector.load %arg5[%c0_8, %c0_9, %c0_10] : memref<1x64x16xf32, #tpu.memory_space<vmem>>, vector<1x64x16xf32>
    %10 = vector.shape_cast %9 : vector<1x64x16xf32> to vector<64x16xf32>
    %11 = vector.shape_cast %8 : vector<64x16xf32> to vector<1x64x16xf32>
    tpu.vector_store %arg5[%c0_8, %c0_9, %c0_10], %11 {strides = array<i32>} : memref<1x64x16xf32, #tpu.memory_space<vmem>>, vector<1x64x16xf32>,
    return
  }
  func.func @transform_0(%arg0: i32, %arg1: i32) -> (i32, i32, i32) {
    %c0_i32 = arith.constant 0 : i32
    %c0_i32_0 = arith.constant 0 : i32
    return %arg0, %arg1, %c0_i32 : i32, i32, i32
  }
  func.func @transform_1(%arg0: i32, %arg1: i32) -> (i32, i32, i32) {
    %c0_i32 = arith.constant 0 : i32
    %c0_i32_0 = arith.constant 0 : i32
    %c0_i32_1 = arith.constant 0 : i32
    return %arg0, %c0_i32, %c0_i32_0 : i32, i32, i32
  }
  func.func @transform_2(%arg0: i32, %arg1: i32) -> (i32, i32, i32) {
    %c0_i32 = arith.constant 0 : i32
    %c0_i32_0 = arith.constant 0 : i32
    %c0_i32_1 = arith.constant 0 : i32
    return %arg0, %c0_i32, %c0_i32_0 : i32, i32, i32
  }
  func.func @transform_3(%arg0: i32, %arg1: i32) -> (i32, i32, i32) {
    %c0_i32 = arith.constant 0 : i32
    %c0_i32_0 = arith.constant 0 : i32
    return %arg0, %arg1, %c0_i32 : i32, i32, i32
  }
}

module attributes {stable_mosaic.version = 11 : i64} {
  func.func @_gmm_kernel(%arg0: i32, %arg1: i32, %arg2: memref<1x8x8xf32, #tpu.memory_space<vmem>>, %arg3: memref<1x8x128xf32, #tpu.memory_space<vmem>>, %arg4: memref<1x1x128xf32, #tpu.memory_space<vmem>>, %arg5: memref<1x8x128xf32, #tpu.memory_space<vmem>>) attributes {dimension_semantics = [#tpu.dimension_semantics<parallel>, #tpu.dimension_semantics<parallel>], iteration_bounds = array<i64: 1, 1>, scalar_prefetch = 0 : i64, scratch_operands = 0 : i64, tpu.core_type = #tpu.core_type<tc>, window_params = [{transform_indices = @transform_0, window_bounds = array<i64: 1, 8, 8>}, {transform_indices = @transform_1, window_bounds = array<i64: 1, 8, 128>}, {transform_indices = @transform_2, window_bounds = array<i64: 1, 1, 128>}, {transform_indices = @transform_3, window_bounds = array<i64: 1, 8, 128>}]} {
    %c0 = arith.constant 0 : index
    %c0_0 = arith.constant 0 : index
    %c0_1 = arith.constant 0 : index
    %0 = vector.load %arg2[%c0, %c0_0, %c0_1] : memref<1x8x8xf32, #tpu.memory_space<vmem>>, vector<1x8x8xf32>
    %1 = vector.shape_cast %0 : vector<1x8x8xf32> to vector<8x8xf32>
    %c0_2 = arith.constant 0 : index
    %c0_3 = arith.constant 0 : index
    %c0_4 = arith.constant 0 : index
    %2 = vector.load %arg3[%c0_2, %c0_3, %c0_4] : memref<1x8x128xf32, #tpu.memory_space<vmem>>, vector<1x8x128xf32>
    %3 = vector.shape_cast %2 : vector<1x8x128xf32> to vector<8x128xf32>
    %cst = arith.constant dense<0.000000e+00> : vector<8x128xf32>
    %4 = tpu.matmul %1, %3, %cst {dimension_numbers = #tpu.dot_dimension_numbers<[1], [0], [0], [1], [0, 0, 1, 1], [], []>} : vector<8x8xf32>, vector<8x128xf32>, vector<8x128xf32> -> vector<8x128xf32>
    %c0_5 = arith.constant 0 : index
    %c0_6 = arith.constant 0 : index
    %c0_7 = arith.constant 0 : index
    %5 = vector.load %arg4[%c0_5, %c0_6, %c0_7] : memref<1x1x128xf32, #tpu.memory_space<vmem>>, vector<1x1x128xf32>
    %6 = vector.shape_cast %5 : vector<1x1x128xf32> to vector<1x128xf32>
    %7 = vector.broadcast %6 : vector<1x128xf32> to vector<8x128xf32>
    %8 = arith.addf %4, %7 : vector<8x128xf32>
    %c0_8 = arith.constant 0 : index
    %c0_9 = arith.constant 0 : index
    %c0_10 = arith.constant 0 : index
    %9 = vector.load %arg5[%c0_8, %c0_9, %c0_10] : memref<1x8x128xf32, #tpu.memory_space<vmem>>, vector<1x8x128xf32>
    %10 = vector.shape_cast %9 : vector<1x8x128xf32> to vector<8x128xf32>
    %11 = vector.shape_cast %8 : vector<8x128xf32> to vector<1x8x128xf32>
    tpu.vector_store %arg5[%c0_8, %c0_9, %c0_10], %11 {strides = array<i32>} : memref<1x8x128xf32, #tpu.memory_space<vmem>>, vector<1x8x128xf32>,
    return
  }
  func.func @transform_0(%arg0: i32, %arg1: i32) -> (i32, i32, i32) {
    %c0_i32 = arith.constant 0 : i32
    %c0_i32_0 = arith.constant 0 : i32
    return %arg0, %arg1, %c0_i32 : i32, i32, i32
  }
  func.func @transform_1(%arg0: i32, %arg1: i32) -> (i32, i32, i32) {
    %c0_i32 = arith.constant 0 : i32
    %c0_i32_0 = arith.constant 0 : i32
    %c0_i32_1 = arith.constant 0 : i32
    return %arg0, %c0_i32, %c0_i32_0 : i32, i32, i32
  }
  func.func @transform_2(%arg0: i32, %arg1: i32) -> (i32, i32, i32) {
    %c0_i32 = arith.constant 0 : i32
    %c0_i32_0 = arith.constant 0 : i32
    %c0_i32_1 = arith.constant 0 : i32
    return %arg0, %c0_i32, %c0_i32_0 : i32, i32, i32
  }
  func.func @transform_3(%arg0: i32, %arg1: i32) -> (i32, i32, i32) {
    %c0_i32 = arith.constant 0 : i32
    %c0_i32_0 = arith.constant 0 : i32
    return %arg0, %arg1, %c0_i32 : i32, i32, i32
  }
}

module attributes {stable_mosaic.version = 11 : i64} {
  func.func @_gate_pred_kernel(%arg0: i32, %arg1: memref<64x16xf32, #tpu.memory_space<vmem>>, %arg2: memref<64x16xf32, #tpu.memory_space<vmem>>, %arg3: memref<64x16xf32, #tpu.memory_space<vmem>>, %arg4: memref<16x16xf32, #tpu.memory_space<vmem>>, %arg5: memref<1x16xf32, #tpu.memory_space<vmem>>, %arg6: memref<16x1xf32, #tpu.memory_space<vmem>>, %arg7: memref<1x1xf32, #tpu.memory_space<vmem>>, %arg8: memref<64x1xf32, #tpu.memory_space<vmem>>) attributes {dimension_semantics = [#tpu.dimension_semantics<parallel>], iteration_bounds = array<i64: 1>, scalar_prefetch = 0 : i64, scratch_operands = 0 : i64, tpu.core_type = #tpu.core_type<tc>, window_params = [{transform_indices = @transform_0, window_bounds = array<i64: 64, 16>}, {transform_indices = @transform_1, window_bounds = array<i64: 64, 16>}, {transform_indices = @transform_2, window_bounds = array<i64: 64, 16>}, {pipeline_mode = #tpu.pipeline_mode<synchronous>, transform_indices = @transform_3, window_bounds = array<i64: 16, 16>}, {pipeline_mode = #tpu.pipeline_mode<synchronous>, transform_indices = @transform_4, window_bounds = array<i64: 1, 16>}, {pipeline_mode = #tpu.pipeline_mode<synchronous>, transform_indices = @transform_5, window_bounds = array<i64: 16, 1>}, {pipeline_mode = #tpu.pipeline_mode<synchronous>, transform_indices = @transform_6, window_bounds = array<i64: 1, 1>}, {transform_indices = @transform_7, window_bounds = array<i64: 64, 1>}]} {
    %c0 = arith.constant 0 : index
    %c0_0 = arith.constant 0 : index
    %0 = vector.load %arg1[%c0, %c0_0] : memref<64x16xf32, #tpu.memory_space<vmem>>, vector<64x16xf32>
    %c0_1 = arith.constant 0 : index
    %c0_2 = arith.constant 0 : index
    %1 = vector.load %arg2[%c0_1, %c0_2] : memref<64x16xf32, #tpu.memory_space<vmem>>, vector<64x16xf32>
    %c0_3 = arith.constant 0 : index
    %c0_4 = arith.constant 0 : index
    %2 = vector.load %arg3[%c0_3, %c0_4] : memref<64x16xf32, #tpu.memory_space<vmem>>, vector<64x16xf32>
    %3 = arith.addf %0, %1 : vector<64x16xf32>
    %4 = arith.addf %3, %2 : vector<64x16xf32>
    %c0_5 = arith.constant 0 : index
    %c0_6 = arith.constant 0 : index
    %5 = vector.load %arg4[%c0_5, %c0_6] : memref<16x16xf32, #tpu.memory_space<vmem>>, vector<16x16xf32>
    %cst = arith.constant dense<0.000000e+00> : vector<64x16xf32>
    %6 = tpu.matmul %4, %5, %cst {dimension_numbers = #tpu.dot_dimension_numbers<[1], [0], [0], [1], [0, 0, 1, 1], [], []>} : vector<64x16xf32>, vector<16x16xf32>, vector<64x16xf32> -> vector<64x16xf32>
    %c0_7 = arith.constant 0 : index
    %c0_8 = arith.constant 0 : index
    %7 = vector.load %arg5[%c0_7, %c0_8] : memref<1x16xf32, #tpu.memory_space<vmem>>, vector<1x16xf32>
    %8 = vector.broadcast %7 : vector<1x16xf32> to vector<64x16xf32>
    %9 = arith.addf %6, %8 : vector<64x16xf32>
    %10 = arith.negf %9 : vector<64x16xf32>
    %11 = math.exp %10 : vector<64x16xf32>
    %cst_9 = arith.constant 1.000000e+00 : f32
    %12 = vector.broadcast %cst_9 : f32 to vector<64x16xf32>
    %13 = arith.addf %12, %11 : vector<64x16xf32>
    %14 = arith.divf %12, %13 : vector<64x16xf32>
    %15 = arith.mulf %14, %1 : vector<64x16xf32>
    %16 = arith.addf %0, %15 : vector<64x16xf32>
    %c0_10 = arith.constant 0 : index
    %c0_11 = arith.constant 0 : index
    %17 = vector.load %arg6[%c0_10, %c0_11] : memref<16x1xf32, #tpu.memory_space<vmem>>, vector<16x1xf32>
    %cst_12 = arith.constant dense<0.000000e+00> : vector<64x1xf32>
    %18 = tpu.matmul %16, %17, %cst_12 {dimension_numbers = #tpu.dot_dimension_numbers<[1], [0], [0], [1], [0, 0, 1, 1], [], []>} : vector<64x16xf32>, vector<16x1xf32>, vector<64x1xf32> -> vector<64x1xf32>
    %c0_13 = arith.constant 0 : index
    %c0_14 = arith.constant 0 : index
    %19 = vector.load %arg7[%c0_13, %c0_14] : memref<1x1xf32, #tpu.memory_space<vmem>>, vector<1x1xf32>
    %20 = vector.broadcast %19 : vector<1x1xf32> to vector<64x1xf32>
    %21 = arith.addf %18, %20 : vector<64x1xf32>
    %c0_15 = arith.constant 0 : index
    %c0_16 = arith.constant 0 : index
    %22 = vector.load %arg8[%c0_15, %c0_16] : memref<64x1xf32, #tpu.memory_space<vmem>>, vector<64x1xf32>
    tpu.vector_store %arg8[%c0_15, %c0_16], %21 {strides = array<i32>} : memref<64x1xf32, #tpu.memory_space<vmem>>, vector<64x1xf32>,
    return
  }
  func.func @transform_0(%arg0: i32) -> (i32, i32) {
    %c0_i32 = arith.constant 0 : i32
    %c0_i32_0 = arith.constant 0 : i32
    return %arg0, %c0_i32 : i32, i32
  }
  func.func @transform_1(%arg0: i32) -> (i32, i32) {
    %c0_i32 = arith.constant 0 : i32
    %c0_i32_0 = arith.constant 0 : i32
    return %arg0, %c0_i32 : i32, i32
  }
  func.func @transform_2(%arg0: i32) -> (i32, i32) {
    %c0_i32 = arith.constant 0 : i32
    %c0_i32_0 = arith.constant 0 : i32
    return %arg0, %c0_i32 : i32, i32
  }
  func.func @transform_3(%arg0: i32) -> (i32, i32) {
    %c0_i32 = arith.constant 0 : i32
    %c0_i32_0 = arith.constant 0 : i32
    %c0_i32_1 = arith.constant 0 : i32
    return %c0_i32, %c0_i32_0 : i32, i32
  }
  func.func @transform_4(%arg0: i32) -> (i32, i32) {
    %c0_i32 = arith.constant 0 : i32
    %c0_i32_0 = arith.constant 0 : i32
    %c0_i32_1 = arith.constant 0 : i32
    return %c0_i32, %c0_i32_0 : i32, i32
  }
  func.func @transform_5(%arg0: i32) -> (i32, i32) {
    %c0_i32 = arith.constant 0 : i32
    %c0_i32_0 = arith.constant 0 : i32
    %c0_i32_1 = arith.constant 0 : i32
    return %c0_i32, %c0_i32_0 : i32, i32
  }
  func.func @transform_6(%arg0: i32) -> (i32, i32) {
    %c0_i32 = arith.constant 0 : i32
    %c0_i32_0 = arith.constant 0 : i32
    %c0_i32_1 = arith.constant 0 : i32
    return %c0_i32, %c0_i32_0 : i32, i32
  }
  func.func @transform_7(%arg0: i32) -> (i32, i32) {
    %c0_i32 = arith.constant 0 : i32
    %c0_i32_0 = arith.constant 0 : i32
    return %arg0, %c0_i32 : i32, i32
  }
}

</mosaic_0001>

<bundles_post_ra>
// kernel: neg.1
= control target key start
LH: loop header
LB: loop body
LE: loop exit
PB: predicated region body
PF: predicated region fallthrough
CT: control target
= control target key end

     0   :  { %s24_s0 = inlined_call_operand.vmem [shape: f32[4,20], index: 0, kind: input, shape index: {}]   ;;  %s25_s1 = inlined_call_operand.vmem [shape: f32[4,20], index: 1, kind: output, shape index: {}]  }
   0x1   :  { %v2_v0 = vld [vmem:[%s24_s0] sm:$0xf] }
   0x2   :  { %v5_v1 = vxor.u32 2147483648, %v2_v0 }
   0x4   :  { %7 = vst [vmem:[%s25_s1] sm:$0xf] %v5_v1 }

// kernel: sub.11
= control target key start
LH: loop header
LB: loop body
LE: loop exit
PB: predicated region body
PF: predicated region fallthrough
CT: control target
= control target key end

     0   :  { %s7_s6 = smov 3  ;;  %s21_s9 = smov 3  ;;  %vm4_vm0 = vcmask 31744   ;;  %vm11_vm1 = vcmask 162944   ;;  %vm18_vm2 = vcmask 130144   ;;  %vm25_vm3 = vcmask 97344   ;;  %s82_s0 = inlined_call_operand.vmem [shape: f32[5,4,2], index: 0, kind: input, shape index: {}]   ;;  %s83_s1 = inlined_call_operand.vmem [shape: f32[20,2], index: 1, kind: output, shape index: {}]  }
   0x1   :  { %v42_v0 = vld [vmem:[%s82_s0 + $0x4] ss:$8 sm:%s7_s6]   ;;  %s50_s10 = smov 16   ;;  %v44_v1 = vld [vmem:[%s82_s0 + $0x2] ss:$8 sm:%s21_s9]   ;;  %s14_s13 = smov 3 }
   0x2   :  { %9 = vrot.lane.b32.xlu0 %v42_v0, %s50_s10  ;;  %s51_s14 = smov 8   ;;  %v43_v2 = vld [vmem:[%s82_s0 + $0x3] ss:$8 sm:%s14_s13]   ;;  %s28_s17 = smov 3  ;;  %vm32_vm4 = vcmask 64544  }
   0x3   :  { %23 = vrot.lane.b32.xlu1 %v44_v1, %s51_s14  ;;  %v45_v3 = vld [vmem:[%s82_s0 + $0x1] ss:$8 sm:%s28_s17]   ;;  %s2_s20 = smov 3  ;;  %s53_s23 = smov 4  }
   0x4   :  { %v3_v4 = vld [vmem:[%s82_s0] ss:$8 sm:%s2_s20]   ;;  %s52_s0 = smov 12  }
   0x5   :  { %5 = vst.msk [vmem:[#allocation0] sm:$0x3] %vm4_vm0, %v3_v4  }
   0x6   :  { %16 = vrot.lane.b32.xlu0 %v43_v2, %s52_s0 }
   0x7   :  { %30 = vrot.lane.b32.xlu1 %v45_v3, %s53_s23 }
  0x74   :  { %v10_v5 = vpop.permute.xlu0 %9  }
  0x75   :  { %12 = vst.msk [vmem:[#allocation0] sm:$0x3] %vm11_vm1, %v10_v5   ;;  %v24_v6 = vpop.permute.xlu1 %23  }
  0x78   :  { %v17_v7 = vpop.permute.xlu0 %16  }
  0x79   :  { %19 = vst.msk [vmem:[#allocation0] sm:$0x3] %vm18_vm2, %v17_v7   ;;  %v31_v8 = vpop.permute.xlu1 %30  }
  0x7a   :  { %26 = vst.msk [vmem:[#allocation0] sm:$0x3] %vm25_vm3, %v24_v6  }
  0x7b   :  { %33 = vst.msk [vmem:[#allocation0] sm:$0x3] %vm32_vm4, %v31_v8  }
  0x82   :  { %v38_v9 = vld [vmem:[#allocation0] sm:$0x3] }
  0x83   :  { %41 = vst [vmem:[%s83_s1] sm:$0x3] %v38_v9 }

// kernel: _lambda_.15
= control target key start
LH: loop header
LB: loop body
LE: loop exit
PB: predicated region body
PF: predicated region fallthrough
CT: control target
= control target key end

     0   :  { %s625_s12 = smov 0   ;;  %s627_s13 = smov 0   ;;  %s689_s0 = inlined_call_operand.vmem [shape: f32[2,64,3], index: 0, kind: input, shape index: {}]   ;;  %s690_s1 = inlined_call_operand.vmem [shape: f32[2,3,16], index: 1, kind: input, shape index: {}]   ;;  %s691_s2 = inlined_call_operand.vmem [shape: f32[2,1,16], index: 2, kind: input, shape index: {}]   ;;  %s692_s3 = inlined_call_operand.vmem [shape: f32[2,64,16], index: 3, kind: output, shape index: {}]  }
   0x1   :  { %s629_s14 = smov 0  }
   0x2 LB: > { %s25_s15 = sadd.s32 1, %s599_s13  ;;  %p512_p0 = scmp.ge.s32.totalorder %s603_s14, 1  ;;  %s603_s14 = sphi %s629_s14, %s13_s14   ;;  %s599_s13 = sphi %s627_s13, %s694_s13   ;;  %s595_s12 = sphi %s625_s12, %s693_s12  }
   0x3   : > { %p27_p1 = scmp.ge.s32.totalorder %s25_s15, 2  ;;  %p175_p2 = scmp.lt.s32.totalorder %s603_s14, 3 }
   0x5   : > { %s696_s15 = smov (%p27_p1, %s25_s15), 0  ;;  %p176_p3 = pnand %p512_p0, %p175_p2 }
   0x6   : > { %p215_p4 = scmp.lt.s32.totalorder (!%p176_p3), %s595_s12, 1 }
   0x7   : > { %179 = sbr.rel (%p176_p3) target bundleno = 221 (0xdd), region = 32 }
   0xc   : > { %s698_s12 = smov (!%p215_p4, %s595_s12), 1  ;;  %vm282_vm0 = vcmask 1042432   ;;  %vm257_vm1 = vcmask 23552   ;;  %vm391_vm2 = vcmask 130048  }
   0xd   : > { %s530_s16 = sshll.u32 %s698_s12, 6  ;;  %s515_s17 = sshll.u32 %s698_s12, 2 }
   0xe   : > { %s222_s20 = scalar_lea.vmem %s689_s0, %s530_s16  ;;  %s227_s23 = scalar_lea.vmem %s690_s1, %s515_s17 }
   0xf   : > { %v249_v0 = vld [vmem:[%s227_s23] sm:$0x7]  ;;  %v242_v3 = vld [vmem:[%s222_s20 + $0x8] sm:$0xff]  ;;  %v243_v5 = vld [vmem:[%s222_s20 + $0x10] sm:$0xff]  ;;  %s230_s26 = scalar_lea.vmem %s691_s2, %s698_s12  ;;  %s239_s29 = scalar_lea.vmem %s692_s3, %s530_s16 }
  0x10   : > { %v241_v1 = vld [vmem:[%s222_s20] sm:$0xff]  ;;  %541 = vmatprep.subr.msk.mxu0 %vm282_vm0, %v249_v0  ;;  %555 = vmatprep.subr.msk.mxu1 %vm282_vm0, %v249_v0  ;;  %v246_v4 = vld [vmem:[%s222_s20 + $0x28] sm:$0xff]  ;;  %v247_v6 = vld [vmem:[%s222_s20 + $0x30] sm:$0xff] }
  0x11   : > { %v245_v2 = vld [vmem:[%s222_s20 + $0x20] sm:$0xff]  ;;  %542 = vmatpush3.msk.msra.mxu0 %vm282_vm0, %v249_v0  ;;  %556 = vmatpush3.msk.msra.mxu1 %vm282_vm0, %v249_v0  ;;  %v244_v7 = vld [vmem:[%s222_s20 + $0x18] sm:$0xff] }
  0x12   : > { %543 = vmatprep.mubr.msk.f32.mxu0 %vm257_vm1, %v241_v1  ;;  %549 = vmatprep.mubr.msk.f32.mxu1 %vm257_vm1, %v245_v2  ;;  %v248_v8 = vld [vmem:[%s222_s20 + $0x38] sm:$0xff]  ;;  %v518_v9 = vld [vmem:[%s230_s26] ss:$0 sm:$0xff] }
  0x13   : > { %544 = vmatmul.mubr.msk.f32.vlgmr.msra.gmra.mxu0 %vm257_vm1, %v242_v3  ;;  %550 = vmatmul.mubr.msk.f32.vlgmr.msra.gmra.mxu1 %vm257_vm1, %v246_v4 }
  0x14   : > { %546 = vmatprep.mubr.msk.f32.mxu0 %vm257_vm1, %v243_v5  ;;  %552 = vmatprep.mubr.msk.f32.mxu1 %vm257_vm1, %v247_v6 }
  0x17   : > { %547 = vmatmul.mubr.msk.f32.gmra.mxu0 %vm257_vm1, %v244_v7  ;;  %553 = vmatmul.mubr.msk.f32.gmra.mxu1 %vm257_vm1, %v248_v8 }
  0xd3   : > { %v545_v10 = vpop.f32.mrf.mxu0  ;;  %v551_v11 = vpop.f32.mrf.mxu1 }
  0xd4   : > { %v358_v12 = vadd.f32 %v545_v10, %v518_v9  ;;  %v378_v13 = vadd.f32 %v551_v11, %v518_v9 }
  0xd5   : > { %v352_v14 = vpop.f32.mrf.mxu0  ;;  %v372_v15 = vpop.f32.mrf.mxu1 }
  0xd6   : > { %393 = vst.msk [vmem:[%s239_s29 + $0x8] sm:$0xff] %vm391_vm2, %v358_v12  ;;  %397 = vst.msk [vmem:[%s239_s29 + $0x28] sm:$0xff] %vm391_vm2, %v378_v13  ;;  %v353_v16 = vadd.f32 %v518_v9, %v352_v14  ;;  %v373_v17 = vadd.f32 %v518_v9, %v372_v15 }
  0xd7   : > { %v548_v18 = vpop.f32.mrf.mxu0  ;;  %v554_v19 = vpop.f32.mrf.mxu1 }
  0xd8   : > { %392 = vst.msk [vmem:[%s239_s29] sm:$0xff] %vm391_vm2, %v353_v16  ;;  %396 = vst.msk [vmem:[%s239_s29 + $0x20] sm:$0xff] %vm391_vm2, %v373_v17  ;;  %v368_v20 = vadd.f32 %v548_v18, %v518_v9  ;;  %v388_v21 = vadd.f32 %v554_v19, %v518_v9 }
  0xd9   : > { %v362_v22 = vpop.f32.mrf.mxu0  ;;  %v382_v23 = vpop.f32.mrf.mxu1 }
  0xda   : > { %395 = vst.msk [vmem:[%s239_s29 + $0x18] sm:$0xff] %vm391_vm2, %v368_v20  ;;  %399 = vst.msk [vmem:[%s239_s29 + $0x38] sm:$0xff] %vm391_vm2, %v388_v21  ;;  %v363_v24 = vadd.f32 %v518_v9, %v362_v22  ;;  %v383_v25 = vadd.f32 %v518_v9, %v382_v23 }
  0xdc   : > { %394 = vst.msk [vmem:[%s239_s29 + $0x10] sm:$0xff] %vm391_vm2, %v363_v24  ;;  %398 = vst.msk [vmem:[%s239_s29 + $0x30] sm:$0xff] %vm391_vm2, %v383_v25 }
  0xdd PF: > { %s13_s14 = sadd.s32 1, %s603_s14   ;;  %s693_s12 = smov %s599_s13 }
  0xde   : > { %p10_p5 = scmp.ge.s32.totalorder %s13_s14, 4   ;;  %s694_s13 = smov %s696_s15 }
  0xe0   :  { %12 = sbr.rel (!%p10_p5) target bundleno = 2 (0x2), region = 68 }

// kernel: _lambda_.14
= control target key start
LH: loop header
LB: loop body
LE: loop exit
PB: predicated region body
PF: predicated region fallthrough
CT: control target
= control target key end

     0   :  { %vm42_vm0 = vcmask 64512   ;;  %v717_v0 = vmov 0.0   ;;  %vm718_vm1 = vmmov 0   ;;  %s721_s21 = smov 120   ;;  %s722_s22 = smov 112   ;;  %s963_s4 = inlined_call_operand.vmem [shape: f32[8,8], index: 4, kind: input, shape index: {}]   ;;  %s964_s0 = inlined_call_operand.vmem [shape: f32[24,8], index: 0, kind: input, shape index: {}]   ;;  %s965_s6 = inlined_call_operand.vmem [shape: f32[8,8], index: 6, kind: input, shape index: {}]   ;;  %s966_s5 = inlined_call_operand.vmem [shape: f32[1,8], index: 5, kind: input, shape index: {}]   ;;  %s967_s1 = inlined_call_operand.vmem [shape: f32[24,24], index: 1, kind: input, shape index: {}]   ;;  %s968_s7 = inlined_call_operand.vmem [shape: f32[1,8], index: 7, kind: input, shape index: {}]   ;;  %s969_s3 = inlined_call_operand.vmem [shape: f32[24,3], index: 3, kind: input, shape index: {}]   ;;  %s970_s2 = inlined_call_operand.vmem [shape: f32[24,24], index: 2, kind: input, shape index: {}]   ;;  %s971_s9 = inlined_call_operand.vmem [shape: f32[24,8], index: 9, kind: output, shape index: {1}]   ;;  %s972_s8 = inlined_call_operand.vmem [shape: f32[24,8], index: 8, kind: output, shape index: {0}]  }
   0x1   :  { %649 = vmatprep.subr.mxu0 %v717_v0  ;;  %v34_v1 = vld [vmem:[%s963_s4] sm:$0xff]  ;;  %651 = vmatprep.mubr.msk.f32.mxu0 %vm718_vm1, %v717_v0  ;;  %v32_v3 = vld [vmem:[%s964_s0 + $0x8] sm:$0xff]  ;;  %v33_v4 = vld [vmem:[%s964_s0 + $0x10] sm:$0xff]  ;;  %s723_s10 = smov 127   ;;  %s724_s13 = smov 126  }
   0x2   :  { %v31_v2 = vld [vmem:[%s964_s0] sm:$0xff]  ;;  %650 = vmatpush3.msra.mxu0 %v34_v1  ;;  %660 = vmatprep.subr.mxu1 %v717_v0  ;;  %s719_s0 = smov 16   ;;  %v826_v27 = vld [vmem:[%s967_s1 + $0x8] sm:$0xff]  ;;  %v833_v30 = vld [vmem:[%s967_s1 + $0x10] sm:$0xff]  ;;  %s726_s14 = smov 1  }
   0x3   :  { %652 = vmatmul.mubr.msk.f32.vlgmr.msra.gmra.mxu0 %vm42_vm0, %v31_v2  ;;  %662 = vmatprep.mubr.msk.f32.mxu1 %vm718_vm1, %v717_v0  ;;  %v132_v5 = vld [vmem:[%s965_s6] sm:$0xff] }
   0x4   :  { %654 = vmatprep.mubr.msk.f32.mxu0 %vm718_vm1, %v717_v0  ;;  %661 = vmatpush3.msra.mxu1 %v132_v5  ;;  %v633_v6 = vld [vmem:[%s966_s5] ss:$0 sm:$0xff]  ;;  %s720_s5 = smov 8  }
   0x5   :  { %v817_v22 = vld [vmem:[%s967_s1] sm:$0xff] }
   0x6   :  { %v640_v37 = vld [vmem:[%s968_s7] ss:$0 sm:$0xff] }
   0x7   :  { %655 = vmatmul.mubr.msk.f32.gmra.mxu0 %vm42_vm0, %v32_v3  ;;  %v247_v1 = vld [vmem:[%s969_s3] sm:$0xff] }
   0x8   :  { %657 = vmatprep.mubr.msk.f32.mxu0 %vm718_vm1, %v717_v0 }
   0xb   :  { %658 = vmatmul.mubr.msk.f32.gmra.mxu0 %vm42_vm0, %v33_v4 }
  0xc3   :  { %v118_v7 = vpop.f32.mrf.mxu0 }
  0xc4   :  { %v119_v8 = vadd.f32 %v633_v6, %v118_v7  ;;  %v248_v7 = vld [vmem:[%s969_s3 + $0x8] sm:$0xff] }
  0xc5   :  { %v653_v9 = vpop.f32.mrf.mxu0 }
  0xc6   :  { %663 = vmatmul.mubr.msk.f32.vlgmr.msra.gmra.mxu1 %vm42_vm0, %v119_v8  ;;  %v229_v38 = vmul.f32 %v640_v37, %v119_v8 }
  0xc7   :  { %v123_v10 = vpop.f32.mrf.mxu0  ;;  %665 = vmatprep.mubr.msk.f32.mxu1 %vm718_vm1, %v717_v0 }
  0xc8   :  { %v124_v11 = vadd.f32 %v633_v6, %v123_v10  ;;  %v232_v39 = vsel %vm42_vm0, %v229_v38, 0.0 }
  0xc9   :  { %v656_v12 = vpop.f32.mrf.mxu0 }
  0xca   :  { %666 = vmatmul.mubr.msk.f32.gmra.mxu1 %vm42_vm0, %v124_v11  ;;  %v230_v41 = vmul.f32 %v640_v37, %v124_v11  ;;  %v249_v12 = vld [vmem:[%s969_s3 + $0x10] sm:$0xff]  ;;  %s725_s3 = smov 2  }
  0xcb   :  { %v128_v13 = vpop.f32.mrf.mxu0  ;;  %668 = vmatprep.mubr.msk.f32.mxu1 %vm718_vm1, %v717_v0 }
  0xcc   :  { %v129_v14 = vadd.f32 %v633_v6, %v128_v13  ;;  %v235_v43 = vsel %vm42_vm0, %v230_v41, 0.0 }
  0xcd   :  { %v659_v15 = vpop.f32.mrf.mxu0 }
  0xce   :  { %669 = vmatmul.mubr.msk.f32.gmra.mxu1 %vm42_vm0, %v129_v14  ;;  %v231_v40 = vmul.f32 %v640_v37, %v129_v14 }
  0xd0   :  { %v238_v42 = vsel %vm42_vm0, %v231_v40, 0.0 }
 0x186   :  { %v810_v16 = vpop.f32.mrf.mxu1 }
 0x187   :  { %310 = vrot.lane.b32.xlu1 %v810_v16, %s719_s0  ;;  %271 = vrot.lane.b32.xlu0 %v810_v16, %s720_s5  ;;  %v250_v56 = vmul.f32 %v817_v22, %v810_v16 }
 0x188   :  { %v664_v17 = vpop.f32.mrf.mxu1 }
 0x189   :  { %v253_v58 = vsel %vm42_vm0, %v250_v56, 0.0 }
 0x18a   :  { %v213_v18 = vpop.f32.mrf.mxu1 }
 0x18b   :  { %273 = vrot.lane.b32.xlu0 %v213_v18, %s720_s5  ;;  %v251_v57 = vmul.f32 %v826_v27, %v213_v18 }
 0x18c   :  { %v667_v19 = vpop.f32.mrf.mxu1 }
 0x18d   :  { %v256_v59 = vsel %vm42_vm0, %v251_v57, 0.0 }
 0x18e   :  { %v218_v20 = vpop.f32.mrf.mxu1 }
 0x18f   :  { %312 = vrot.lane.b32.xlu0 %v213_v18, %s719_s0  ;;  %275 = vrot.lane.b32.xlu1 %v218_v20, %s720_s5  ;;  %v252_v60 = vmul.f32 %v833_v30, %v218_v20 }
 0x190   :  { %v670_v21 = vpop.f32.mrf.mxu1 }
 0x191   :  { %v259_v61 = vsel %vm42_vm0, %v252_v60, 0.0 }
 0x193   :  { %314 = vrot.lane.b32.xlu1 %v218_v20, %s719_s0 }
 0x1f9   :  { %v311_v23 = vpop.permute.xlu1 %310  ;;  %v272_v24 = vpop.permute.xlu0 %271 }
 0x1fa   :  { %v319_v25 = vmul.f32 %v311_v23, %v817_v22  ;;  %v280_v26 = vmul.f32 %v272_v24, %v817_v22 }
 0x1fc   :  { %286 = vrot.lane.b32.xlu0 %v280_v26, %s721_s21  ;;  %325 = vrot.lane.b32.xlu1 %v319_v25, %s722_s22 }
 0x1fd   :  { %v274_v28 = vpop.permute.xlu0 %273 }
 0x1fe   :  { %v281_v29 = vmul.f32 %v274_v28, %v826_v27 }
 0x200   :  { %288 = vrot.lane.b32.xlu1 %v281_v29, %s721_s21 }
 0x201   :  { %v276_v31 = vpop.permute.xlu1 %275  ;;  %v313_v33 = vpop.permute.xlu0 %312 }
 0x202   :  { %v282_v32 = vmul.f32 %v276_v31, %v833_v30  ;;  %v320_v35 = vmul.f32 %v313_v33, %v826_v27 }
 0x204   :  { %290 = vrot.lane.b32.xlu0 %v282_v32, %s721_s21 }
 0x205   :  { %v315_v34 = vpop.permute.xlu1 %314 }
 0x206   :  { %v321_v36 = vmul.f32 %v315_v34, %v833_v30 }
 0x208   :  { %327 = vrot.lane.b32.xlu0 %v320_v35, %s722_s22  ;;  %329 = vrot.lane.b32.xlu1 %v321_v36, %s722_s22 }
 0x227   :  { %233 = vadd.xlane.f32.xlu0 %v232_v39 }
 0x22b   :  { %239 = vadd.xlane.f32.xlu0 %v238_v42 }
 0x22c   :  { %236 = vadd.xlane.f32.xlu1 %v235_v43 }
 0x26e   :  { %v287_v44 = vpop.permute.xlu0 %286  ;;  %v326_v45 = vpop.permute.xlu1 %325 }
 0x26f   :  { %v295_v46 = vsel %vm42_vm0, %v287_v44, 0.0  ;;  %v334_v47 = vsel %vm42_vm0, %v326_v45, 0.0 }
 0x270   :  { %296 = vadd.xlane.f32.xlu0 %v295_v46  ;;  %335 = vadd.xlane.f32.xlu1 %v334_v47 }
 0x272   :  { %v289_v48 = vpop.permute.xlu1 %288 }
 0x273   :  { %v298_v49 = vsel %vm42_vm0, %v289_v48, 0.0 }
 0x274   :  { %299 = vadd.xlane.f32.xlu1 %v298_v49 }
 0x276   :  { %v291_v50 = vpop.permute.xlu0 %290 }
 0x277   :  { %v301_v51 = vsel %vm42_vm0, %v291_v50, 0.0 }
 0x278   :  { %302 = vadd.xlane.f32.xlu0 %v301_v51 }
 0x27a   :  { %v328_v52 = vpop.permute.xlu0 %327  ;;  %v330_v53 = vpop.permute.xlu1 %329 }
 0x27b   :  { %v337_v54 = vsel %vm42_vm0, %v328_v52, 0.0  ;;  %v340_v55 = vsel %vm42_vm0, %v330_v53, 0.0 }
 0x27c   :  { %338 = vadd.xlane.f32.xlu0 %v337_v54  ;;  %341 = vadd.xlane.f32.xlu1 %v340_v55 }
 0x280   :  { %254 = vadd.xlane.f32.xlu0 %v253_v58  ;;  %257 = vadd.xlane.f32.xlu1 %v256_v59 }
 0x284   :  { %260 = vadd.xlane.f32.xlu0 %v259_v61 }
 0x2b0   :  { %v234_v62 = vpop.xlane.xlu0 %233 }
 0x2b4   :  { %v240_v63 = vpop.xlane.xlu0 %239 }
 0x2b5   :  { %v237_v0 = vpop.xlane.xlu1 %236 }
 0x2f9   :  { %v297_v2 = vpop.xlane.xlu0 %296  ;;  %v336_v3 = vpop.xlane.xlu1 %335 }
 0x2fa   :  { %v304_v4 = vadd.f32 %v297_v2, %v234_v62  ;;  %v343_v6 = vadd.f32 %v336_v3, %v234_v62 }
 0x2fc   :  { %v307_v5 = vadd.f32 %v304_v4, %v247_v1  ;;  %v346_v10 = vadd.f32 %v343_v6, %v247_v1 }
 0x2fd   :  { %v300_v8 = vpop.xlane.xlu1 %299 }
 0x2fe   :  { %v305_v9 = vadd.f32 %v300_v8, %v237_v0  ;;  %352 = vrot.lane.b32.xlu1 %v307_v5, %s723_s10 }
 0x300   :  { %v308_v11 = vadd.f32 %v305_v9, %v248_v7 }
 0x301   :  { %v303_v13 = vpop.xlane.xlu0 %302 }
 0x302   :  { %v306_v14 = vadd.f32 %v303_v13, %v240_v63  ;;  %367 = vrot.lane.b32.xlu1 %v346_v10, %s724_s13  ;;  %354 = vrot.lane.b32.xlu0 %v308_v11, %s723_s10 }
 0x304   :  { %v309_v15 = vadd.f32 %v306_v14, %v249_v12 }
 0x305   :  { %v339_v16 = vpop.xlane.xlu0 %338  ;;  %v342_v17 = vpop.xlane.xlu1 %341 }
 0x306   :  { %v344_v18 = vadd.f32 %v339_v16, %v237_v0  ;;  %v345_v19 = vadd.f32 %v342_v17, %v240_v63  ;;  %356 = vrot.lane.b32.xlu1 %v309_v15, %s723_s10 }
 0x308   :  { %v347_v20 = vadd.f32 %v344_v18, %v248_v7  ;;  %v348_v21 = vadd.f32 %v345_v19, %v249_v12  ;;  %v727_v18 = vmov 1  }
 0x309   :  { %v255_v23 = vpop.xlane.xlu0 %254  ;;  %v258_v24 = vpop.xlane.xlu1 %257  ;;  %684 = vset.pattern.permute.xlu0 %v727_v18  ;;  %686 = vset.pattern.permute.xlu1 %v727_v18 }
 0x30a   :  { %v263_v25 = vadd.f32 %v258_v24, %v237_v0  ;;  %371 = vrot.lane.b32.xlu1 %v348_v21, %s724_s13  ;;  %369 = vrot.lane.b32.xlu0 %v347_v20, %s724_s13  ;;  %v262_v32 = vadd.f32 %v255_v23, %v234_v62 }
 0x30c   :  { %v875_v26 = vadd.f32 %v263_v25, %v248_v7  ;;  %v265_v34 = vadd.f32 %v262_v32, %v247_v1 }
 0x30d   :  { %v261_v28 = vpop.xlane.xlu0 %260 }
 0x30e   :  { %v264_v29 = vadd.f32 %v261_v28, %v240_v63 }
 0x310   :  { %v877_v31 = vadd.f32 %v264_v29, %v249_v12 }
 0x370   :  { %v353_v33 = vpop.permute.xlu1 %352 }
 0x371   :  { %v361_v35 = vmax.f32 %v265_v34, %v353_v33 }
 0x374   :  { %v368_v36 = vpop.permute.xlu1 %367  ;;  %v355_v39 = vpop.permute.xlu0 %354 }
 0x375   :  { %v376_v37 = vmax.f32 %v361_v35, %v368_v36  ;;  %v362_v41 = vmax.f32 %v875_v26, %v355_v39 }
 0x377   :  { %v379_v38 = vsub.f32 %v265_v34, %v376_v37  ;;  %409 = vrot.lane.b32.xlu1 %v376_v37, %s725_s3  ;;  %391 = vrot.lane.b32.xlu0 %v376_v37, %s726_s14 }
 0x378   :  { %v357_v40 = vpop.permute.xlu1 %356 }
 0x379   :  { %v363_v42 = vmax.f32 %v877_v31, %v357_v40  ;;  %v382_v9 = vmul.f32 1.442695, %v379_v38 }
 0x37c   :  { %v372_v43 = vpop.permute.xlu1 %371  ;;  %v370_v44 = vpop.permute.xlu0 %369 }
 0x37d   :  { %v378_v45 = vmax.f32 %v363_v42, %v372_v43  ;;  %v377_v46 = vmax.f32 %v362_v41, %v370_v44  ;;  %v728_v41 = vmov 2  }
 0x37f   :  { %v381_v47 = vsub.f32 %v877_v31, %v378_v45  ;;  %v380_v48 = vsub.f32 %v875_v26, %v377_v46  ;;  %395 = vrot.lane.b32.xlu0 %v378_v45, %s726_s14  ;;  %393 = vrot.lane.b32.xlu1 %v377_v46, %s726_s14 }
 0x383   :  { %411 = vrot.lane.b32.xlu0 %v377_v46, %s725_s3  ;;  %413 = vrot.lane.b32.xlu1 %v378_v45, %s725_s3  ;;  %v729_v45 = vmov 0  }
 0x3e9   :  { %v410_v49 = vpop.permute.xlu1 %409  ;;  %v392_v50 = vpop.permute.xlu0 %391 }
 0x3ea   :  { %v418_v51 = vsub.f32 %v346_v10, %v410_v49  ;;  %v400_v52 = vsub.f32 %v307_v5, %v392_v50  ;;  %v386_v10 = vmul.f32 1.442695, %v381_v47 }
 0x3ec   :  { %v421_v53 = vmul.f32 1.442695, %v418_v51  ;;  %v403_v54 = vmul.f32 1.442695, %v400_v52  ;;  %v244_v51 = vld [vmem:[%s970_s2] sm:$0xff] }
 0x3ee   :  { %693 = vpow2.f32 %v421_v53 }
 0x3ef   :  { %695 = vpow2.f32 %v403_v54 }
 0x3f1   :  { %v394_v55 = vpop.permute.xlu1 %393  ;;  %v396_v56 = vpop.permute.xlu0 %395 }
 0x3f2   :  { %v401_v57 = vsub.f32 %v308_v11, %v394_v55  ;;  %v402_v58 = vsub.f32 %v309_v15, %v396_v56  ;;  %v384_v11 = vmul.f32 1.442695, %v380_v48 }
 0x3f4   :  { %v405_v59 = vmul.f32 1.442695, %v401_v57  ;;  %v407_v60 = vmul.f32 1.442695, %v402_v58  ;;  %v245_v58 = vld [vmem:[%s970_s2 + $0x8] sm:$0xff] }
 0x3f5   :  { %v414_v61 = vpop.permute.xlu1 %413  ;;  %v412_v62 = vpop.permute.xlu0 %411 }
 0x3f6   :  { %697 = vpow2.f32 %v405_v59  ;;  %v420_v63 = vsub.f32 %v348_v21, %v414_v61  ;;  %v419_v0 = vsub.f32 %v347_v20, %v412_v62 }
 0x3f7   :  { %699 = vpow2.f32 %v407_v60 }
 0x3f8   :  { %v425_v1 = vmul.f32 1.442695, %v420_v63  ;;  %v423_v2 = vmul.f32 1.442695, %v419_v0  ;;  %v246_v0 = vld [vmem:[%s970_s2 + $0x10] sm:$0xff] }
 0x3fa   :  { %701 = vpow2.f32 %v425_v1 }
 0x3fb   :  { %v694_v3 = vpop.eup %693  ;;  %703 = vpow2.f32 %v423_v2 }
 0x3fc   :  { %v696_v4 = vpop.eup %695  ;;  %445 = vrot.lane.b32.xlu1 %v694_v3, %s724_s13  ;;  %705 = vpow2.f32 %v382_v9 }
 0x3fd   :  { %430 = vrot.lane.b32.xlu0 %v696_v4, %s723_s10  ;;  %707 = vpow2.f32 %v386_v10 }
 0x3fe   :  { %709 = vpow2.f32 %v384_v11 }
 0x403   :  { %v698_v5 = vpop.eup %697 }
 0x404   :  { %v891_v6 = vpop.eup %699  ;;  %432 = vrot.lane.b32.xlu1 %v698_v5, %s723_s10 }
 0x405   :  { %434 = vrot.lane.b32.xlu0 %v891_v6, %s723_s10 }
 0x407   :  { %v896_v7 = vpop.eup %701 }
 0x408   :  { %v704_v8 = vpop.eup %703  ;;  %449 = vrot.lane.b32.xlu1 %v896_v7, %s724_s13 }
 0x409   :  { %447 = vrot.lane.b32.xlu0 %v704_v8, %s724_s13  ;;  %v706_v12 = vpop.eup %705 }
 0x40a   :  { %v708_v20 = vpop.eup %707 }
 0x40b   :  { %v710_v21 = vpop.eup %709 }
 0x46e   :  { %v446_v15 = vpop.permute.xlu1 %445 }
 0x46f   :  { %v431_v13 = vpop.permute.xlu0 %430 }
 0x470   :  { %v439_v14 = vadd.f32 %v706_v12, %v431_v13 }
 0x472   :  { %v454_v16 = vadd.f32 %v446_v15, %v439_v14 }
 0x474   :  { %711 = vrcp.f32 %v454_v16 }
 0x476   :  { %v433_v17 = vpop.permute.xlu1 %432 }
 0x477   :  { %v435_v19 = vpop.permute.xlu0 %434  ;;  %v440_v24 = vadd.f32 %v710_v21, %v433_v17 }
 0x478   :  { %v441_v23 = vadd.f32 %v708_v20, %v435_v19 }
 0x47a   :  { %v450_v25 = vpop.permute.xlu1 %449 }
 0x47b   :  { %v456_v26 = vadd.f32 %v450_v25, %v441_v23  ;;  %v448_v28 = vpop.permute.xlu0 %447 }
 0x47c   :  { %v455_v29 = vadd.f32 %v448_v28, %v440_v24 }
 0x47d   :  { %713 = vrcp.f32 %v456_v26 }
 0x47e   :  { %715 = vrcp.f32 %v455_v29 }
 0x481   :  { %v712_v31 = vpop.eup %711 }
 0x482   :  { %556 = vrot.lane.b32.xlu1 %v712_v31, %s725_s3  ;;  %493 = vrot.lane.b32.xlu0 %v712_v31, %s726_s14  ;;  %v460_v32 = vmul.f32 %v712_v31, %v706_v12 }
 0x48a   :  { %v714_v33 = vpop.eup %713 }
 0x48b   :  { %v716_v34 = vpop.eup %715  ;;  %497 = vrot.lane.b32.xlu0 %v714_v33, %s726_s14  ;;  %v462_v35 = vmul.f32 %v714_v33, %v708_v20 }
 0x48c   :  { %495 = vrot.lane.b32.xlu1 %v716_v34, %s726_s14  ;;  %v461_v36 = vmul.f32 %v716_v34, %v710_v21 }
 0x48f   :  { %558 = vrot.lane.b32.xlu0 %v716_v34, %s725_s3 }
 0x490   :  { %560 = vrot.lane.b32.xlu1 %v714_v33, %s725_s3 }
 0x4f4   :  { %v494_v37 = vpop.permute.xlu0 %493  ;;  %v557_v39 = vpop.permute.xlu1 %556 }
 0x4f5   :  { %v502_v38 = vmul.f32 %v696_v4, %v494_v37  ;;  %v565_v40 = vmul.f32 %v694_v3, %v557_v39 }
 0x4f7   :  { %507 = vperm.xlu0 %684, %v502_v38  }
 0x4fb   :  { %685 = vset.pattern.permute.xlu0 %v728_v41 }
 0x4fc   :  { %570 = vperm.xlu0 %685, %v565_v40  }
 0x4fd   :  { %v498_v42 = vpop.permute.xlu0 %497 }
 0x4fe   :  { %v496_v43 = vpop.permute.xlu1 %495  ;;  %v504_v48 = vmul.f32 %v891_v6, %v498_v42 }
 0x4ff   :  { %v503_v44 = vmul.f32 %v698_v5, %v496_v43 }
 0x500   :  { %690 = vset.pattern.permute.xlu0 %v729_v45 }
 0x501   :  { %512 = vperm.xlu1 %686, %v503_v44   ;;  %465 = vperm.xlu0 %690, %v460_v32   ;;  %v559_v46 = vpop.permute.xlu0 %558 }
 0x502   :  { %v566_v47 = vmul.f32 %v704_v8, %v559_v46  ;;  %v561_v49 = vpop.permute.xlu1 %560 }
 0x503   :  { %v567_v50 = vmul.f32 %v896_v7, %v561_v49 }
 0x505   :  { %687 = vset.pattern.permute.xlu1 %v728_v41  ;;  %692 = vset.pattern.permute.xlu0 %v728_v41 }
 0x506   :  { %575 = vperm.xlu1 %687, %v566_v47  }
 0x50a   :  { %688 = vset.pattern.permute.xlu1 %v727_v18 }
 0x50b   :  { %517 = vperm.xlu1 %688, %v504_v48  }
 0x50f   :  { %689 = vset.pattern.permute.xlu1 %v728_v41 }
 0x510   :  { %580 = vperm.xlu1 %689, %v567_v50  }
 0x514   :  { %691 = vset.pattern.permute.xlu1 %v729_v45 }
 0x515   :  { %470 = vperm.xlu1 %691, %v461_v36  }
 0x519   :  { %475 = vperm.xlu1 %691, %v462_v35  }
 0x572   :  { %v508_v52 = vpop.permute.xlu0 %507 }
 0x573   :  { %v520_v53 = vmul.f32 %v508_v52, %v244_v51  ;;  %v538_v54 = vmul.f32 %v508_v52, %v817_v22 }
 0x575   :  { %544 = vrot.lane.b32.xlu1 %v538_v54, %s721_s21  ;;  %526 = vrot.lane.b32.xlu0 %v520_v53, %s721_s21 }
 0x577   :  { %v571_v55 = vpop.permute.xlu0 %570 }
 0x578   :  { %v583_v56 = vmul.f32 %v571_v55, %v244_v51  ;;  %v601_v57 = vmul.f32 %v571_v55, %v817_v22 }
 0x57a   :  { %607 = vrot.lane.b32.xlu1 %v601_v57, %s722_s22  ;;  %589 = vrot.lane.b32.xlu0 %v583_v56, %s722_s22 }
 0x57c   :  { %v513_v59 = vpop.permute.xlu1 %512  ;;  %v466_v9 = vpop.permute.xlu0 %465 }
 0x57d   :  { %v521_v60 = vmul.f32 %v513_v59, %v245_v58  ;;  %v539_v61 = vmul.f32 %v513_v59, %v826_v27  ;;  %v478_v13 = vmul.f32 %v466_v9, %v244_v51  ;;  %v484_v14 = vmul.f32 %v466_v9, %v817_v22 }
 0x57f   :  { %528 = vrot.lane.b32.xlu1 %v521_v60, %s721_s21  ;;  %546 = vrot.lane.b32.xlu0 %v539_v61, %s721_s21 }
 0x581   :  { %v576_v62 = vpop.permute.xlu1 %575 }
 0x582   :  { %v584_v63 = vmul.f32 %v576_v62, %v245_v58  ;;  %v602_v7 = vmul.f32 %v576_v62, %v826_v27 }
 0x584   :  { %591 = vrot.lane.b32.xlu1 %v584_v63, %s722_s22 }
 0x586   :  { %v518_v1 = vpop.permute.xlu1 %517 }
 0x587   :  { %v522_v2 = vmul.f32 %v518_v1, %v246_v0  ;;  %v540_v3 = vmul.f32 %v518_v1, %v833_v30 }
 0x589   :  { %548 = vrot.lane.b32.xlu1 %v540_v3, %s721_s21  ;;  %530 = vrot.lane.b32.xlu0 %v522_v2, %s721_s21 }
 0x58b   :  { %v581_v4 = vpop.permute.xlu1 %580 }
 0x58c   :  { %v585_v5 = vmul.f32 %v581_v4, %v246_v0  ;;  %v603_v6 = vmul.f32 %v581_v4, %v833_v30 }
 0x58e   :  { %611 = vrot.lane.b32.xlu1 %v603_v6, %s722_s22  ;;  %593 = vrot.lane.b32.xlu0 %v585_v5, %s722_s22 }
 0x590   :  { %v471_v8 = vpop.permute.xlu1 %470 }
 0x591   :  { %v479_v23 = vmul.f32 %v471_v8, %v245_v58  ;;  %v485_v37 = vmul.f32 %v471_v8, %v826_v27 }
 0x592   :  { %609 = vrot.lane.b32.xlu0 %v602_v7, %s722_s22 }
 0x594   :  { %v476_v10 = vpop.permute.xlu1 %475 }
 0x595   :  { %v480_v31 = vmul.f32 %v476_v10, %v246_v0  ;;  %v486_v32 = vmul.f32 %v476_v10, %v833_v30 }
 0x5e7   :  { %v545_v11 = vpop.permute.xlu1 %544  ;;  %v527_v12 = vpop.permute.xlu0 %526 }
 0x5e8   :  { %v553_v15 = vadd.f32 %v545_v11, %v484_v14  ;;  %v535_v16 = vadd.f32 %v527_v12, %v478_v13 }
 0x5ec   :  { %v608_v17 = vpop.permute.xlu1 %607  ;;  %v590_v18 = vpop.permute.xlu0 %589 }
 0x5ed   :  { %v616_v19 = vadd.f32 %v608_v17, %v553_v15  ;;  %v598_v20 = vadd.f32 %v590_v18, %v535_v16 }
 0x5ef   :  { %622 = vst.msk [vmem:[%s971_s9] sm:$0xff] %vm42_vm0, %v616_v19  ;;  %619 = vst.msk [vmem:[%s972_s8] sm:$0xff] %vm42_vm0, %v598_v20 }
 0x5f1   :  { %v529_v21 = vpop.permute.xlu1 %528  ;;  %v547_v25 = vpop.permute.xlu0 %546 }
 0x5f2   :  { %v536_v24 = vadd.f32 %v529_v21, %v479_v23  ;;  %v554_v40 = vadd.f32 %v547_v25, %v485_v37 }
 0x5f6   :  { %v592_v22 = vpop.permute.xlu1 %591 }
 0x5f7   :  { %v599_v26 = vadd.f32 %v592_v22, %v536_v24 }
 0x5f9   :  { %620 = vst.msk [vmem:[%s972_s8 + $0x8] sm:$0xff] %vm42_vm0, %v599_v26 }
 0x5fb   :  { %v549_v28 = vpop.permute.xlu1 %548  ;;  %v531_v29 = vpop.permute.xlu0 %530 }
 0x5fc   :  { %v555_v33 = vadd.f32 %v549_v28, %v486_v32  ;;  %v537_v34 = vadd.f32 %v531_v29, %v480_v31 }
 0x600   :  { %v612_v35 = vpop.permute.xlu1 %611  ;;  %v594_v36 = vpop.permute.xlu0 %593 }
 0x601   :  { %v618_v38 = vadd.f32 %v612_v35, %v555_v33  ;;  %v600_v39 = vadd.f32 %v594_v36, %v537_v34 }
 0x603   :  { %624 = vst.msk [vmem:[%s971_s9 + $0x10] sm:$0xff] %vm42_vm0, %v618_v38  ;;  %621 = vst.msk [vmem:[%s972_s8 + $0x10] sm:$0xff] %vm42_vm0, %v600_v39 }
 0x604   :  { %v610_v30 = vpop.permute.xlu0 %609 }
 0x605   :  { %v617_v41 = vadd.f32 %v610_v30, %v554_v40 }
 0x607   :  { %623 = vst.msk [vmem:[%s971_s9 + $0x8] sm:$0xff] %vm42_vm0, %v617_v41 }

// kernel: _lambda_.16
= control target key start
LH: loop header
LB: loop body
LE: loop exit
PB: predicated region body
PF: predicated region fallthrough
CT: control target
= control target key end

     0   :  { %s504_s12 = smov 0   ;;  %s506_s13 = smov 0   ;;  %s543_s0 = inlined_call_operand.vmem [shape: f32[2,8,3], index: 0, kind: input, shape index: {}]   ;;  %s544_s1 = inlined_call_operand.vmem [shape: f32[2,3,20], index: 1, kind: input, shape index: {}]   ;;  %s545_s2 = inlined_call_operand.vmem [shape: f32[2,1,20], index: 2, kind: input, shape index: {}]   ;;  %s546_s3 = inlined_call_operand.vmem [shape: f32[2,8,20], index: 3, kind: output, shape index: {}]  }
   0x1   :  { %s508_s14 = smov 0  }
   0x2 LB: > { %s25_s15 = sadd.s32 1, %s476_s13  ;;  %p416_p0 = scmp.ge.s32.totalorder %s480_s14, 1  ;;  %s480_s14 = sphi %s508_s14, %s13_s14   ;;  %s476_s13 = sphi %s506_s13, %s548_s13   ;;  %s472_s12 = sphi %s504_s12, %s547_s12  }
   0x3   : > { %p27_p1 = scmp.ge.s32.totalorder %s25_s15, 2  ;;  %p172_p2 = scmp.lt.s32.totalorder %s480_s14, 3 }
   0x5   : > { %s550_s15 = smov (%p27_p1, %s25_s15), 0  ;;  %p173_p3 = pnand %p416_p0, %p172_p2 }
   0x6   : > { %p207_p4 = scmp.lt.s32.totalorder (!%p173_p3), %s472_s12, 1 }
   0x7   : > { %176 = sbr.rel (%p173_p3) target bundleno = 213 (0xd5), region = 32 }
   0xc   : > { %v482_v0 = vmov 0.0   ;;  %vm483_vm0 = vmmov 0   ;;  %s552_s12 = smov (!%p207_p4, %s472_s12), 1  ;;  %vm241_vm1 = vcmask 1042432   ;;  %vm237_vm2 = vcmask 23552  }
   0xd   : > { %427 = vmatprep.subr.mxu0 %v482_v0  ;;  %429 = vmatprep.mubr.msk.f32.mxu0 %vm483_vm0, %v482_v0  ;;  %s418_s16 = sshll.u32 %s552_s12, 2  ;;  %s417_s17 = sshll.u32 %s552_s12, 3  ;;  %vm315_vm3 = vcmask 162816  }
   0xe   : > { %s217_s20 = scalar_lea.vmem %s544_s1, %s418_s16  ;;  %s213_s23 = scalar_lea.vmem %s543_s0, %s417_s17 }
   0xf   : > { %v229_v1 = vld [vmem:[%s217_s20] sm:$0x7]  ;;  %s220_s26 = scalar_lea.vmem %s545_s2, %s552_s12  ;;  %s227_s29 = scalar_lea.vmem %s546_s3, %s417_s17 }
  0x10   : > { %v228_v2 = vld [vmem:[%s213_s23] sm:$0xff]  ;;  %428 = vmatpush3.msk.msra.mxu0 %vm241_vm1, %v229_v1 }
  0x11   : > { %430 = vmatmul.mubr.msk.f32.vlgmr.msra.gmra.mxu0 %vm237_vm2, %v228_v2  ;;  %v420_v3 = vld [vmem:[%s220_s26] ss:$0 sm:$0xff] }
  0xd1   : > { %v311_v4 = vpop.f32.mrf.mxu0 }
  0xd2   : > { %v312_v5 = vadd.f32 %v420_v3, %v311_v4 }
  0xd3   : > { %v431_v6 = vpop.f32.mrf.mxu0 }
  0xd4   : > { %316 = vst.msk [vmem:[%s227_s29] sm:$0xff] %vm315_vm3, %v312_v5 }
  0xd5 PF: > { %s13_s14 = sadd.s32 1, %s480_s14   ;;  %s547_s12 = smov %s476_s13 }
  0xd6   : > { %p10_p5 = scmp.ge.s32.totalorder %s13_s14, 4   ;;  %s548_s13 = smov %s550_s15 }
  0xd8   :  { %12 = sbr.rel (!%p10_p5) target bundleno = 2 (0x2), region = 68 }

// kernel: _lambda_.18
= control target key start
LH: loop header
LB: loop body
LE: loop exit
PB: predicated region body
PF: predicated region fallthrough
CT: control target
= control target key end

     0   :  { %s1185_s18 = smov 0   ;;  %s1187_s19 = smov 0   ;;  %s1353_s0 = inlined_call_operand.vmem [shape: f32[2,64,16], index: 0, kind: input, shape index: {}]   ;;  %s1354_s1 = inlined_call_operand.vmem [shape: f32[2,64,16], index: 1, kind: input, shape index: {}]   ;;  %s1355_s2 = inlined_call_operand.vmem [shape: f32[2,64,16], index: 2, kind: input, shape index: {}]   ;;  %s1356_s3 = inlined_call_operand.vmem [shape: f32[2,48,16], index: 3, kind: input, shape index: {}]   ;;  %s1357_s4 = inlined_call_operand.vmem [shape: f32[2,1,16], index: 4, kind: input, shape index: {}]   ;;  %s1358_s5 = inlined_call_operand.vmem [shape: f32[2,64,16], index: 5, kind: output, shape index: {}]  }
   0x1   :  { %s1189_s20 = smov 0  }
   0x2 LB: > { %s27_s21 = sadd.s32 1, %s1149_s19  ;;  %p983_p0 = scmp.ge.s32.totalorder %s1153_s20, 1  ;;  %s1153_s20 = sphi %s1189_s20, %s15_s20   ;;  %s1149_s19 = sphi %s1187_s19, %s1360_s19   ;;  %s1145_s18 = sphi %s1185_s18, %s1359_s18  }
   0x3   : > { %p29_p1 = scmp.ge.s32.totalorder %s27_s21, 2  ;;  %p260_p2 = scmp.lt.s32.totalorder %s1153_s20, 3 }
   0x5   : > { %s1362_s21 = smov (%p29_p1, %s27_s21), 0  ;;  %p261_p3 = pnand %p983_p0, %p260_p2 }
   0x6   : > { %p323_p4 = scmp.lt.s32.totalorder (!%p261_p3), %s1145_s18, 1 }
   0x7   : > { %264 = sbr.rel (%p261_p3) target bundleno = 247 (0xf7), region = 40 }
   0xc   : > { %s1364_s18 = smov (!%p323_p4, %s1145_s18), 1  ;;  %vm400_vm0 = vcmask 130048  }
   0xd   : > { %s1106_s22 = smul.u32 48, %s1364_s18  ;;  %s1207_s23 = sshll.u32 %s1364_s18, 6 }
   0xe   : > { %s1213_s26 = scalar_lea.vmem %s1354_s1, %s1207_s23  ;;  %s1252_s7 = scalar_lea.vmem %s1353_s0, %s1207_s23 }
   0xf   : > { %s1218_s29 = scalar_lea.vmem %s1356_s3, %s1106_s22  ;;  %v1221_v0 = vld [vmem:[%s1213_s26 + $0x20] sm:$0xff]  ;;  %v1233_v4 = vld [vmem:[%s1213_s26 + $0x28] sm:$0xff]  ;;  %v1241_v8 = vld [vmem:[%s1213_s26 + $0x30] sm:$0xff]  ;;  %s1264_s10 = scalar_lea.vmem %s1355_s2, %s1207_s23 }
  0x10   : > { %v1224_v1 = vld [vmem:[%s1213_s26] sm:$0xff]  ;;  %v397_v2 = vld [vmem:[%s1218_s29 + $0x18] sm:$0xff]  ;;  %v396_v3 = vld [vmem:[%s1218_s29 + $0x10] sm:$0xff]  ;;  %1064 = vmatprep.mubr.msk.f32.mxu1 %vm400_vm0, %v1221_v0  ;;  %s359_s13 = scalar_lea.vmem %s1357_s4, %s1364_s18  ;;  %s1318_s16 = scalar_lea.vmem %s1358_s5, %s1207_s23 }
  0x11   : > { %1058 = vmatprep.mubr.msk.f32.mxu0 %vm400_vm0, %v1224_v1  ;;  %1102 = vmatprep.subr.mxu1 %v397_v2  ;;  %v395_v5 = vld [vmem:[%s1218_s29 + $0x8] sm:$0xff]  ;;  %v1246_v9 = vld [vmem:[%s1213_s26 + $0x10] sm:$0xff]  ;;  %v1257_v10 = vld [vmem:[%s1213_s26 + $0x38] sm:$0xff] }
  0x12   : > { %1054 = vmatprep.subr.mxu0 %v397_v2  ;;  %1104 = vmatpush3.msra.mxu1 %v397_v2  ;;  %v1237_v6 = vld [vmem:[%s1213_s26 + $0x8] sm:$0xff]  ;;  %v394_v11 = vld [vmem:[%s1218_s29] sm:$0xff]  ;;  %v1269_v12 = vld [vmem:[%s1213_s26 + $0x18] sm:$0xff] }
  0x13   : > { %1055 = vmatpush3.msra.mxu0 %v397_v2  ;;  %1103 = vmatprep.subr.mxu1 %v396_v3  ;;  %v399_v7 = vld [vmem:[%s1218_s29 + $0x28] sm:$0xff]  ;;  %v398_v13 = vld [vmem:[%s1218_s29 + $0x20] sm:$0xff]  ;;  %v372_v18 = vld [vmem:[%s1252_s7 + $0x10] sm:$0xff] }
  0x14   : > { %1056 = vmatprep.subr.mxu0 %v396_v3  ;;  %1105 = vmatpush3.msra.mxu1 %v396_v3  ;;  %v370_v14 = vld [vmem:[%s1252_s7] sm:$0xff]  ;;  %v371_v16 = vld [vmem:[%s1252_s7 + $0x8] sm:$0xff]  ;;  %v388_v19 = vld [vmem:[%s1264_s10 + $0x10] sm:$0xff] }
  0x15   : > { %1057 = vmatpush3.msra.mxu0 %v396_v3  ;;  %1065 = vmatmul.mubr.msk.f32.vlgmr.msra.gmra.mxu1 %vm400_vm0, %v1233_v4  ;;  %v386_v15 = vld [vmem:[%s1264_s10] sm:$0xff]  ;;  %v387_v17 = vld [vmem:[%s1264_s10 + $0x8] sm:$0xff]  ;;  %v373_v20 = vld [vmem:[%s1252_s7 + $0x18] sm:$0xff] }
  0x16   : > { %1070 = vmatprep.subr.mxu1 %v395_v5  ;;  %1059 = vmatmul.mubr.msk.f32.vlgmr.msra.gmra.mxu0 %vm400_vm0, %v1237_v6  ;;  %v389_v21 = vld [vmem:[%s1264_s10 + $0x18] sm:$0xff]  ;;  %v374_v22 = vld [vmem:[%s1252_s7 + $0x20] sm:$0xff]  ;;  %v375_v24 = vld [vmem:[%s1252_s7 + $0x28] sm:$0xff] }
  0x17   : > { %1071 = vmatpush3.msra.mxu1 %v395_v5  ;;  %1086 = vmatprep.subr.mxu0 %v399_v7  ;;  %v390_v23 = vld [vmem:[%s1264_s10 + $0x20] sm:$0xff]  ;;  %v391_v25 = vld [vmem:[%s1264_s10 + $0x28] sm:$0xff]  ;;  %v376_v26 = vld [vmem:[%s1252_s7 + $0x30] sm:$0xff] }
  0x18   : > { %1067 = vmatprep.mubr.msk.f32.mxu1 %vm400_vm0, %v1241_v8  ;;  %1087 = vmatpush3.msra.mxu0 %v399_v7  ;;  %v392_v27 = vld [vmem:[%s1264_s10 + $0x30] sm:$0xff]  ;;  %v377_v28 = vld [vmem:[%s1252_s7 + $0x38] sm:$0xff]  ;;  %v1017_v41 = vld [vmem:[%s359_s13] ss:$0 sm:$0xff] }
  0x19   : > { %1061 = vmatprep.mubr.msk.f32.mxu0 %vm400_vm0, %v1246_v9  ;;  %1068 = vmatmul.mubr.msk.f32.gmra.mxu1 %vm400_vm0, %v1257_v10  ;;  %v393_v29 = vld [vmem:[%s1264_s10 + $0x38] sm:$0xff] }
  0x1a   : > { %1072 = vmatprep.subr.mxu1 %v394_v11  ;;  %1062 = vmatmul.mubr.msk.f32.gmra.mxu0 %vm400_vm0, %v1269_v12 }
  0x1b   : > { %1073 = vmatpush3.msra.mxu1 %v394_v11  ;;  %1088 = vmatprep.subr.mxu0 %v398_v13 }
  0x1c   : > { %1074 = vmatprep.mubr.msk.f32.mxu1 %vm400_vm0, %v370_v14  ;;  %1089 = vmatpush3.msra.mxu0 %v398_v13 }
  0x1d   : > { %1090 = vmatprep.mubr.msk.f32.mxu0 %vm400_vm0, %v386_v15  ;;  %1075 = vmatmul.mubr.msk.f32.vlgmr.msra.gmra.mxu1 %vm400_vm0, %v371_v16 }
  0x1e   : > { %1091 = vmatmul.mubr.msk.f32.vlgmr.msra.gmra.mxu0 %vm400_vm0, %v387_v17  ;;  %1077 = vmatprep.mubr.msk.f32.mxu1 %vm400_vm0, %v372_v18 }
  0x1f   : > { %1093 = vmatprep.mubr.msk.f32.mxu0 %vm400_vm0, %v388_v19 }
  0x21   : > { %1078 = vmatmul.mubr.msk.f32.gmra.mxu1 %vm400_vm0, %v373_v20 }
  0x22   : > { %1094 = vmatmul.mubr.msk.f32.gmra.mxu0 %vm400_vm0, %v389_v21  ;;  %1080 = vmatprep.mubr.msk.f32.mxu1 %vm400_vm0, %v374_v22 }
  0x23   : > { %1096 = vmatprep.mubr.msk.f32.mxu0 %vm400_vm0, %v390_v23 }
  0x25   : > { %1081 = vmatmul.mubr.msk.f32.gmra.mxu1 %vm400_vm0, %v375_v24 }
  0x26   : > { %1097 = vmatmul.mubr.msk.f32.gmra.mxu0 %vm400_vm0, %v391_v25  ;;  %1083 = vmatprep.mubr.msk.f32.mxu1 %vm400_vm0, %v376_v26 }
  0x27   : > { %1099 = vmatprep.mubr.msk.f32.mxu0 %vm400_vm0, %v392_v27 }
  0x29   : > { %1084 = vmatmul.mubr.msk.f32.gmra.mxu1 %vm400_vm0, %v377_v28 }
  0x2a   : > { %1100 = vmatmul.mubr.msk.f32.gmra.mxu0 %vm400_vm0, %v393_v29 }
  0xd5   : > { %v1066_v30 = vpop.f32.mrf.mxu1 }
  0xd6   : > { %v1060_v31 = vpop.f32.mrf.mxu0 }
  0xd7   : > { %v511_v32 = vpop.f32.mrf.mxu1 }
  0xd8   : > { %v491_v33 = vpop.f32.mrf.mxu0 }
  0xd9   : > { %v1069_v34 = vpop.f32.mrf.mxu1 }
  0xda   : > { %v1063_v35 = vpop.f32.mrf.mxu0 }
  0xdb   : > { %v521_v36 = vpop.f32.mrf.mxu1 }
  0xdc   : > { %v501_v37 = vpop.f32.mrf.mxu0 }
  0xdd   : > { %v1076_v38 = vpop.f32.mrf.mxu1 }
  0xde   : > { %v626_v39 = vadd.f32 %v1076_v38, %v1060_v31  ;;  %v1092_v40 = vpop.f32.mrf.mxu0 }
  0xdf   : > { %v620_v42 = vpop.f32.mrf.mxu1 }
  0xe0   : > { %v789_v43 = vadd.f32 %v1092_v40, %v626_v39  ;;  %v621_v44 = vadd.f32 %v620_v42, %v491_v33  ;;  %v749_v45 = vpop.f32.mrf.mxu0 }
  0xe1   : > { %v1079_v46 = vpop.f32.mrf.mxu1 }
  0xe2   : > { %v804_v47 = vadd.f32 %v1017_v41, %v789_v43  ;;  %v788_v48 = vadd.f32 %v749_v45, %v621_v44  ;;  %v636_v49 = vadd.f32 %v1079_v46, %v1063_v35  ;;  %v1095_v50 = vpop.f32.mrf.mxu0 }
  0xe3   : > { %v630_v51 = vpop.f32.mrf.mxu1 }
  0xe4   : > { %v812_v52 = vmax.f32 %v804_v47, 0.0  ;;  %v803_v53 = vadd.f32 %v1017_v41, %v788_v48  ;;  %v791_v54 = vadd.f32 %v1095_v50, %v636_v49  ;;  %v631_v55 = vadd.f32 %v630_v51, %v501_v37  ;;  %v759_v56 = vpop.f32.mrf.mxu0 }
  0xe5   : > { %v1082_v57 = vpop.f32.mrf.mxu1 }
  0xe6   : > { %v820_v58 = vadd.f32 %v812_v52, %v1237_v6  ;;  %v811_v59 = vmax.f32 %v803_v53, 0.0  ;;  %v806_v60 = vadd.f32 %v1017_v41, %v791_v54  ;;  %v790_v61 = vadd.f32 %v759_v56, %v631_v55  ;;  %v1098_v62 = vpop.f32.mrf.mxu0 }
  0xe7   : > { %v646_v63 = vadd.f32 %v1082_v57, %v1066_v30  ;;  %v640_v2 = vpop.f32.mrf.mxu1 }
  0xe8   : > { %828 = vst.msk [vmem:[%s1318_s16 + $0x8] sm:$0xff] %vm400_vm0, %v820_v58  ;;  %v819_v3 = vadd.f32 %v811_v59, %v1224_v1  ;;  %v814_v5 = vmax.f32 %v806_v60, 0.0  ;;  %v805_v7 = vadd.f32 %v1017_v41, %v790_v61  ;;  %v641_v11 = vadd.f32 %v640_v2, %v511_v32  ;;  %v769_v13 = vpop.f32.mrf.mxu0 }
  0xe9   : > { %v793_v14 = vadd.f32 %v1098_v62, %v646_v63  ;;  %v1085_v15 = vpop.f32.mrf.mxu1 }
  0xea   : > { %827 = vst.msk [vmem:[%s1318_s16] sm:$0xff] %vm400_vm0, %v819_v3  ;;  %v822_v6 = vadd.f32 %v814_v5, %v1269_v12  ;;  %v813_v16 = vmax.f32 %v805_v7, 0.0  ;;  %v792_v17 = vadd.f32 %v769_v13, %v641_v11  ;;  %v656_v18 = vadd.f32 %v1085_v15, %v1069_v34  ;;  %v1101_v19 = vpop.f32.mrf.mxu0 }
  0xeb   : > { %v808_v20 = vadd.f32 %v1017_v41, %v793_v14  ;;  %v650_v21 = vpop.f32.mrf.mxu1 }
  0xec   : > { %830 = vst.msk [vmem:[%s1318_s16 + $0x18] sm:$0xff] %vm400_vm0, %v822_v6  ;;  %v821_v1 = vadd.f32 %v813_v16, %v1246_v9  ;;  %v807_v22 = vadd.f32 %v1017_v41, %v792_v17  ;;  %v795_v23 = vadd.f32 %v1101_v19, %v656_v18  ;;  %v651_v24 = vadd.f32 %v650_v21, %v521_v36  ;;  %v779_v26 = vpop.f32.mrf.mxu0 }
  0xed   : > { %v816_v25 = vmax.f32 %v808_v20, 0.0 }
  0xee   : > { %829 = vst.msk [vmem:[%s1318_s16 + $0x10] sm:$0xff] %vm400_vm0, %v821_v1  ;;  %v815_v12 = vmax.f32 %v807_v22, 0.0  ;;  %v810_v27 = vadd.f32 %v1017_v41, %v795_v23  ;;  %v794_v28 = vadd.f32 %v779_v26, %v651_v24 }
  0xef   : > { %v824_v29 = vadd.f32 %v816_v25, %v1233_v4 }
  0xf0   : > { %v823_v30 = vadd.f32 %v815_v12, %v1221_v0  ;;  %v818_v31 = vmax.f32 %v810_v27, 0.0  ;;  %v809_v32 = vadd.f32 %v1017_v41, %v794_v28 }
  0xf1   : > { %832 = vst.msk [vmem:[%s1318_s16 + $0x28] sm:$0xff] %vm400_vm0, %v824_v29 }
  0xf2   : > { %831 = vst.msk [vmem:[%s1318_s16 + $0x20] sm:$0xff] %vm400_vm0, %v823_v30  ;;  %v826_v9 = vadd.f32 %v818_v31, %v1257_v10  ;;  %v817_v33 = vmax.f32 %v809_v32, 0.0 }
  0xf4   : > { %834 = vst.msk [vmem:[%s1318_s16 + $0x38] sm:$0xff] %vm400_vm0, %v826_v9  ;;  %v825_v34 = vadd.f32 %v817_v33, %v1241_v8 }
  0xf6   : > { %833 = vst.msk [vmem:[%s1318_s16 + $0x30] sm:$0xff] %vm400_vm0, %v825_v34 }
  0xf7 PF: > { %s15_s20 = sadd.s32 1, %s1153_s20   ;;  %s1359_s18 = smov %s1149_s19 }
  0xf8   : > { %p12_p5 = scmp.ge.s32.totalorder %s15_s20, 4   ;;  %s1360_s19 = smov %s1362_s21 }
  0xfa   :  { %14 = sbr.rel (!%p12_p5) target bundleno = 2 (0x2), region = 82 }

// kernel: _lambda_.17
= control target key start
LH: loop header
LB: loop body
LE: loop exit
PB: predicated region body
PF: predicated region fallthrough
CT: control target
= control target key end

     0   :  { %s529_s12 = smov 0   ;;  %s531_s13 = smov 0   ;;  %s580_s0 = inlined_call_operand.vmem [shape: f32[2,8,10], index: 0, kind: input, shape index: {}]   ;;  %s581_s1 = inlined_call_operand.vmem [shape: f32[2,10,4], index: 1, kind: input, shape index: {}]   ;;  %s582_s2 = inlined_call_operand.vmem [shape: f32[2,1,4], index: 2, kind: input, shape index: {}]   ;;  %s583_s3 = inlined_call_operand.vmem [shape: f32[2,8,4], index: 3, kind: output, shape index: {}]  }
   0x1   :  { %s533_s14 = smov 0  }
   0x2 LB: > { %s25_s15 = sadd.s32 1, %s501_s13  ;;  %p432_p0 = scmp.ge.s32.totalorder %s505_s14, 1  ;;  %s505_s14 = sphi %s533_s14, %s13_s14   ;;  %s501_s13 = sphi %s531_s13, %s585_s13   ;;  %s497_s12 = sphi %s529_s12, %s584_s12  }
   0x3   : > { %p27_p1 = scmp.ge.s32.totalorder %s25_s15, 2  ;;  %p173_p2 = scmp.lt.s32.totalorder %s505_s14, 3 }
   0x5   : > { %s587_s15 = smov (%p27_p1, %s25_s15), 0  ;;  %p174_p3 = pnand %p432_p0, %p173_p2 }
   0x6   : > { %p209_p4 = scmp.lt.s32.totalorder (!%p174_p3), %s497_s12, 1 }
   0x7   : > { %177 = sbr.rel (%p174_p3) target bundleno = 529 (0x211), region = 32 }
   0xc   : > { %v507_v0 = vmov 0.0   ;;  %vm508_vm0 = vmmov 0   ;;  %s589_s12 = smov (!%p209_p4, %s497_s12), 1  ;;  %vm245_vm1 = vcmask 1041408   ;;  %vm241_vm2 = vcmask 80896  }
   0xd   : > { %446 = vmatprep.subr.mxu0 %v507_v0  ;;  %450 = vmatprep.mubr.msk.f32.mxu0 %vm508_vm0, %v507_v0  ;;  %s442_s16 = sshll.u32 %s589_s12, 4  ;;  %s433_s17 = sshll.u32 %s589_s12, 3  ;;  %vm320_vm3 = vcmask 31744  }
   0xe   : > { %s220_s20 = scalar_lea.vmem %s581_s1, %s442_s16  ;;  %s215_s23 = scalar_lea.vmem %s580_s0, %s433_s17 }
   0xf   : > { %v233_v1 = vld [vmem:[%s220_s20 + $0x8] sm:$0x3]  ;;  %v232_v2 = vld [vmem:[%s220_s20] sm:$0xff]  ;;  %s223_s26 = scalar_lea.vmem %s582_s2, %s589_s12  ;;  %s230_s29 = scalar_lea.vmem %s583_s3, %s433_s17 }
  0x10   : > { %447 = vmatpush3.msk.msra.mxu0 %vm245_vm1, %v233_v1  ;;  %v231_v3 = vld [vmem:[%s215_s23] sm:$0xff] }
  0x11   : > { %448 = vmatprep.subr.mxu0 %v507_v0  ;;  %v437_v4 = vld [vmem:[%s223_s26] ss:$0 sm:$0xff] }
  0x12   : > { %449 = vmatpush3.msra.mxu0 %v232_v2 }
  0x13   : > { %451 = vmatmul.mubr.msk.f32.vlgmr.msra.gmra.mxu0 %vm241_vm2, %v231_v3 }
  0xd3   : > { %v315_v5 = vpop.f32.mrf.mxu0 }
  0xd4   : > { %v316_v6 = vadd.f32 %v437_v4, %v315_v5 }
  0xd5   : > { %v452_v7 = vpop.f32.mrf.mxu0 }
  0xd6   : > { %v319_v8 = vmax.f32 %v316_v6, 0.0 }
  0xd8   : > { %v321_v9 = vsel %vm320_vm3, %v319_v8, -inf }
  0xd9   : > { %322 = vmax.xlane.f32.xlu0 %v321_v9 }
 0x162   : > { %v323_v10 = vpop.xlane.xlu0 %322 }
 0x163   : > { %v324_v11 = vsub.f32 %v319_v8, %v323_v10 }
 0x165   : > { %v325_v12 = vmul.f32 1.442695, %v324_v11 }
 0x167   : > { %479 = vpow2.f32 %v325_v12 }
 0x174   : > { %v480_v13 = vpop.eup %479 }
 0x175   : > { %v327_v14 = vsel %vm320_vm3, %v480_v13, 0.0 }
 0x176   : > { %328 = vadd.xlane.f32.xlu0 %v327_v14 }
 0x1ff   : > { %v329_v15 = vpop.xlane.xlu0 %328 }
 0x200   : > { %481 = vrcp.f32 %v329_v15 }
 0x20d   : > { %v482_v16 = vpop.eup %481 }
 0x20e   : > { %v331_v17 = vmul.f32 %v482_v16, %v480_v13 }
 0x210   : > { %332 = vst.msk [vmem:[%s230_s29] sm:$0xff] %vm320_vm3, %v331_v17 }
 0x211 PF: > { %s13_s14 = sadd.s32 1, %s505_s14   ;;  %s584_s12 = smov %s501_s13 }
 0x212   : > { %p10_p5 = scmp.ge.s32.totalorder %s13_s14, 4   ;;  %s585_s13 = smov %s587_s15 }
 0x214   :  { %12 = sbr.rel (!%p10_p5) target bundleno = 2 (0x2), region = 68 }

// kernel: _lambda_.21
= control target key start
LH: loop header
LB: loop body
LE: loop exit
PB: predicated region body
PF: predicated region fallthrough
CT: control target
= control target key end

     0   :  { %s1381_s12 = smov 0   ;;  %s1383_s13 = smov 0   ;;  %s1755_s0 = inlined_call_operand.vmem [shape: f32[2,512,4], index: 0, kind: input, shape index: {}]   ;;  %s1756_s1 = inlined_call_operand.vmem [shape: f32[2,4,12], index: 1, kind: input, shape index: {}]   ;;  %s1757_s2 = inlined_call_operand.vmem [shape: f32[2,1,12], index: 2, kind: input, shape index: {}]   ;;  %s1758_s3 = inlined_call_operand.vmem [shape: f32[2,512,12], index: 3, kind: output, shape index: {}]  }
   0x1   :  { %s1385_s14 = smov 0  }
   0x2 LB: > { %s25_s15 = sadd.s32 1, %s1355_s13  ;;  %p1072_p0 = scmp.ge.s32.totalorder %s1359_s14, 1  ;;  %s1359_s14 = sphi %s1385_s14, %s13_s14   ;;  %s1355_s13 = sphi %s1383_s13, %s1760_s13   ;;  %s1351_s12 = sphi %s1381_s12, %s1759_s12  }
   0x3   : > { %p27_p1 = scmp.ge.s32.totalorder %s25_s15, 2  ;;  %p175_p2 = scmp.lt.s32.totalorder %s1359_s14, 3 }
   0x5   : > { %s1762_s15 = smov (%p27_p1, %s25_s15), 0  ;;  %p176_p3 = pnand %p1072_p0, %p175_p2 }
   0x6   : > { %p215_p4 = scmp.lt.s32.totalorder (!%p176_p3), %s1351_s12, 1 }
   0x7   : > { %179 = sbr.rel (%p176_p3) target bundleno = 277 (0x115), region = 32 }
   0xc   : > { %s1764_s12 = smov (!%p215_p4, %s1351_s12), 1  ;;  %vm506_vm0 = vcmask 1043456   ;;  %vm313_vm1 = vcmask 31744   ;;  %vm895_vm2 = vcmask 97280  }
   0xd   : > { %s1146_s16 = sshll.u32 %s1764_s12, 9  ;;  %s1075_s17 = sshll.u32 %s1764_s12, 2 }
   0xe   : > { %s1408_s20 = scalar_lea.vmem %s1755_s0, %s1146_s16  ;;  %s227_s23 = scalar_lea.vmem %s1756_s1, %s1075_s17 }
   0xf   : > { %v305_v0 = vld [vmem:[%s227_s23] sm:$0xf]  ;;  %v242_v3 = vld [vmem:[%s1408_s20 + $0x8] sm:$0xff]  ;;  %v243_v5 = vld [vmem:[%s1408_s20 + $0x10] sm:$0xff]  ;;  %s230_s26 = scalar_lea.vmem %s1757_s2, %s1764_s12  ;;  %s1552_s29 = scalar_lea.vmem %s1758_s3, %s1146_s16 }
  0x10   : > { %v241_v1 = vld [vmem:[%s1408_s20] sm:$0xff]  ;;  %1213 = vmatprep.subr.msk.mxu0 %vm506_vm0, %v305_v0  ;;  %1311 = vmatprep.subr.msk.mxu1 %vm506_vm0, %v305_v0  ;;  %v274_v4 = vld [vmem:[%s1408_s20 + $0x108] sm:$0xff]  ;;  %v275_v6 = vld [vmem:[%s1408_s20 + $0x110] sm:$0xff] }
  0x11   : > { %v273_v2 = vld [vmem:[%s1408_s20 + $0x100] sm:$0xff]  ;;  %1214 = vmatpush3.msk.msra.mxu0 %vm506_vm0, %v305_v0  ;;  %1312 = vmatpush3.msk.msra.mxu1 %vm506_vm0, %v305_v0  ;;  %v244_v7 = vld [vmem:[%s1408_s20 + $0x18] sm:$0xff]  ;;  %v246_v11 = vld [vmem:[%s1408_s20 + $0x28] sm:$0xff] }
  0x12   : > { %1215 = vmatprep.mubr.msk.f32.mxu0 %vm313_vm1, %v241_v1  ;;  %1263 = vmatprep.mubr.msk.f32.mxu1 %vm313_vm1, %v273_v2  ;;  %v276_v8 = vld [vmem:[%s1408_s20 + $0x118] sm:$0xff]  ;;  %v245_v9 = vld [vmem:[%s1408_s20 + $0x20] sm:$0xff]  ;;  %v278_v12 = vld [vmem:[%s1408_s20 + $0x128] sm:$0xff] }
  0x13   : > { %1216 = vmatmul.mubr.msk.f32.vlgmr.msra.gmra.mxu0 %vm313_vm1, %v242_v3  ;;  %1264 = vmatmul.mubr.msk.f32.vlgmr.msra.gmra.mxu1 %vm313_vm1, %v274_v4  ;;  %v277_v10 = vld [vmem:[%s1408_s20 + $0x120] sm:$0xff]  ;;  %v247_v13 = vld [vmem:[%s1408_s20 + $0x30] sm:$0xff]  ;;  %v248_v15 = vld [vmem:[%s1408_s20 + $0x38] sm:$0xff] }
  0x14   : > { %1218 = vmatprep.mubr.msk.f32.mxu0 %vm313_vm1, %v243_v5  ;;  %1266 = vmatprep.mubr.msk.f32.mxu1 %vm313_vm1, %v275_v6  ;;  %v279_v14 = vld [vmem:[%s1408_s20 + $0x130] sm:$0xff]  ;;  %v280_v16 = vld [vmem:[%s1408_s20 + $0x138] sm:$0xff]  ;;  %v249_v17 = vld [vmem:[%s1408_s20 + $0x40] sm:$0xff] }
  0x15   : > { %v281_v18 = vld [vmem:[%s1408_s20 + $0x140] sm:$0xff]  ;;  %v250_v19 = vld [vmem:[%s1408_s20 + $0x48] sm:$0xff]  ;;  %v251_v21 = vld [vmem:[%s1408_s20 + $0x50] sm:$0xff] }
  0x16   : > { %v282_v20 = vld [vmem:[%s1408_s20 + $0x148] sm:$0xff]  ;;  %v283_v22 = vld [vmem:[%s1408_s20 + $0x150] sm:$0xff]  ;;  %v252_v23 = vld [vmem:[%s1408_s20 + $0x58] sm:$0xff] }
  0x17   : > { %1219 = vmatmul.mubr.msk.f32.gmra.mxu0 %vm313_vm1, %v244_v7  ;;  %1267 = vmatmul.mubr.msk.f32.gmra.mxu1 %vm313_vm1, %v276_v8  ;;  %v284_v24 = vld [vmem:[%s1408_s20 + $0x158] sm:$0xff]  ;;  %v253_v25 = vld [vmem:[%s1408_s20 + $0x60] sm:$0xff]  ;;  %v254_v27 = vld [vmem:[%s1408_s20 + $0x68] sm:$0xff] }
  0x18   : > { %1221 = vmatprep.mubr.msk.f32.mxu0 %vm313_vm1, %v245_v9  ;;  %1269 = vmatprep.mubr.msk.f32.mxu1 %vm313_vm1, %v277_v10  ;;  %v285_v26 = vld [vmem:[%s1408_s20 + $0x160] sm:$0xff]  ;;  %v286_v28 = vld [vmem:[%s1408_s20 + $0x168] sm:$0xff]  ;;  %v255_v29 = vld [vmem:[%s1408_s20 + $0x70] sm:$0xff] }
  0x19   : > { %v287_v30 = vld [vmem:[%s1408_s20 + $0x170] sm:$0xff]  ;;  %v256_v31 = vld [vmem:[%s1408_s20 + $0x78] sm:$0xff]  ;;  %v257_v33 = vld [vmem:[%s1408_s20 + $0x80] sm:$0xff] }
  0x1a   : > { %v288_v32 = vld [vmem:[%s1408_s20 + $0x178] sm:$0xff]  ;;  %v289_v34 = vld [vmem:[%s1408_s20 + $0x180] sm:$0xff]  ;;  %v258_v35 = vld [vmem:[%s1408_s20 + $0x88] sm:$0xff] }
  0x1b   : > { %1222 = vmatmul.mubr.msk.f32.gmra.mxu0 %vm313_vm1, %v246_v11  ;;  %1270 = vmatmul.mubr.msk.f32.gmra.mxu1 %vm313_vm1, %v278_v12  ;;  %v290_v36 = vld [vmem:[%s1408_s20 + $0x188] sm:$0xff]  ;;  %v259_v37 = vld [vmem:[%s1408_s20 + $0x90] sm:$0xff]  ;;  %v260_v39 = vld [vmem:[%s1408_s20 + $0x98] sm:$0xff] }
  0x1c   : > { %1224 = vmatprep.mubr.msk.f32.mxu0 %vm313_vm1, %v247_v13  ;;  %1272 = vmatprep.mubr.msk.f32.mxu1 %vm313_vm1, %v279_v14  ;;  %v291_v38 = vld [vmem:[%s1408_s20 + $0x190] sm:$0xff]  ;;  %v292_v40 = vld [vmem:[%s1408_s20 + $0x198] sm:$0xff]  ;;  %v261_v41 = vld [vmem:[%s1408_s20 + $0xa0] sm:$0xff] }
  0x1d   : > { %v293_v42 = vld [vmem:[%s1408_s20 + $0x1a0] sm:$0xff]  ;;  %v262_v43 = vld [vmem:[%s1408_s20 + $0xa8] sm:$0xff]  ;;  %v263_v45 = vld [vmem:[%s1408_s20 + $0xb0] sm:$0xff] }
  0x1e   : > { %v294_v44 = vld [vmem:[%s1408_s20 + $0x1a8] sm:$0xff]  ;;  %v295_v46 = vld [vmem:[%s1408_s20 + $0x1b0] sm:$0xff]  ;;  %v264_v47 = vld [vmem:[%s1408_s20 + $0xb8] sm:$0xff] }
  0x1f   : > { %1225 = vmatmul.mubr.msk.f32.gmra.mxu0 %vm313_vm1, %v248_v15  ;;  %1273 = vmatmul.mubr.msk.f32.gmra.mxu1 %vm313_vm1, %v280_v16  ;;  %v296_v48 = vld [vmem:[%s1408_s20 + $0x1b8] sm:$0xff]  ;;  %v265_v49 = vld [vmem:[%s1408_s20 + $0xc0] sm:$0xff]  ;;  %v266_v51 = vld [vmem:[%s1408_s20 + $0xc8] sm:$0xff] }
  0x20   : > { %1227 = vmatprep.mubr.msk.f32.mxu0 %vm313_vm1, %v249_v17  ;;  %1275 = vmatprep.mubr.msk.f32.mxu1 %vm313_vm1, %v281_v18  ;;  %v297_v50 = vld [vmem:[%s1408_s20 + $0x1c0] sm:$0xff]  ;;  %v298_v52 = vld [vmem:[%s1408_s20 + $0x1c8] sm:$0xff]  ;;  %v267_v53 = vld [vmem:[%s1408_s20 + $0xd0] sm:$0xff] }
  0x21   : > { %v299_v54 = vld [vmem:[%s1408_s20 + $0x1d0] sm:$0xff]  ;;  %v268_v55 = vld [vmem:[%s1408_s20 + $0xd8] sm:$0xff]  ;;  %v269_v57 = vld [vmem:[%s1408_s20 + $0xe0] sm:$0xff] }
  0x22   : > { %v300_v56 = vld [vmem:[%s1408_s20 + $0x1d8] sm:$0xff]  ;;  %v301_v58 = vld [vmem:[%s1408_s20 + $0x1e0] sm:$0xff]  ;;  %v270_v59 = vld [vmem:[%s1408_s20 + $0xe8] sm:$0xff] }
  0x23   : > { %1228 = vmatmul.mubr.msk.f32.gmra.mxu0 %vm313_vm1, %v250_v19  ;;  %1276 = vmatmul.mubr.msk.f32.gmra.mxu1 %vm313_vm1, %v282_v20  ;;  %v302_v60 = vld [vmem:[%s1408_s20 + $0x1e8] sm:$0xff]  ;;  %v271_v61 = vld [vmem:[%s1408_s20 + $0xf0] sm:$0xff]  ;;  %v272_v63 = vld [vmem:[%s1408_s20 + $0xf8] sm:$0xff] }
  0x24   : > { %1230 = vmatprep.mubr.msk.f32.mxu0 %vm313_vm1, %v251_v21  ;;  %1278 = vmatprep.mubr.msk.f32.mxu1 %vm313_vm1, %v283_v22  ;;  %v303_v62 = vld [vmem:[%s1408_s20 + $0x1f0] sm:$0xff]  ;;  %v304_v0 = vld [vmem:[%s1408_s20 + $0x1f8] sm:$0xff]  ;;  %v1545_v1 = vld [vmem:[%s230_s26] ss:$0 sm:$0xff] }
  0x27   : > { %1231 = vmatmul.mubr.msk.f32.gmra.mxu0 %vm313_vm1, %v252_v23  ;;  %1279 = vmatmul.mubr.msk.f32.gmra.mxu1 %vm313_vm1, %v284_v24 }
  0x28   : > { %1233 = vmatprep.mubr.msk.f32.mxu0 %vm313_vm1, %v253_v25  ;;  %1281 = vmatprep.mubr.msk.f32.mxu1 %vm313_vm1, %v285_v26 }
  0x2b   : > { %1234 = vmatmul.mubr.msk.f32.gmra.mxu0 %vm313_vm1, %v254_v27  ;;  %1282 = vmatmul.mubr.msk.f32.gmra.mxu1 %vm313_vm1, %v286_v28 }
  0x2c   : > { %1236 = vmatprep.mubr.msk.f32.mxu0 %vm313_vm1, %v255_v29  ;;  %1284 = vmatprep.mubr.msk.f32.mxu1 %vm313_vm1, %v287_v30 }
  0x2f   : > { %1237 = vmatmul.mubr.msk.f32.gmra.mxu0 %vm313_vm1, %v256_v31  ;;  %1285 = vmatmul.mubr.msk.f32.gmra.mxu1 %vm313_vm1, %v288_v32 }
  0x30   : > { %1239 = vmatprep.mubr.msk.f32.mxu0 %vm313_vm1, %v257_v33  ;;  %1287 = vmatprep.mubr.msk.f32.mxu1 %vm313_vm1, %v289_v34 }
  0x33   : > { %1240 = vmatmul.mubr.msk.f32.gmra.mxu0 %vm313_vm1, %v258_v35  ;;  %1288 = vmatmul.mubr.msk.f32.gmra.mxu1 %vm313_vm1, %v290_v36 }
  0x34   : > { %1242 = vmatprep.mubr.msk.f32.mxu0 %vm313_vm1, %v259_v37  ;;  %1290 = vmatprep.mubr.msk.f32.mxu1 %vm313_vm1, %v291_v38 }
  0x37   : > { %1243 = vmatmul.mubr.msk.f32.gmra.mxu0 %vm313_vm1, %v260_v39  ;;  %1291 = vmatmul.mubr.msk.f32.gmra.mxu1 %vm313_vm1, %v292_v40 }
  0x38   : > { %1245 = vmatprep.mubr.msk.f32.mxu0 %vm313_vm1, %v261_v41  ;;  %1293 = vmatprep.mubr.msk.f32.mxu1 %vm313_vm1, %v293_v42 }
  0x3b   : > { %1246 = vmatmul.mubr.msk.f32.gmra.mxu0 %vm313_vm1, %v262_v43  ;;  %1294 = vmatmul.mubr.msk.f32.gmra.mxu1 %vm313_vm1, %v294_v44 }
  0x3c   : > { %1248 = vmatprep.mubr.msk.f32.mxu0 %vm313_vm1, %v263_v45  ;;  %1296 = vmatprep.mubr.msk.f32.mxu1 %vm313_vm1, %v295_v46 }
  0x3f   : > { %1249 = vmatmul.mubr.msk.f32.gmra.mxu0 %vm313_vm1, %v264_v47  ;;  %1297 = vmatmul.mubr.msk.f32.gmra.mxu1 %vm313_vm1, %v296_v48 }
  0x40   : > { %1251 = vmatprep.mubr.msk.f32.mxu0 %vm313_vm1, %v265_v49  ;;  %1299 = vmatprep.mubr.msk.f32.mxu1 %vm313_vm1, %v297_v50 }
  0x43   : > { %1252 = vmatmul.mubr.msk.f32.gmra.mxu0 %vm313_vm1, %v266_v51  ;;  %1300 = vmatmul.mubr.msk.f32.gmra.mxu1 %vm313_vm1, %v298_v52 }
  0x44   : > { %1254 = vmatprep.mubr.msk.f32.mxu0 %vm313_vm1, %v267_v53  ;;  %1302 = vmatprep.mubr.msk.f32.mxu1 %vm313_vm1, %v299_v54 }
  0x47   : > { %1255 = vmatmul.mubr.msk.f32.gmra.mxu0 %vm313_vm1, %v268_v55  ;;  %1303 = vmatmul.mubr.msk.f32.gmra.mxu1 %vm313_vm1, %v300_v56 }
  0x48   : > { %1257 = vmatprep.mubr.msk.f32.mxu0 %vm313_vm1, %v269_v57  ;;  %1305 = vmatprep.mubr.msk.f32.mxu1 %vm313_vm1, %v301_v58 }
  0x4b   : > { %1258 = vmatmul.mubr.msk.f32.gmra.mxu0 %vm313_vm1, %v270_v59  ;;  %1306 = vmatmul.mubr.msk.f32.gmra.mxu1 %vm313_vm1, %v302_v60 }
  0x4c   : > { %1260 = vmatprep.mubr.msk.f32.mxu0 %vm313_vm1, %v271_v61  ;;  %1308 = vmatprep.mubr.msk.f32.mxu1 %vm313_vm1, %v303_v62 }
  0x4f   : > { %1261 = vmatmul.mubr.msk.f32.gmra.mxu0 %vm313_vm1, %v272_v63  ;;  %1309 = vmatmul.mubr.msk.f32.gmra.mxu1 %vm313_vm1, %v304_v0 }
  0xd3   : > { %v1217_v2 = vpop.f32.mrf.mxu0  ;;  %v1265_v3 = vpop.f32.mrf.mxu1 }
  0xd4   : > { %v582_v4 = vadd.f32 %v1217_v2, %v1545_v1  ;;  %v742_v5 = vadd.f32 %v1265_v3, %v1545_v1 }
  0xd5   : > { %v576_v6 = vpop.f32.mrf.mxu0  ;;  %v736_v7 = vpop.f32.mrf.mxu1 }
  0xd6   : > { %897 = vst.msk [vmem:[%s1552_s29 + $0x8] sm:$0xff] %vm895_vm2, %v582_v4  ;;  %929 = vst.msk [vmem:[%s1552_s29 + $0x108] sm:$0xff] %vm895_vm2, %v742_v5  ;;  %v577_v8 = vadd.f32 %v1545_v1, %v576_v6  ;;  %v737_v9 = vadd.f32 %v1545_v1, %v736_v7 }
  0xd7   : > { %v1220_v10 = vpop.f32.mrf.mxu0  ;;  %v1268_v11 = vpop.f32.mrf.mxu1 }
  0xd8   : > { %896 = vst.msk [vmem:[%s1552_s29] sm:$0xff] %vm895_vm2, %v577_v8  ;;  %928 = vst.msk [vmem:[%s1552_s29 + $0x100] sm:$0xff] %vm895_vm2, %v737_v9  ;;  %v592_v12 = vadd.f32 %v1220_v10, %v1545_v1  ;;  %v752_v13 = vadd.f32 %v1268_v11, %v1545_v1 }
  0xd9   : > { %v586_v14 = vpop.f32.mrf.mxu0  ;;  %v746_v15 = vpop.f32.mrf.mxu1 }
  0xda   : > { %899 = vst.msk [vmem:[%s1552_s29 + $0x18] sm:$0xff] %vm895_vm2, %v592_v12  ;;  %931 = vst.msk [vmem:[%s1552_s29 + $0x118] sm:$0xff] %vm895_vm2, %v752_v13  ;;  %v587_v16 = vadd.f32 %v1545_v1, %v586_v14  ;;  %v747_v17 = vadd.f32 %v1545_v1, %v746_v15 }
  0xdb   : > { %v1223_v18 = vpop.f32.mrf.mxu0  ;;  %v1271_v19 = vpop.f32.mrf.mxu1 }
  0xdc   : > { %898 = vst.msk [vmem:[%s1552_s29 + $0x10] sm:$0xff] %vm895_vm2, %v587_v16  ;;  %930 = vst.msk [vmem:[%s1552_s29 + $0x110] sm:$0xff] %vm895_vm2, %v747_v17  ;;  %v602_v20 = vadd.f32 %v1223_v18, %v1545_v1  ;;  %v762_v21 = vadd.f32 %v1271_v19, %v1545_v1 }
  0xdd   : > { %v596_v22 = vpop.f32.mrf.mxu0  ;;  %v756_v23 = vpop.f32.mrf.mxu1 }
  0xde   : > { %901 = vst.msk [vmem:[%s1552_s29 + $0x28] sm:$0xff] %vm895_vm2, %v602_v20  ;;  %933 = vst.msk [vmem:[%s1552_s29 + $0x128] sm:$0xff] %vm895_vm2, %v762_v21  ;;  %v597_v24 = vadd.f32 %v1545_v1, %v596_v22  ;;  %v757_v25 = vadd.f32 %v1545_v1, %v756_v23 }
  0xdf   : > { %v1226_v26 = vpop.f32.mrf.mxu0  ;;  %v1274_v27 = vpop.f32.mrf.mxu1 }
  0xe0   : > { %900 = vst.msk [vmem:[%s1552_s29 + $0x20] sm:$0xff] %vm895_vm2, %v597_v24  ;;  %932 = vst.msk [vmem:[%s1552_s29 + $0x120] sm:$0xff] %vm895_vm2, %v757_v25  ;;  %v612_v28 = vadd.f32 %v1226_v26, %v1545_v1  ;;  %v772_v29 = vadd.f32 %v1274_v27, %v1545_v1 }
  0xe1   : > { %v606_v30 = vpop.f32.mrf.mxu0  ;;  %v766_v31 = vpop.f32.mrf.mxu1 }
  0xe2   : > { %903 = vst.msk [vmem:[%s1552_s29 + $0x38] sm:$0xff] %vm895_vm2, %v612_v28  ;;  %935 = vst.msk [vmem:[%s1552_s29 + $0x138] sm:$0xff] %vm895_vm2, %v772_v29  ;;  %v607_v32 = vadd.f32 %v1545_v1, %v606_v30  ;;  %v767_v33 = vadd.f32 %v1545_v1, %v766_v31 }
  0xe3   : > { %v1229_v34 = vpop.f32.mrf.mxu0  ;;  %v1277_v35 = vpop.f32.mrf.mxu1 }
  0xe4   : > { %902 = vst.msk [vmem:[%s1552_s29 + $0x30] sm:$0xff] %vm895_vm2, %v607_v32  ;;  %934 = vst.msk [vmem:[%s1552_s29 + $0x130] sm:$0xff] %vm895_vm2, %v767_v33  ;;  %v622_v36 = vadd.f32 %v1229_v34, %v1545_v1  ;;  %v782_v37 = vadd.f32 %v1277_v35, %v1545_v1 }
  0xe5   : > { %v616_v38 = vpop.f32.mrf.mxu0  ;;  %v776_v39 = vpop.f32.mrf.mxu1 }
  0xe6   : > { %905 = vst.msk [vmem:[%s1552_s29 + $0x48] sm:$0xff] %vm895_vm2, %v622_v36  ;;  %937 = vst.msk [vmem:[%s1552_s29 + $0x148] sm:$0xff] %vm895_vm2, %v782_v37  ;;  %v617_v40 = vadd.f32 %v1545_v1, %v616_v38  ;;  %v777_v41 = vadd.f32 %v1545_v1, %v776_v39 }
  0xe7   : > { %v1232_v42 = vpop.f32.mrf.mxu0  ;;  %v1280_v43 = vpop.f32.mrf.mxu1 }
  0xe8   : > { %904 = vst.msk [vmem:[%s1552_s29 + $0x40] sm:$0xff] %vm895_vm2, %v617_v40  ;;  %936 = vst.msk [vmem:[%s1552_s29 + $0x140] sm:$0xff] %vm895_vm2, %v777_v41  ;;  %v632_v44 = vadd.f32 %v1232_v42, %v1545_v1  ;;  %v792_v45 = vadd.f32 %v1280_v43, %v1545_v1 }
  0xe9   : > { %v626_v46 = vpop.f32.mrf.mxu0  ;;  %v786_v47 = vpop.f32.mrf.mxu1 }
  0xea   : > { %907 = vst.msk [vmem:[%s1552_s29 + $0x58] sm:$0xff] %vm895_vm2, %v632_v44  ;;  %939 = vst.msk [vmem:[%s1552_s29 + $0x158] sm:$0xff] %vm895_vm2, %v792_v45  ;;  %v627_v48 = vadd.f32 %v1545_v1, %v626_v46  ;;  %v787_v49 = vadd.f32 %v1545_v1, %v786_v47 }
  0xeb   : > { %v1235_v50 = vpop.f32.mrf.mxu0  ;;  %v1283_v51 = vpop.f32.mrf.mxu1 }
  0xec   : > { %906 = vst.msk [vmem:[%s1552_s29 + $0x50] sm:$0xff] %vm895_vm2, %v627_v48  ;;  %938 = vst.msk [vmem:[%s1552_s29 + $0x150] sm:$0xff] %vm895_vm2, %v787_v49  ;;  %v642_v52 = vadd.f32 %v1235_v50, %v1545_v1  ;;  %v802_v53 = vadd.f32 %v1283_v51, %v1545_v1 }
  0xed   : > { %v636_v54 = vpop.f32.mrf.mxu0  ;;  %v796_v55 = vpop.f32.mrf.mxu1 }
  0xee   : > { %909 = vst.msk [vmem:[%s1552_s29 + $0x68] sm:$0xff] %vm895_vm2, %v642_v52  ;;  %941 = vst.msk [vmem:[%s1552_s29 + $0x168] sm:$0xff] %vm895_vm2, %v802_v53  ;;  %v637_v56 = vadd.f32 %v1545_v1, %v636_v54  ;;  %v797_v57 = vadd.f32 %v1545_v1, %v796_v55 }
  0xef   : > { %v1238_v58 = vpop.f32.mrf.mxu0  ;;  %v1286_v59 = vpop.f32.mrf.mxu1 }
  0xf0   : > { %908 = vst.msk [vmem:[%s1552_s29 + $0x60] sm:$0xff] %vm895_vm2, %v637_v56  ;;  %940 = vst.msk [vmem:[%s1552_s29 + $0x160] sm:$0xff] %vm895_vm2, %v797_v57  ;;  %v652_v60 = vadd.f32 %v1238_v58, %v1545_v1  ;;  %v812_v61 = vadd.f32 %v1286_v59, %v1545_v1 }
  0xf1   : > { %v646_v62 = vpop.f32.mrf.mxu0  ;;  %v806_v63 = vpop.f32.mrf.mxu1 }
  0xf2   : > { %911 = vst.msk [vmem:[%s1552_s29 + $0x78] sm:$0xff] %vm895_vm2, %v652_v60  ;;  %943 = vst.msk [vmem:[%s1552_s29 + $0x178] sm:$0xff] %vm895_vm2, %v812_v61  ;;  %v647_v0 = vadd.f32 %v1545_v1, %v646_v62  ;;  %v807_v2 = vadd.f32 %v1545_v1, %v806_v63 }
  0xf3   : > { %v1241_v3 = vpop.f32.mrf.mxu0  ;;  %v1289_v4 = vpop.f32.mrf.mxu1 }
  0xf4   : > { %910 = vst.msk [vmem:[%s1552_s29 + $0x70] sm:$0xff] %vm895_vm2, %v647_v0  ;;  %942 = vst.msk [vmem:[%s1552_s29 + $0x170] sm:$0xff] %vm895_vm2, %v807_v2  ;;  %v662_v5 = vadd.f32 %v1241_v3, %v1545_v1  ;;  %v822_v6 = vadd.f32 %v1289_v4, %v1545_v1 }
  0xf5   : > { %v656_v7 = vpop.f32.mrf.mxu0  ;;  %v816_v8 = vpop.f32.mrf.mxu1 }
  0xf6   : > { %913 = vst.msk [vmem:[%s1552_s29 + $0x88] sm:$0xff] %vm895_vm2, %v662_v5  ;;  %945 = vst.msk [vmem:[%s1552_s29 + $0x188] sm:$0xff] %vm895_vm2, %v822_v6  ;;  %v657_v9 = vadd.f32 %v1545_v1, %v656_v7  ;;  %v817_v10 = vadd.f32 %v1545_v1, %v816_v8 }
  0xf7   : > { %v1244_v11 = vpop.f32.mrf.mxu0  ;;  %v1292_v12 = vpop.f32.mrf.mxu1 }
  0xf8   : > { %912 = vst.msk [vmem:[%s1552_s29 + $0x80] sm:$0xff] %vm895_vm2, %v657_v9  ;;  %944 = vst.msk [vmem:[%s1552_s29 + $0x180] sm:$0xff] %vm895_vm2, %v817_v10  ;;  %v672_v13 = vadd.f32 %v1244_v11, %v1545_v1  ;;  %v832_v14 = vadd.f32 %v1292_v12, %v1545_v1 }
  0xf9   : > { %v666_v15 = vpop.f32.mrf.mxu0  ;;  %v826_v16 = vpop.f32.mrf.mxu1 }
  0xfa   : > { %915 = vst.msk [vmem:[%s1552_s29 + $0x98] sm:$0xff] %vm895_vm2, %v672_v13  ;;  %947 = vst.msk [vmem:[%s1552_s29 + $0x198] sm:$0xff] %vm895_vm2, %v832_v14  ;;  %v667_v17 = vadd.f32 %v1545_v1, %v666_v15  ;;  %v827_v18 = vadd.f32 %v1545_v1, %v826_v16 }
  0xfb   : > { %v1247_v19 = vpop.f32.mrf.mxu0  ;;  %v1295_v20 = vpop.f32.mrf.mxu1 }
  0xfc   : > { %914 = vst.msk [vmem:[%s1552_s29 + $0x90] sm:$0xff] %vm895_vm2, %v667_v17  ;;  %946 = vst.msk [vmem:[%s1552_s29 + $0x190] sm:$0xff] %vm895_vm2, %v827_v18  ;;  %v682_v21 = vadd.f32 %v1247_v19, %v1545_v1  ;;  %v842_v22 = vadd.f32 %v1295_v20, %v1545_v1 }
  0xfd   : > { %v676_v23 = vpop.f32.mrf.mxu0  ;;  %v836_v24 = vpop.f32.mrf.mxu1 }
  0xfe   : > { %917 = vst.msk [vmem:[%s1552_s29 + $0xa8] sm:$0xff] %vm895_vm2, %v682_v21  ;;  %949 = vst.msk [vmem:[%s1552_s29 + $0x1a8] sm:$0xff] %vm895_vm2, %v842_v22  ;;  %v677_v25 = vadd.f32 %v1545_v1, %v676_v23  ;;  %v837_v26 = vadd.f32 %v1545_v1, %v836_v24 }
  0xff   : > { %v1250_v27 = vpop.f32.mrf.mxu0  ;;  %v1298_v28 = vpop.f32.mrf.mxu1 }
 0x100   : > { %916 = vst.msk [vmem:[%s1552_s29 + $0xa0] sm:$0xff] %vm895_vm2, %v677_v25  ;;  %948 = vst.msk [vmem:[%s1552_s29 + $0x1a0] sm:$0xff] %vm895_vm2, %v837_v26  ;;  %v692_v29 = vadd.f32 %v1250_v27, %v1545_v1  ;;  %v852_v30 = vadd.f32 %v1298_v28, %v1545_v1 }
 0x101   : > { %v686_v31 = vpop.f32.mrf.mxu0  ;;  %v846_v32 = vpop.f32.mrf.mxu1 }
 0x102   : > { %919 = vst.msk [vmem:[%s1552_s29 + $0xb8] sm:$0xff] %vm895_vm2, %v692_v29  ;;  %951 = vst.msk [vmem:[%s1552_s29 + $0x1b8] sm:$0xff] %vm895_vm2, %v852_v30  ;;  %v687_v33 = vadd.f32 %v1545_v1, %v686_v31  ;;  %v847_v34 = vadd.f32 %v1545_v1, %v846_v32 }
 0x103   : > { %v1253_v35 = vpop.f32.mrf.mxu0  ;;  %v1301_v36 = vpop.f32.mrf.mxu1 }
 0x104   : > { %918 = vst.msk [vmem:[%s1552_s29 + $0xb0] sm:$0xff] %vm895_vm2, %v687_v33  ;;  %950 = vst.msk [vmem:[%s1552_s29 + $0x1b0] sm:$0xff] %vm895_vm2, %v847_v34  ;;  %v702_v37 = vadd.f32 %v1253_v35, %v1545_v1  ;;  %v862_v38 = vadd.f32 %v1301_v36, %v1545_v1 }
 0x105   : > { %v696_v39 = vpop.f32.mrf.mxu0  ;;  %v856_v40 = vpop.f32.mrf.mxu1 }
 0x106   : > { %921 = vst.msk [vmem:[%s1552_s29 + $0xc8] sm:$0xff] %vm895_vm2, %v702_v37  ;;  %953 = vst.msk [vmem:[%s1552_s29 + $0x1c8] sm:$0xff] %vm895_vm2, %v862_v38  ;;  %v697_v41 = vadd.f32 %v1545_v1, %v696_v39  ;;  %v857_v42 = vadd.f32 %v1545_v1, %v856_v40 }
 0x107   : > { %v1256_v43 = vpop.f32.mrf.mxu0  ;;  %v1304_v44 = vpop.f32.mrf.mxu1 }
 0x108   : > { %920 = vst.msk [vmem:[%s1552_s29 + $0xc0] sm:$0xff] %vm895_vm2, %v697_v41  ;;  %952 = vst.msk [vmem:[%s1552_s29 + $0x1c0] sm:$0xff] %vm895_vm2, %v857_v42  ;;  %v712_v45 = vadd.f32 %v1256_v43, %v1545_v1  ;;  %v872_v46 = vadd.f32 %v1304_v44, %v1545_v1 }
 0x109   : > { %v706_v47 = vpop.f32.mrf.mxu0  ;;  %v866_v48 = vpop.f32.mrf.mxu1 }
 0x10a   : > { %923 = vst.msk [vmem:[%s1552_s29 + $0xd8] sm:$0xff] %vm895_vm2, %v712_v45  ;;  %955 = vst.msk [vmem:[%s1552_s29 + $0x1d8] sm:$0xff] %vm895_vm2, %v872_v46  ;;  %v707_v49 = vadd.f32 %v1545_v1, %v706_v47  ;;  %v867_v50 = vadd.f32 %v1545_v1, %v866_v48 }
 0x10b   : > { %v1259_v51 = vpop.f32.mrf.mxu0  ;;  %v1307_v52 = vpop.f32.mrf.mxu1 }
 0x10c   : > { %922 = vst.msk [vmem:[%s1552_s29 + $0xd0] sm:$0xff] %vm895_vm2, %v707_v49  ;;  %954 = vst.msk [vmem:[%s1552_s29 + $0x1d0] sm:$0xff] %vm895_vm2, %v867_v50  ;;  %v722_v53 = vadd.f32 %v1259_v51, %v1545_v1  ;;  %v882_v54 = vadd.f32 %v1307_v52, %v1545_v1 }
 0x10d   : > { %v716_v55 = vpop.f32.mrf.mxu0  ;;  %v876_v56 = vpop.f32.mrf.mxu1 }
 0x10e   : > { %925 = vst.msk [vmem:[%s1552_s29 + $0xe8] sm:$0xff] %vm895_vm2, %v722_v53  ;;  %957 = vst.msk [vmem:[%s1552_s29 + $0x1e8] sm:$0xff] %vm895_vm2, %v882_v54  ;;  %v717_v57 = vadd.f32 %v1545_v1, %v716_v55  ;;  %v877_v58 = vadd.f32 %v1545_v1, %v876_v56 }
 0x10f   : > { %v1262_v59 = vpop.f32.mrf.mxu0  ;;  %v1310_v60 = vpop.f32.mrf.mxu1 }
 0x110   : > { %924 = vst.msk [vmem:[%s1552_s29 + $0xe0] sm:$0xff] %vm895_vm2, %v717_v57  ;;  %956 = vst.msk [vmem:[%s1552_s29 + $0x1e0] sm:$0xff] %vm895_vm2, %v877_v58  ;;  %v732_v61 = vadd.f32 %v1262_v59, %v1545_v1  ;;  %v892_v62 = vadd.f32 %v1310_v60, %v1545_v1 }
 0x111   : > { %v726_v63 = vpop.f32.mrf.mxu0  ;;  %v886_v0 = vpop.f32.mrf.mxu1 }
 0x112   : > { %927 = vst.msk [vmem:[%s1552_s29 + $0xf8] sm:$0xff] %vm895_vm2, %v732_v61  ;;  %959 = vst.msk [vmem:[%s1552_s29 + $0x1f8] sm:$0xff] %vm895_vm2, %v892_v62  ;;  %v727_v2 = vadd.f32 %v1545_v1, %v726_v63  ;;  %v887_v3 = vadd.f32 %v1545_v1, %v886_v0 }
 0x114   : > { %926 = vst.msk [vmem:[%s1552_s29 + $0xf0] sm:$0xff] %vm895_vm2, %v727_v2  ;;  %958 = vst.msk [vmem:[%s1552_s29 + $0x1f0] sm:$0xff] %vm895_vm2, %v887_v3 }
 0x115 PF: > { %s13_s14 = sadd.s32 1, %s1359_s14   ;;  %s1759_s12 = smov %s1355_s13 }
 0x116   : > { %p10_p5 = scmp.ge.s32.totalorder %s13_s14, 4   ;;  %s1760_s13 = smov %s1762_s15 }
 0x118   :  { %12 = sbr.rel (!%p10_p5) target bundleno = 2 (0x2), region = 68 }

// kernel: _lambda_.22
= control target key start
LH: loop header
LB: loop body
LE: loop exit
PB: predicated region body
PF: predicated region fallthrough
CT: control target
= control target key end

     0   :  { %s1391_s12 = smov 0   ;;  %s1393_s13 = smov 0   ;;  %s1765_s0 = inlined_call_operand.vmem [shape: f32[2,512,12], index: 0, kind: input, shape index: {}]   ;;  %s1766_s1 = inlined_call_operand.vmem [shape: f32[2,12,12], index: 1, kind: input, shape index: {}]   ;;  %s1767_s2 = inlined_call_operand.vmem [shape: f32[2,1,12], index: 2, kind: input, shape index: {}]   ;;  %s1768_s3 = inlined_call_operand.vmem [shape: f32[2,512,12], index: 3, kind: output, shape index: {}]  }
   0x1   :  { %s1395_s14 = smov 0  }
   0x2 LB: > { %s25_s15 = sadd.s32 1, %s1365_s13  ;;  %p1075_p0 = scmp.ge.s32.totalorder %s1369_s14, 1  ;;  %s1369_s14 = sphi %s1395_s14, %s13_s14   ;;  %s1365_s13 = sphi %s1393_s13, %s1770_s13   ;;  %s1361_s12 = sphi %s1391_s12, %s1769_s12  }
   0x3   : > { %p27_p1 = scmp.ge.s32.totalorder %s25_s15, 2  ;;  %p176_p2 = scmp.lt.s32.totalorder %s1369_s14, 3 }
   0x5   : > { %s1772_s15 = smov (%p27_p1, %s25_s15), 0  ;;  %p177_p3 = pnand %p1075_p0, %p176_p2 }
   0x6   : > { %p217_p4 = scmp.lt.s32.totalorder (!%p177_p3), %s1361_s12, 1 }
   0x7   : > { %180 = sbr.rel (%p177_p3) target bundleno = 279 (0x117), region = 32 }
   0xc   : > { %s1774_s12 = smov (!%p217_p4, %s1361_s12), 1  ;;  %vm510_vm0 = vcmask 1043456   ;;  %vm317_vm1 = vcmask 97280  }
   0xd   : > { %s1150_s16 = sshll.u32 %s1774_s12, 9  ;;  %s1151_s17 = sshll.u32 %s1774_s12, 4 }
   0xe   : > { %s1418_s20 = scalar_lea.vmem %s1765_s0, %s1150_s16  ;;  %s230_s23 = scalar_lea.vmem %s1766_s1, %s1151_s17 }
   0xf   : > { %v309_v0 = vld [vmem:[%s230_s23 + $0x8] sm:$0xf]  ;;  %v308_v1 = vld [vmem:[%s230_s23] sm:$0xff]  ;;  %v246_v6 = vld [vmem:[%s1418_s20 + $0x10] sm:$0xff]  ;;  %s233_s26 = scalar_lea.vmem %s1767_s2, %s1774_s12  ;;  %s1562_s29 = scalar_lea.vmem %s1768_s3, %s1150_s16 }
  0x10   : > { %1219 = vmatprep.subr.msk.mxu0 %vm510_vm0, %v309_v0  ;;  %1319 = vmatprep.subr.msk.mxu1 %vm510_vm0, %v309_v0  ;;  %v244_v2 = vld [vmem:[%s1418_s20] sm:$0xff]  ;;  %v245_v4 = vld [vmem:[%s1418_s20 + $0x8] sm:$0xff]  ;;  %v278_v7 = vld [vmem:[%s1418_s20 + $0x110] sm:$0xff] }
  0x11   : > { %1220 = vmatpush3.msk.msra.mxu0 %vm510_vm0, %v309_v0  ;;  %1321 = vmatpush3.msk.msra.mxu1 %vm510_vm0, %v309_v0  ;;  %v276_v3 = vld [vmem:[%s1418_s20 + $0x100] sm:$0xff]  ;;  %v277_v5 = vld [vmem:[%s1418_s20 + $0x108] sm:$0xff]  ;;  %v247_v8 = vld [vmem:[%s1418_s20 + $0x18] sm:$0xff] }
  0x12   : > { %1221 = vmatprep.subr.mxu0 %v308_v1  ;;  %1320 = vmatprep.subr.mxu1 %v308_v1  ;;  %v279_v9 = vld [vmem:[%s1418_s20 + $0x118] sm:$0xff]  ;;  %v248_v10 = vld [vmem:[%s1418_s20 + $0x20] sm:$0xff]  ;;  %v249_v12 = vld [vmem:[%s1418_s20 + $0x28] sm:$0xff] }
  0x13   : > { %1222 = vmatpush3.msra.mxu0 %v308_v1  ;;  %1322 = vmatpush3.msra.mxu1 %v308_v1  ;;  %v280_v11 = vld [vmem:[%s1418_s20 + $0x120] sm:$0xff]  ;;  %v281_v13 = vld [vmem:[%s1418_s20 + $0x128] sm:$0xff]  ;;  %v250_v14 = vld [vmem:[%s1418_s20 + $0x30] sm:$0xff] }
  0x14   : > { %1223 = vmatprep.mubr.msk.f32.mxu0 %vm317_vm1, %v244_v2  ;;  %1271 = vmatprep.mubr.msk.f32.mxu1 %vm317_vm1, %v276_v3  ;;  %v282_v15 = vld [vmem:[%s1418_s20 + $0x130] sm:$0xff]  ;;  %v251_v16 = vld [vmem:[%s1418_s20 + $0x38] sm:$0xff]  ;;  %v252_v18 = vld [vmem:[%s1418_s20 + $0x40] sm:$0xff] }
  0x15   : > { %1224 = vmatmul.mubr.msk.f32.vlgmr.msra.gmra.mxu0 %vm317_vm1, %v245_v4  ;;  %1272 = vmatmul.mubr.msk.f32.vlgmr.msra.gmra.mxu1 %vm317_vm1, %v277_v5  ;;  %v283_v17 = vld [vmem:[%s1418_s20 + $0x138] sm:$0xff]  ;;  %v284_v19 = vld [vmem:[%s1418_s20 + $0x140] sm:$0xff]  ;;  %v253_v20 = vld [vmem:[%s1418_s20 + $0x48] sm:$0xff] }
  0x16   : > { %1226 = vmatprep.mubr.msk.f32.mxu0 %vm317_vm1, %v246_v6  ;;  %1274 = vmatprep.mubr.msk.f32.mxu1 %vm317_vm1, %v278_v7  ;;  %v285_v21 = vld [vmem:[%s1418_s20 + $0x148] sm:$0xff]  ;;  %v254_v22 = vld [vmem:[%s1418_s20 + $0x50] sm:$0xff]  ;;  %v255_v24 = vld [vmem:[%s1418_s20 + $0x58] sm:$0xff] }
  0x17   : > { %v286_v23 = vld [vmem:[%s1418_s20 + $0x150] sm:$0xff]  ;;  %v287_v25 = vld [vmem:[%s1418_s20 + $0x158] sm:$0xff]  ;;  %v256_v26 = vld [vmem:[%s1418_s20 + $0x60] sm:$0xff] }
  0x18   : > { %v288_v27 = vld [vmem:[%s1418_s20 + $0x160] sm:$0xff]  ;;  %v257_v28 = vld [vmem:[%s1418_s20 + $0x68] sm:$0xff]  ;;  %v258_v30 = vld [vmem:[%s1418_s20 + $0x70] sm:$0xff] }
  0x19   : > { %1227 = vmatmul.mubr.msk.f32.gmra.mxu0 %vm317_vm1, %v247_v8  ;;  %1275 = vmatmul.mubr.msk.f32.gmra.mxu1 %vm317_vm1, %v279_v9  ;;  %v289_v29 = vld [vmem:[%s1418_s20 + $0x168] sm:$0xff]  ;;  %v290_v31 = vld [vmem:[%s1418_s20 + $0x170] sm:$0xff]  ;;  %v259_v32 = vld [vmem:[%s1418_s20 + $0x78] sm:$0xff] }
  0x1a   : > { %1229 = vmatprep.mubr.msk.f32.mxu0 %vm317_vm1, %v248_v10  ;;  %1277 = vmatprep.mubr.msk.f32.mxu1 %vm317_vm1, %v280_v11  ;;  %v291_v33 = vld [vmem:[%s1418_s20 + $0x178] sm:$0xff]  ;;  %v260_v34 = vld [vmem:[%s1418_s20 + $0x80] sm:$0xff]  ;;  %v261_v36 = vld [vmem:[%s1418_s20 + $0x88] sm:$0xff] }
  0x1b   : > { %v292_v35 = vld [vmem:[%s1418_s20 + $0x180] sm:$0xff]  ;;  %v293_v37 = vld [vmem:[%s1418_s20 + $0x188] sm:$0xff]  ;;  %v262_v38 = vld [vmem:[%s1418_s20 + $0x90] sm:$0xff] }
  0x1c   : > { %v294_v39 = vld [vmem:[%s1418_s20 + $0x190] sm:$0xff]  ;;  %v263_v40 = vld [vmem:[%s1418_s20 + $0x98] sm:$0xff]  ;;  %v264_v42 = vld [vmem:[%s1418_s20 + $0xa0] sm:$0xff] }
  0x1d   : > { %1230 = vmatmul.mubr.msk.f32.gmra.mxu0 %vm317_vm1, %v249_v12  ;;  %1278 = vmatmul.mubr.msk.f32.gmra.mxu1 %vm317_vm1, %v281_v13  ;;  %v295_v41 = vld [vmem:[%s1418_s20 + $0x198] sm:$0xff]  ;;  %v296_v43 = vld [vmem:[%s1418_s20 + $0x1a0] sm:$0xff]  ;;  %v265_v44 = vld [vmem:[%s1418_s20 + $0xa8] sm:$0xff] }
  0x1e   : > { %1232 = vmatprep.mubr.msk.f32.mxu0 %vm317_vm1, %v250_v14  ;;  %1280 = vmatprep.mubr.msk.f32.mxu1 %vm317_vm1, %v282_v15  ;;  %v297_v45 = vld [vmem:[%s1418_s20 + $0x1a8] sm:$0xff]  ;;  %v266_v46 = vld [vmem:[%s1418_s20 + $0xb0] sm:$0xff]  ;;  %v267_v48 = vld [vmem:[%s1418_s20 + $0xb8] sm:$0xff] }
  0x1f   : > { %v298_v47 = vld [vmem:[%s1418_s20 + $0x1b0] sm:$0xff]  ;;  %v299_v49 = vld [vmem:[%s1418_s20 + $0x1b8] sm:$0xff]  ;;  %v268_v50 = vld [vmem:[%s1418_s20 + $0xc0] sm:$0xff] }
  0x20   : > { %v300_v51 = vld [vmem:[%s1418_s20 + $0x1c0] sm:$0xff]  ;;  %v269_v52 = vld [vmem:[%s1418_s20 + $0xc8] sm:$0xff]  ;;  %v270_v54 = vld [vmem:[%s1418_s20 + $0xd0] sm:$0xff] }
  0x21   : > { %1233 = vmatmul.mubr.msk.f32.gmra.mxu0 %vm317_vm1, %v251_v16  ;;  %1281 = vmatmul.mubr.msk.f32.gmra.mxu1 %vm317_vm1, %v283_v17  ;;  %v301_v53 = vld [vmem:[%s1418_s20 + $0x1c8] sm:$0xff]  ;;  %v302_v55 = vld [vmem:[%s1418_s20 + $0x1d0] sm:$0xff]  ;;  %v271_v56 = vld [vmem:[%s1418_s20 + $0xd8] sm:$0xff] }
  0x22   : > { %1235 = vmatprep.mubr.msk.f32.mxu0 %vm317_vm1, %v252_v18  ;;  %1283 = vmatprep.mubr.msk.f32.mxu1 %vm317_vm1, %v284_v19  ;;  %v303_v57 = vld [vmem:[%s1418_s20 + $0x1d8] sm:$0xff]  ;;  %v272_v58 = vld [vmem:[%s1418_s20 + $0xe0] sm:$0xff]  ;;  %v273_v60 = vld [vmem:[%s1418_s20 + $0xe8] sm:$0xff] }
  0x23   : > { %v304_v59 = vld [vmem:[%s1418_s20 + $0x1e0] sm:$0xff]  ;;  %v305_v61 = vld [vmem:[%s1418_s20 + $0x1e8] sm:$0xff]  ;;  %v274_v62 = vld [vmem:[%s1418_s20 + $0xf0] sm:$0xff] }
  0x24   : > { %v306_v63 = vld [vmem:[%s1418_s20 + $0x1f0] sm:$0xff]  ;;  %v275_v0 = vld [vmem:[%s1418_s20 + $0xf8] sm:$0xff]  ;;  %v1555_v2 = vld [vmem:[%s233_s26] ss:$0 sm:$0xff] }
  0x25   : > { %1236 = vmatmul.mubr.msk.f32.gmra.mxu0 %vm317_vm1, %v253_v20  ;;  %1284 = vmatmul.mubr.msk.f32.gmra.mxu1 %vm317_vm1, %v285_v21  ;;  %v307_v1 = vld [vmem:[%s1418_s20 + $0x1f8] sm:$0xff] }
  0x26   : > { %1238 = vmatprep.mubr.msk.f32.mxu0 %vm317_vm1, %v254_v22  ;;  %1286 = vmatprep.mubr.msk.f32.mxu1 %vm317_vm1, %v286_v23 }
  0x29   : > { %1239 = vmatmul.mubr.msk.f32.gmra.mxu0 %vm317_vm1, %v255_v24  ;;  %1287 = vmatmul.mubr.msk.f32.gmra.mxu1 %vm317_vm1, %v287_v25 }
  0x2a   : > { %1241 = vmatprep.mubr.msk.f32.mxu0 %vm317_vm1, %v256_v26  ;;  %1289 = vmatprep.mubr.msk.f32.mxu1 %vm317_vm1, %v288_v27 }
  0x2d   : > { %1242 = vmatmul.mubr.msk.f32.gmra.mxu0 %vm317_vm1, %v257_v28  ;;  %1290 = vmatmul.mubr.msk.f32.gmra.mxu1 %vm317_vm1, %v289_v29 }
  0x2e   : > { %1244 = vmatprep.mubr.msk.f32.mxu0 %vm317_vm1, %v258_v30  ;;  %1292 = vmatprep.mubr.msk.f32.mxu1 %vm317_vm1, %v290_v31 }
  0x31   : > { %1245 = vmatmul.mubr.msk.f32.gmra.mxu0 %vm317_vm1, %v259_v32  ;;  %1293 = vmatmul.mubr.msk.f32.gmra.mxu1 %vm317_vm1, %v291_v33 }
  0x32   : > { %1247 = vmatprep.mubr.msk.f32.mxu0 %vm317_vm1, %v260_v34  ;;  %1295 = vmatprep.mubr.msk.f32.mxu1 %vm317_vm1, %v292_v35 }
  0x35   : > { %1248 = vmatmul.mubr.msk.f32.gmra.mxu0 %vm317_vm1, %v261_v36  ;;  %1296 = vmatmul.mubr.msk.f32.gmra.mxu1 %vm317_vm1, %v293_v37 }
  0x36   : > { %1250 = vmatprep.mubr.msk.f32.mxu0 %vm317_vm1, %v262_v38  ;;  %1298 = vmatprep.mubr.msk.f32.mxu1 %vm317_vm1, %v294_v39 }
  0x39   : > { %1251 = vmatmul.mubr.msk.f32.gmra.mxu0 %vm317_vm1, %v263_v40  ;;  %1299 = vmatmul.mubr.msk.f32.gmra.mxu1 %vm317_vm1, %v295_v41 }
  0x3a   : > { %1253 = vmatprep.mubr.msk.f32.mxu0 %vm317_vm1, %v264_v42  ;;  %1301 = vmatprep.mubr.msk.f32.mxu1 %vm317_vm1, %v296_v43 }
  0x3d   : > { %1254 = vmatmul.mubr.msk.f32.gmra.mxu0 %vm317_vm1, %v265_v44  ;;  %1302 = vmatmul.mubr.msk.f32.gmra.mxu1 %vm317_vm1, %v297_v45 }
  0x3e   : > { %1256 = vmatprep.mubr.msk.f32.mxu0 %vm317_vm1, %v266_v46  ;;  %1304 = vmatprep.mubr.msk.f32.mxu1 %vm317_vm1, %v298_v47 }
  0x41   : > { %1257 = vmatmul.mubr.msk.f32.gmra.mxu0 %vm317_vm1, %v267_v48  ;;  %1305 = vmatmul.mubr.msk.f32.gmra.mxu1 %vm317_vm1, %v299_v49 }
  0x42   : > { %1259 = vmatprep.mubr.msk.f32.mxu0 %vm317_vm1, %v268_v50  ;;  %1307 = vmatprep.mubr.msk.f32.mxu1 %vm317_vm1, %v300_v51 }
  0x45   : > { %1260 = vmatmul.mubr.msk.f32.gmra.mxu0 %vm317_vm1, %v269_v52  ;;  %1308 = vmatmul.mubr.msk.f32.gmra.mxu1 %vm317_vm1, %v301_v53 }
  0x46   : > { %1262 = vmatprep.mubr.msk.f32.mxu0 %vm317_vm1, %v270_v54  ;;  %1310 = vmatprep.mubr.msk.f32.mxu1 %vm317_vm1, %v302_v55 }
  0x49   : > { %1263 = vmatmul.mubr.msk.f32.gmra.mxu0 %vm317_vm1, %v271_v56  ;;  %1311 = vmatmul.mubr.msk.f32.gmra.mxu1 %vm317_vm1, %v303_v57 }
  0x4a   : > { %1265 = vmatprep.mubr.msk.f32.mxu0 %vm317_vm1, %v272_v58  ;;  %1313 = vmatprep.mubr.msk.f32.mxu1 %vm317_vm1, %v304_v59 }
  0x4d   : > { %1266 = vmatmul.mubr.msk.f32.gmra.mxu0 %vm317_vm1, %v273_v60  ;;  %1314 = vmatmul.mubr.msk.f32.gmra.mxu1 %vm317_vm1, %v305_v61 }
  0x4e   : > { %1268 = vmatprep.mubr.msk.f32.mxu0 %vm317_vm1, %v274_v62  ;;  %1316 = vmatprep.mubr.msk.f32.mxu1 %vm317_vm1, %v306_v63 }
  0x51   : > { %1269 = vmatmul.mubr.msk.f32.gmra.mxu0 %vm317_vm1, %v275_v0  ;;  %1317 = vmatmul.mubr.msk.f32.gmra.mxu1 %vm317_vm1, %v307_v1 }
  0xd5   : > { %v1225_v3 = vpop.f32.mrf.mxu0  ;;  %v1273_v4 = vpop.f32.mrf.mxu1 }
  0xd6   : > { %v586_v5 = vadd.f32 %v1225_v3, %v1555_v2  ;;  %v746_v6 = vadd.f32 %v1273_v4, %v1555_v2 }
  0xd7   : > { %v580_v7 = vpop.f32.mrf.mxu0  ;;  %v740_v8 = vpop.f32.mrf.mxu1 }
  0xd8   : > { %900 = vst.msk [vmem:[%s1562_s29 + $0x8] sm:$0xff] %vm317_vm1, %v586_v5  ;;  %932 = vst.msk [vmem:[%s1562_s29 + $0x108] sm:$0xff] %vm317_vm1, %v746_v6  ;;  %v581_v9 = vadd.f32 %v1555_v2, %v580_v7  ;;  %v741_v10 = vadd.f32 %v1555_v2, %v740_v8 }
  0xd9   : > { %v1228_v11 = vpop.f32.mrf.mxu0  ;;  %v1276_v12 = vpop.f32.mrf.mxu1 }
  0xda   : > { %899 = vst.msk [vmem:[%s1562_s29] sm:$0xff] %vm317_vm1, %v581_v9  ;;  %931 = vst.msk [vmem:[%s1562_s29 + $0x100] sm:$0xff] %vm317_vm1, %v741_v10  ;;  %v596_v13 = vadd.f32 %v1228_v11, %v1555_v2  ;;  %v756_v14 = vadd.f32 %v1276_v12, %v1555_v2 }
  0xdb   : > { %v590_v15 = vpop.f32.mrf.mxu0  ;;  %v750_v16 = vpop.f32.mrf.mxu1 }
  0xdc   : > { %902 = vst.msk [vmem:[%s1562_s29 + $0x18] sm:$0xff] %vm317_vm1, %v596_v13  ;;  %934 = vst.msk [vmem:[%s1562_s29 + $0x118] sm:$0xff] %vm317_vm1, %v756_v14  ;;  %v591_v17 = vadd.f32 %v1555_v2, %v590_v15  ;;  %v751_v18 = vadd.f32 %v1555_v2, %v750_v16 }
  0xdd   : > { %v1231_v19 = vpop.f32.mrf.mxu0  ;;  %v1279_v20 = vpop.f32.mrf.mxu1 }
  0xde   : > { %901 = vst.msk [vmem:[%s1562_s29 + $0x10] sm:$0xff] %vm317_vm1, %v591_v17  ;;  %933 = vst.msk [vmem:[%s1562_s29 + $0x110] sm:$0xff] %vm317_vm1, %v751_v18  ;;  %v606_v21 = vadd.f32 %v1231_v19, %v1555_v2  ;;  %v766_v22 = vadd.f32 %v1279_v20, %v1555_v2 }
  0xdf   : > { %v600_v23 = vpop.f32.mrf.mxu0  ;;  %v760_v24 = vpop.f32.mrf.mxu1 }
  0xe0   : > { %904 = vst.msk [vmem:[%s1562_s29 + $0x28] sm:$0xff] %vm317_vm1, %v606_v21  ;;  %936 = vst.msk [vmem:[%s1562_s29 + $0x128] sm:$0xff] %vm317_vm1, %v766_v22  ;;  %v601_v25 = vadd.f32 %v1555_v2, %v600_v23  ;;  %v761_v26 = vadd.f32 %v1555_v2, %v760_v24 }
  0xe1   : > { %v1234_v27 = vpop.f32.mrf.mxu0  ;;  %v1282_v28 = vpop.f32.mrf.mxu1 }
  0xe2   : > { %903 = vst.msk [vmem:[%s1562_s29 + $0x20] sm:$0xff] %vm317_vm1, %v601_v25  ;;  %935 = vst.msk [vmem:[%s1562_s29 + $0x120] sm:$0xff] %vm317_vm1, %v761_v26  ;;  %v616_v29 = vadd.f32 %v1234_v27, %v1555_v2  ;;  %v776_v30 = vadd.f32 %v1282_v28, %v1555_v2 }
  0xe3   : > { %v610_v31 = vpop.f32.mrf.mxu0  ;;  %v770_v32 = vpop.f32.mrf.mxu1 }
  0xe4   : > { %906 = vst.msk [vmem:[%s1562_s29 + $0x38] sm:$0xff] %vm317_vm1, %v616_v29  ;;  %938 = vst.msk [vmem:[%s1562_s29 + $0x138] sm:$0xff] %vm317_vm1, %v776_v30  ;;  %v611_v33 = vadd.f32 %v1555_v2, %v610_v31  ;;  %v771_v34 = vadd.f32 %v1555_v2, %v770_v32 }
  0xe5   : > { %v1237_v35 = vpop.f32.mrf.mxu0  ;;  %v1285_v36 = vpop.f32.mrf.mxu1 }
  0xe6   : > { %905 = vst.msk [vmem:[%s1562_s29 + $0x30] sm:$0xff] %vm317_vm1, %v611_v33  ;;  %937 = vst.msk [vmem:[%s1562_s29 + $0x130] sm:$0xff] %vm317_vm1, %v771_v34  ;;  %v626_v37 = vadd.f32 %v1237_v35, %v1555_v2  ;;  %v786_v38 = vadd.f32 %v1285_v36, %v1555_v2 }
  0xe7   : > { %v620_v39 = vpop.f32.mrf.mxu0  ;;  %v780_v40 = vpop.f32.mrf.mxu1 }
  0xe8   : > { %908 = vst.msk [vmem:[%s1562_s29 + $0x48] sm:$0xff] %vm317_vm1, %v626_v37  ;;  %940 = vst.msk [vmem:[%s1562_s29 + $0x148] sm:$0xff] %vm317_vm1, %v786_v38  ;;  %v621_v41 = vadd.f32 %v1555_v2, %v620_v39  ;;  %v781_v42 = vadd.f32 %v1555_v2, %v780_v40 }
  0xe9   : > { %v1240_v43 = vpop.f32.mrf.mxu0  ;;  %v1288_v44 = vpop.f32.mrf.mxu1 }
  0xea   : > { %907 = vst.msk [vmem:[%s1562_s29 + $0x40] sm:$0xff] %vm317_vm1, %v621_v41  ;;  %939 = vst.msk [vmem:[%s1562_s29 + $0x140] sm:$0xff] %vm317_vm1, %v781_v42  ;;  %v636_v45 = vadd.f32 %v1240_v43, %v1555_v2  ;;  %v796_v46 = vadd.f32 %v1288_v44, %v1555_v2 }
  0xeb   : > { %v630_v47 = vpop.f32.mrf.mxu0  ;;  %v790_v48 = vpop.f32.mrf.mxu1 }
  0xec   : > { %910 = vst.msk [vmem:[%s1562_s29 + $0x58] sm:$0xff] %vm317_vm1, %v636_v45  ;;  %942 = vst.msk [vmem:[%s1562_s29 + $0x158] sm:$0xff] %vm317_vm1, %v796_v46  ;;  %v631_v49 = vadd.f32 %v1555_v2, %v630_v47  ;;  %v791_v50 = vadd.f32 %v1555_v2, %v790_v48 }
  0xed   : > { %v1243_v51 = vpop.f32.mrf.mxu0  ;;  %v1291_v52 = vpop.f32.mrf.mxu1 }
  0xee   : > { %909 = vst.msk [vmem:[%s1562_s29 + $0x50] sm:$0xff] %vm317_vm1, %v631_v49  ;;  %941 = vst.msk [vmem:[%s1562_s29 + $0x150] sm:$0xff] %vm317_vm1, %v791_v50  ;;  %v646_v53 = vadd.f32 %v1243_v51, %v1555_v2  ;;  %v806_v54 = vadd.f32 %v1291_v52, %v1555_v2 }
  0xef   : > { %v640_v55 = vpop.f32.mrf.mxu0  ;;  %v800_v56 = vpop.f32.mrf.mxu1 }
  0xf0   : > { %912 = vst.msk [vmem:[%s1562_s29 + $0x68] sm:$0xff] %vm317_vm1, %v646_v53  ;;  %944 = vst.msk [vmem:[%s1562_s29 + $0x168] sm:$0xff] %vm317_vm1, %v806_v54  ;;  %v641_v57 = vadd.f32 %v1555_v2, %v640_v55  ;;  %v801_v58 = vadd.f32 %v1555_v2, %v800_v56 }
  0xf1   : > { %v1246_v59 = vpop.f32.mrf.mxu0  ;;  %v1294_v60 = vpop.f32.mrf.mxu1 }
  0xf2   : > { %911 = vst.msk [vmem:[%s1562_s29 + $0x60] sm:$0xff] %vm317_vm1, %v641_v57  ;;  %943 = vst.msk [vmem:[%s1562_s29 + $0x160] sm:$0xff] %vm317_vm1, %v801_v58  ;;  %v656_v61 = vadd.f32 %v1246_v59, %v1555_v2  ;;  %v816_v62 = vadd.f32 %v1294_v60, %v1555_v2 }
  0xf3   : > { %v650_v63 = vpop.f32.mrf.mxu0  ;;  %v810_v0 = vpop.f32.mrf.mxu1 }
  0xf4   : > { %914 = vst.msk [vmem:[%s1562_s29 + $0x78] sm:$0xff] %vm317_vm1, %v656_v61  ;;  %946 = vst.msk [vmem:[%s1562_s29 + $0x178] sm:$0xff] %vm317_vm1, %v816_v62  ;;  %v651_v1 = vadd.f32 %v1555_v2, %v650_v63  ;;  %v811_v3 = vadd.f32 %v1555_v2, %v810_v0 }
  0xf5   : > { %v1249_v4 = vpop.f32.mrf.mxu0  ;;  %v1297_v5 = vpop.f32.mrf.mxu1 }
  0xf6   : > { %913 = vst.msk [vmem:[%s1562_s29 + $0x70] sm:$0xff] %vm317_vm1, %v651_v1  ;;  %945 = vst.msk [vmem:[%s1562_s29 + $0x170] sm:$0xff] %vm317_vm1, %v811_v3  ;;  %v666_v6 = vadd.f32 %v1249_v4, %v1555_v2  ;;  %v826_v7 = vadd.f32 %v1297_v5, %v1555_v2 }
  0xf7   : > { %v660_v8 = vpop.f32.mrf.mxu0  ;;  %v820_v9 = vpop.f32.mrf.mxu1 }
  0xf8   : > { %916 = vst.msk [vmem:[%s1562_s29 + $0x88] sm:$0xff] %vm317_vm1, %v666_v6  ;;  %948 = vst.msk [vmem:[%s1562_s29 + $0x188] sm:$0xff] %vm317_vm1, %v826_v7  ;;  %v661_v10 = vadd.f32 %v1555_v2, %v660_v8  ;;  %v821_v11 = vadd.f32 %v1555_v2, %v820_v9 }
  0xf9   : > { %v1252_v12 = vpop.f32.mrf.mxu0  ;;  %v1300_v13 = vpop.f32.mrf.mxu1 }
  0xfa   : > { %915 = vst.msk [vmem:[%s1562_s29 + $0x80] sm:$0xff] %vm317_vm1, %v661_v10  ;;  %947 = vst.msk [vmem:[%s1562_s29 + $0x180] sm:$0xff] %vm317_vm1, %v821_v11  ;;  %v676_v14 = vadd.f32 %v1252_v12, %v1555_v2  ;;  %v836_v15 = vadd.f32 %v1300_v13, %v1555_v2 }
  0xfb   : > { %v670_v16 = vpop.f32.mrf.mxu0  ;;  %v830_v17 = vpop.f32.mrf.mxu1 }
  0xfc   : > { %918 = vst.msk [vmem:[%s1562_s29 + $0x98] sm:$0xff] %vm317_vm1, %v676_v14  ;;  %950 = vst.msk [vmem:[%s1562_s29 + $0x198] sm:$0xff] %vm317_vm1, %v836_v15  ;;  %v671_v18 = vadd.f32 %v1555_v2, %v670_v16  ;;  %v831_v19 = vadd.f32 %v1555_v2, %v830_v17 }
  0xfd   : > { %v1255_v20 = vpop.f32.mrf.mxu0  ;;  %v1303_v21 = vpop.f32.mrf.mxu1 }
  0xfe   : > { %917 = vst.msk [vmem:[%s1562_s29 + $0x90] sm:$0xff] %vm317_vm1, %v671_v18  ;;  %949 = vst.msk [vmem:[%s1562_s29 + $0x190] sm:$0xff] %vm317_vm1, %v831_v19  ;;  %v686_v22 = vadd.f32 %v1255_v20, %v1555_v2  ;;  %v846_v23 = vadd.f32 %v1303_v21, %v1555_v2 }
  0xff   : > { %v680_v24 = vpop.f32.mrf.mxu0  ;;  %v840_v25 = vpop.f32.mrf.mxu1 }
 0x100   : > { %920 = vst.msk [vmem:[%s1562_s29 + $0xa8] sm:$0xff] %vm317_vm1, %v686_v22  ;;  %952 = vst.msk [vmem:[%s1562_s29 + $0x1a8] sm:$0xff] %vm317_vm1, %v846_v23  ;;  %v681_v26 = vadd.f32 %v1555_v2, %v680_v24  ;;  %v841_v27 = vadd.f32 %v1555_v2, %v840_v25 }
 0x101   : > { %v1258_v28 = vpop.f32.mrf.mxu0  ;;  %v1306_v29 = vpop.f32.mrf.mxu1 }
 0x102   : > { %919 = vst.msk [vmem:[%s1562_s29 + $0xa0] sm:$0xff] %vm317_vm1, %v681_v26  ;;  %951 = vst.msk [vmem:[%s1562_s29 + $0x1a0] sm:$0xff] %vm317_vm1, %v841_v27  ;;  %v696_v30 = vadd.f32 %v1258_v28, %v1555_v2  ;;  %v856_v31 = vadd.f32 %v1306_v29, %v1555_v2 }
 0x103   : > { %v690_v32 = vpop.f32.mrf.mxu0  ;;  %v850_v33 = vpop.f32.mrf.mxu1 }
 0x104   : > { %922 = vst.msk [vmem:[%s1562_s29 + $0xb8] sm:$0xff] %vm317_vm1, %v696_v30  ;;  %954 = vst.msk [vmem:[%s1562_s29 + $0x1b8] sm:$0xff] %vm317_vm1, %v856_v31  ;;  %v691_v34 = vadd.f32 %v1555_v2, %v690_v32  ;;  %v851_v35 = vadd.f32 %v1555_v2, %v850_v33 }
 0x105   : > { %v1261_v36 = vpop.f32.mrf.mxu0  ;;  %v1309_v37 = vpop.f32.mrf.mxu1 }
 0x106   : > { %921 = vst.msk [vmem:[%s1562_s29 + $0xb0] sm:$0xff] %vm317_vm1, %v691_v34  ;;  %953 = vst.msk [vmem:[%s1562_s29 + $0x1b0] sm:$0xff] %vm317_vm1, %v851_v35  ;;  %v706_v38 = vadd.f32 %v1261_v36, %v1555_v2  ;;  %v866_v39 = vadd.f32 %v1309_v37, %v1555_v2 }
 0x107   : > { %v700_v40 = vpop.f32.mrf.mxu0  ;;  %v860_v41 = vpop.f32.mrf.mxu1 }
 0x108   : > { %924 = vst.msk [vmem:[%s1562_s29 + $0xc8] sm:$0xff] %vm317_vm1, %v706_v38  ;;  %956 = vst.msk [vmem:[%s1562_s29 + $0x1c8] sm:$0xff] %vm317_vm1, %v866_v39  ;;  %v701_v42 = vadd.f32 %v1555_v2, %v700_v40  ;;  %v861_v43 = vadd.f32 %v1555_v2, %v860_v41 }
 0x109   : > { %v1264_v44 = vpop.f32.mrf.mxu0  ;;  %v1312_v45 = vpop.f32.mrf.mxu1 }
 0x10a   : > { %923 = vst.msk [vmem:[%s1562_s29 + $0xc0] sm:$0xff] %vm317_vm1, %v701_v42  ;;  %955 = vst.msk [vmem:[%s1562_s29 + $0x1c0] sm:$0xff] %vm317_vm1, %v861_v43  ;;  %v716_v46 = vadd.f32 %v1264_v44, %v1555_v2  ;;  %v876_v47 = vadd.f32 %v1312_v45, %v1555_v2 }
 0x10b   : > { %v710_v48 = vpop.f32.mrf.mxu0  ;;  %v870_v49 = vpop.f32.mrf.mxu1 }
 0x10c   : > { %926 = vst.msk [vmem:[%s1562_s29 + $0xd8] sm:$0xff] %vm317_vm1, %v716_v46  ;;  %958 = vst.msk [vmem:[%s1562_s29 + $0x1d8] sm:$0xff] %vm317_vm1, %v876_v47  ;;  %v711_v50 = vadd.f32 %v1555_v2, %v710_v48  ;;  %v871_v51 = vadd.f32 %v1555_v2, %v870_v49 }
 0x10d   : > { %v1267_v52 = vpop.f32.mrf.mxu0  ;;  %v1315_v53 = vpop.f32.mrf.mxu1 }
 0x10e   : > { %925 = vst.msk [vmem:[%s1562_s29 + $0xd0] sm:$0xff] %vm317_vm1, %v711_v50  ;;  %957 = vst.msk [vmem:[%s1562_s29 + $0x1d0] sm:$0xff] %vm317_vm1, %v871_v51  ;;  %v726_v54 = vadd.f32 %v1267_v52, %v1555_v2  ;;  %v886_v55 = vadd.f32 %v1315_v53, %v1555_v2 }
 0x10f   : > { %v720_v56 = vpop.f32.mrf.mxu0  ;;  %v880_v57 = vpop.f32.mrf.mxu1 }
 0x110   : > { %928 = vst.msk [vmem:[%s1562_s29 + $0xe8] sm:$0xff] %vm317_vm1, %v726_v54  ;;  %960 = vst.msk [vmem:[%s1562_s29 + $0x1e8] sm:$0xff] %vm317_vm1, %v886_v55  ;;  %v721_v58 = vadd.f32 %v1555_v2, %v720_v56  ;;  %v881_v59 = vadd.f32 %v1555_v2, %v880_v57 }
 0x111   : > { %v1270_v60 = vpop.f32.mrf.mxu0  ;;  %v1318_v61 = vpop.f32.mrf.mxu1 }
 0x112   : > { %927 = vst.msk [vmem:[%s1562_s29 + $0xe0] sm:$0xff] %vm317_vm1, %v721_v58  ;;  %959 = vst.msk [vmem:[%s1562_s29 + $0x1e0] sm:$0xff] %vm317_vm1, %v881_v59  ;;  %v736_v62 = vadd.f32 %v1270_v60, %v1555_v2  ;;  %v896_v63 = vadd.f32 %v1318_v61, %v1555_v2 }
 0x113   : > { %v730_v0 = vpop.f32.mrf.mxu0  ;;  %v890_v1 = vpop.f32.mrf.mxu1 }
 0x114   : > { %930 = vst.msk [vmem:[%s1562_s29 + $0xf8] sm:$0xff] %vm317_vm1, %v736_v62  ;;  %962 = vst.msk [vmem:[%s1562_s29 + $0x1f8] sm:$0xff] %vm317_vm1, %v896_v63  ;;  %v731_v3 = vadd.f32 %v1555_v2, %v730_v0  ;;  %v891_v4 = vadd.f32 %v1555_v2, %v890_v1 }
 0x116   : > { %929 = vst.msk [vmem:[%s1562_s29 + $0xf0] sm:$0xff] %vm317_vm1, %v731_v3  ;;  %961 = vst.msk [vmem:[%s1562_s29 + $0x1f0] sm:$0xff] %vm317_vm1, %v891_v4 }
 0x117 PF: > { %s13_s14 = sadd.s32 1, %s1369_s14   ;;  %s1769_s12 = smov %s1365_s13 }
 0x118   : > { %p10_p5 = scmp.ge.s32.totalorder %s13_s14, 4   ;;  %s1770_s13 = smov %s1772_s15 }
 0x11a   :  { %12 = sbr.rel (!%p10_p5) target bundleno = 2 (0x2), region = 68 }

// kernel: _lambda_.23
= control target key start
LH: loop header
LB: loop body
LE: loop exit
PB: predicated region body
PF: predicated region fallthrough
CT: control target
= control target key end

     0   :  { %s984_s12 = smov 0   ;;  %s986_s13 = smov 0   ;;  %s1207_s0 = inlined_call_operand.vmem [shape: f32[2,256,56], index: 0, kind: input, shape index: {}]   ;;  %s1208_s1 = inlined_call_operand.vmem [shape: f32[2,56,8], index: 1, kind: input, shape index: {}]   ;;  %s1209_s2 = inlined_call_operand.vmem [shape: f32[2,1,8], index: 2, kind: input, shape index: {}]   ;;  %s1210_s3 = inlined_call_operand.vmem [shape: f32[2,256,8], index: 3, kind: output, shape index: {}]  }
   0x1   :  { %s988_s14 = smov 0  }
   0x2 LB: > { %s25_s15 = sadd.s32 1, %s958_s13  ;;  %p757_p0 = scmp.ge.s32.totalorder %s962_s14, 1  ;;  %s962_s14 = sphi %s988_s14, %s13_s14   ;;  %s958_s13 = sphi %s986_s13, %s1212_s13   ;;  %s954_s12 = sphi %s984_s12, %s1211_s12  }
   0x3   : > { %p27_p1 = scmp.ge.s32.totalorder %s25_s15, 2  ;;  %p176_p2 = scmp.lt.s32.totalorder %s962_s14, 3 }
   0x5   : > { %s1214_s15 = smov (%p27_p1, %s25_s15), 0  ;;  %p177_p3 = pnand %p757_p0, %p176_p2 }
   0x6   : > { %p217_p4 = scmp.lt.s32.totalorder (!%p177_p3), %s954_s12, 1 }
   0x7   : > { %180 = sbr.rel (%p177_p3) target bundleno = 258 (0x102), region = 32 }
   0xc   : > { %s1216_s12 = smov (!%p217_p4, %s954_s12), 1  ;;  %vm290_vm0 = vcmask 457728   ;;  %vm612_vm1 = vcmask 64512  }
   0xd   : > { %s798_s16 = sshll.u32 %s1216_s12, 8  ;;  %s915_s17 = smul.u32 56, %s1216_s12 }
   0xe   : > { %s1011_s20 = scalar_lea.vmem %s1207_s0, %s798_s16  ;;  %s233_s26 = scalar_lea.vmem %s1209_s2, %s1216_s12 }
   0xf   : > { %s1016_s23 = scalar_lea.vmem %s1208_s1, %s915_s17  ;;  %v244_v0 = vld [vmem:[%s1011_s20] sm:$0xff]  ;;  %v245_v9 = vld [vmem:[%s1011_s20 + $0x8] sm:$0xff]  ;;  %v246_v11 = vld [vmem:[%s1011_s20 + $0x10] sm:$0xff]  ;;  %s1100_s29 = scalar_lea.vmem %s1210_s3, %s798_s16 }
  0x10   : > { %v260_v1 = vld [vmem:[%s1011_s20 + $0x80] sm:$0xff]  ;;  %v282_v2 = vld [vmem:[%s1016_s23 + $0x30] sm:$0xff]  ;;  %v281_v3 = vld [vmem:[%s1016_s23 + $0x28] sm:$0xff]  ;;  %853 = vmatprep.mubr.msk.f32.mxu0 %vm290_vm0, %v244_v0 }
  0x11   : > { %877 = vmatprep.mubr.msk.f32.mxu1 %vm290_vm0, %v260_v1  ;;  %839 = vmatprep.subr.mxu0 %v282_v2  ;;  %v280_v4 = vld [vmem:[%s1016_s23 + $0x20] sm:$0xff]  ;;  %v279_v5 = vld [vmem:[%s1016_s23 + $0x18] sm:$0xff]  ;;  %v278_v6 = vld [vmem:[%s1016_s23 + $0x10] sm:$0xff] }
  0x12   : > { %901 = vmatprep.subr.mxu1 %v282_v2  ;;  %840 = vmatpush3.msra.mxu0 %v282_v2  ;;  %v277_v7 = vld [vmem:[%s1016_s23 + $0x8] sm:$0xff]  ;;  %v276_v8 = vld [vmem:[%s1016_s23] sm:$0xff]  ;;  %v262_v12 = vld [vmem:[%s1011_s20 + $0x90] sm:$0xff] }
  0x13   : > { %908 = vmatpush3.msra.mxu1 %v282_v2  ;;  %841 = vmatprep.subr.mxu0 %v281_v3  ;;  %v261_v10 = vld [vmem:[%s1011_s20 + $0x88] sm:$0xff]  ;;  %v247_v13 = vld [vmem:[%s1011_s20 + $0x18] sm:$0xff]  ;;  %v248_v15 = vld [vmem:[%s1011_s20 + $0x20] sm:$0xff] }
  0x14   : > { %902 = vmatprep.subr.mxu1 %v281_v3  ;;  %842 = vmatpush3.msra.mxu0 %v281_v3  ;;  %v263_v14 = vld [vmem:[%s1011_s20 + $0x98] sm:$0xff]  ;;  %v264_v16 = vld [vmem:[%s1011_s20 + $0xa0] sm:$0xff]  ;;  %v249_v17 = vld [vmem:[%s1011_s20 + $0x28] sm:$0xff] }
  0x15   : > { %909 = vmatpush3.msra.mxu1 %v281_v3  ;;  %843 = vmatprep.subr.mxu0 %v280_v4  ;;  %v265_v18 = vld [vmem:[%s1011_s20 + $0xa8] sm:$0xff]  ;;  %v250_v19 = vld [vmem:[%s1011_s20 + $0x30] sm:$0xff]  ;;  %v251_v21 = vld [vmem:[%s1011_s20 + $0x38] sm:$0xff] }
  0x16   : > { %903 = vmatprep.subr.mxu1 %v280_v4  ;;  %844 = vmatpush3.msra.mxu0 %v280_v4  ;;  %v266_v20 = vld [vmem:[%s1011_s20 + $0xb0] sm:$0xff]  ;;  %v267_v22 = vld [vmem:[%s1011_s20 + $0xb8] sm:$0xff]  ;;  %v252_v23 = vld [vmem:[%s1011_s20 + $0x40] sm:$0xff] }
  0x17   : > { %910 = vmatpush3.msra.mxu1 %v280_v4  ;;  %845 = vmatprep.subr.mxu0 %v279_v5  ;;  %v268_v24 = vld [vmem:[%s1011_s20 + $0xc0] sm:$0xff]  ;;  %v253_v25 = vld [vmem:[%s1011_s20 + $0x48] sm:$0xff]  ;;  %v254_v27 = vld [vmem:[%s1011_s20 + $0x50] sm:$0xff] }
  0x18   : > { %904 = vmatprep.subr.mxu1 %v279_v5  ;;  %846 = vmatpush3.msra.mxu0 %v279_v5  ;;  %v269_v26 = vld [vmem:[%s1011_s20 + $0xc8] sm:$0xff]  ;;  %v270_v28 = vld [vmem:[%s1011_s20 + $0xd0] sm:$0xff]  ;;  %v255_v29 = vld [vmem:[%s1011_s20 + $0x58] sm:$0xff] }
  0x19   : > { %911 = vmatpush3.msra.mxu1 %v279_v5  ;;  %847 = vmatprep.subr.mxu0 %v278_v6  ;;  %v271_v30 = vld [vmem:[%s1011_s20 + $0xd8] sm:$0xff]  ;;  %v256_v31 = vld [vmem:[%s1011_s20 + $0x60] sm:$0xff]  ;;  %v257_v33 = vld [vmem:[%s1011_s20 + $0x68] sm:$0xff] }
  0x1a   : > { %905 = vmatprep.subr.mxu1 %v278_v6  ;;  %848 = vmatpush3.msra.mxu0 %v278_v6  ;;  %v272_v32 = vld [vmem:[%s1011_s20 + $0xe0] sm:$0xff]  ;;  %v273_v34 = vld [vmem:[%s1011_s20 + $0xe8] sm:$0xff]  ;;  %v258_v35 = vld [vmem:[%s1011_s20 + $0x70] sm:$0xff] }
  0x1b   : > { %912 = vmatpush3.msra.mxu1 %v278_v6  ;;  %849 = vmatprep.subr.mxu0 %v277_v7  ;;  %v274_v36 = vld [vmem:[%s1011_s20 + $0xf0] sm:$0xff]  ;;  %v259_v37 = vld [vmem:[%s1011_s20 + $0x78] sm:$0xff]  ;;  %v1093_v39 = vld [vmem:[%s233_s26] ss:$0 sm:$0xff] }
  0x1c   : > { %906 = vmatprep.subr.mxu1 %v277_v7  ;;  %850 = vmatpush3.msra.mxu0 %v277_v7  ;;  %v275_v38 = vld [vmem:[%s1011_s20 + $0xf8] sm:$0xff] }
  0x1d   : > { %913 = vmatpush3.msra.mxu1 %v277_v7  ;;  %851 = vmatprep.subr.mxu0 %v276_v8 }
  0x1e   : > { %907 = vmatprep.subr.mxu1 %v276_v8  ;;  %852 = vmatpush3.msra.mxu0 %v276_v8 }
  0x1f   : > { %914 = vmatpush3.msra.mxu1 %v276_v8  ;;  %854 = vmatmul.mubr.msk.f32.vlgmr.msra.gmra.mxu0 %vm290_vm0, %v245_v9 }
  0x20   : > { %878 = vmatmul.mubr.msk.f32.vlgmr.msra.gmra.mxu1 %vm290_vm0, %v261_v10  ;;  %856 = vmatprep.mubr.msk.f32.mxu0 %vm290_vm0, %v246_v11 }
  0x21   : > { %880 = vmatprep.mubr.msk.f32.mxu1 %vm290_vm0, %v262_v12 }
  0x23   : > { %857 = vmatmul.mubr.msk.f32.gmra.mxu0 %vm290_vm0, %v247_v13 }
  0x24   : > { %881 = vmatmul.mubr.msk.f32.gmra.mxu1 %vm290_vm0, %v263_v14  ;;  %859 = vmatprep.mubr.msk.f32.mxu0 %vm290_vm0, %v248_v15 }
  0x25   : > { %883 = vmatprep.mubr.msk.f32.mxu1 %vm290_vm0, %v264_v16 }
  0x27   : > { %860 = vmatmul.mubr.msk.f32.gmra.mxu0 %vm290_vm0, %v249_v17 }
  0x28   : > { %884 = vmatmul.mubr.msk.f32.gmra.mxu1 %vm290_vm0, %v265_v18  ;;  %862 = vmatprep.mubr.msk.f32.mxu0 %vm290_vm0, %v250_v19 }
  0x29   : > { %886 = vmatprep.mubr.msk.f32.mxu1 %vm290_vm0, %v266_v20 }
  0x2b   : > { %863 = vmatmul.mubr.msk.f32.gmra.mxu0 %vm290_vm0, %v251_v21 }
  0x2c   : > { %887 = vmatmul.mubr.msk.f32.gmra.mxu1 %vm290_vm0, %v267_v22  ;;  %865 = vmatprep.mubr.msk.f32.mxu0 %vm290_vm0, %v252_v23 }
  0x2d   : > { %889 = vmatprep.mubr.msk.f32.mxu1 %vm290_vm0, %v268_v24 }
  0x2f   : > { %866 = vmatmul.mubr.msk.f32.gmra.mxu0 %vm290_vm0, %v253_v25 }
  0x30   : > { %890 = vmatmul.mubr.msk.f32.gmra.mxu1 %vm290_vm0, %v269_v26  ;;  %868 = vmatprep.mubr.msk.f32.mxu0 %vm290_vm0, %v254_v27 }
  0x31   : > { %892 = vmatprep.mubr.msk.f32.mxu1 %vm290_vm0, %v270_v28 }
  0x33   : > { %869 = vmatmul.mubr.msk.f32.gmra.mxu0 %vm290_vm0, %v255_v29 }
  0x34   : > { %893 = vmatmul.mubr.msk.f32.gmra.mxu1 %vm290_vm0, %v271_v30  ;;  %871 = vmatprep.mubr.msk.f32.mxu0 %vm290_vm0, %v256_v31 }
  0x35   : > { %895 = vmatprep.mubr.msk.f32.mxu1 %vm290_vm0, %v272_v32 }
  0x37   : > { %872 = vmatmul.mubr.msk.f32.gmra.mxu0 %vm290_vm0, %v257_v33 }
  0x38   : > { %896 = vmatmul.mubr.msk.f32.gmra.mxu1 %vm290_vm0, %v273_v34  ;;  %874 = vmatprep.mubr.msk.f32.mxu0 %vm290_vm0, %v258_v35 }
  0x39   : > { %898 = vmatprep.mubr.msk.f32.mxu1 %vm290_vm0, %v274_v36 }
  0x3b   : > { %875 = vmatmul.mubr.msk.f32.gmra.mxu0 %vm290_vm0, %v259_v37 }
  0x3c   : > { %899 = vmatmul.mubr.msk.f32.gmra.mxu1 %vm290_vm0, %v275_v38 }
  0xdf   : > { %v855_v40 = vpop.f32.mrf.mxu0 }
  0xe0   : > { %v879_v41 = vpop.f32.mrf.mxu1  ;;  %v459_v42 = vadd.f32 %v855_v40, %v1093_v39 }
  0xe1   : > { %v539_v43 = vadd.f32 %v879_v41, %v1093_v39  ;;  %v453_v44 = vpop.f32.mrf.mxu0 }
  0xe2   : > { %v533_v45 = vpop.f32.mrf.mxu1  ;;  %614 = vst.msk [vmem:[%s1100_s29 + $0x8] sm:$0xff] %vm612_vm1, %v459_v42  ;;  %v454_v46 = vadd.f32 %v1093_v39, %v453_v44 }
  0xe3   : > { %630 = vst.msk [vmem:[%s1100_s29 + $0x88] sm:$0xff] %vm612_vm1, %v539_v43  ;;  %v534_v47 = vadd.f32 %v1093_v39, %v533_v45  ;;  %v858_v48 = vpop.f32.mrf.mxu0 }
  0xe4   : > { %v882_v49 = vpop.f32.mrf.mxu1  ;;  %613 = vst.msk [vmem:[%s1100_s29] sm:$0xff] %vm612_vm1, %v454_v46  ;;  %v469_v50 = vadd.f32 %v858_v48, %v1093_v39 }
  0xe5   : > { %629 = vst.msk [vmem:[%s1100_s29 + $0x80] sm:$0xff] %vm612_vm1, %v534_v47  ;;  %v549_v51 = vadd.f32 %v882_v49, %v1093_v39  ;;  %v463_v52 = vpop.f32.mrf.mxu0 }
  0xe6   : > { %v543_v53 = vpop.f32.mrf.mxu1  ;;  %616 = vst.msk [vmem:[%s1100_s29 + $0x18] sm:$0xff] %vm612_vm1, %v469_v50  ;;  %v464_v54 = vadd.f32 %v1093_v39, %v463_v52 }
  0xe7   : > { %632 = vst.msk [vmem:[%s1100_s29 + $0x98] sm:$0xff] %vm612_vm1, %v549_v51  ;;  %v544_v55 = vadd.f32 %v1093_v39, %v543_v53  ;;  %v861_v56 = vpop.f32.mrf.mxu0 }
  0xe8   : > { %v885_v57 = vpop.f32.mrf.mxu1  ;;  %615 = vst.msk [vmem:[%s1100_s29 + $0x10] sm:$0xff] %vm612_vm1, %v464_v54  ;;  %v479_v58 = vadd.f32 %v861_v56, %v1093_v39 }
  0xe9   : > { %631 = vst.msk [vmem:[%s1100_s29 + $0x90] sm:$0xff] %vm612_vm1, %v544_v55  ;;  %v559_v59 = vadd.f32 %v885_v57, %v1093_v39  ;;  %v473_v60 = vpop.f32.mrf.mxu0 }
  0xea   : > { %v553_v61 = vpop.f32.mrf.mxu1  ;;  %618 = vst.msk [vmem:[%s1100_s29 + $0x28] sm:$0xff] %vm612_vm1, %v479_v58  ;;  %v474_v62 = vadd.f32 %v1093_v39, %v473_v60 }
  0xeb   : > { %634 = vst.msk [vmem:[%s1100_s29 + $0xa8] sm:$0xff] %vm612_vm1, %v559_v59  ;;  %v554_v63 = vadd.f32 %v1093_v39, %v553_v61  ;;  %v864_v0 = vpop.f32.mrf.mxu0 }
  0xec   : > { %v888_v1 = vpop.f32.mrf.mxu1  ;;  %617 = vst.msk [vmem:[%s1100_s29 + $0x20] sm:$0xff] %vm612_vm1, %v474_v62  ;;  %v489_v2 = vadd.f32 %v864_v0, %v1093_v39 }
  0xed   : > { %633 = vst.msk [vmem:[%s1100_s29 + $0xa0] sm:$0xff] %vm612_vm1, %v554_v63  ;;  %v569_v3 = vadd.f32 %v888_v1, %v1093_v39  ;;  %v483_v4 = vpop.f32.mrf.mxu0 }
  0xee   : > { %v563_v5 = vpop.f32.mrf.mxu1  ;;  %620 = vst.msk [vmem:[%s1100_s29 + $0x38] sm:$0xff] %vm612_vm1, %v489_v2  ;;  %v484_v6 = vadd.f32 %v1093_v39, %v483_v4 }
  0xef   : > { %636 = vst.msk [vmem:[%s1100_s29 + $0xb8] sm:$0xff] %vm612_vm1, %v569_v3  ;;  %v564_v7 = vadd.f32 %v1093_v39, %v563_v5  ;;  %v867_v8 = vpop.f32.mrf.mxu0 }
  0xf0   : > { %v891_v9 = vpop.f32.mrf.mxu1  ;;  %619 = vst.msk [vmem:[%s1100_s29 + $0x30] sm:$0xff] %vm612_vm1, %v484_v6  ;;  %v499_v10 = vadd.f32 %v867_v8, %v1093_v39 }
  0xf1   : > { %635 = vst.msk [vmem:[%s1100_s29 + $0xb0] sm:$0xff] %vm612_vm1, %v564_v7  ;;  %v579_v11 = vadd.f32 %v891_v9, %v1093_v39  ;;  %v493_v12 = vpop.f32.mrf.mxu0 }
  0xf2   : > { %v573_v13 = vpop.f32.mrf.mxu1  ;;  %622 = vst.msk [vmem:[%s1100_s29 + $0x48] sm:$0xff] %vm612_vm1, %v499_v10  ;;  %v494_v14 = vadd.f32 %v1093_v39, %v493_v12 }
  0xf3   : > { %638 = vst.msk [vmem:[%s1100_s29 + $0xc8] sm:$0xff] %vm612_vm1, %v579_v11  ;;  %v574_v15 = vadd.f32 %v1093_v39, %v573_v13  ;;  %v870_v16 = vpop.f32.mrf.mxu0 }
  0xf4   : > { %v894_v17 = vpop.f32.mrf.mxu1  ;;  %621 = vst.msk [vmem:[%s1100_s29 + $0x40] sm:$0xff] %vm612_vm1, %v494_v14  ;;  %v509_v18 = vadd.f32 %v870_v16, %v1093_v39 }
  0xf5   : > { %637 = vst.msk [vmem:[%s1100_s29 + $0xc0] sm:$0xff] %vm612_vm1, %v574_v15  ;;  %v589_v19 = vadd.f32 %v894_v17, %v1093_v39  ;;  %v503_v20 = vpop.f32.mrf.mxu0 }
  0xf6   : > { %v583_v21 = vpop.f32.mrf.mxu1  ;;  %624 = vst.msk [vmem:[%s1100_s29 + $0x58] sm:$0xff] %vm612_vm1, %v509_v18  ;;  %v504_v22 = vadd.f32 %v1093_v39, %v503_v20 }
  0xf7   : > { %640 = vst.msk [vmem:[%s1100_s29 + $0xd8] sm:$0xff] %vm612_vm1, %v589_v19  ;;  %v584_v23 = vadd.f32 %v1093_v39, %v583_v21  ;;  %v873_v24 = vpop.f32.mrf.mxu0 }
  0xf8   : > { %v897_v25 = vpop.f32.mrf.mxu1  ;;  %623 = vst.msk [vmem:[%s1100_s29 + $0x50] sm:$0xff] %vm612_vm1, %v504_v22  ;;  %v519_v26 = vadd.f32 %v873_v24, %v1093_v39 }
  0xf9   : > { %639 = vst.msk [vmem:[%s1100_s29 + $0xd0] sm:$0xff] %vm612_vm1, %v584_v23  ;;  %v599_v27 = vadd.f32 %v897_v25, %v1093_v39  ;;  %v513_v28 = vpop.f32.mrf.mxu0 }
  0xfa   : > { %v593_v29 = vpop.f32.mrf.mxu1  ;;  %626 = vst.msk [vmem:[%s1100_s29 + $0x68] sm:$0xff] %vm612_vm1, %v519_v26  ;;  %v514_v30 = vadd.f32 %v1093_v39, %v513_v28 }
  0xfb   : > { %642 = vst.msk [vmem:[%s1100_s29 + $0xe8] sm:$0xff] %vm612_vm1, %v599_v27  ;;  %v594_v31 = vadd.f32 %v1093_v39, %v593_v29  ;;  %v876_v32 = vpop.f32.mrf.mxu0 }
  0xfc   : > { %v900_v33 = vpop.f32.mrf.mxu1  ;;  %625 = vst.msk [vmem:[%s1100_s29 + $0x60] sm:$0xff] %vm612_vm1, %v514_v30  ;;  %v529_v34 = vadd.f32 %v876_v32, %v1093_v39 }
  0xfd   : > { %641 = vst.msk [vmem:[%s1100_s29 + $0xe0] sm:$0xff] %vm612_vm1, %v594_v31  ;;  %v609_v35 = vadd.f32 %v900_v33, %v1093_v39  ;;  %v523_v36 = vpop.f32.mrf.mxu0 }
  0xfe   : > { %v603_v37 = vpop.f32.mrf.mxu1  ;;  %628 = vst.msk [vmem:[%s1100_s29 + $0x78] sm:$0xff] %vm612_vm1, %v529_v34  ;;  %v524_v38 = vadd.f32 %v1093_v39, %v523_v36 }
  0xff   : > { %644 = vst.msk [vmem:[%s1100_s29 + $0xf8] sm:$0xff] %vm612_vm1, %v609_v35  ;;  %v604_v40 = vadd.f32 %v1093_v39, %v603_v37 }
 0x100   : > { %627 = vst.msk [vmem:[%s1100_s29 + $0x70] sm:$0xff] %vm612_vm1, %v524_v38 }
 0x101   : > { %643 = vst.msk [vmem:[%s1100_s29 + $0xf0] sm:$0xff] %vm612_vm1, %v604_v40 }
 0x102 PF: > { %s13_s14 = sadd.s32 1, %s962_s14   ;;  %s1211_s12 = smov %s958_s13 }
 0x103   : > { %p10_p5 = scmp.ge.s32.totalorder %s13_s14, 4   ;;  %s1212_s13 = smov %s1214_s15 }
 0x105   :  { %12 = sbr.rel (!%p10_p5) target bundleno = 2 (0x2), region = 68 }

// kernel: _lambda_.24
= control target key start
LH: loop header
LB: loop body
LE: loop exit
PB: predicated region body
PF: predicated region fallthrough
CT: control target
= control target key end

     0   :  { %s739_s12 = smov 0   ;;  %s741_s13 = smov 0   ;;  %s855_s0 = inlined_call_operand.vmem [shape: f32[2,128,16], index: 0, kind: input, shape index: {}]   ;;  %s856_s1 = inlined_call_operand.vmem [shape: f32[2,16,24], index: 1, kind: input, shape index: {}]   ;;  %s857_s2 = inlined_call_operand.vmem [shape: f32[2,1,24], index: 2, kind: input, shape index: {}]   ;;  %s858_s3 = inlined_call_operand.vmem [shape: f32[2,128,24], index: 3, kind: output, shape index: {}]  }
   0x1   :  { %s743_s14 = smov 0  }
   0x2 LB: > { %s25_s15 = sadd.s32 1, %s713_s13  ;;  %p592_p0 = scmp.ge.s32.totalorder %s717_s14, 1  ;;  %s717_s14 = sphi %s743_s14, %s13_s14   ;;  %s713_s13 = sphi %s741_s13, %s860_s13   ;;  %s709_s12 = sphi %s739_s12, %s859_s12  }
   0x3   : > { %p27_p1 = scmp.ge.s32.totalorder %s25_s15, 2  ;;  %p176_p2 = scmp.lt.s32.totalorder %s717_s14, 3 }
   0x5   : > { %s862_s15 = smov (%p27_p1, %s25_s15), 0  ;;  %p177_p3 = pnand %p592_p0, %p176_p2 }
   0x6   : > { %p217_p4 = scmp.lt.s32.totalorder (!%p177_p3), %s709_s12, 1 }
   0x7   : > { %180 = sbr.rel (%p177_p3) target bundleno = 231 (0xe7), region = 32 }
   0xc   : > { %s864_s12 = smov (!%p217_p4, %s709_s12), 1  ;;  %vm269_vm0 = vcmask 130048   ;;  %vm463_vm1 = vcmask 195584  }
   0xd   : > { %s618_s16 = sshll.u32 %s864_s12, 7  ;;  %s619_s17 = sshll.u32 %s864_s12, 4 }
   0xe   : > { %s766_s20 = scalar_lea.vmem %s855_s0, %s618_s16  ;;  %s230_s23 = scalar_lea.vmem %s856_s1, %s619_s17 }
   0xf   : > { %v261_v0 = vld [vmem:[%s230_s23 + $0x8] sm:$0xff]  ;;  %v260_v1 = vld [vmem:[%s230_s23] sm:$0xff]  ;;  %v246_v6 = vld [vmem:[%s766_s20 + $0x10] sm:$0xff]  ;;  %s233_s26 = scalar_lea.vmem %s857_s2, %s864_s12  ;;  %s812_s29 = scalar_lea.vmem %s858_s3, %s618_s16 }
  0x10   : > { %639 = vmatprep.subr.mxu0 %v261_v0  ;;  %667 = vmatprep.subr.mxu1 %v261_v0  ;;  %v244_v2 = vld [vmem:[%s766_s20] sm:$0xff]  ;;  %v245_v4 = vld [vmem:[%s766_s20 + $0x8] sm:$0xff]  ;;  %v254_v7 = vld [vmem:[%s766_s20 + $0x50] sm:$0xff] }
  0x11   : > { %640 = vmatpush3.msra.mxu0 %v261_v0  ;;  %669 = vmatpush3.msra.mxu1 %v261_v0  ;;  %v252_v3 = vld [vmem:[%s766_s20 + $0x40] sm:$0xff]  ;;  %v253_v5 = vld [vmem:[%s766_s20 + $0x48] sm:$0xff]  ;;  %v247_v8 = vld [vmem:[%s766_s20 + $0x18] sm:$0xff] }
  0x12   : > { %641 = vmatprep.subr.mxu0 %v260_v1  ;;  %668 = vmatprep.subr.mxu1 %v260_v1  ;;  %v255_v9 = vld [vmem:[%s766_s20 + $0x58] sm:$0xff]  ;;  %v248_v10 = vld [vmem:[%s766_s20 + $0x20] sm:$0xff]  ;;  %v249_v12 = vld [vmem:[%s766_s20 + $0x28] sm:$0xff] }
  0x13   : > { %642 = vmatpush3.msra.mxu0 %v260_v1  ;;  %670 = vmatpush3.msra.mxu1 %v260_v1  ;;  %v256_v11 = vld [vmem:[%s766_s20 + $0x60] sm:$0xff]  ;;  %v257_v13 = vld [vmem:[%s766_s20 + $0x68] sm:$0xff]  ;;  %v250_v14 = vld [vmem:[%s766_s20 + $0x30] sm:$0xff] }
  0x14   : > { %643 = vmatprep.mubr.msk.f32.mxu0 %vm269_vm0, %v244_v2  ;;  %655 = vmatprep.mubr.msk.f32.mxu1 %vm269_vm0, %v252_v3  ;;  %v258_v15 = vld [vmem:[%s766_s20 + $0x70] sm:$0xff]  ;;  %v251_v16 = vld [vmem:[%s766_s20 + $0x38] sm:$0xff]  ;;  %v599_v18 = vld [vmem:[%s233_s26] ss:$0 sm:$0xff] }
  0x15   : > { %644 = vmatmul.mubr.msk.f32.vlgmr.msra.gmra.mxu0 %vm269_vm0, %v245_v4  ;;  %656 = vmatmul.mubr.msk.f32.vlgmr.msra.gmra.mxu1 %vm269_vm0, %v253_v5  ;;  %v259_v17 = vld [vmem:[%s766_s20 + $0x78] sm:$0xff] }
  0x16   : > { %646 = vmatprep.mubr.msk.f32.mxu0 %vm269_vm0, %v246_v6  ;;  %658 = vmatprep.mubr.msk.f32.mxu1 %vm269_vm0, %v254_v7 }
  0x19   : > { %647 = vmatmul.mubr.msk.f32.gmra.mxu0 %vm269_vm0, %v247_v8  ;;  %659 = vmatmul.mubr.msk.f32.gmra.mxu1 %vm269_vm0, %v255_v9 }
  0x1a   : > { %649 = vmatprep.mubr.msk.f32.mxu0 %vm269_vm0, %v248_v10  ;;  %661 = vmatprep.mubr.msk.f32.mxu1 %vm269_vm0, %v256_v11 }
  0x1d   : > { %650 = vmatmul.mubr.msk.f32.gmra.mxu0 %vm269_vm0, %v249_v12  ;;  %662 = vmatmul.mubr.msk.f32.gmra.mxu1 %vm269_vm0, %v257_v13 }
  0x1e   : > { %652 = vmatprep.mubr.msk.f32.mxu0 %vm269_vm0, %v250_v14  ;;  %664 = vmatprep.mubr.msk.f32.mxu1 %vm269_vm0, %v258_v15 }
  0x21   : > { %653 = vmatmul.mubr.msk.f32.gmra.mxu0 %vm269_vm0, %v251_v16  ;;  %665 = vmatmul.mubr.msk.f32.gmra.mxu1 %vm269_vm0, %v259_v17 }
  0xd5   : > { %v645_v19 = vpop.f32.mrf.mxu0  ;;  %v657_v20 = vpop.f32.mrf.mxu1 }
  0xd6   : > { %v390_v21 = vadd.f32 %v645_v19, %v599_v18  ;;  %v430_v22 = vadd.f32 %v657_v20, %v599_v18 }
  0xd7   : > { %v384_v23 = vpop.f32.mrf.mxu0  ;;  %v424_v24 = vpop.f32.mrf.mxu1 }
  0xd8   : > { %465 = vst.msk [vmem:[%s812_s29 + $0x8] sm:$0xff] %vm463_vm1, %v390_v21  ;;  %473 = vst.msk [vmem:[%s812_s29 + $0x48] sm:$0xff] %vm463_vm1, %v430_v22  ;;  %v385_v25 = vadd.f32 %v599_v18, %v384_v23  ;;  %v425_v26 = vadd.f32 %v599_v18, %v424_v24 }
  0xd9   : > { %v648_v27 = vpop.f32.mrf.mxu0  ;;  %v660_v28 = vpop.f32.mrf.mxu1 }
  0xda   : > { %464 = vst.msk [vmem:[%s812_s29] sm:$0xff] %vm463_vm1, %v385_v25  ;;  %472 = vst.msk [vmem:[%s812_s29 + $0x40] sm:$0xff] %vm463_vm1, %v425_v26  ;;  %v400_v29 = vadd.f32 %v648_v27, %v599_v18  ;;  %v440_v30 = vadd.f32 %v660_v28, %v599_v18 }
  0xdb   : > { %v394_v31 = vpop.f32.mrf.mxu0  ;;  %v434_v32 = vpop.f32.mrf.mxu1 }
  0xdc   : > { %467 = vst.msk [vmem:[%s812_s29 + $0x18] sm:$0xff] %vm463_vm1, %v400_v29  ;;  %475 = vst.msk [vmem:[%s812_s29 + $0x58] sm:$0xff] %vm463_vm1, %v440_v30  ;;  %v395_v33 = vadd.f32 %v599_v18, %v394_v31  ;;  %v435_v34 = vadd.f32 %v599_v18, %v434_v32 }
  0xdd   : > { %v651_v35 = vpop.f32.mrf.mxu0  ;;  %v663_v36 = vpop.f32.mrf.mxu1 }
  0xde   : > { %466 = vst.msk [vmem:[%s812_s29 + $0x10] sm:$0xff] %vm463_vm1, %v395_v33  ;;  %474 = vst.msk [vmem:[%s812_s29 + $0x50] sm:$0xff] %vm463_vm1, %v435_v34  ;;  %v410_v37 = vadd.f32 %v651_v35, %v599_v18  ;;  %v450_v38 = vadd.f32 %v663_v36, %v599_v18 }
  0xdf   : > { %v404_v39 = vpop.f32.mrf.mxu0  ;;  %v444_v40 = vpop.f32.mrf.mxu1 }
  0xe0   : > { %469 = vst.msk [vmem:[%s812_s29 + $0x28] sm:$0xff] %vm463_vm1, %v410_v37  ;;  %477 = vst.msk [vmem:[%s812_s29 + $0x68] sm:$0xff] %vm463_vm1, %v450_v38  ;;  %v405_v41 = vadd.f32 %v599_v18, %v404_v39  ;;  %v445_v42 = vadd.f32 %v599_v18, %v444_v40 }
  0xe1   : > { %v654_v43 = vpop.f32.mrf.mxu0  ;;  %v666_v44 = vpop.f32.mrf.mxu1 }
  0xe2   : > { %468 = vst.msk [vmem:[%s812_s29 + $0x20] sm:$0xff] %vm463_vm1, %v405_v41  ;;  %476 = vst.msk [vmem:[%s812_s29 + $0x60] sm:$0xff] %vm463_vm1, %v445_v42  ;;  %v420_v45 = vadd.f32 %v654_v43, %v599_v18  ;;  %v460_v46 = vadd.f32 %v666_v44, %v599_v18 }
  0xe3   : > { %v414_v47 = vpop.f32.mrf.mxu0  ;;  %v454_v48 = vpop.f32.mrf.mxu1 }
  0xe4   : > { %471 = vst.msk [vmem:[%s812_s29 + $0x38] sm:$0xff] %vm463_vm1, %v420_v45  ;;  %479 = vst.msk [vmem:[%s812_s29 + $0x78] sm:$0xff] %vm463_vm1, %v460_v46  ;;  %v415_v49 = vadd.f32 %v599_v18, %v414_v47  ;;  %v455_v50 = vadd.f32 %v599_v18, %v454_v48 }
  0xe6   : > { %470 = vst.msk [vmem:[%s812_s29 + $0x30] sm:$0xff] %vm463_vm1, %v415_v49  ;;  %478 = vst.msk [vmem:[%s812_s29 + $0x70] sm:$0xff] %vm463_vm1, %v455_v50 }
  0xe7 PF: > { %s13_s14 = sadd.s32 1, %s717_s14   ;;  %s859_s12 = smov %s713_s13 }
  0xe8   : > { %p10_p5 = scmp.ge.s32.totalorder %s13_s14, 4   ;;  %s860_s13 = smov %s862_s15 }
  0xea   :  { %12 = sbr.rel (!%p10_p5) target bundleno = 2 (0x2), region = 68 }

// kernel: _lambda_.20
= control target key start
LH: loop header
LB: loop body
LE: loop exit
PB: predicated region body
PF: predicated region fallthrough
CT: control target
= control target key end

     0   :  { %s630_s12 = smov 0   ;;  %s632_s13 = smov 0   ;;  %s694_s0 = inlined_call_operand.vmem [shape: f32[2,64,16], index: 0, kind: input, shape index: {}]   ;;  %s695_s1 = inlined_call_operand.vmem [shape: f32[2,16,16], index: 1, kind: input, shape index: {}]   ;;  %s696_s2 = inlined_call_operand.vmem [shape: f32[2,1,16], index: 2, kind: input, shape index: {}]   ;;  %s697_s3 = inlined_call_operand.vmem [shape: f32[2,64,16], index: 3, kind: output, shape index: {}]  }
   0x1   :  { %s634_s14 = smov 0  }
   0x2 LB: > { %s25_s15 = sadd.s32 1, %s604_s13  ;;  %p511_p0 = scmp.ge.s32.totalorder %s608_s14, 1  ;;  %s608_s14 = sphi %s634_s14, %s13_s14   ;;  %s604_s13 = sphi %s632_s13, %s699_s13   ;;  %s600_s12 = sphi %s630_s12, %s698_s12  }
   0x3   : > { %p27_p1 = scmp.ge.s32.totalorder %s25_s15, 2  ;;  %p176_p2 = scmp.lt.s32.totalorder %s608_s14, 3 }
   0x5   : > { %s701_s15 = smov (%p27_p1, %s25_s15), 0  ;;  %p177_p3 = pnand %p511_p0, %p176_p2 }
   0x6   : > { %p217_p4 = scmp.lt.s32.totalorder (!%p177_p3), %s600_s12, 1 }
   0x7   : > { %180 = sbr.rel (%p177_p3) target bundleno = 223 (0xdf), region = 32 }
   0xc   : > { %s703_s12 = smov (!%p217_p4, %s600_s12), 1  ;;  %vm261_vm0 = vcmask 130048  }
   0xd   : > { %s529_s16 = sshll.u32 %s703_s12, 6  ;;  %s530_s17 = sshll.u32 %s703_s12, 4 }
   0xe   : > { %s224_s20 = scalar_lea.vmem %s694_s0, %s529_s16  ;;  %s230_s23 = scalar_lea.vmem %s695_s1, %s530_s17 }
   0xf   : > { %v253_v0 = vld [vmem:[%s230_s23 + $0x8] sm:$0xff]  ;;  %v252_v1 = vld [vmem:[%s230_s23] sm:$0xff]  ;;  %v246_v6 = vld [vmem:[%s224_s20 + $0x10] sm:$0xff]  ;;  %s233_s26 = scalar_lea.vmem %s696_s2, %s703_s12  ;;  %s242_s29 = scalar_lea.vmem %s697_s3, %s529_s16 }
  0x10   : > { %542 = vmatprep.subr.mxu0 %v253_v0  ;;  %558 = vmatprep.subr.mxu1 %v253_v0  ;;  %v244_v2 = vld [vmem:[%s224_s20] sm:$0xff]  ;;  %v245_v4 = vld [vmem:[%s224_s20 + $0x8] sm:$0xff]  ;;  %v250_v7 = vld [vmem:[%s224_s20 + $0x30] sm:$0xff] }
  0x11   : > { %543 = vmatpush3.msra.mxu0 %v253_v0  ;;  %560 = vmatpush3.msra.mxu1 %v253_v0  ;;  %v248_v3 = vld [vmem:[%s224_s20 + $0x20] sm:$0xff]  ;;  %v249_v5 = vld [vmem:[%s224_s20 + $0x28] sm:$0xff]  ;;  %v247_v8 = vld [vmem:[%s224_s20 + $0x18] sm:$0xff] }
  0x12   : > { %544 = vmatprep.subr.mxu0 %v252_v1  ;;  %559 = vmatprep.subr.mxu1 %v252_v1  ;;  %v251_v9 = vld [vmem:[%s224_s20 + $0x38] sm:$0xff]  ;;  %v518_v10 = vld [vmem:[%s233_s26] ss:$0 sm:$0xff] }
  0x13   : > { %545 = vmatpush3.msra.mxu0 %v252_v1  ;;  %561 = vmatpush3.msra.mxu1 %v252_v1 }
  0x14   : > { %546 = vmatprep.mubr.msk.f32.mxu0 %vm261_vm0, %v244_v2  ;;  %552 = vmatprep.mubr.msk.f32.mxu1 %vm261_vm0, %v248_v3 }
  0x15   : > { %547 = vmatmul.mubr.msk.f32.vlgmr.msra.gmra.mxu0 %vm261_vm0, %v245_v4  ;;  %553 = vmatmul.mubr.msk.f32.vlgmr.msra.gmra.mxu1 %vm261_vm0, %v249_v5 }
  0x16   : > { %549 = vmatprep.mubr.msk.f32.mxu0 %vm261_vm0, %v246_v6  ;;  %555 = vmatprep.mubr.msk.f32.mxu1 %vm261_vm0, %v250_v7 }
  0x19   : > { %550 = vmatmul.mubr.msk.f32.gmra.mxu0 %vm261_vm0, %v247_v8  ;;  %556 = vmatmul.mubr.msk.f32.gmra.mxu1 %vm261_vm0, %v251_v9 }
  0xd5   : > { %v548_v11 = vpop.f32.mrf.mxu0  ;;  %v554_v12 = vpop.f32.mrf.mxu1 }
  0xd6   : > { %v358_v13 = vadd.f32 %v548_v11, %v518_v10  ;;  %v378_v14 = vadd.f32 %v554_v12, %v518_v10 }
  0xd7   : > { %v352_v15 = vpop.f32.mrf.mxu0  ;;  %v372_v16 = vpop.f32.mrf.mxu1 }
  0xd8   : > { %392 = vst.msk [vmem:[%s242_s29 + $0x8] sm:$0xff] %vm261_vm0, %v358_v13  ;;  %396 = vst.msk [vmem:[%s242_s29 + $0x28] sm:$0xff] %vm261_vm0, %v378_v14  ;;  %v353_v17 = vadd.f32 %v518_v10, %v352_v15  ;;  %v373_v18 = vadd.f32 %v518_v10, %v372_v16 }
  0xd9   : > { %v551_v19 = vpop.f32.mrf.mxu0  ;;  %v557_v20 = vpop.f32.mrf.mxu1 }
  0xda   : > { %391 = vst.msk [vmem:[%s242_s29] sm:$0xff] %vm261_vm0, %v353_v17  ;;  %395 = vst.msk [vmem:[%s242_s29 + $0x20] sm:$0xff] %vm261_vm0, %v373_v18  ;;  %v368_v21 = vadd.f32 %v551_v19, %v518_v10  ;;  %v388_v22 = vadd.f32 %v557_v20, %v518_v10 }
  0xdb   : > { %v362_v23 = vpop.f32.mrf.mxu0  ;;  %v382_v24 = vpop.f32.mrf.mxu1 }
  0xdc   : > { %394 = vst.msk [vmem:[%s242_s29 + $0x18] sm:$0xff] %vm261_vm0, %v368_v21  ;;  %398 = vst.msk [vmem:[%s242_s29 + $0x38] sm:$0xff] %vm261_vm0, %v388_v22  ;;  %v363_v25 = vadd.f32 %v518_v10, %v362_v23  ;;  %v383_v26 = vadd.f32 %v518_v10, %v382_v24 }
  0xde   : > { %393 = vst.msk [vmem:[%s242_s29 + $0x10] sm:$0xff] %vm261_vm0, %v363_v25  ;;  %397 = vst.msk [vmem:[%s242_s29 + $0x30] sm:$0xff] %vm261_vm0, %v383_v26 }
  0xdf PF: > { %s13_s14 = sadd.s32 1, %s608_s14   ;;  %s698_s12 = smov %s604_s13 }
  0xe0   : > { %p10_p5 = scmp.ge.s32.totalorder %s13_s14, 4   ;;  %s699_s13 = smov %s701_s15 }
  0xe2   :  { %12 = sbr.rel (!%p10_p5) target bundleno = 2 (0x2), region = 68 }

// kernel: _lambda_.26
= control target key start
LH: loop header
LB: loop body
LE: loop exit
PB: predicated region body
PF: predicated region fallthrough
CT: control target
= control target key end

     0   :  { %vm23_vm0 = vcmask 64512   ;;  %v113_v0 = vmov 0.0   ;;  %vm114_vm1 = vmmov 0   ;;  %s147_s1 = inlined_call_operand.vmem [shape: f32[1,8,128], index: 1, kind: input, shape index: {}]   ;;  %s148_s0 = inlined_call_operand.vmem [shape: f32[1,8,8], index: 0, kind: input, shape index: {}]   ;;  %s149_s2 = inlined_call_operand.vmem [shape: f32[1,1,128], index: 2, kind: input, shape index: {}]   ;;  %s150_s3 = inlined_call_operand.vmem [shape: f32[1,8,128], index: 3, kind: output, shape index: {}]  }
   0x1   :  { %106 = vmatprep.subr.mxu0 %v113_v0  ;;  %v15_v1 = vld [vmem:[%s147_s1] sm:$0xff]  ;;  %108 = vmatprep.mubr.msk.f32.mxu0 %vm114_vm1, %v113_v0 }
   0x2   :  { %v14_v2 = vld [vmem:[%s148_s0] sm:$0xff]  ;;  %107 = vmatpush3.msra.mxu0 %v15_v1 }
   0x3   :  { %109 = vmatmul.mubr.msk.f32.vlgmr.msra.gmra.mxu0 %vm23_vm0, %v14_v2  ;;  %v102_v3 = vld [vmem:[%s149_s2] ss:$0 sm:$0xff] }
  0xc3   :  { %v93_v4 = vpop.f32.mrf.mxu0 }
  0xc4   :  { %v94_v5 = vadd.f32 %v102_v3, %v93_v4 }
  0xc5   :  { %v110_v6 = vpop.f32.mrf.mxu0 }
  0xc6   :  { %97 = vst [vmem:[%s150_s3] sm:$0xff] %v94_v5 }

// kernel: squeeze.29
= control target key start
LH: loop header
LB: loop body
LE: loop exit
PB: predicated region body
PF: predicated region fallthrough
CT: control target
= control target key end

     0   :  { %vm3_vm0 = vcmask 64512   ;;  %s620_s8 = smov 104   ;;  %s621_s9 = smov 112   ;;  %s871_s0 = inlined_call_operand.vmem [shape: f32[1,8,128], index: 0, kind: input, shape index: {}]   ;;  %s872_s1 = inlined_call_operand.vmem [shape: f32[2,16,4,8], index: 1, kind: output, shape index: {}]  }
   0x1   :  { %v19_v0 = vld [vmem:[%s871_s0] sm:$0xff]   ;;  %s619_s0 = smov 120   ;;  %s622_s10 = smov 96  }
   0x2   :  { %20 = vrot.lane.b32.xlu0 %v19_v0, %s619_s0  ;;  %60 = vrot.lane.b32.xlu1 %v19_v0, %s620_s8  ;;  %8 = vst.msk [vmem:[#allocation0 + $0x3e] sm:$0x4] %vm3_vm0, %v19_v0   ;;  %10 = vst.msk [vmem:[#allocation0 + $0x5d] sm:$0x8] %vm3_vm0, %v19_v0   ;;  %s623_s11 = smov 88   ;;  %s624_s12 = smov 80  }
   0x3   :  { %12 = vst.msk [vmem:[#allocation0 + $0x7c] sm:$0x10] %vm3_vm0, %v19_v0   ;;  %14 = vst.msk [vmem:[#allocation0 + $0x9b] sm:$0x20] %vm3_vm0, %v19_v0   ;;  %s625_s13 = smov 72   ;;  %s626_s14 = smov 64  }
   0x4   :  { %18 = vst.msk [vmem:[#allocation0 + $0xd9] sm:$0x80] %vm3_vm0, %v19_v0   ;;  %4 = vst.msk [vmem:[#allocation0] sm:$0x1] %vm3_vm0, %v19_v0   ;;  %s627_s15 = smov 56   ;;  %s628_s16 = smov 48  }
   0x5   :  { %6 = vst.msk [vmem:[#allocation0 + $0x1f] sm:$0x2] %vm3_vm0, %v19_v0   ;;  %16 = vst.msk [vmem:[#allocation0 + $0xba] sm:$0x40] %vm3_vm0, %v19_v0   ;;  %s629_s17 = smov 40   ;;  %s630_s18 = smov 32  }
   0x6   :  { %40 = vrot.lane.b32.xlu0 %v19_v0, %s621_s9  ;;  %80 = vrot.lane.b32.xlu1 %v19_v0, %s622_s10  ;;  %s631_s19 = smov 24   ;;  %s632_s20 = smov 16  }
   0x7   :  { %s633_s21 = smov 8  }
   0xa   :  { %100 = vrot.lane.b32.xlu0 %v19_v0, %s623_s11  ;;  %120 = vrot.lane.b32.xlu1 %v19_v0, %s624_s12 }
   0xe   :  { %140 = vrot.lane.b32.xlu0 %v19_v0, %s625_s13  ;;  %160 = vrot.lane.b32.xlu1 %v19_v0, %s626_s14 }
  0x12   :  { %180 = vrot.lane.b32.xlu0 %v19_v0, %s627_s15  ;;  %200 = vrot.lane.b32.xlu1 %v19_v0, %s628_s16 }
  0x16   :  { %220 = vrot.lane.b32.xlu0 %v19_v0, %s629_s17  ;;  %240 = vrot.lane.b32.xlu1 %v19_v0, %s630_s18 }
  0x1a   :  { %260 = vrot.lane.b32.xlu0 %v19_v0, %s631_s19  ;;  %280 = vrot.lane.b32.xlu1 %v19_v0, %s632_s20 }
  0x1e   :  { %300 = vrot.lane.b32.xlu0 %v19_v0, %s633_s21 }
  0x74   :  { %v21_v1 = vpop.permute.xlu0 %20   ;;  %v61_v2 = vpop.permute.xlu1 %60  }
  0x75   :  { %24 = vst.msk [vmem:[#allocation0 + $0x1] sm:$0x1] %vm3_vm0, %v21_v1   ;;  %26 = vst.msk [vmem:[#allocation0 + $0x20] sm:$0x2] %vm3_vm0, %v21_v1  }
  0x76   :  { %28 = vst.msk [vmem:[#allocation0 + $0x3f] sm:$0x4] %vm3_vm0, %v21_v1   ;;  %30 = vst.msk [vmem:[#allocation0 + $0x5e] sm:$0x8] %vm3_vm0, %v21_v1  }
  0x77   :  { %32 = vst.msk [vmem:[#allocation0 + $0x7d] sm:$0x10] %vm3_vm0, %v21_v1   ;;  %34 = vst.msk [vmem:[#allocation0 + $0x9c] sm:$0x20] %vm3_vm0, %v21_v1  }
  0x78   :  { %36 = vst.msk [vmem:[#allocation0 + $0xbb] sm:$0x40] %vm3_vm0, %v21_v1   ;;  %38 = vst.msk [vmem:[#allocation0 + $0xda] sm:$0x80] %vm3_vm0, %v21_v1   ;;  %v41_v3 = vpop.permute.xlu0 %40   ;;  %v81_v4 = vpop.permute.xlu1 %80  }
  0x79   :  { %64 = vst.msk [vmem:[#allocation0 + $0x3] sm:$0x1] %vm3_vm0, %v61_v2   ;;  %66 = vst.msk [vmem:[#allocation0 + $0x22] sm:$0x2] %vm3_vm0, %v61_v2  }
  0x7a   :  { %68 = vst.msk [vmem:[#allocation0 + $0x41] sm:$0x4] %vm3_vm0, %v61_v2   ;;  %70 = vst.msk [vmem:[#allocation0 + $0x60] sm:$0x8] %vm3_vm0, %v61_v2  }
  0x7b   :  { %72 = vst.msk [vmem:[#allocation0 + $0x7f] sm:$0x10] %vm3_vm0, %v61_v2   ;;  %74 = vst.msk [vmem:[#allocation0 + $0x9e] sm:$0x20] %vm3_vm0, %v61_v2  }
  0x7c   :  { %76 = vst.msk [vmem:[#allocation0 + $0xbd] sm:$0x40] %vm3_vm0, %v61_v2   ;;  %78 = vst.msk [vmem:[#allocation0 + $0xdc] sm:$0x80] %vm3_vm0, %v61_v2   ;;  %v101_v5 = vpop.permute.xlu0 %100   ;;  %v121_v6 = vpop.permute.xlu1 %120  }
  0x7d   :  { %44 = vst.msk [vmem:[#allocation0 + $0x2] sm:$0x1] %vm3_vm0, %v41_v3   ;;  %46 = vst.msk [vmem:[#allocation0 + $0x21] sm:$0x2] %vm3_vm0, %v41_v3  }
  0x7e   :  { %48 = vst.msk [vmem:[#allocation0 + $0x40] sm:$0x4] %vm3_vm0, %v41_v3   ;;  %50 = vst.msk [vmem:[#allocation0 + $0x5f] sm:$0x8] %vm3_vm0, %v41_v3  }
  0x7f   :  { %52 = vst.msk [vmem:[#allocation0 + $0x7e] sm:$0x10] %vm3_vm0, %v41_v3   ;;  %54 = vst.msk [vmem:[#allocation0 + $0x9d] sm:$0x20] %vm3_vm0, %v41_v3  }
  0x80   :  { %56 = vst.msk [vmem:[#allocation0 + $0xbc] sm:$0x40] %vm3_vm0, %v41_v3   ;;  %58 = vst.msk [vmem:[#allocation0 + $0xdb] sm:$0x80] %vm3_vm0, %v41_v3   ;;  %v141_v10 = vpop.permute.xlu0 %140   ;;  %v161_v11 = vpop.permute.xlu1 %160  }
  0x81   :  { %84 = vst.msk [vmem:[#allocation0 + $0x8] sm:$0x1] %vm3_vm0, %v81_v4   ;;  %86 = vst.msk [vmem:[#allocation0 + $0x27] sm:$0x2] %vm3_vm0, %v81_v4  }
  0x82   :  { %88 = vst.msk [vmem:[#allocation0 + $0x46] sm:$0x4] %vm3_vm0, %v81_v4   ;;  %90 = vst.msk [vmem:[#allocation0 + $0x65] sm:$0x8] %vm3_vm0, %v81_v4  }
  0x83   :  { %92 = vst.msk [vmem:[#allocation0 + $0x84] sm:$0x10] %vm3_vm0, %v81_v4   ;;  %94 = vst.msk [vmem:[#allocation0 + $0xa3] sm:$0x20] %vm3_vm0, %v81_v4  }
  0x84   :  { %96 = vst.msk [vmem:[#allocation0 + $0xc2] sm:$0x40] %vm3_vm0, %v81_v4   ;;  %98 = vst.msk [vmem:[#allocation0 + $0xe1] sm:$0x80] %vm3_vm0, %v81_v4   ;;  %v323_v7 = vld [vmem:[#allocation0] sm:$0xf]  ;;  %v181_v17 = vpop.permute.xlu0 %180   ;;  %v201_v18 = vpop.permute.xlu1 %200  }
  0x85   :  { %104 = vst.msk [vmem:[#allocation0 + $0x9] sm:$0x1] %vm3_vm0, %v101_v5   ;;  %106 = vst.msk [vmem:[#allocation0 + $0x28] sm:$0x2] %vm3_vm0, %v101_v5   ;;  %v348_v8 = vld [vmem:[#allocation0 + $0x20] sm:$0xf] }
  0x86   :  { %108 = vst.msk [vmem:[#allocation0 + $0x47] sm:$0x4] %vm3_vm0, %v101_v5   ;;  %110 = vst.msk [vmem:[#allocation0 + $0x66] sm:$0x8] %vm3_vm0, %v101_v5   ;;  %v376_v9 = vld [vmem:[#allocation0 + $0x40] sm:$0xf] }
  0x87   :  { %112 = vst.msk [vmem:[#allocation0 + $0x85] sm:$0x10] %vm3_vm0, %v101_v5   ;;  %114 = vst.msk [vmem:[#allocation0 + $0xa4] sm:$0x20] %vm3_vm0, %v101_v5   ;;  %v404_v12 = vld [vmem:[#allocation0 + $0x60] sm:$0xf] }
  0x88   :  { %116 = vst.msk [vmem:[#allocation0 + $0xc3] sm:$0x40] %vm3_vm0, %v101_v5   ;;  %118 = vst.msk [vmem:[#allocation0 + $0xe2] sm:$0x80] %vm3_vm0, %v101_v5   ;;  %v432_v13 = vld [vmem:[#allocation0 + $0x80] sm:$0xf]  ;;  %v221_v22 = vpop.permute.xlu0 %220   ;;  %v241_v23 = vpop.permute.xlu1 %240  }
  0x89   :  { %124 = vst.msk [vmem:[#allocation0 + $0xa] sm:$0x1] %vm3_vm0, %v121_v6   ;;  %126 = vst.msk [vmem:[#allocation0 + $0x29] sm:$0x2] %vm3_vm0, %v121_v6   ;;  %v460_v14 = vld [vmem:[#allocation0 + $0xa0] sm:$0xf] }
  0x8a   :  { %128 = vst.msk [vmem:[#allocation0 + $0x48] sm:$0x4] %vm3_vm0, %v121_v6   ;;  %130 = vst.msk [vmem:[#allocation0 + $0x67] sm:$0x8] %vm3_vm0, %v121_v6   ;;  %v488_v15 = vld [vmem:[#allocation0 + $0xc0] sm:$0xf] }
  0x8b   :  { %132 = vst.msk [vmem:[#allocation0 + $0x86] sm:$0x10] %vm3_vm0, %v121_v6   ;;  %134 = vst.msk [vmem:[#allocation0 + $0xa5] sm:$0x20] %vm3_vm0, %v121_v6   ;;  %v516_v16 = vld [vmem:[#allocation0 + $0xe0] sm:$0xf] }
  0x8c   :  { %136 = vst.msk [vmem:[#allocation0 + $0xc4] sm:$0x40] %vm3_vm0, %v121_v6   ;;  %138 = vst.msk [vmem:[#allocation0 + $0xe3] sm:$0x80] %vm3_vm0, %v121_v6   ;;  %v261_v29 = vpop.permute.xlu0 %260   ;;  %v281_v30 = vpop.permute.xlu1 %280  }
  0x8d   :  { %326 = vst [vmem:[%s872_s1] sm:$0xf] %v323_v7  ;;  %576 = vst [vmem:[%s872_s1 + $0x10] sm:$0xf] %v348_v8 }
  0x8e   :  { %580 = vst [vmem:[%s872_s1 + $0x20] sm:$0xf] %v376_v9  ;;  %144 = vst.msk [vmem:[#allocation0 + $0xb] sm:$0x1] %vm3_vm0, %v141_v10  }
  0x8f   :  { %146 = vst.msk [vmem:[#allocation0 + $0x2a] sm:$0x2] %vm3_vm0, %v141_v10   ;;  %148 = vst.msk [vmem:[#allocation0 + $0x49] sm:$0x4] %vm3_vm0, %v141_v10  }
  0x90   :  { %150 = vst.msk [vmem:[#allocation0 + $0x68] sm:$0x8] %vm3_vm0, %v141_v10   ;;  %152 = vst.msk [vmem:[#allocation0 + $0x87] sm:$0x10] %vm3_vm0, %v141_v10   ;;  %v301_v34 = vpop.permute.xlu0 %300  }
  0x91   :  { %154 = vst.msk [vmem:[#allocation0 + $0xa6] sm:$0x20] %vm3_vm0, %v141_v10   ;;  %156 = vst.msk [vmem:[#allocation0 + $0xc5] sm:$0x40] %vm3_vm0, %v141_v10  }
  0x92   :  { %158 = vst.msk [vmem:[#allocation0 + $0xe4] sm:$0x80] %vm3_vm0, %v141_v10   ;;  %164 = vst.msk [vmem:[#allocation0 + $0x10] sm:$0x1] %vm3_vm0, %v161_v11  }
  0x93   :  { %166 = vst.msk [vmem:[#allocation0 + $0x2f] sm:$0x2] %vm3_vm0, %v161_v11   ;;  %168 = vst.msk [vmem:[#allocation0 + $0x4e] sm:$0x4] %vm3_vm0, %v161_v11  }
  0x94   :  { %170 = vst.msk [vmem:[#allocation0 + $0x6d] sm:$0x8] %vm3_vm0, %v161_v11   ;;  %172 = vst.msk [vmem:[#allocation0 + $0x8c] sm:$0x10] %vm3_vm0, %v161_v11  }
  0x95   :  { %174 = vst.msk [vmem:[#allocation0 + $0xab] sm:$0x20] %vm3_vm0, %v161_v11   ;;  %176 = vst.msk [vmem:[#allocation0 + $0xca] sm:$0x40] %vm3_vm0, %v161_v11   ;;  %v328_v20 = vld [vmem:[#allocation0 + $0x8] sm:$0xf] }
  0x96   :  { %178 = vst.msk [vmem:[#allocation0 + $0xe9] sm:$0x80] %vm3_vm0, %v161_v11   ;;  %584 = vst [vmem:[%s872_s1 + $0x30] sm:$0xf] %v404_v12  ;;  %v355_v21 = vld [vmem:[#allocation0 + $0x28] sm:$0xf] }
  0x97   :  { %588 = vst [vmem:[%s872_s1 + $0x40] sm:$0xf] %v432_v13  ;;  %592 = vst [vmem:[%s872_s1 + $0x50] sm:$0xf] %v460_v14  ;;  %v383_v24 = vld [vmem:[#allocation0 + $0x48] sm:$0xf] }
  0x98   :  { %596 = vst [vmem:[%s872_s1 + $0x60] sm:$0xf] %v488_v15  ;;  %600 = vst [vmem:[%s872_s1 + $0x70] sm:$0xf] %v516_v16  ;;  %v411_v25 = vld [vmem:[#allocation0 + $0x68] sm:$0xf] }
  0x99   :  { %184 = vst.msk [vmem:[#allocation0 + $0x11] sm:$0x1] %vm3_vm0, %v181_v17   ;;  %186 = vst.msk [vmem:[#allocation0 + $0x30] sm:$0x2] %vm3_vm0, %v181_v17   ;;  %v523_v19 = vld [vmem:[#allocation0 + $0xe8] sm:$0xf] }
  0x9a   :  { %188 = vst.msk [vmem:[#allocation0 + $0x4f] sm:$0x4] %vm3_vm0, %v181_v17   ;;  %190 = vst.msk [vmem:[#allocation0 + $0x6e] sm:$0x8] %vm3_vm0, %v181_v17   ;;  %v439_v26 = vld [vmem:[#allocation0 + $0x88] sm:$0xf] }
  0x9b   :  { %192 = vst.msk [vmem:[#allocation0 + $0x8d] sm:$0x10] %vm3_vm0, %v181_v17   ;;  %194 = vst.msk [vmem:[#allocation0 + $0xac] sm:$0x20] %vm3_vm0, %v181_v17   ;;  %v467_v27 = vld [vmem:[#allocation0 + $0xa8] sm:$0xf] }
  0x9c   :  { %196 = vst.msk [vmem:[#allocation0 + $0xcb] sm:$0x40] %vm3_vm0, %v181_v17   ;;  %198 = vst.msk [vmem:[#allocation0 + $0xea] sm:$0x80] %vm3_vm0, %v181_v17   ;;  %v495_v28 = vld [vmem:[#allocation0 + $0xc8] sm:$0xf] }
  0x9d   :  { %204 = vst.msk [vmem:[#allocation0 + $0x12] sm:$0x1] %vm3_vm0, %v201_v18   ;;  %206 = vst.msk [vmem:[#allocation0 + $0x31] sm:$0x2] %vm3_vm0, %v201_v18  }
  0x9e   :  { %208 = vst.msk [vmem:[#allocation0 + $0x50] sm:$0x4] %vm3_vm0, %v201_v18   ;;  %210 = vst.msk [vmem:[#allocation0 + $0x6f] sm:$0x8] %vm3_vm0, %v201_v18  }
  0x9f   :  { %212 = vst.msk [vmem:[#allocation0 + $0x8e] sm:$0x10] %vm3_vm0, %v201_v18   ;;  %214 = vst.msk [vmem:[#allocation0 + $0xad] sm:$0x20] %vm3_vm0, %v201_v18  }
  0xa0   :  { %216 = vst.msk [vmem:[#allocation0 + $0xcc] sm:$0x40] %vm3_vm0, %v201_v18   ;;  %218 = vst.msk [vmem:[#allocation0 + $0xeb] sm:$0x80] %vm3_vm0, %v201_v18  }
  0xa1   :  { %601 = vst [vmem:[%s872_s1 + $0x74] sm:$0xf] %v523_v19  ;;  %573 = vst [vmem:[%s872_s1 + $0x4] sm:$0xf] %v328_v20 }
  0xa2   :  { %577 = vst [vmem:[%s872_s1 + $0x14] sm:$0xf] %v355_v21  ;;  %224 = vst.msk [vmem:[#allocation0 + $0x13] sm:$0x1] %vm3_vm0, %v221_v22  }
  0xa3   :  { %226 = vst.msk [vmem:[#allocation0 + $0x32] sm:$0x2] %vm3_vm0, %v221_v22   ;;  %228 = vst.msk [vmem:[#allocation0 + $0x51] sm:$0x4] %vm3_vm0, %v221_v22  }
  0xa4   :  { %230 = vst.msk [vmem:[#allocation0 + $0x70] sm:$0x8] %vm3_vm0, %v221_v22   ;;  %232 = vst.msk [vmem:[#allocation0 + $0x8f] sm:$0x10] %vm3_vm0, %v221_v22  }
  0xa5   :  { %234 = vst.msk [vmem:[#allocation0 + $0xae] sm:$0x20] %vm3_vm0, %v221_v22   ;;  %236 = vst.msk [vmem:[#allocation0 + $0xcd] sm:$0x40] %vm3_vm0, %v221_v22  }
  0xa6   :  { %238 = vst.msk [vmem:[#allocation0 + $0xec] sm:$0x80] %vm3_vm0, %v221_v22   ;;  %244 = vst.msk [vmem:[#allocation0 + $0x18] sm:$0x1] %vm3_vm0, %v241_v23  }
  0xa7   :  { %246 = vst.msk [vmem:[#allocation0 + $0x37] sm:$0x2] %vm3_vm0, %v241_v23   ;;  %248 = vst.msk [vmem:[#allocation0 + $0x56] sm:$0x4] %vm3_vm0, %v241_v23  }
  0xa8   :  { %250 = vst.msk [vmem:[#allocation0 + $0x75] sm:$0x8] %vm3_vm0, %v241_v23   ;;  %252 = vst.msk [vmem:[#allocation0 + $0x94] sm:$0x10] %vm3_vm0, %v241_v23  }
  0xa9   :  { %254 = vst.msk [vmem:[#allocation0 + $0xb3] sm:$0x20] %vm3_vm0, %v241_v23   ;;  %256 = vst.msk [vmem:[#allocation0 + $0xd2] sm:$0x40] %vm3_vm0, %v241_v23   ;;  %v334_v33 = vld [vmem:[#allocation0 + $0x10] sm:$0xf] }
  0xaa   :  { %258 = vst.msk [vmem:[#allocation0 + $0xf1] sm:$0x80] %vm3_vm0, %v241_v23   ;;  %581 = vst [vmem:[%s872_s1 + $0x24] sm:$0xf] %v383_v24  ;;  %v362_v31 = vld [vmem:[#allocation0 + $0x30] sm:$0xf] }
  0xab   :  { %585 = vst [vmem:[%s872_s1 + $0x34] sm:$0xf] %v411_v25  ;;  %589 = vst [vmem:[%s872_s1 + $0x44] sm:$0xf] %v439_v26  ;;  %v390_v32 = vld [vmem:[#allocation0 + $0x50] sm:$0xf] }
  0xac   :  { %593 = vst [vmem:[%s872_s1 + $0x54] sm:$0xf] %v467_v27  ;;  %597 = vst [vmem:[%s872_s1 + $0x64] sm:$0xf] %v495_v28  ;;  %v418_v35 = vld [vmem:[#allocation0 + $0x70] sm:$0xf] }
  0xad   :  { %264 = vst.msk [vmem:[#allocation0 + $0x19] sm:$0x1] %vm3_vm0, %v261_v29   ;;  %266 = vst.msk [vmem:[#allocation0 + $0x38] sm:$0x2] %vm3_vm0, %v261_v29   ;;  %v446_v36 = vld [vmem:[#allocation0 + $0x90] sm:$0xf] }
  0xae   :  { %268 = vst.msk [vmem:[#allocation0 + $0x57] sm:$0x4] %vm3_vm0, %v261_v29   ;;  %270 = vst.msk [vmem:[#allocation0 + $0x76] sm:$0x8] %vm3_vm0, %v261_v29   ;;  %v474_v37 = vld [vmem:[#allocation0 + $0xb0] sm:$0xf] }
  0xaf   :  { %272 = vst.msk [vmem:[#allocation0 + $0x95] sm:$0x10] %vm3_vm0, %v261_v29   ;;  %274 = vst.msk [vmem:[#allocation0 + $0xb4] sm:$0x20] %vm3_vm0, %v261_v29   ;;  %v502_v38 = vld [vmem:[#allocation0 + $0xd0] sm:$0xf] }
  0xb0   :  { %276 = vst.msk [vmem:[#allocation0 + $0xd3] sm:$0x40] %vm3_vm0, %v261_v29   ;;  %278 = vst.msk [vmem:[#allocation0 + $0xf2] sm:$0x80] %vm3_vm0, %v261_v29   ;;  %v530_v39 = vld [vmem:[#allocation0 + $0xf0] sm:$0xf] }
  0xb1   :  { %284 = vst.msk [vmem:[#allocation0 + $0x1a] sm:$0x1] %vm3_vm0, %v281_v30   ;;  %286 = vst.msk [vmem:[#allocation0 + $0x39] sm:$0x2] %vm3_vm0, %v281_v30  }
  0xb2   :  { %288 = vst.msk [vmem:[#allocation0 + $0x58] sm:$0x4] %vm3_vm0, %v281_v30   ;;  %290 = vst.msk [vmem:[#allocation0 + $0x77] sm:$0x8] %vm3_vm0, %v281_v30  }
  0xb3   :  { %292 = vst.msk [vmem:[#allocation0 + $0x96] sm:$0x10] %vm3_vm0, %v281_v30   ;;  %294 = vst.msk [vmem:[#allocation0 + $0xb5] sm:$0x20] %vm3_vm0, %v281_v30  }
  0xb4   :  { %296 = vst.msk [vmem:[#allocation0 + $0xd4] sm:$0x40] %vm3_vm0, %v281_v30   ;;  %298 = vst.msk [vmem:[#allocation0 + $0xf3] sm:$0x80] %vm3_vm0, %v281_v30  }
  0xb5   :  { %578 = vst [vmem:[%s872_s1 + $0x18] sm:$0xf] %v362_v31  ;;  %582 = vst [vmem:[%s872_s1 + $0x28] sm:$0xf] %v390_v32 }
  0xb6   :  { %574 = vst [vmem:[%s872_s1 + $0x8] sm:$0xf] %v334_v33  ;;  %304 = vst.msk [vmem:[#allocation0 + $0x1b] sm:$0x1] %vm3_vm0, %v301_v34  }
  0xb7   :  { %306 = vst.msk [vmem:[#allocation0 + $0x3a] sm:$0x2] %vm3_vm0, %v301_v34   ;;  %308 = vst.msk [vmem:[#allocation0 + $0x59] sm:$0x4] %vm3_vm0, %v301_v34  }
  0xb8   :  { %310 = vst.msk [vmem:[#allocation0 + $0x78] sm:$0x8] %vm3_vm0, %v301_v34   ;;  %312 = vst.msk [vmem:[#allocation0 + $0x97] sm:$0x10] %vm3_vm0, %v301_v34  }
  0xb9   :  { %314 = vst.msk [vmem:[#allocation0 + $0xb6] sm:$0x20] %vm3_vm0, %v301_v34   ;;  %316 = vst.msk [vmem:[#allocation0 + $0xd5] sm:$0x40] %vm3_vm0, %v301_v34  }
  0xba   :  { %318 = vst.msk [vmem:[#allocation0 + $0xf4] sm:$0x80] %vm3_vm0, %v301_v34   ;;  %586 = vst [vmem:[%s872_s1 + $0x38] sm:$0xf] %v418_v35 }
  0xbb   :  { %590 = vst [vmem:[%s872_s1 + $0x48] sm:$0xf] %v446_v36  ;;  %594 = vst [vmem:[%s872_s1 + $0x58] sm:$0xf] %v474_v37 }
  0xbc   :  { %598 = vst [vmem:[%s872_s1 + $0x68] sm:$0xf] %v502_v38  ;;  %602 = vst [vmem:[%s872_s1 + $0x78] sm:$0xf] %v530_v39 }
  0xbd   :  { %v341_v40 = vld [vmem:[#allocation0 + $0x18] sm:$0xf] }
  0xbe   :  { %575 = vst [vmem:[%s872_s1 + $0xc] sm:$0xf] %v341_v40  ;;  %v369_v43 = vld [vmem:[#allocation0 + $0x38] sm:$0xf] }
  0xbf   :  { %v425_v41 = vld [vmem:[#allocation0 + $0x78] sm:$0xf]  ;;  %579 = vst [vmem:[%s872_s1 + $0x1c] sm:$0xf] %v369_v43 }
  0xc0   :  { %v453_v42 = vld [vmem:[#allocation0 + $0x98] sm:$0xf]  ;;  %587 = vst [vmem:[%s872_s1 + $0x3c] sm:$0xf] %v425_v41 }
  0xc1   :  { %591 = vst [vmem:[%s872_s1 + $0x4c] sm:$0xf] %v453_v42  ;;  %v397_v44 = vld [vmem:[#allocation0 + $0x58] sm:$0xf] }
  0xc2   :  { %v481_v45 = vld [vmem:[#allocation0 + $0xb8] sm:$0xf]  ;;  %583 = vst [vmem:[%s872_s1 + $0x2c] sm:$0xf] %v397_v44 }
  0xc3   :  { %595 = vst [vmem:[%s872_s1 + $0x5c] sm:$0xf] %v481_v45  ;;  %v509_v46 = vld [vmem:[#allocation0 + $0xd8] sm:$0xf] }
  0xc4   :  { %v537_v47 = vld [vmem:[#allocation0 + $0xf8] sm:$0xf]  ;;  %599 = vst [vmem:[%s872_s1 + $0x6c] sm:$0xf] %v509_v46 }
  0xc5   :  { %603 = vst [vmem:[%s872_s1 + $0x7c] sm:$0xf] %v537_v47 }

// kernel: _lambda_.27
= control target key start
LH: loop header
LB: loop body
LE: loop exit
PB: predicated region body
PF: predicated region fallthrough
CT: control target
= control target key end

     0   :  { %vm77_vm0 = vcmask 130048   ;;  %vm409_vm1 = vcmask 7168   ;;  %s774_s3 = inlined_call_operand.vmem [shape: f32[16,16], index: 3, kind: input, shape index: {}]   ;;  %s775_s0 = inlined_call_operand.vmem [shape: f32[64,16], index: 0, kind: input, shape index: {}]   ;;  %s776_s1 = inlined_call_operand.vmem [shape: f32[64,16], index: 1, kind: input, shape index: {}]   ;;  %s777_s2 = inlined_call_operand.vmem [shape: f32[64,16], index: 2, kind: input, shape index: {}]   ;;  %s778_s5 = inlined_call_operand.vmem [shape: f32[16,1], index: 5, kind: input, shape index: {}]   ;;  %s779_s6 = inlined_call_operand.<no memory space> [shape: f32[1,1], index: 6, kind: input, shape index: {}]   ;;  %s780_s4 = inlined_call_operand.vmem [shape: f32[1,16], index: 4, kind: input, shape index: {}]   ;;  %s781_s7 = inlined_call_operand.vmem [shape: f32[64,1], index: 7, kind: output, shape index: {}]  }
   0x1   :  { %v69_v0 = vld [vmem:[%s774_s3 + $0x8] sm:$0xff]  ;;  %v68_v1 = vld [vmem:[%s774_s3] sm:$0xff]  ;;  %v609_v9 = vld [vmem:[%s775_s0 + $0x10] sm:$0xff]  ;;  %v12_v44 = vstv %s779_s6 }
   0x2   :  { %v581_v2 = vld [vmem:[%s775_s0] sm:$0xff]  ;;  %468 = vmatprep.subr.mxu0 %v69_v0  ;;  %v594_v5 = vld [vmem:[%s775_s0 + $0x8] sm:$0xff]  ;;  %v616_v11 = vld [vmem:[%s776_s1 + $0x10] sm:$0xff]  ;;  %13 = vst [vmem:[#allocation2] sm:$0x1] %v12_v44 }
   0x3   :  { %v586_v3 = vld [vmem:[%s776_s1] sm:$0xff]  ;;  %469 = vmatpush3.msra.mxu0 %v69_v0  ;;  %v601_v7 = vld [vmem:[%s776_s1 + $0x8] sm:$0xff]  ;;  %v46_v12 = vld [vmem:[%s777_s2 + $0x10] sm:$0xff]  ;;  %v54_v15 = vadd.f32 %v616_v11, %v609_v9 }
   0x4   :  { %v44_v4 = vld [vmem:[%s777_s2] sm:$0xff]  ;;  %v52_v6 = vadd.f32 %v586_v3, %v581_v2  ;;  %v45_v8 = vld [vmem:[%s777_s2 + $0x8] sm:$0xff]  ;;  %470 = vmatprep.subr.mxu0 %v68_v1  ;;  %v53_v10 = vadd.f32 %v601_v7, %v594_v5  ;;  %v624_v13 = vld [vmem:[%s775_s0 + $0x18] sm:$0xff] }
   0x5   :  { %471 = vmatpush3.msra.mxu0 %v68_v1  ;;  %v631_v16 = vld [vmem:[%s776_s1 + $0x18] sm:$0xff]  ;;  %v639_v18 = vld [vmem:[%s775_s0 + $0x20] sm:$0xff]  ;;  %v654_v23 = vld [vmem:[%s775_s0 + $0x28] sm:$0xff]  ;;  %v62_v24 = vadd.f32 %v54_v15, %v46_v12 }
   0x6   :  { %v60_v14 = vadd.f32 %v52_v6, %v44_v4  ;;  %v47_v17 = vld [vmem:[%s777_s2 + $0x18] sm:$0xff]  ;;  %v61_v19 = vadd.f32 %v53_v10, %v45_v8  ;;  %v55_v20 = vadd.f32 %v631_v16, %v624_v13  ;;  %v646_v21 = vld [vmem:[%s776_s1 + $0x20] sm:$0xff]  ;;  %v662_v26 = vld [vmem:[%s776_s1 + $0x28] sm:$0xff] }
   0x7   :  { %v48_v22 = vld [vmem:[%s777_s2 + $0x20] sm:$0xff]  ;;  %v56_v25 = vadd.f32 %v646_v21, %v639_v18  ;;  %v667_v27 = vld [vmem:[%s775_s0 + $0x30] sm:$0xff]  ;;  %v57_v29 = vadd.f32 %v662_v26, %v654_v23  ;;  %v49_v32 = vld [vmem:[%s777_s2 + $0x28] sm:$0xff] }
   0x8   :  { %472 = vmatprep.mubr.msk.f32.mxu0 %vm77_vm0, %v60_v14  ;;  %v63_v28 = vadd.f32 %v55_v20, %v47_v17  ;;  %v675_v30 = vld [vmem:[%s776_s1 + $0x30] sm:$0xff]  ;;  %v686_v34 = vld [vmem:[%s775_s0 + $0x38] sm:$0xff]  ;;  %v272_v42 = vld [vmem:[%s778_s5 + $0x8] sm:$0xff] }
   0x9   :  { %473 = vmatmul.mubr.msk.f32.vlgmr.msra.gmra.mxu0 %vm77_vm0, %v61_v19  ;;  %v64_v31 = vadd.f32 %v56_v25, %v48_v22  ;;  %v58_v33 = vadd.f32 %v675_v30, %v667_v27  ;;  %v691_v35 = vld [vmem:[%s776_s1 + $0x38] sm:$0xff]  ;;  %v50_v36 = vld [vmem:[%s777_s2 + $0x30] sm:$0xff]  ;;  %v65_v37 = vadd.f32 %v57_v29, %v49_v32  ;;  %v271_v43 = vld [vmem:[%s778_s5] sm:$0xff]  ;;  %484 = vmatprep.subr.mxu1 %v272_v42 }
   0xa   :  { %475 = vmatprep.mubr.msk.f32.mxu0 %vm77_vm0, %v62_v24  ;;  %v59_v38 = vadd.f32 %v691_v35, %v686_v34  ;;  %v51_v40 = vld [vmem:[%s777_s2 + $0x38] sm:$0xff]  ;;  %485 = vmatpush3.msra.mxu1 %v272_v42  ;;  %v422_v45 = vld [vmem:[%s780_s4] ss:$0 sm:$0xff] }
   0xb   :  { %v66_v39 = vadd.f32 %v58_v33, %v50_v36  ;;  %486 = vmatprep.subr.mxu1 %v271_v43 }
   0xc   :  { %v67_v41 = vadd.f32 %v59_v38, %v51_v40  ;;  %487 = vmatpush3.msra.mxu1 %v271_v43 }
   0xd   :  { %476 = vmatmul.mubr.msk.f32.gmra.mxu0 %vm77_vm0, %v63_v28 }
   0xe   :  { %478 = vmatprep.mubr.msk.f32.mxu0 %vm77_vm0, %v64_v31 }
  0x11   :  { %479 = vmatmul.mubr.msk.f32.gmra.mxu0 %vm77_vm0, %v65_v37 }
  0x12   :  { %481 = vmatprep.mubr.msk.f32.mxu0 %vm77_vm0, %v66_v39 }
  0x15   :  { %482 = vmatmul.mubr.msk.f32.gmra.mxu0 %vm77_vm0, %v67_v41 }
  0xc9   :  { %v474_v46 = vpop.f32.mrf.mxu0 }
  0xca   :  { %v174_v47 = vadd.f32 %v474_v46, %v422_v45 }
  0xcb   :  { %v168_v48 = vpop.f32.mrf.mxu0 }
  0xcc   :  { %v432_v49 = vmul.f32 -1.442695, %v174_v47  ;;  %v169_v50 = vadd.f32 %v422_v45, %v168_v48 }
  0xcd   :  { %v477_v51 = vpop.f32.mrf.mxu0 }
  0xce   :  { %500 = vpow2.f32 %v432_v49  ;;  %v431_v52 = vmul.f32 -1.442695, %v169_v50  ;;  %v184_v53 = vadd.f32 %v477_v51, %v422_v45 }
  0xcf   :  { %v178_v54 = vpop.f32.mrf.mxu0 }
  0xd0   :  { %502 = vpow2.f32 %v431_v52  ;;  %v434_v55 = vmul.f32 -1.442695, %v184_v53  ;;  %v179_v56 = vadd.f32 %v422_v45, %v178_v54 }
  0xd1   :  { %v480_v57 = vpop.f32.mrf.mxu0 }
  0xd2   :  { %504 = vpow2.f32 %v434_v55  ;;  %v433_v58 = vmul.f32 -1.442695, %v179_v56  ;;  %v194_v59 = vadd.f32 %v480_v57, %v422_v45 }
  0xd3   :  { %v188_v60 = vpop.f32.mrf.mxu0 }
  0xd4   :  { %506 = vpow2.f32 %v433_v58  ;;  %v436_v61 = vmul.f32 -1.442695, %v194_v59  ;;  %v189_v62 = vadd.f32 %v422_v45, %v188_v60 }
  0xd5   :  { %v483_v63 = vpop.f32.mrf.mxu0 }
  0xd6   :  { %508 = vpow2.f32 %v436_v61  ;;  %v435_v0 = vmul.f32 -1.442695, %v189_v62  ;;  %v204_v1 = vadd.f32 %v483_v63, %v422_v45 }
  0xd7   :  { %v198_v4 = vpop.f32.mrf.mxu0 }
  0xd8   :  { %510 = vpow2.f32 %v435_v0  ;;  %v438_v6 = vmul.f32 -1.442695, %v204_v1  ;;  %v199_v8 = vadd.f32 %v422_v45, %v198_v4 }
  0xda   :  { %512 = vpow2.f32 %v438_v6  ;;  %v437_v10 = vmul.f32 -1.442695, %v199_v8 }
  0xdb   :  { %v501_v12 = vpop.eup %500 }
  0xdc   :  { %v232_v14 = vadd.f32 1.0, %v501_v12  ;;  %514 = vpow2.f32 %v437_v10 }
  0xdd   :  { %v503_v15 = vpop.eup %502 }
  0xde   :  { %516 = vrcp.f32 %v232_v14  ;;  %v231_v17 = vadd.f32 1.0, %v503_v15 }
  0xdf   :  { %v505_v19 = vpop.eup %504 }
  0xe0   :  { %518 = vrcp.f32 %v231_v17  ;;  %v234_v20 = vadd.f32 1.0, %v505_v19 }
  0xe1   :  { %v507_v22 = vpop.eup %506 }
  0xe2   :  { %520 = vrcp.f32 %v234_v20  ;;  %v233_v24 = vadd.f32 1.0, %v507_v22 }
  0xe3   :  { %v509_v25 = vpop.eup %508 }
  0xe4   :  { %522 = vrcp.f32 %v233_v24  ;;  %v236_v28 = vadd.f32 1.0, %v509_v25 }
  0xe5   :  { %v511_v29 = vpop.eup %510 }
  0xe6   :  { %524 = vrcp.f32 %v236_v28  ;;  %v235_v31 = vadd.f32 1.0, %v511_v29 }
  0xe7   :  { %v513_v32 = vpop.eup %512 }
  0xe8   :  { %526 = vrcp.f32 %v235_v31  ;;  %v238_v33 = vadd.f32 1.0, %v513_v32 }
  0xe9   :  { %v515_v36 = vpop.eup %514 }
  0xea   :  { %528 = vrcp.f32 %v238_v33  ;;  %v237_v37 = vadd.f32 1.0, %v515_v36 }
  0xeb   :  { %v517_v38 = vpop.eup %516 }
  0xec   :  { %530 = vrcp.f32 %v237_v37  ;;  %v256_v40 = vmul.f32 %v517_v38, %v601_v7 }
  0xed   :  { %v519_v39 = vpop.eup %518 }
  0xee   :  { %v255_v41 = vmul.f32 %v519_v39, %v586_v3  ;;  %v264_v45 = vadd.f32 %v256_v40, %v594_v5 }
  0xef   :  { %v521_v42 = vpop.eup %520 }
  0xf0   :  { %v263_v43 = vadd.f32 %v255_v41, %v581_v2  ;;  %v258_v46 = vmul.f32 %v521_v42, %v631_v16 }
  0xf1   :  { %v523_v44 = vpop.eup %522 }
  0xf2   :  { %488 = vmatprep.mubr.msk.f32.mxu1 %vm77_vm0, %v263_v43  ;;  %v257_v47 = vmul.f32 %v523_v44, %v616_v11  ;;  %v266_v3 = vadd.f32 %v258_v46, %v624_v13 }
  0xf3   :  { %v525_v48 = vpop.eup %524  ;;  %489 = vmatmul.mubr.msk.f32.vlgmr.msra.gmra.mxu1 %vm77_vm0, %v264_v45 }
  0xf4   :  { %v265_v49 = vadd.f32 %v257_v47, %v609_v9  ;;  %v260_v50 = vmul.f32 %v525_v48, %v662_v26 }
  0xf5   :  { %v527_v7 = vpop.eup %526 }
  0xf6   :  { %491 = vmatprep.mubr.msk.f32.mxu1 %vm77_vm0, %v265_v49  ;;  %v259_v2 = vmul.f32 %v527_v7, %v646_v21  ;;  %v268_v51 = vadd.f32 %v260_v50, %v654_v23 }
  0xf7   :  { %v529_v5 = vpop.eup %528  ;;  %492 = vmatmul.mubr.msk.f32.gmra.mxu1 %vm77_vm0, %v266_v3 }
  0xf8   :  { %v267_v16 = vadd.f32 %v259_v2, %v639_v18  ;;  %v262_v52 = vmul.f32 %v529_v5, %v691_v35  ;;  %v439_v18 = vld [vmem:[#allocation2] ss:$0 sm:$0xff] }
  0xf9   :  { %v531_v11 = vpop.eup %530 }
  0xfa   :  { %494 = vmatprep.mubr.msk.f32.mxu1 %vm77_vm0, %v267_v16  ;;  %v261_v9 = vmul.f32 %v531_v11, %v675_v30  ;;  %v270_v21 = vadd.f32 %v262_v52, %v686_v34 }
  0xfb   :  { %495 = vmatmul.mubr.msk.f32.gmra.mxu1 %vm77_vm0, %v268_v51 }
  0xfc   :  { %v269_v13 = vadd.f32 %v261_v9, %v667_v27 }
  0xfe   :  { %497 = vmatprep.mubr.msk.f32.mxu1 %vm77_vm0, %v269_v13 }
  0xff   :  { %498 = vmatmul.mubr.msk.f32.gmra.mxu1 %vm77_vm0, %v270_v21 }
 0x1b3   :  { %v490_v26 = vpop.f32.mrf.mxu1 }
 0x1b4   :  { %v376_v23 = vadd.f32 %v490_v26, %v439_v18 }
 0x1b5   :  { %v370_v53 = vpop.f32.mrf.mxu1 }
 0x1b6   :  { %411 = vst.msk [vmem:[%s781_s7 + $0x8] sm:$0xff] %vm409_vm1, %v376_v23  ;;  %v371_v30 = vadd.f32 %v439_v18, %v370_v53 }
 0x1b7   :  { %v493_v35 = vpop.f32.mrf.mxu1 }
 0x1b8   :  { %410 = vst.msk [vmem:[%s781_s7] sm:$0xff] %vm409_vm1, %v371_v30  ;;  %v386_v27 = vadd.f32 %v493_v35, %v439_v18 }
 0x1b9   :  { %v380_v34 = vpop.f32.mrf.mxu1 }
 0x1ba   :  { %413 = vst.msk [vmem:[%s781_s7 + $0x18] sm:$0xff] %vm409_vm1, %v386_v27  ;;  %v381_v54 = vadd.f32 %v439_v18, %v380_v34 }
 0x1bb   :  { %v496_v55 = vpop.f32.mrf.mxu1 }
 0x1bc   :  { %412 = vst.msk [vmem:[%s781_s7 + $0x10] sm:$0xff] %vm409_vm1, %v381_v54  ;;  %v396_v56 = vadd.f32 %v496_v55, %v439_v18 }
 0x1bd   :  { %v390_v57 = vpop.f32.mrf.mxu1 }
 0x1be   :  { %415 = vst.msk [vmem:[%s781_s7 + $0x28] sm:$0xff] %vm409_vm1, %v396_v56  ;;  %v391_v58 = vadd.f32 %v439_v18, %v390_v57 }
 0x1bf   :  { %v499_v59 = vpop.f32.mrf.mxu1 }
 0x1c0   :  { %414 = vst.msk [vmem:[%s781_s7 + $0x20] sm:$0xff] %vm409_vm1, %v391_v58  ;;  %v406_v60 = vadd.f32 %v499_v59, %v439_v18 }
 0x1c1   :  { %v400_v61 = vpop.f32.mrf.mxu1 }
 0x1c2   :  { %417 = vst.msk [vmem:[%s781_s7 + $0x38] sm:$0xff] %vm409_vm1, %v406_v60  ;;  %v401_v62 = vadd.f32 %v439_v18, %v400_v61 }
 0x1c4   :  { %416 = vst.msk [vmem:[%s781_s7 + $0x30] sm:$0xff] %vm409_vm1, %v401_v62 }

// kernel: _lambda_.25
= control target key start
LH: loop header
LB: loop body
LE: loop exit
PB: predicated region body
PF: predicated region fallthrough
CT: control target
= control target key end

     0   :  { %vm110_vm0 = vcmask 64512   ;;  %v5973_v0 = vmov 0.0   ;;  %vm5974_vm1 = vmmov 0   ;;  %s7019_s1 = inlined_call_operand.vmem [shape: f32[32,8,8], index: 1, kind: input, shape index: {}]   ;;  %s7020_s0 = inlined_call_operand.vmem [shape: f32[32,8,8], index: 0, kind: input, shape index: {}]   ;;  %s7021_s2 = inlined_call_operand.vmem [shape: f32[32,8,8], index: 2, kind: input, shape index: {}]   ;;  %s7022_s3 = inlined_call_operand.vmem [shape: f32[32,8,8], index: 3, kind: output, shape index: {}]  }
   0x1   :  { %5523 = vmatprep.subr.mxu0 %v5973_v0  ;;  %v46_v1 = vld [vmem:[%s7019_s1] sm:$0xff]  ;;  %5525 = vmatprep.mubr.msk.f32.mxu0 %vm5974_vm1, %v5973_v0  ;;  %v47_v2 = vld [vmem:[%s7019_s1 + $0x8] sm:$0xff]  ;;  %v48_v4 = vld [vmem:[%s7019_s1 + $0x10] sm:$0xff] }
   0x2   :  { %5524 = vmatpush3.xpose.msk.msra.mxu0 %vm110_vm0, %v46_v1  ;;  %5528 = vmatprep.subr.mxu1 %v5973_v0  ;;  %v14_v3 = vld [vmem:[%s7020_s0] sm:$0xff]  ;;  %v15_v5 = vld [vmem:[%s7020_s0 + $0x8] sm:$0xff]  ;;  %v49_v6 = vld [vmem:[%s7019_s1 + $0x18] sm:$0xff] }
   0x3   :  { %5529 = vmatpush3.xpose.msk.msra.mxu1 %vm110_vm0, %v47_v2  ;;  %5533 = vmatprep.subr.mxu0 %v5973_v0  ;;  %v16_v7 = vld [vmem:[%s7020_s0 + $0x10] sm:$0xff]  ;;  %v50_v8 = vld [vmem:[%s7019_s1 + $0x20] sm:$0xff]  ;;  %v17_v9 = vld [vmem:[%s7020_s0 + $0x18] sm:$0xff] }
   0x4   :  { %5530 = vmatprep.mubr.msk.f32.mxu1 %vm5974_vm1, %v5973_v0  ;;  %5538 = vmatprep.subr.mxu1 %v5973_v0  ;;  %v51_v10 = vld [vmem:[%s7019_s1 + $0x28] sm:$0xff]  ;;  %v18_v11 = vld [vmem:[%s7020_s0 + $0x20] sm:$0xff]  ;;  %v52_v12 = vld [vmem:[%s7019_s1 + $0x30] sm:$0xff] }
   0x5   :  { %5526 = vmatmul.mubr.msk.f32.vlgmr.msra.gmra.mxu0 %vm110_vm0, %v14_v3  ;;  %v19_v13 = vld [vmem:[%s7020_s0 + $0x28] sm:$0xff]  ;;  %v53_v14 = vld [vmem:[%s7019_s1 + $0x38] sm:$0xff]  ;;  %v20_v15 = vld [vmem:[%s7020_s0 + $0x30] sm:$0xff] }
   0x6   :  { %5534 = vmatpush3.xpose.msk.msra.mxu0 %vm110_vm0, %v48_v4  ;;  %5531 = vmatmul.mubr.msk.f32.vlgmr.msra.gmra.mxu1 %vm110_vm0, %v15_v5  ;;  %v54_v16 = vld [vmem:[%s7019_s1 + $0x40] sm:$0xff]  ;;  %v21_v17 = vld [vmem:[%s7020_s0 + $0x38] sm:$0xff]  ;;  %v55_v18 = vld [vmem:[%s7019_s1 + $0x48] sm:$0xff] }
   0x7   :  { %5535 = vmatprep.mubr.msk.f32.mxu0 %vm5974_vm1, %v5973_v0  ;;  %5539 = vmatpush3.xpose.msk.msra.mxu1 %vm110_vm0, %v49_v6  ;;  %v22_v19 = vld [vmem:[%s7020_s0 + $0x40] sm:$0xff]  ;;  %v56_v20 = vld [vmem:[%s7019_s1 + $0x50] sm:$0xff]  ;;  %v23_v21 = vld [vmem:[%s7020_s0 + $0x48] sm:$0xff] }
   0x8   :  { %5543 = vmatprep.subr.mxu0 %v5973_v0  ;;  %5540 = vmatprep.mubr.msk.f32.mxu1 %vm5974_vm1, %v5973_v0  ;;  %v57_v22 = vld [vmem:[%s7019_s1 + $0x58] sm:$0xff]  ;;  %v24_v23 = vld [vmem:[%s7020_s0 + $0x50] sm:$0xff]  ;;  %v58_v24 = vld [vmem:[%s7019_s1 + $0x60] sm:$0xff] }
   0x9   :  { %5536 = vmatmul.mubr.msk.f32.vlgmr.msra.gmra.mxu0 %vm110_vm0, %v16_v7  ;;  %5548 = vmatprep.subr.mxu1 %v5973_v0  ;;  %v25_v25 = vld [vmem:[%s7020_s0 + $0x58] sm:$0xff]  ;;  %v59_v26 = vld [vmem:[%s7019_s1 + $0x68] sm:$0xff]  ;;  %v26_v27 = vld [vmem:[%s7020_s0 + $0x60] sm:$0xff] }
   0xa   :  { %5544 = vmatpush3.xpose.msk.msra.mxu0 %vm110_vm0, %v50_v8  ;;  %5541 = vmatmul.mubr.msk.f32.vlgmr.msra.gmra.mxu1 %vm110_vm0, %v17_v9  ;;  %v60_v28 = vld [vmem:[%s7019_s1 + $0x70] sm:$0xff]  ;;  %v27_v29 = vld [vmem:[%s7020_s0 + $0x68] sm:$0xff]  ;;  %v61_v30 = vld [vmem:[%s7019_s1 + $0x78] sm:$0xff] }
   0xb   :  { %5545 = vmatprep.mubr.msk.f32.mxu0 %vm5974_vm1, %v5973_v0  ;;  %5549 = vmatpush3.xpose.msk.msra.mxu1 %vm110_vm0, %v51_v10  ;;  %v28_v31 = vld [vmem:[%s7020_s0 + $0x70] sm:$0xff]  ;;  %v62_v32 = vld [vmem:[%s7019_s1 + $0x80] sm:$0xff]  ;;  %v29_v33 = vld [vmem:[%s7020_s0 + $0x78] sm:$0xff] }
   0xc   :  { %5553 = vmatprep.subr.mxu0 %v5973_v0  ;;  %5550 = vmatprep.mubr.msk.f32.mxu1 %vm5974_vm1, %v5973_v0  ;;  %v63_v34 = vld [vmem:[%s7019_s1 + $0x88] sm:$0xff]  ;;  %v30_v35 = vld [vmem:[%s7020_s0 + $0x80] sm:$0xff]  ;;  %v64_v36 = vld [vmem:[%s7019_s1 + $0x90] sm:$0xff] }
   0xd   :  { %5546 = vmatmul.mubr.msk.f32.vlgmr.msra.gmra.mxu0 %vm110_vm0, %v18_v11  ;;  %5558 = vmatprep.subr.mxu1 %v5973_v0  ;;  %v31_v37 = vld [vmem:[%s7020_s0 + $0x88] sm:$0xff]  ;;  %v65_v38 = vld [vmem:[%s7019_s1 + $0x98] sm:$0xff]  ;;  %v32_v39 = vld [vmem:[%s7020_s0 + $0x90] sm:$0xff] }
   0xe   :  { %5554 = vmatpush3.xpose.msk.msra.mxu0 %vm110_vm0, %v52_v12  ;;  %5551 = vmatmul.mubr.msk.f32.vlgmr.msra.gmra.mxu1 %vm110_vm0, %v19_v13  ;;  %v66_v40 = vld [vmem:[%s7019_s1 + $0xa0] sm:$0xff]  ;;  %v33_v41 = vld [vmem:[%s7020_s0 + $0x98] sm:$0xff]  ;;  %v67_v42 = vld [vmem:[%s7019_s1 + $0xa8] sm:$0xff] }
   0xf   :  { %5555 = vmatprep.mubr.msk.f32.mxu0 %vm5974_vm1, %v5973_v0  ;;  %5559 = vmatpush3.xpose.msk.msra.mxu1 %vm110_vm0, %v53_v14  ;;  %v34_v43 = vld [vmem:[%s7020_s0 + $0xa0] sm:$0xff]  ;;  %v68_v44 = vld [vmem:[%s7019_s1 + $0xb0] sm:$0xff]  ;;  %v35_v45 = vld [vmem:[%s7020_s0 + $0xa8] sm:$0xff] }
  0x10   :  { %5563 = vmatprep.subr.mxu0 %v5973_v0  ;;  %5560 = vmatprep.mubr.msk.f32.mxu1 %vm5974_vm1, %v5973_v0  ;;  %v69_v46 = vld [vmem:[%s7019_s1 + $0xb8] sm:$0xff]  ;;  %v36_v47 = vld [vmem:[%s7020_s0 + $0xb0] sm:$0xff]  ;;  %v70_v48 = vld [vmem:[%s7019_s1 + $0xc0] sm:$0xff] }
  0x11   :  { %5556 = vmatmul.mubr.msk.f32.vlgmr.msra.gmra.mxu0 %vm110_vm0, %v20_v15  ;;  %5568 = vmatprep.subr.mxu1 %v5973_v0  ;;  %v37_v49 = vld [vmem:[%s7020_s0 + $0xb8] sm:$0xff]  ;;  %v71_v50 = vld [vmem:[%s7019_s1 + $0xc8] sm:$0xff]  ;;  %v38_v51 = vld [vmem:[%s7020_s0 + $0xc0] sm:$0xff] }
  0x12   :  { %5564 = vmatpush3.xpose.msk.msra.mxu0 %vm110_vm0, %v54_v16  ;;  %5561 = vmatmul.mubr.msk.f32.vlgmr.msra.gmra.mxu1 %vm110_vm0, %v21_v17  ;;  %v72_v52 = vld [vmem:[%s7019_s1 + $0xd0] sm:$0xff]  ;;  %v39_v53 = vld [vmem:[%s7020_s0 + $0xc8] sm:$0xff]  ;;  %v73_v54 = vld [vmem:[%s7019_s1 + $0xd8] sm:$0xff] }
  0x13   :  { %5565 = vmatprep.mubr.msk.f32.mxu0 %vm5974_vm1, %v5973_v0  ;;  %5569 = vmatpush3.xpose.msk.msra.mxu1 %vm110_vm0, %v55_v18  ;;  %v40_v55 = vld [vmem:[%s7020_s0 + $0xd0] sm:$0xff]  ;;  %v74_v56 = vld [vmem:[%s7019_s1 + $0xe0] sm:$0xff]  ;;  %v41_v57 = vld [vmem:[%s7020_s0 + $0xd8] sm:$0xff] }
  0x14   :  { %5573 = vmatprep.subr.mxu0 %v5973_v0  ;;  %5570 = vmatprep.mubr.msk.f32.mxu1 %vm5974_vm1, %v5973_v0  ;;  %v75_v58 = vld [vmem:[%s7019_s1 + $0xe8] sm:$0xff]  ;;  %v42_v59 = vld [vmem:[%s7020_s0 + $0xe0] sm:$0xff]  ;;  %v76_v60 = vld [vmem:[%s7019_s1 + $0xf0] sm:$0xff] }
  0x15   :  { %5566 = vmatmul.mubr.msk.f32.vlgmr.msra.gmra.mxu0 %vm110_vm0, %v22_v19  ;;  %5578 = vmatprep.subr.mxu1 %v5973_v0  ;;  %v43_v61 = vld [vmem:[%s7020_s0 + $0xe8] sm:$0xff]  ;;  %v77_v62 = vld [vmem:[%s7019_s1 + $0xf8] sm:$0xff]  ;;  %v44_v63 = vld [vmem:[%s7020_s0 + $0xf0] sm:$0xff] }
  0x16   :  { %5574 = vmatpush3.xpose.msk.msra.mxu0 %vm110_vm0, %v56_v20  ;;  %5571 = vmatmul.mubr.msk.f32.vlgmr.msra.gmra.mxu1 %vm110_vm0, %v23_v21  ;;  %v45_v1 = vld [vmem:[%s7020_s0 + $0xf8] sm:$0xff] }
  0x17   :  { %5575 = vmatprep.mubr.msk.f32.mxu0 %vm5974_vm1, %v5973_v0  ;;  %5579 = vmatpush3.xpose.msk.msra.mxu1 %vm110_vm0, %v57_v22 }
  0x18   :  { %5583 = vmatprep.subr.mxu0 %v5973_v0  ;;  %5580 = vmatprep.mubr.msk.f32.mxu1 %vm5974_vm1, %v5973_v0 }
  0x19   :  { %5576 = vmatmul.mubr.msk.f32.vlgmr.msra.gmra.mxu0 %vm110_vm0, %v24_v23  ;;  %5588 = vmatprep.subr.mxu1 %v5973_v0 }
  0x1a   :  { %5584 = vmatpush3.xpose.msk.msra.mxu0 %vm110_vm0, %v58_v24  ;;  %5581 = vmatmul.mubr.msk.f32.vlgmr.msra.gmra.mxu1 %vm110_vm0, %v25_v25 }
  0x1b   :  { %5585 = vmatprep.mubr.msk.f32.mxu0 %vm5974_vm1, %v5973_v0  ;;  %5589 = vmatpush3.xpose.msk.msra.mxu1 %vm110_vm0, %v59_v26 }
  0x1c   :  { %5593 = vmatprep.subr.mxu0 %v5973_v0  ;;  %5590 = vmatprep.mubr.msk.f32.mxu1 %vm5974_vm1, %v5973_v0 }
  0x1d   :  { %5586 = vmatmul.mubr.msk.f32.vlgmr.msra.gmra.mxu0 %vm110_vm0, %v26_v27  ;;  %5598 = vmatprep.subr.mxu1 %v5973_v0 }
  0x1e   :  { %5594 = vmatpush3.xpose.msk.msra.mxu0 %vm110_vm0, %v60_v28  ;;  %5591 = vmatmul.mubr.msk.f32.vlgmr.msra.gmra.mxu1 %vm110_vm0, %v27_v29 }
  0x1f   :  { %5595 = vmatprep.mubr.msk.f32.mxu0 %vm5974_vm1, %v5973_v0  ;;  %5599 = vmatpush3.xpose.msk.msra.mxu1 %vm110_vm0, %v61_v30 }
  0x20   :  { %5603 = vmatprep.subr.mxu0 %v5973_v0  ;;  %5600 = vmatprep.mubr.msk.f32.mxu1 %vm5974_vm1, %v5973_v0 }
  0x21   :  { %5596 = vmatmul.mubr.msk.f32.vlgmr.msra.gmra.mxu0 %vm110_vm0, %v28_v31  ;;  %5608 = vmatprep.subr.mxu1 %v5973_v0 }
  0x22   :  { %5604 = vmatpush3.xpose.msk.msra.mxu0 %vm110_vm0, %v62_v32  ;;  %5601 = vmatmul.mubr.msk.f32.vlgmr.msra.gmra.mxu1 %vm110_vm0, %v29_v33 }
  0x23   :  { %5605 = vmatprep.mubr.msk.f32.mxu0 %vm5974_vm1, %v5973_v0  ;;  %5609 = vmatpush3.xpose.msk.msra.mxu1 %vm110_vm0, %v63_v34 }
  0x24   :  { %5613 = vmatprep.subr.mxu0 %v5973_v0  ;;  %5610 = vmatprep.mubr.msk.f32.mxu1 %vm5974_vm1, %v5973_v0 }
  0x25   :  { %5606 = vmatmul.mubr.msk.f32.vlgmr.msra.gmra.mxu0 %vm110_vm0, %v30_v35  ;;  %5618 = vmatprep.subr.mxu1 %v5973_v0 }
  0x26   :  { %5614 = vmatpush3.xpose.msk.msra.mxu0 %vm110_vm0, %v64_v36  ;;  %5611 = vmatmul.mubr.msk.f32.vlgmr.msra.gmra.mxu1 %vm110_vm0, %v31_v37 }
  0x27   :  { %5615 = vmatprep.mubr.msk.f32.mxu0 %vm5974_vm1, %v5973_v0  ;;  %5619 = vmatpush3.xpose.msk.msra.mxu1 %vm110_vm0, %v65_v38 }
  0x28   :  { %5623 = vmatprep.subr.mxu0 %v5973_v0  ;;  %5620 = vmatprep.mubr.msk.f32.mxu1 %vm5974_vm1, %v5973_v0 }
  0x29   :  { %5616 = vmatmul.mubr.msk.f32.vlgmr.msra.gmra.mxu0 %vm110_vm0, %v32_v39  ;;  %5628 = vmatprep.subr.mxu1 %v5973_v0 }
  0x2a   :  { %5624 = vmatpush3.xpose.msk.msra.mxu0 %vm110_vm0, %v66_v40  ;;  %5621 = vmatmul.mubr.msk.f32.vlgmr.msra.gmra.mxu1 %vm110_vm0, %v33_v41 }
  0x2b   :  { %5625 = vmatprep.mubr.msk.f32.mxu0 %vm5974_vm1, %v5973_v0  ;;  %5629 = vmatpush3.xpose.msk.msra.mxu1 %vm110_vm0, %v67_v42 }
  0x2c   :  { %5633 = vmatprep.subr.mxu0 %v5973_v0  ;;  %5630 = vmatprep.mubr.msk.f32.mxu1 %vm5974_vm1, %v5973_v0 }
  0x2d   :  { %5626 = vmatmul.mubr.msk.f32.vlgmr.msra.gmra.mxu0 %vm110_vm0, %v34_v43  ;;  %5638 = vmatprep.subr.mxu1 %v5973_v0 }
  0x2e   :  { %5634 = vmatpush3.xpose.msk.msra.mxu0 %vm110_vm0, %v68_v44  ;;  %5631 = vmatmul.mubr.msk.f32.vlgmr.msra.gmra.mxu1 %vm110_vm0, %v35_v45 }
  0x2f   :  { %5635 = vmatprep.mubr.msk.f32.mxu0 %vm5974_vm1, %v5973_v0  ;;  %5639 = vmatpush3.xpose.msk.msra.mxu1 %vm110_vm0, %v69_v46 }
  0x30   :  { %5643 = vmatprep.subr.mxu0 %v5973_v0  ;;  %5640 = vmatprep.mubr.msk.f32.mxu1 %vm5974_vm1, %v5973_v0 }
  0x31   :  { %5636 = vmatmul.mubr.msk.f32.vlgmr.msra.gmra.mxu0 %vm110_vm0, %v36_v47  ;;  %5648 = vmatprep.subr.mxu1 %v5973_v0 }
  0x32   :  { %5644 = vmatpush3.xpose.msk.msra.mxu0 %vm110_vm0, %v70_v48  ;;  %5641 = vmatmul.mubr.msk.f32.vlgmr.msra.gmra.mxu1 %vm110_vm0, %v37_v49 }
  0x33   :  { %5645 = vmatprep.mubr.msk.f32.mxu0 %vm5974_vm1, %v5973_v0  ;;  %5649 = vmatpush3.xpose.msk.msra.mxu1 %vm110_vm0, %v71_v50 }
  0x34   :  { %5653 = vmatprep.subr.mxu0 %v5973_v0  ;;  %5650 = vmatprep.mubr.msk.f32.mxu1 %vm5974_vm1, %v5973_v0 }
  0x35   :  { %5646 = vmatmul.mubr.msk.f32.vlgmr.msra.gmra.mxu0 %vm110_vm0, %v38_v51  ;;  %5658 = vmatprep.subr.mxu1 %v5973_v0 }
  0x36   :  { %5654 = vmatpush3.xpose.msk.msra.mxu0 %vm110_vm0, %v72_v52  ;;  %5651 = vmatmul.mubr.msk.f32.vlgmr.msra.gmra.mxu1 %vm110_vm0, %v39_v53 }
  0x37   :  { %5655 = vmatprep.mubr.msk.f32.mxu0 %vm5974_vm1, %v5973_v0  ;;  %5659 = vmatpush3.xpose.msk.msra.mxu1 %vm110_vm0, %v73_v54 }
  0x38   :  { %5663 = vmatprep.subr.mxu0 %v5973_v0  ;;  %5660 = vmatprep.mubr.msk.f32.mxu1 %vm5974_vm1, %v5973_v0 }
  0x39   :  { %5656 = vmatmul.mubr.msk.f32.vlgmr.msra.gmra.mxu0 %vm110_vm0, %v40_v55  ;;  %5668 = vmatprep.subr.mxu1 %v5973_v0 }
  0x3a   :  { %5664 = vmatpush3.xpose.msk.msra.mxu0 %vm110_vm0, %v74_v56  ;;  %5661 = vmatmul.mubr.msk.f32.vlgmr.msra.gmra.mxu1 %vm110_vm0, %v41_v57 }
  0x3b   :  { %5665 = vmatprep.mubr.msk.f32.mxu0 %vm5974_vm1, %v5973_v0  ;;  %5669 = vmatpush3.xpose.msk.msra.mxu1 %vm110_vm0, %v75_v58 }
  0x3c   :  { %5673 = vmatprep.subr.mxu0 %v5973_v0  ;;  %5670 = vmatprep.mubr.msk.f32.mxu1 %vm5974_vm1, %v5973_v0 }
  0x3d   :  { %5666 = vmatmul.mubr.msk.f32.vlgmr.msra.gmra.mxu0 %vm110_vm0, %v42_v59  ;;  %5678 = vmatprep.subr.mxu1 %v5973_v0 }
  0x3e   :  { %5674 = vmatpush3.xpose.msk.msra.mxu0 %vm110_vm0, %v76_v60  ;;  %5671 = vmatmul.mubr.msk.f32.vlgmr.msra.gmra.mxu1 %vm110_vm0, %v43_v61 }
  0x3f   :  { %5675 = vmatprep.mubr.msk.f32.mxu0 %vm5974_vm1, %v5973_v0  ;;  %5679 = vmatpush3.xpose.msk.msra.mxu1 %vm110_vm0, %v77_v62 }
  0x40   :  { %5680 = vmatprep.mubr.msk.f32.mxu1 %vm5974_vm1, %v5973_v0  ;;  %5683 = vmatprep.subr.mxu0 %v5973_v0 }
  0x41   :  { %5676 = vmatmul.mubr.msk.f32.vlgmr.msra.gmra.mxu0 %vm110_vm0, %v44_v63  ;;  %5688 = vmatprep.subr.mxu1 %v5973_v0 }
  0x42   :  { %5681 = vmatmul.mubr.msk.f32.vlgmr.msra.gmra.mxu1 %vm110_vm0, %v45_v1  ;;  %5685 = vmatprep.mubr.msk.f32.mxu0 %vm5974_vm1, %v5973_v0 }
  0x43   :  { %5690 = vmatprep.mubr.msk.f32.mxu1 %vm5974_vm1, %v5973_v0 }
  0xc5   :  { %v183_v2 = vpop.f32.mrf.mxu0 }
  0xc6   :  { %v6353_v3 = vmul.f32 0.35355338, %v183_v2  ;;  %v259_v4 = vpop.f32.mrf.mxu1 }
  0xc7   :  { %v5527_v5 = vpop.f32.mrf.mxu0  ;;  %v6355_v6 = vmul.f32 0.35355338, %v259_v4 }
  0xc8   :  { %v2575_v7 = vsel %vm110_vm0, %v6353_v3, -inf  ;;  %v5532_v8 = vpop.f32.mrf.mxu1 }
  0xc9   :  { %2576 = vmax.xlane.f32.xlu0 %v2575_v7  ;;  %v335_v9 = vpop.f32.mrf.mxu0  ;;  %v2578_v12 = vsel %vm110_vm0, %v6355_v6, -inf }
  0xca   :  { %v6359_v10 = vmul.f32 0.35355338, %v335_v9  ;;  %v411_v11 = vpop.f32.mrf.mxu1 }
  0xcb   :  { %v5537_v13 = vpop.f32.mrf.mxu0  ;;  %v6363_v14 = vmul.f32 0.35355338, %v411_v11 }
  0xcc   :  { %v2581_v15 = vsel %vm110_vm0, %v6359_v10, -inf  ;;  %v5542_v16 = vpop.f32.mrf.mxu1 }
  0xcd   :  { %2579 = vmax.xlane.f32.xlu0 %v2578_v12  ;;  %2582 = vmax.xlane.f32.xlu1 %v2581_v15  ;;  %v487_v17 = vpop.f32.mrf.mxu0  ;;  %v2584_v20 = vsel %vm110_vm0, %v6363_v14, -inf }
  0xce   :  { %v6367_v18 = vmul.f32 0.35355338, %v487_v17  ;;  %v563_v19 = vpop.f32.mrf.mxu1 }
  0xcf   :  { %v5547_v21 = vpop.f32.mrf.mxu0  ;;  %v6371_v22 = vmul.f32 0.35355338, %v563_v19 }
  0xd0   :  { %v2587_v23 = vsel %vm110_vm0, %v6367_v18, -inf  ;;  %v5552_v24 = vpop.f32.mrf.mxu1 }
  0xd1   :  { %2585 = vmax.xlane.f32.xlu1 %v2584_v20  ;;  %2588 = vmax.xlane.f32.xlu0 %v2587_v23  ;;  %v639_v25 = vpop.f32.mrf.mxu0  ;;  %v2590_v28 = vsel %vm110_vm0, %v6371_v22, -inf }
  0xd2   :  { %v6375_v26 = vmul.f32 0.35355338, %v639_v25  ;;  %v715_v27 = vpop.f32.mrf.mxu1 }
  0xd3   :  { %v5557_v29 = vpop.f32.mrf.mxu0  ;;  %v6379_v30 = vmul.f32 0.35355338, %v715_v27 }
  0xd4   :  { %v2593_v31 = vsel %vm110_vm0, %v6375_v26, -inf  ;;  %v5562_v32 = vpop.f32.mrf.mxu1 }
  0xd5   :  { %2591 = vmax.xlane.f32.xlu1 %v2590_v28  ;;  %2594 = vmax.xlane.f32.xlu0 %v2593_v31  ;;  %v791_v33 = vpop.f32.mrf.mxu0  ;;  %v2596_v36 = vsel %vm110_vm0, %v6379_v30, -inf }
  0xd6   :  { %v6383_v34 = vmul.f32 0.35355338, %v791_v33  ;;  %v867_v35 = vpop.f32.mrf.mxu1 }
  0xd7   :  { %v5567_v37 = vpop.f32.mrf.mxu0  ;;  %v6387_v38 = vmul.f32 0.35355338, %v867_v35 }
  0xd8   :  { %v2599_v39 = vsel %vm110_vm0, %v6383_v34, -inf  ;;  %v5572_v40 = vpop.f32.mrf.mxu1 }
  0xd9   :  { %2597 = vmax.xlane.f32.xlu1 %v2596_v36  ;;  %2600 = vmax.xlane.f32.xlu0 %v2599_v39  ;;  %v943_v41 = vpop.f32.mrf.mxu0  ;;  %v2602_v44 = vsel %vm110_vm0, %v6387_v38, -inf }
  0xda   :  { %v6391_v42 = vmul.f32 0.35355338, %v943_v41  ;;  %v1019_v43 = vpop.f32.mrf.mxu1 }
  0xdb   :  { %v5577_v45 = vpop.f32.mrf.mxu0  ;;  %v6395_v46 = vmul.f32 0.35355338, %v1019_v43 }
  0xdc   :  { %v2605_v47 = vsel %vm110_vm0, %v6391_v42, -inf  ;;  %v5582_v48 = vpop.f32.mrf.mxu1 }
  0xdd   :  { %2603 = vmax.xlane.f32.xlu1 %v2602_v44  ;;  %2606 = vmax.xlane.f32.xlu0 %v2605_v47  ;;  %v1095_v49 = vpop.f32.mrf.mxu0  ;;  %v2608_v52 = vsel %vm110_vm0, %v6395_v46, -inf }
  0xde   :  { %v6399_v50 = vmul.f32 0.35355338, %v1095_v49  ;;  %v1171_v51 = vpop.f32.mrf.mxu1 }
  0xdf   :  { %v5587_v53 = vpop.f32.mrf.mxu0  ;;  %v6403_v54 = vmul.f32 0.35355338, %v1171_v51 }
  0xe0   :  { %v2611_v55 = vsel %vm110_vm0, %v6399_v50, -inf  ;;  %v5592_v56 = vpop.f32.mrf.mxu1 }
  0xe1   :  { %2609 = vmax.xlane.f32.xlu1 %v2608_v52  ;;  %2612 = vmax.xlane.f32.xlu0 %v2611_v55  ;;  %v1247_v57 = vpop.f32.mrf.mxu0  ;;  %v2614_v60 = vsel %vm110_vm0, %v6403_v54, -inf }
  0xe2   :  { %v6407_v58 = vmul.f32 0.35355338, %v1247_v57  ;;  %v1323_v59 = vpop.f32.mrf.mxu1 }
  0xe3   :  { %v5597_v61 = vpop.f32.mrf.mxu0  ;;  %v6411_v62 = vmul.f32 0.35355338, %v1323_v59 }
  0xe4   :  { %v2617_v63 = vsel %vm110_vm0, %v6407_v58, -inf  ;;  %v5602_v1 = vpop.f32.mrf.mxu1 }
  0xe5   :  { %2615 = vmax.xlane.f32.xlu1 %v2614_v60  ;;  %2618 = vmax.xlane.f32.xlu0 %v2617_v63  ;;  %v1399_v2 = vpop.f32.mrf.mxu0  ;;  %v2620_v7 = vsel %vm110_vm0, %v6411_v62, -inf }
  0xe6   :  { %v6415_v4 = vmul.f32 0.35355338, %v1399_v2  ;;  %v1475_v5 = vpop.f32.mrf.mxu1 }
  0xe7   :  { %v5607_v8 = vpop.f32.mrf.mxu0  ;;  %v6419_v9 = vmul.f32 0.35355338, %v1475_v5 }
  0xe8   :  { %v2623_v11 = vsel %vm110_vm0, %v6415_v4, -inf  ;;  %v5612_v12 = vpop.f32.mrf.mxu1 }
  0xe9   :  { %2621 = vmax.xlane.f32.xlu1 %v2620_v7  ;;  %2624 = vmax.xlane.f32.xlu0 %v2623_v11  ;;  %v1551_v13 = vpop.f32.mrf.mxu0  ;;  %v2626_v17 = vsel %vm110_vm0, %v6419_v9, -inf }
  0xea   :  { %v6423_v15 = vmul.f32 0.35355338, %v1551_v13  ;;  %v1627_v16 = vpop.f32.mrf.mxu1 }
  0xeb   :  { %v5617_v19 = vpop.f32.mrf.mxu0  ;;  %v6427_v20 = vmul.f32 0.35355338, %v1627_v16 }
  0xec   :  { %v2629_v21 = vsel %vm110_vm0, %v6423_v15, -inf  ;;  %v5622_v23 = vpop.f32.mrf.mxu1 }
  0xed   :  { %2627 = vmax.xlane.f32.xlu1 %v2626_v17  ;;  %2630 = vmax.xlane.f32.xlu0 %v2629_v21  ;;  %v1703_v24 = vpop.f32.mrf.mxu0  ;;  %v2632_v28 = vsel %vm110_vm0, %v6427_v20, -inf }
  0xee   :  { %v6431_v25 = vmul.f32 0.35355338, %v1703_v24  ;;  %v1779_v27 = vpop.f32.mrf.mxu1 }
  0xef   :  { %v5627_v29 = vpop.f32.mrf.mxu0  ;;  %v6435_v31 = vmul.f32 0.35355338, %v1779_v27 }
  0xf0   :  { %v2635_v32 = vsel %vm110_vm0, %v6431_v25, -inf  ;;  %v5632_v33 = vpop.f32.mrf.mxu1 }
  0xf1   :  { %2633 = vmax.xlane.f32.xlu1 %v2632_v28  ;;  %2636 = vmax.xlane.f32.xlu0 %v2635_v32  ;;  %v1855_v35 = vpop.f32.mrf.mxu0  ;;  %v2638_v39 = vsel %vm110_vm0, %v6435_v31, -inf }
  0xf2   :  { %v6439_v36 = vmul.f32 0.35355338, %v1855_v35  ;;  %v1931_v37 = vpop.f32.mrf.mxu1 }
  0xf3   :  { %v5637_v40 = vpop.f32.mrf.mxu0  ;;  %v6443_v41 = vmul.f32 0.35355338, %v1931_v37 }
  0xf4   :  { %v2641_v43 = vsel %vm110_vm0, %v6439_v36, -inf  ;;  %v5642_v44 = vpop.f32.mrf.mxu1 }
  0xf5   :  { %2639 = vmax.xlane.f32.xlu1 %v2638_v39  ;;  %2642 = vmax.xlane.f32.xlu0 %v2641_v43  ;;  %v2007_v45 = vpop.f32.mrf.mxu0  ;;  %v2644_v49 = vsel %vm110_vm0, %v6443_v41, -inf }
  0xf6   :  { %v6447_v47 = vmul.f32 0.35355338, %v2007_v45  ;;  %v2083_v48 = vpop.f32.mrf.mxu1 }
  0xf7   :  { %v5647_v51 = vpop.f32.mrf.mxu0  ;;  %v6451_v52 = vmul.f32 0.35355338, %v2083_v48 }
  0xf8   :  { %v2647_v53 = vsel %vm110_vm0, %v6447_v47, -inf  ;;  %v5652_v55 = vpop.f32.mrf.mxu1 }
  0xf9   :  { %2645 = vmax.xlane.f32.xlu1 %v2644_v49  ;;  %2648 = vmax.xlane.f32.xlu0 %v2647_v53  ;;  %v2159_v56 = vpop.f32.mrf.mxu0  ;;  %v2650_v60 = vsel %vm110_vm0, %v6451_v52, -inf }
  0xfa   :  { %v6455_v57 = vmul.f32 0.35355338, %v2159_v56  ;;  %v2235_v59 = vpop.f32.mrf.mxu1 }
  0xfb   :  { %v5657_v61 = vpop.f32.mrf.mxu0  ;;  %v6459_v63 = vmul.f32 0.35355338, %v2235_v59 }
  0xfc   :  { %v2653_v1 = vsel %vm110_vm0, %v6455_v57, -inf  ;;  %v5662_v2 = vpop.f32.mrf.mxu1 }
  0xfd   :  { %2651 = vmax.xlane.f32.xlu1 %v2650_v60  ;;  %2654 = vmax.xlane.f32.xlu0 %v2653_v1  ;;  %v2311_v5 = vpop.f32.mrf.mxu0  ;;  %v2656_v11 = vsel %vm110_vm0, %v6459_v63, -inf }
  0xfe   :  { %v6463_v7 = vmul.f32 0.35355338, %v2311_v5  ;;  %v2387_v8 = vpop.f32.mrf.mxu1 }
  0xff   :  { %v5667_v12 = vpop.f32.mrf.mxu0  ;;  %v6467_v13 = vmul.f32 0.35355338, %v2387_v8 }
 0x100   :  { %v2659_v16 = vsel %vm110_vm0, %v6463_v7, -inf  ;;  %v5672_v17 = vpop.f32.mrf.mxu1 }
 0x101   :  { %2657 = vmax.xlane.f32.xlu1 %v2656_v11  ;;  %2660 = vmax.xlane.f32.xlu0 %v2659_v16  ;;  %v2463_v19 = vpop.f32.mrf.mxu0  ;;  %v2662_v24 = vsel %vm110_vm0, %v6467_v13, -inf }
 0x102   :  { %v6471_v21 = vmul.f32 0.35355338, %v2463_v19  ;;  %v2539_v23 = vpop.f32.mrf.mxu1 }
 0x103   :  { %v6475_v27 = vmul.f32 0.35355338, %v2539_v23  ;;  %v5677_v28 = vpop.f32.mrf.mxu0 }
 0x104   :  { %v2665_v29 = vsel %vm110_vm0, %v6471_v21, -inf  ;;  %v5682_v32 = vpop.f32.mrf.mxu1 }
 0x105   :  { %2663 = vmax.xlane.f32.xlu1 %v2662_v24  ;;  %2666 = vmax.xlane.f32.xlu0 %v2665_v29  ;;  %v2668_v33 = vsel %vm110_vm0, %v6475_v27, -inf }
 0x109   :  { %2669 = vmax.xlane.f32.xlu1 %v2668_v33 }
 0x152   :  { %v2577_v35 = vpop.xlane.xlu0 %2576 }
 0x153   :  { %v2671_v37 = vsub.f32 %v6353_v3, %v2577_v35 }
 0x155   :  { %v2703_v39 = vmul.f32 1.442695, %v2671_v37 }
 0x156   :  { %v2580_v40 = vpop.xlane.xlu0 %2579  ;;  %v2583_v43 = vpop.xlane.xlu1 %2582 }
 0x157   :  { %5845 = vpow2.f32 %v2703_v39  ;;  %v2672_v44 = vsub.f32 %v6355_v6, %v2580_v40  ;;  %v2673_v45 = vsub.f32 %v6359_v10, %v2583_v43 }
 0x159   :  { %v2705_v48 = vmul.f32 1.442695, %v2672_v44  ;;  %v2707_v49 = vmul.f32 1.442695, %v2673_v45 }
 0x15a   :  { %v2586_v51 = vpop.xlane.xlu1 %2585  ;;  %v2589_v53 = vpop.xlane.xlu0 %2588 }
 0x15b   :  { %5847 = vpow2.f32 %v2705_v48  ;;  %v2674_v55 = vsub.f32 %v6363_v14, %v2586_v51  ;;  %v2675_v56 = vsub.f32 %v6367_v18, %v2589_v53 }
 0x15c   :  { %5849 = vpow2.f32 %v2707_v49 }
 0x15d   :  { %v2709_v59 = vmul.f32 1.442695, %v2674_v55  ;;  %v2711_v3 = vmul.f32 1.442695, %v2675_v56 }
 0x15e   :  { %v2592_v60 = vpop.xlane.xlu1 %2591  ;;  %v2595_v61 = vpop.xlane.xlu0 %2594 }
 0x15f   :  { %5851 = vpow2.f32 %v2709_v59  ;;  %v2676_v1 = vsub.f32 %v6371_v22, %v2592_v60  ;;  %v2677_v6 = vsub.f32 %v6375_v26, %v2595_v61 }
 0x160   :  { %5853 = vpow2.f32 %v2711_v3 }
 0x161   :  { %v2713_v10 = vmul.f32 1.442695, %v2676_v1  ;;  %v2715_v2 = vmul.f32 1.442695, %v2677_v6 }
 0x162   :  { %v2598_v5 = vpop.xlane.xlu1 %2597  ;;  %v2601_v8 = vpop.xlane.xlu0 %2600 }
 0x163   :  { %5855 = vpow2.f32 %v2713_v10  ;;  %v2678_v14 = vsub.f32 %v6379_v30, %v2598_v5  ;;  %v2679_v18 = vsub.f32 %v6383_v34, %v2601_v8 }
 0x164   :  { %v6490_v11 = vpop.eup %5845  ;;  %5857 = vpow2.f32 %v2715_v2 }
 0x165   :  { %v2717_v12 = vmul.f32 1.442695, %v2678_v14  ;;  %v2719_v16 = vmul.f32 1.442695, %v2679_v18  ;;  %v2767_v22 = vsel %vm110_vm0, %v6490_v11, 0.0 }
 0x166   :  { %v2604_v17 = vpop.xlane.xlu1 %2603  ;;  %v2607_v26 = vpop.xlane.xlu0 %2606  ;;  %2768 = vadd.xlane.f32.xlu0 %v2767_v22 }
 0x167   :  { %5859 = vpow2.f32 %v2717_v12  ;;  %v2680_v19 = vsub.f32 %v6387_v38, %v2604_v17  ;;  %v2681_v23 = vsub.f32 %v6391_v42, %v2607_v26 }
 0x168   :  { %v6496_v24 = vpop.eup %5847  ;;  %5861 = vpow2.f32 %v2719_v16 }
 0x169   :  { %v6498_v30 = vpop.eup %5849  ;;  %v2721_v34 = vmul.f32 1.442695, %v2680_v19  ;;  %v2723_v28 = vmul.f32 1.442695, %v2681_v23  ;;  %v2770_v29 = vsel %vm110_vm0, %v6496_v24, 0.0 }
 0x16a   :  { %2771 = vadd.xlane.f32.xlu1 %v2770_v29  ;;  %v2610_v32 = vpop.xlane.xlu1 %2609  ;;  %v2613_v33 = vpop.xlane.xlu0 %2612  ;;  %v2773_v35 = vsel %vm110_vm0, %v6498_v30, 0.0 }
 0x16b   :  { %5863 = vpow2.f32 %v2721_v34  ;;  %v2682_v38 = vsub.f32 %v6395_v46, %v2610_v32  ;;  %v2683_v42 = vsub.f32 %v6399_v50, %v2613_v33  ;;  %2774 = vadd.xlane.f32.xlu0 %v2773_v35 }
 0x16c   :  { %v6506_v37 = vpop.eup %5851  ;;  %5865 = vpow2.f32 %v2723_v28 }
 0x16d   :  { %v6508_v39 = vpop.eup %5853  ;;  %v2725_v40 = vmul.f32 1.442695, %v2682_v38  ;;  %v2727_v43 = vmul.f32 1.442695, %v2683_v42  ;;  %v2776_v44 = vsel %vm110_vm0, %v6506_v37, 0.0 }
 0x16e   :  { %2777 = vadd.xlane.f32.xlu1 %v2776_v44  ;;  %v2616_v45 = vpop.xlane.xlu1 %2615  ;;  %v2619_v48 = vpop.xlane.xlu0 %2618  ;;  %v2779_v49 = vsel %vm110_vm0, %v6508_v39, 0.0 }
 0x16f   :  { %5867 = vpow2.f32 %v2725_v40  ;;  %v2684_v46 = vsub.f32 %v6403_v54, %v2616_v45  ;;  %v2685_v50 = vsub.f32 %v6407_v58, %v2619_v48  ;;  %2780 = vadd.xlane.f32.xlu0 %v2779_v49 }
 0x170   :  { %v6516_v51 = vpop.eup %5855  ;;  %5869 = vpow2.f32 %v2727_v43 }
 0x171   :  { %v6518_v53 = vpop.eup %5857  ;;  %v2729_v55 = vmul.f32 1.442695, %v2684_v46  ;;  %v2731_v56 = vmul.f32 1.442695, %v2685_v50  ;;  %v2782_v59 = vsel %vm110_vm0, %v6516_v51, 0.0 }
 0x172   :  { %2783 = vadd.xlane.f32.xlu1 %v2782_v59  ;;  %v2622_v3 = vpop.xlane.xlu1 %2621  ;;  %v2625_v60 = vpop.xlane.xlu0 %2624  ;;  %v2785_v61 = vsel %vm110_vm0, %v6518_v53, 0.0 }
 0x173   :  { %5871 = vpow2.f32 %v2729_v55  ;;  %v2686_v54 = vsub.f32 %v6411_v62, %v2622_v3  ;;  %v2687_v58 = vsub.f32 %v6415_v4, %v2625_v60  ;;  %2786 = vadd.xlane.f32.xlu0 %v2785_v61 }
 0x174   :  { %v6526_v1 = vpop.eup %5859  ;;  %5873 = vpow2.f32 %v2731_v56 }
 0x175   :  { %v6528_v6 = vpop.eup %5861  ;;  %v2733_v10 = vmul.f32 1.442695, %v2686_v54  ;;  %v2735_v2 = vmul.f32 1.442695, %v2687_v58  ;;  %v2788_v5 = vsel %vm110_vm0, %v6526_v1, 0.0 }
 0x176   :  { %2789 = vadd.xlane.f32.xlu1 %v2788_v5  ;;  %v2628_v8 = vpop.xlane.xlu1 %2627  ;;  %v2631_v14 = vpop.xlane.xlu0 %2630  ;;  %v2791_v18 = vsel %vm110_vm0, %v6528_v6, 0.0 }
 0x177   :  { %5875 = vpow2.f32 %v2733_v10  ;;  %v2688_v62 = vsub.f32 %v6419_v9, %v2628_v8  ;;  %v2689_v4 = vsub.f32 %v6423_v15, %v2631_v14  ;;  %2792 = vadd.xlane.f32.xlu0 %v2791_v18 }
 0x178   :  { %v6536_v12 = vpop.eup %5863  ;;  %5877 = vpow2.f32 %v2735_v2 }
 0x179   :  { %v6538_v16 = vpop.eup %5865  ;;  %v2737_v22 = vmul.f32 1.442695, %v2688_v62  ;;  %v2739_v17 = vmul.f32 1.442695, %v2689_v4  ;;  %v2794_v26 = vsel %vm110_vm0, %v6536_v12, 0.0 }
 0x17a   :  { %2795 = vadd.xlane.f32.xlu1 %v2794_v26  ;;  %v2634_v19 = vpop.xlane.xlu1 %2633  ;;  %v2637_v23 = vpop.xlane.xlu0 %2636  ;;  %v2797_v34 = vsel %vm110_vm0, %v6538_v16, 0.0 }
 0x17b   :  { %5879 = vpow2.f32 %v2737_v22  ;;  %v2690_v9 = vsub.f32 %v6427_v20, %v2634_v19  ;;  %v2691_v15 = vsub.f32 %v6431_v25, %v2637_v23  ;;  %2798 = vadd.xlane.f32.xlu0 %v2797_v34  ;;  %v78_v20 = vld [vmem:[%s7021_s2] sm:$0xff] }
 0x17c   :  { %v6546_v28 = vpop.eup %5867  ;;  %5881 = vpow2.f32 %v2739_v17  ;;  %5684 = vmatpush3.msra.mxu0 %v78_v20 }
 0x17d   :  { %v6548_v29 = vpop.eup %5869  ;;  %v2741_v32 = vmul.f32 1.442695, %v2690_v9  ;;  %v2743_v33 = vmul.f32 1.442695, %v2691_v15  ;;  %v2800_v35 = vsel %vm110_vm0, %v6546_v28, 0.0  ;;  %5693 = vmatprep.subr.mxu0 %v5973_v0 }
 0x17e   :  { %2801 = vadd.xlane.f32.xlu1 %v2800_v35  ;;  %v2640_v38 = vpop.xlane.xlu1 %2639  ;;  %v2643_v42 = vpop.xlane.xlu0 %2642  ;;  %v2803_v40 = vsel %vm110_vm0, %v6548_v29, 0.0 }
 0x17f   :  { %5883 = vpow2.f32 %v2741_v32  ;;  %v2692_v25 = vsub.f32 %v6435_v31, %v2640_v38  ;;  %v2693_v43 = vsub.f32 %v6439_v36, %v2643_v42  ;;  %2804 = vadd.xlane.f32.xlu0 %v2803_v40  ;;  %v79_v31 = vld [vmem:[%s7021_s2 + $0x8] sm:$0xff] }
 0x180   :  { %v6559_v44 = vpop.eup %5871  ;;  %5885 = vpow2.f32 %v2743_v33  ;;  %5689 = vmatpush3.msra.mxu1 %v79_v31 }
 0x181   :  { %v6562_v45 = vpop.eup %5873  ;;  %v2745_v48 = vmul.f32 1.442695, %v2692_v25  ;;  %v2747_v49 = vmul.f32 1.442695, %v2693_v43  ;;  %v2806_v46 = vsel %vm110_vm0, %v6559_v44, 0.0  ;;  %5698 = vmatprep.subr.mxu1 %v5973_v0 }
 0x182   :  { %2807 = vadd.xlane.f32.xlu1 %v2806_v46  ;;  %v2646_v36 = vpop.xlane.xlu1 %2645  ;;  %v2649_v50 = vpop.xlane.xlu0 %2648  ;;  %v2809_v55 = vsel %vm110_vm0, %v6562_v45, 0.0 }
 0x183   :  { %5887 = vpow2.f32 %v2745_v48  ;;  %v2694_v56 = vsub.f32 %v6443_v41, %v2646_v36  ;;  %v2695_v59 = vsub.f32 %v6447_v47, %v2649_v50  ;;  %2810 = vadd.xlane.f32.xlu0 %v2809_v55 }
 0x184   :  { %v6574_v3 = vpop.eup %5875  ;;  %5889 = vpow2.f32 %v2747_v49 }
 0x185   :  { %v6576_v60 = vpop.eup %5877  ;;  %v2749_v61 = vmul.f32 1.442695, %v2694_v56  ;;  %v2751_v54 = vmul.f32 1.442695, %v2695_v59  ;;  %v2812_v58 = vsel %vm110_vm0, %v6574_v3, 0.0 }
 0x186   :  { %2813 = vadd.xlane.f32.xlu1 %v2812_v58  ;;  %v2652_v10 = vpop.xlane.xlu1 %2651  ;;  %v2655_v2 = vpop.xlane.xlu0 %2654  ;;  %v2815_v41 = vsel %vm110_vm0, %v6576_v60, 0.0 }
 0x187   :  { %5891 = vpow2.f32 %v2749_v61  ;;  %v2696_v47 = vsub.f32 %v6451_v52, %v2652_v10  ;;  %v2697_v5 = vsub.f32 %v6455_v57, %v2655_v2  ;;  %2816 = vadd.xlane.f32.xlu0 %v2815_v41 }
 0x188   :  { %v6584_v8 = vpop.eup %5879  ;;  %5893 = vpow2.f32 %v2751_v54 }
 0x189   :  { %v6586_v14 = vpop.eup %5881  ;;  %v2753_v18 = vmul.f32 1.442695, %v2696_v47  ;;  %v2755_v62 = vmul.f32 1.442695, %v2697_v5  ;;  %v2818_v4 = vsel %vm110_vm0, %v6584_v8, 0.0 }
 0x18a   :  { %2819 = vadd.xlane.f32.xlu1 %v2818_v4  ;;  %v2658_v22 = vpop.xlane.xlu1 %2657  ;;  %v2661_v17 = vpop.xlane.xlu0 %2660  ;;  %v2821_v26 = vsel %vm110_vm0, %v6586_v14, 0.0 }
 0x18b   :  { %5895 = vpow2.f32 %v2753_v18  ;;  %v2698_v52 = vsub.f32 %v6459_v63, %v2658_v22  ;;  %v2699_v57 = vsub.f32 %v6463_v7, %v2661_v17  ;;  %2822 = vadd.xlane.f32.xlu0 %v2821_v26 }
 0x18c   :  { %v6594_v19 = vpop.eup %5883  ;;  %5897 = vpow2.f32 %v2755_v62 }
 0x18d   :  { %v6596_v23 = vpop.eup %5885  ;;  %v2757_v34 = vmul.f32 1.442695, %v2698_v52  ;;  %v2759_v9 = vmul.f32 1.442695, %v2699_v57  ;;  %v2824_v15 = vsel %vm110_vm0, %v6594_v19, 0.0 }
 0x18e   :  { %2825 = vadd.xlane.f32.xlu1 %v2824_v15  ;;  %v2664_v32 = vpop.xlane.xlu1 %2663  ;;  %v2827_v33 = vsel %vm110_vm0, %v6596_v23, 0.0  ;;  %v2667_v35 = vpop.xlane.xlu0 %2666  ;;  %v80_v15 = vld [vmem:[%s7021_s2 + $0x10] sm:$0xff] }
 0x18f   :  { %5899 = vpow2.f32 %v2757_v34  ;;  %v2700_v63 = vsub.f32 %v6467_v13, %v2664_v32  ;;  %2828 = vadd.xlane.f32.xlu0 %v2827_v33  ;;  %v2701_v7 = vsub.f32 %v6471_v21, %v2667_v35 }
 0x190   :  { %v6604_v38 = vpop.eup %5887  ;;  %5901 = vpow2.f32 %v2759_v9 }
 0x191   :  { %v6606_v42 = vpop.eup %5889  ;;  %v2761_v40 = vmul.f32 1.442695, %v2700_v63  ;;  %v2763_v20 = vmul.f32 1.442695, %v2701_v7  ;;  %v2830_v25 = vsel %vm110_vm0, %v6604_v38, 0.0 }
 0x192   :  { %2831 = vadd.xlane.f32.xlu1 %v2830_v25  ;;  %v2670_v43 = vpop.xlane.xlu1 %2669  ;;  %v2833_v48 = vsel %vm110_vm0, %v6606_v42, 0.0  ;;  %v82_v25 = vld [vmem:[%s7021_s2 + $0x20] sm:$0xff] }
 0x193   :  { %5903 = vpow2.f32 %v2761_v40  ;;  %v2702_v13 = vsub.f32 %v6475_v27, %v2670_v43  ;;  %2834 = vadd.xlane.f32.xlu0 %v2833_v48 }
 0x194   :  { %v6613_v21 = vpop.eup %5891  ;;  %5905 = vpow2.f32 %v2763_v20 }
 0x195   :  { %v6615_v49 = vpop.eup %5893  ;;  %v2765_v46 = vmul.f32 1.442695, %v2702_v13  ;;  %v2836_v31 = vsel %vm110_vm0, %v6613_v21, 0.0  ;;  %v83_v13 = vld [vmem:[%s7021_s2 + $0x28] sm:$0xff] }
 0x196   :  { %2837 = vadd.xlane.f32.xlu1 %v2836_v31  ;;  %v2839_v36 = vsel %vm110_vm0, %v6615_v49, 0.0 }
 0x197   :  { %5907 = vpow2.f32 %v2765_v46  ;;  %2840 = vadd.xlane.f32.xlu0 %v2839_v36  ;;  %v84_v36 = vld [vmem:[%s7021_s2 + $0x30] sm:$0xff] }
 0x198   :  { %v6621_v50 = vpop.eup %5895 }
 0x199   :  { %v6623_v55 = vpop.eup %5897  ;;  %v2842_v27 = vsel %vm110_vm0, %v6621_v50, 0.0 }
 0x19a   :  { %2843 = vadd.xlane.f32.xlu1 %v2842_v27  ;;  %v2845_v56 = vsel %vm110_vm0, %v6623_v55, 0.0 }
 0x19b   :  { %2846 = vadd.xlane.f32.xlu0 %v2845_v56 }
 0x19c   :  { %v6629_v59 = vpop.eup %5899 }
 0x19d   :  { %v6631_v61 = vpop.eup %5901  ;;  %v2848_v54 = vsel %vm110_vm0, %v6629_v59, 0.0 }
 0x19e   :  { %2849 = vadd.xlane.f32.xlu1 %v2848_v54  ;;  %v2851_v58 = vsel %vm110_vm0, %v6631_v61, 0.0  ;;  %v85_v54 = vld [vmem:[%s7021_s2 + $0x38] sm:$0xff] }
 0x19f   :  { %2852 = vadd.xlane.f32.xlu0 %v2851_v58 }
 0x1a0   :  { %v6637_v10 = vpop.eup %5903 }
 0x1a1   :  { %v6639_v2 = vpop.eup %5905  ;;  %v2854_v41 = vsel %vm110_vm0, %v6637_v10, 0.0 }
 0x1a2   :  { %2855 = vadd.xlane.f32.xlu1 %v2854_v41  ;;  %v2857_v47 = vsel %vm110_vm0, %v6639_v2, 0.0 }
 0x1a3   :  { %2858 = vadd.xlane.f32.xlu0 %v2857_v47  ;;  %v86_v47 = vld [vmem:[%s7021_s2 + $0x40] sm:$0xff] }
 0x1a4   :  { %v6645_v5 = vpop.eup %5907 }
 0x1a5   :  { %v2860_v18 = vsel %vm110_vm0, %v6645_v5, 0.0 }
 0x1a6   :  { %2861 = vadd.xlane.f32.xlu1 %v2860_v18 }
 0x1ef   :  { %v2769_v62 = vpop.xlane.xlu0 %2768 }
 0x1f0   :  { %5909 = vrcp.f32 %v2769_v62 }
 0x1f3   :  { %v2772_v4 = vpop.xlane.xlu1 %2771 }
 0x1f4   :  { %5911 = vrcp.f32 %v2772_v4  ;;  %v2775_v22 = vpop.xlane.xlu0 %2774  ;;  %v87_v4 = vld [vmem:[%s7021_s2 + $0x48] sm:$0xff] }
 0x1f5   :  { %5913 = vrcp.f32 %v2775_v22 }
 0x1f7   :  { %v2778_v17 = vpop.xlane.xlu1 %2777 }
 0x1f8   :  { %5915 = vrcp.f32 %v2778_v17  ;;  %v2781_v26 = vpop.xlane.xlu0 %2780 }
 0x1f9   :  { %5917 = vrcp.f32 %v2781_v26  ;;  %v88_v26 = vld [vmem:[%s7021_s2 + $0x50] sm:$0xff] }
 0x1fb   :  { %v2784_v52 = vpop.xlane.xlu1 %2783 }
 0x1fc   :  { %5919 = vrcp.f32 %v2784_v52  ;;  %v2787_v57 = vpop.xlane.xlu0 %2786 }
 0x1fd   :  { %v5910_v34 = vpop.eup %5909  ;;  %5921 = vrcp.f32 %v2787_v57 }
 0x1fe   :  { %v2895_v9 = vmul.f32 %v5910_v34, %v6490_v11  ;;  %v81_v11 = vld [vmem:[%s7021_s2 + $0x18] sm:$0xff] }
 0x1ff   :  { %v2790_v32 = vpop.xlane.xlu1 %2789  ;;  %v89_v34 = vld [vmem:[%s7021_s2 + $0x58] sm:$0xff] }
 0x200   :  { %5923 = vrcp.f32 %v2790_v32  ;;  %v2793_v33 = vpop.xlane.xlu0 %2792  ;;  %5686 = vmatmul.mubr.msk.f32.vlgmr.msra.gmra.mxu0 %vm110_vm0, %v2895_v9  ;;  %v90_v32 = vld [vmem:[%s7021_s2 + $0x60] sm:$0xff] }
 0x201   :  { %v5912_v35 = vpop.eup %5911  ;;  %5925 = vrcp.f32 %v2793_v33  ;;  %5694 = vmatpush3.msra.mxu0 %v80_v15  ;;  %5695 = vmatprep.mubr.msk.f32.mxu0 %vm5974_vm1, %v5973_v0 }
 0x202   :  { %v5914_v63 = vpop.eup %5913  ;;  %v2896_v7 = vmul.f32 %v5912_v35, %v6496_v24  ;;  %5703 = vmatprep.subr.mxu0 %v5973_v0 }
 0x203   :  { %v2796_v40 = vpop.xlane.xlu1 %2795  ;;  %v2897_v20 = vmul.f32 %v5914_v63, %v6498_v30  ;;  %v91_v63 = vld [vmem:[%s7021_s2 + $0x68] sm:$0xff] }
 0x204   :  { %5927 = vrcp.f32 %v2796_v40  ;;  %v2799_v43 = vpop.xlane.xlu0 %2798  ;;  %5691 = vmatmul.mubr.msk.f32.vlgmr.msra.gmra.mxu1 %vm110_vm0, %v2896_v7  ;;  %v92_v40 = vld [vmem:[%s7021_s2 + $0x70] sm:$0xff] }
 0x205   :  { %v5916_v48 = vpop.eup %5915  ;;  %5929 = vrcp.f32 %v2799_v43  ;;  %5696 = vmatmul.mubr.msk.f32.vlgmr.msra.gmra.mxu0 %vm110_vm0, %v2897_v20  ;;  %5699 = vmatpush3.msra.mxu1 %v81_v11  ;;  %v93_v43 = vld [vmem:[%s7021_s2 + $0x78] sm:$0xff] }
 0x206   :  { %v5918_v24 = vpop.eup %5917  ;;  %5700 = vmatprep.mubr.msk.f32.mxu1 %vm5974_vm1, %v5973_v0  ;;  %5704 = vmatpush3.msra.mxu0 %v82_v25  ;;  %v2898_v30 = vmul.f32 %v5916_v48, %v6506_v37 }
 0x207   :  { %v2802_v46 = vpop.xlane.xlu1 %2801  ;;  %5705 = vmatprep.mubr.msk.f32.mxu0 %vm5974_vm1, %v5973_v0  ;;  %v2899_v31 = vmul.f32 %v5918_v24, %v6508_v39  ;;  %5708 = vmatprep.subr.mxu1 %v5973_v0 }
 0x208   :  { %5931 = vrcp.f32 %v2802_v46  ;;  %v2805_v27 = vpop.xlane.xlu0 %2804  ;;  %5701 = vmatmul.mubr.msk.f32.vlgmr.msra.gmra.mxu1 %vm110_vm0, %v2898_v30  ;;  %5713 = vmatprep.subr.mxu0 %v5973_v0  ;;  %v94_v30 = vld [vmem:[%s7021_s2 + $0x80] sm:$0xff] }
 0x209   :  { %v5920_v37 = vpop.eup %5919  ;;  %5933 = vrcp.f32 %v2805_v27  ;;  %5706 = vmatmul.mubr.msk.f32.vlgmr.msra.gmra.mxu0 %vm110_vm0, %v2899_v31  ;;  %5709 = vmatpush3.msra.mxu1 %v83_v13  ;;  %v95_v31 = vld [vmem:[%s7021_s2 + $0x88] sm:$0xff] }
 0x20a   :  { %v5922_v56 = vpop.eup %5921  ;;  %5710 = vmatprep.mubr.msk.f32.mxu1 %vm5974_vm1, %v5973_v0  ;;  %5714 = vmatpush3.msra.mxu0 %v84_v36  ;;  %v2900_v39 = vmul.f32 %v5920_v37, %v6516_v51  ;;  %v96_v37 = vld [vmem:[%s7021_s2 + $0x90] sm:$0xff] }
 0x20b   :  { %v2808_v58 = vpop.xlane.xlu1 %2807  ;;  %5715 = vmatprep.mubr.msk.f32.mxu0 %vm5974_vm1, %v5973_v0  ;;  %v2901_v41 = vmul.f32 %v5922_v56, %v6518_v53  ;;  %5718 = vmatprep.subr.mxu1 %v5973_v0 }
 0x20c   :  { %5935 = vrcp.f32 %v2808_v58  ;;  %v2811_v18 = vpop.xlane.xlu0 %2810  ;;  %5711 = vmatmul.mubr.msk.f32.vlgmr.msra.gmra.mxu1 %vm110_vm0, %v2900_v39  ;;  %5723 = vmatprep.subr.mxu0 %v5973_v0 }
 0x20d   :  { %v5924_v51 = vpop.eup %5923  ;;  %5937 = vrcp.f32 %v2811_v18  ;;  %5716 = vmatmul.mubr.msk.f32.vlgmr.msra.gmra.mxu0 %vm110_vm0, %v2901_v41  ;;  %5719 = vmatpush3.msra.mxu1 %v85_v54  ;;  %v97_v54 = vld [vmem:[%s7021_s2 + $0x98] sm:$0xff] }
 0x20e   :  { %v5926_v62 = vpop.eup %5925  ;;  %5720 = vmatprep.mubr.msk.f32.mxu1 %vm5974_vm1, %v5973_v0  ;;  %5724 = vmatpush3.msra.mxu0 %v86_v47  ;;  %v2902_v53 = vmul.f32 %v5924_v51, %v6526_v1  ;;  %v98_v47 = vld [vmem:[%s7021_s2 + $0xa0] sm:$0xff] }
 0x20f   :  { %v2814_v22 = vpop.xlane.xlu1 %2813  ;;  %5725 = vmatprep.mubr.msk.f32.mxu0 %vm5974_vm1, %v5973_v0  ;;  %v2903_v17 = vmul.f32 %v5926_v62, %v6528_v6  ;;  %5728 = vmatprep.subr.mxu1 %v5973_v0  ;;  %v99_v62 = vld [vmem:[%s7021_s2 + $0xa8] sm:$0xff] }
 0x210   :  { %5939 = vrcp.f32 %v2814_v22  ;;  %v2817_v52 = vpop.xlane.xlu0 %2816  ;;  %5721 = vmatmul.mubr.msk.f32.vlgmr.msra.gmra.mxu1 %vm110_vm0, %v2902_v53  ;;  %5733 = vmatprep.subr.mxu0 %v5973_v0  ;;  %v100_v22 = vld [vmem:[%s7021_s2 + $0xb0] sm:$0xff] }
 0x211   :  { %v5928_v1 = vpop.eup %5927  ;;  %5941 = vrcp.f32 %v2817_v52  ;;  %5726 = vmatmul.mubr.msk.f32.vlgmr.msra.gmra.mxu0 %vm110_vm0, %v2903_v17  ;;  %5729 = vmatpush3.msra.mxu1 %v87_v4  ;;  %v101_v52 = vld [vmem:[%s7021_s2 + $0xb8] sm:$0xff] }
 0x212   :  { %v5930_v57 = vpop.eup %5929  ;;  %5730 = vmatprep.mubr.msk.f32.mxu1 %vm5974_vm1, %v5973_v0  ;;  %5734 = vmatpush3.msra.mxu0 %v88_v26  ;;  %v2904_v6 = vmul.f32 %v5928_v1, %v6536_v12 }
 0x213   :  { %v2820_v9 = vpop.xlane.xlu1 %2819  ;;  %5735 = vmatprep.mubr.msk.f32.mxu0 %vm5974_vm1, %v5973_v0  ;;  %v2905_v15 = vmul.f32 %v5930_v57, %v6538_v16  ;;  %5738 = vmatprep.subr.mxu1 %v5973_v0 }
 0x214   :  { %5943 = vrcp.f32 %v2820_v9  ;;  %v2823_v33 = vpop.xlane.xlu0 %2822  ;;  %5731 = vmatmul.mubr.msk.f32.vlgmr.msra.gmra.mxu1 %vm110_vm0, %v2904_v6  ;;  %5743 = vmatprep.subr.mxu0 %v5973_v0  ;;  %v102_v6 = vld [vmem:[%s7021_s2 + $0xc0] sm:$0xff] }
 0x215   :  { %v5932_v12 = vpop.eup %5931  ;;  %5945 = vrcp.f32 %v2823_v33  ;;  %5736 = vmatmul.mubr.msk.f32.vlgmr.msra.gmra.mxu0 %vm110_vm0, %v2905_v15  ;;  %5739 = vmatpush3.msra.mxu1 %v89_v34  ;;  %v103_v15 = vld [vmem:[%s7021_s2 + $0xc8] sm:$0xff] }
 0x216   :  { %v5934_v35 = vpop.eup %5933  ;;  %5740 = vmatprep.mubr.msk.f32.mxu1 %vm5974_vm1, %v5973_v0  ;;  %5744 = vmatpush3.msra.mxu0 %v90_v32  ;;  %v2906_v16 = vmul.f32 %v5932_v12, %v6546_v28  ;;  %v104_v12 = vld [vmem:[%s7021_s2 + $0xd0] sm:$0xff] }
 0x217   :  { %v2826_v7 = vpop.xlane.xlu1 %2825  ;;  %5745 = vmatprep.mubr.msk.f32.mxu0 %vm5974_vm1, %v5973_v0  ;;  %v2907_v11 = vmul.f32 %v5934_v35, %v6548_v29  ;;  %5748 = vmatprep.subr.mxu1 %v5973_v0 }
 0x218   :  { %5947 = vrcp.f32 %v2826_v7  ;;  %v2829_v20 = vpop.xlane.xlu0 %2828  ;;  %5741 = vmatmul.mubr.msk.f32.vlgmr.msra.gmra.mxu1 %vm110_vm0, %v2906_v16  ;;  %5753 = vmatprep.subr.mxu0 %v5973_v0  ;;  %v105_v16 = vld [vmem:[%s7021_s2 + $0xd8] sm:$0xff]  ;;  %v106_v7 = vld [vmem:[%s7021_s2 + $0xe0] sm:$0xff] }
 0x219   :  { %v5936_v28 = vpop.eup %5935  ;;  %5949 = vrcp.f32 %v2829_v20  ;;  %5746 = vmatmul.mubr.msk.f32.vlgmr.msra.gmra.mxu0 %vm110_vm0, %v2907_v11  ;;  %5749 = vmatpush3.msra.mxu1 %v91_v63 }
 0x21a   :  { %v5938_v25 = vpop.eup %5937  ;;  %5750 = vmatprep.mubr.msk.f32.mxu1 %vm5974_vm1, %v5973_v0  ;;  %5754 = vmatpush3.msra.mxu0 %v92_v40  ;;  %v2908_v29 = vmul.f32 %v5936_v28, %v6559_v44  ;;  %v107_v40 = vld [vmem:[%s7021_s2 + $0xe8] sm:$0xff]  ;;  %v108_v28 = vld [vmem:[%s7021_s2 + $0xf0] sm:$0xff] }
 0x21b   :  { %v2832_v48 = vpop.xlane.xlu1 %2831  ;;  %5755 = vmatprep.mubr.msk.f32.mxu0 %vm5974_vm1, %v5973_v0  ;;  %v2909_v24 = vmul.f32 %v5938_v25, %v6562_v45  ;;  %5758 = vmatprep.subr.mxu1 %v5973_v0 }
 0x21c   :  { %5951 = vrcp.f32 %v2832_v48  ;;  %v2835_v13 = vpop.xlane.xlu0 %2834  ;;  %5751 = vmatmul.mubr.msk.f32.vlgmr.msra.gmra.mxu1 %vm110_vm0, %v2908_v29  ;;  %5763 = vmatprep.subr.mxu0 %v5973_v0  ;;  %v109_v29 = vld [vmem:[%s7021_s2 + $0xf8] sm:$0xff] }
 0x21d   :  { %v5940_v44 = vpop.eup %5939  ;;  %5953 = vrcp.f32 %v2835_v13  ;;  %5756 = vmatmul.mubr.msk.f32.vlgmr.msra.gmra.mxu0 %vm110_vm0, %v2909_v24  ;;  %5759 = vmatpush3.msra.mxu1 %v93_v43 }
 0x21e   :  { %v5942_v46 = vpop.eup %5941  ;;  %5760 = vmatprep.mubr.msk.f32.mxu1 %vm5974_vm1, %v5973_v0  ;;  %5764 = vmatpush3.msra.mxu0 %v94_v30  ;;  %v2910_v45 = vmul.f32 %v5940_v44, %v6574_v3 }
 0x21f   :  { %v2838_v36 = vpop.xlane.xlu1 %2837  ;;  %5765 = vmatprep.mubr.msk.f32.mxu0 %vm5974_vm1, %v5973_v0  ;;  %v2911_v27 = vmul.f32 %v5942_v46, %v6576_v60  ;;  %5768 = vmatprep.subr.mxu1 %v5973_v0 }
 0x220   :  { %5955 = vrcp.f32 %v2838_v36  ;;  %v2841_v56 = vpop.xlane.xlu0 %2840  ;;  %5761 = vmatmul.mubr.msk.f32.vlgmr.msra.gmra.mxu1 %vm110_vm0, %v2910_v45  ;;  %5773 = vmatprep.subr.mxu0 %v5973_v0 }
 0x221   :  { %v5944_v3 = vpop.eup %5943  ;;  %5957 = vrcp.f32 %v2841_v56  ;;  %5766 = vmatmul.mubr.msk.f32.vlgmr.msra.gmra.mxu0 %vm110_vm0, %v2911_v27  ;;  %5769 = vmatpush3.msra.mxu1 %v95_v31 }
 0x222   :  { %v5946_v39 = vpop.eup %5945  ;;  %5770 = vmatprep.mubr.msk.f32.mxu1 %vm5974_vm1, %v5973_v0  ;;  %5774 = vmatpush3.msra.mxu0 %v96_v37  ;;  %v2912_v60 = vmul.f32 %v5944_v3, %v6584_v8 }
 0x223   :  { %v2844_v58 = vpop.xlane.xlu1 %2843  ;;  %5775 = vmatprep.mubr.msk.f32.mxu0 %vm5974_vm1, %v5973_v0  ;;  %v2913_v41 = vmul.f32 %v5946_v39, %v6586_v14  ;;  %5778 = vmatprep.subr.mxu1 %v5973_v0 }
 0x224   :  { %5959 = vrcp.f32 %v2844_v58  ;;  %v2847_v18 = vpop.xlane.xlu0 %2846  ;;  %5771 = vmatmul.mubr.msk.f32.vlgmr.msra.gmra.mxu1 %vm110_vm0, %v2912_v60  ;;  %5783 = vmatprep.subr.mxu0 %v5973_v0 }
 0x225   :  { %v5948_v8 = vpop.eup %5947  ;;  %5961 = vrcp.f32 %v2847_v18  ;;  %5776 = vmatmul.mubr.msk.f32.vlgmr.msra.gmra.mxu0 %vm110_vm0, %v2913_v41  ;;  %5779 = vmatpush3.msra.mxu1 %v97_v54 }
 0x226   :  { %v5950_v51 = vpop.eup %5949  ;;  %5780 = vmatprep.mubr.msk.f32.mxu1 %vm5974_vm1, %v5973_v0  ;;  %5784 = vmatpush3.msra.mxu0 %v98_v47  ;;  %v2914_v14 = vmul.f32 %v5948_v8, %v6594_v19 }
 0x227   :  { %v2850_v53 = vpop.xlane.xlu1 %2849  ;;  %5785 = vmatprep.mubr.msk.f32.mxu0 %vm5974_vm1, %v5973_v0  ;;  %v2915_v4 = vmul.f32 %v5950_v51, %v6596_v23  ;;  %5788 = vmatprep.subr.mxu1 %v5973_v0 }
 0x228   :  { %5963 = vrcp.f32 %v2850_v53  ;;  %v2853_v17 = vpop.xlane.xlu0 %2852  ;;  %5781 = vmatmul.mubr.msk.f32.vlgmr.msra.gmra.mxu1 %vm110_vm0, %v2914_v14  ;;  %5793 = vmatprep.subr.mxu0 %v5973_v0 }
 0x229   :  { %v5952_v19 = vpop.eup %5951  ;;  %5965 = vrcp.f32 %v2853_v17  ;;  %5786 = vmatmul.mubr.msk.f32.vlgmr.msra.gmra.mxu0 %vm110_vm0, %v2915_v4  ;;  %5789 = vmatpush3.msra.mxu1 %v99_v62 }
 0x22a   :  { %v5954_v26 = vpop.eup %5953  ;;  %5790 = vmatprep.mubr.msk.f32.mxu1 %vm5974_vm1, %v5973_v0  ;;  %5794 = vmatpush3.msra.mxu0 %v100_v22  ;;  %v2916_v23 = vmul.f32 %v5952_v19, %v6604_v38 }
 0x22b   :  { %v2856_v1 = vpop.xlane.xlu1 %2855  ;;  %5795 = vmatprep.mubr.msk.f32.mxu0 %vm5974_vm1, %v5973_v0  ;;  %v2917_v57 = vmul.f32 %v5954_v26, %v6606_v42  ;;  %5798 = vmatprep.subr.mxu1 %v5973_v0 }
 0x22c   :  { %5967 = vrcp.f32 %v2856_v1  ;;  %v2859_v34 = vpop.xlane.xlu0 %2858  ;;  %5791 = vmatmul.mubr.msk.f32.vlgmr.msra.gmra.mxu1 %vm110_vm0, %v2916_v23  ;;  %5803 = vmatprep.subr.mxu0 %v5973_v0 }
 0x22d   :  { %v5956_v38 = vpop.eup %5955  ;;  %5969 = vrcp.f32 %v2859_v34  ;;  %5796 = vmatmul.mubr.msk.f32.vlgmr.msra.gmra.mxu0 %vm110_vm0, %v2917_v57  ;;  %5799 = vmatpush3.msra.mxu1 %v101_v52 }
 0x22e   :  { %v5958_v9 = vpop.eup %5957  ;;  %5800 = vmatprep.mubr.msk.f32.mxu1 %vm5974_vm1, %v5973_v0  ;;  %5804 = vmatpush3.msra.mxu0 %v102_v6  ;;  %v2918_v42 = vmul.f32 %v5956_v38, %v6613_v21 }
 0x22f   :  { %v2862_v32 = vpop.xlane.xlu1 %2861  ;;  %5805 = vmatprep.mubr.msk.f32.mxu0 %vm5974_vm1, %v5973_v0  ;;  %v2919_v33 = vmul.f32 %v5958_v9, %v6615_v49  ;;  %5808 = vmatprep.subr.mxu1 %v5973_v0 }
 0x230   :  { %5971 = vrcp.f32 %v2862_v32  ;;  %5801 = vmatmul.mubr.msk.f32.vlgmr.msra.gmra.mxu1 %vm110_vm0, %v2918_v42  ;;  %5813 = vmatprep.subr.mxu0 %v5973_v0 }
 0x231   :  { %v5960_v21 = vpop.eup %5959  ;;  %5806 = vmatmul.mubr.msk.f32.vlgmr.msra.gmra.mxu0 %vm110_vm0, %v2919_v33  ;;  %5809 = vmatpush3.msra.mxu1 %v103_v15 }
 0x232   :  { %v5962_v35 = vpop.eup %5961  ;;  %5810 = vmatprep.mubr.msk.f32.mxu1 %vm5974_vm1, %v5973_v0  ;;  %5814 = vmatpush3.msra.mxu0 %v104_v12  ;;  %v2920_v49 = vmul.f32 %v5960_v21, %v6621_v50 }
 0x233   :  { %5815 = vmatprep.mubr.msk.f32.mxu0 %vm5974_vm1, %v5973_v0  ;;  %v2921_v63 = vmul.f32 %v5962_v35, %v6623_v55  ;;  %5818 = vmatprep.subr.mxu1 %v5973_v0 }
 0x234   :  { %5811 = vmatmul.mubr.msk.f32.vlgmr.msra.gmra.mxu1 %vm110_vm0, %v2920_v49  ;;  %5823 = vmatprep.subr.mxu0 %v5973_v0 }
 0x235   :  { %v5964_v50 = vpop.eup %5963  ;;  %5816 = vmatmul.mubr.msk.f32.vlgmr.msra.gmra.mxu0 %vm110_vm0, %v2921_v63  ;;  %5819 = vmatpush3.msra.mxu1 %v105_v16 }
 0x236   :  { %v5966_v11 = vpop.eup %5965  ;;  %5820 = vmatprep.mubr.msk.f32.mxu1 %vm5974_vm1, %v5973_v0  ;;  %5824 = vmatpush3.msra.mxu0 %v106_v7  ;;  %v2922_v55 = vmul.f32 %v5964_v50, %v6629_v59 }
 0x237   :  { %5825 = vmatprep.mubr.msk.f32.mxu0 %vm5974_vm1, %v5973_v0  ;;  %v2923_v20 = vmul.f32 %v5966_v11, %v6631_v61  ;;  %5828 = vmatprep.subr.mxu1 %v5973_v0 }
 0x238   :  { %5821 = vmatmul.mubr.msk.f32.vlgmr.msra.gmra.mxu1 %vm110_vm0, %v2922_v55  ;;  %5833 = vmatprep.subr.mxu0 %v5973_v0 }
 0x239   :  { %v5968_v59 = vpop.eup %5967  ;;  %5826 = vmatmul.mubr.msk.f32.vlgmr.msra.gmra.mxu0 %vm110_vm0, %v2923_v20  ;;  %5829 = vmatpush3.msra.mxu1 %v107_v40 }
 0x23a   :  { %v5970_v25 = vpop.eup %5969  ;;  %5830 = vmatprep.mubr.msk.f32.mxu1 %vm5974_vm1, %v5973_v0  ;;  %5834 = vmatpush3.msra.mxu0 %v108_v28  ;;  %v2924_v61 = vmul.f32 %v5968_v59, %v6637_v10 }
 0x23b   :  { %5835 = vmatprep.mubr.msk.f32.mxu0 %vm5974_vm1, %v5973_v0  ;;  %v2925_v43 = vmul.f32 %v5970_v25, %v6639_v2  ;;  %5838 = vmatprep.subr.mxu1 %v5973_v0 }
 0x23c   :  { %5831 = vmatmul.mubr.msk.f32.vlgmr.msra.gmra.mxu1 %vm110_vm0, %v2924_v61 }
 0x23d   :  { %v5972_v48 = vpop.eup %5971  ;;  %5836 = vmatmul.mubr.msk.f32.vlgmr.msra.gmra.mxu0 %vm110_vm0, %v2925_v43  ;;  %5839 = vmatpush3.msra.mxu1 %v109_v29 }
 0x23e   :  { %5840 = vmatprep.mubr.msk.f32.mxu1 %vm5974_vm1, %v5973_v0  ;;  %v2926_v10 = vmul.f32 %v5972_v48, %v6645_v5 }
 0x240   :  { %5841 = vmatmul.mubr.msk.f32.vlgmr.msra.gmra.mxu1 %vm110_vm0, %v2926_v10 }
 0x2c0   :  { %v2996_v24 = vpop.f32.mrf.mxu0 }
 0x2c1   :  { %5263 = vst.msk [vmem:[%s7022_s3] sm:$0xff] %vm110_vm0, %v2996_v24 }
 0x2c2   :  { %v5687_v2 = vpop.f32.mrf.mxu0 }
 0x2c4   :  { %v3069_v30 = vpop.f32.mrf.mxu1 }
 0x2c5   :  { %5264 = vst.msk [vmem:[%s7022_s3 + $0x8] sm:$0xff] %vm110_vm0, %v3069_v30  ;;  %v3142_v13 = vpop.f32.mrf.mxu0 }
 0x2c6   :  { %5265 = vst.msk [vmem:[%s7022_s3 + $0x10] sm:$0xff] %vm110_vm0, %v3142_v13  ;;  %v5692_v0 = vpop.f32.mrf.mxu1 }
 0x2c7   :  { %v5697_v5 = vpop.f32.mrf.mxu0 }
 0x2c8   :  { %v3215_v44 = vpop.f32.mrf.mxu1 }
 0x2c9   :  { %5266 = vst.msk [vmem:[%s7022_s3 + $0x18] sm:$0xff] %vm110_vm0, %v3215_v44  ;;  %v3288_v46 = vpop.f32.mrf.mxu0 }
 0x2ca   :  { %5267 = vst.msk [vmem:[%s7022_s3 + $0x20] sm:$0xff] %vm110_vm0, %v3288_v46  ;;  %v5702_v45 = vpop.f32.mrf.mxu1 }
 0x2cb   :  { %v5707_v31 = vpop.f32.mrf.mxu0 }
 0x2cc   :  { %v3361_v36 = vpop.f32.mrf.mxu1 }
 0x2cd   :  { %5268 = vst.msk [vmem:[%s7022_s3 + $0x28] sm:$0xff] %vm110_vm0, %v3361_v36  ;;  %v3434_v27 = vpop.f32.mrf.mxu0 }
 0x2ce   :  { %5269 = vst.msk [vmem:[%s7022_s3 + $0x30] sm:$0xff] %vm110_vm0, %v3434_v27  ;;  %v5712_v37 = vpop.f32.mrf.mxu1 }
 0x2cf   :  { %v5717_v56 = vpop.f32.mrf.mxu0 }
 0x2d0   :  { %v3507_v3 = vpop.f32.mrf.mxu1 }
 0x2d1   :  { %5270 = vst.msk [vmem:[%s7022_s3 + $0x38] sm:$0xff] %vm110_vm0, %v3507_v3  ;;  %v3580_v39 = vpop.f32.mrf.mxu0 }
 0x2d2   :  { %5271 = vst.msk [vmem:[%s7022_s3 + $0x40] sm:$0xff] %vm110_vm0, %v3580_v39  ;;  %v5722_v60 = vpop.f32.mrf.mxu1 }
 0x2d3   :  { %v5727_v54 = vpop.f32.mrf.mxu0 }
 0x2d4   :  { %v3653_v58 = vpop.f32.mrf.mxu1 }
 0x2d5   :  { %5272 = vst.msk [vmem:[%s7022_s3 + $0x48] sm:$0xff] %vm110_vm0, %v3653_v58  ;;  %v3726_v41 = vpop.f32.mrf.mxu0 }
 0x2d6   :  { %5273 = vst.msk [vmem:[%s7022_s3 + $0x50] sm:$0xff] %vm110_vm0, %v3726_v41  ;;  %v5732_v47 = vpop.f32.mrf.mxu1 }
 0x2d7   :  { %v5737_v18 = vpop.f32.mrf.mxu0 }
 0x2d8   :  { %v3799_v8 = vpop.f32.mrf.mxu1 }
 0x2d9   :  { %5274 = vst.msk [vmem:[%s7022_s3 + $0x58] sm:$0xff] %vm110_vm0, %v3799_v8  ;;  %v3872_v51 = vpop.f32.mrf.mxu0 }
 0x2da   :  { %5275 = vst.msk [vmem:[%s7022_s3 + $0x60] sm:$0xff] %vm110_vm0, %v3872_v51  ;;  %v5742_v14 = vpop.f32.mrf.mxu1 }
 0x2db   :  { %v5747_v62 = vpop.f32.mrf.mxu0 }
 0x2dc   :  { %v3945_v53 = vpop.f32.mrf.mxu1 }
 0x2dd   :  { %5276 = vst.msk [vmem:[%s7022_s3 + $0x68] sm:$0xff] %vm110_vm0, %v3945_v53  ;;  %v4018_v4 = vpop.f32.mrf.mxu0 }
 0x2de   :  { %5277 = vst.msk [vmem:[%s7022_s3 + $0x70] sm:$0xff] %vm110_vm0, %v4018_v4  ;;  %v5752_v22 = vpop.f32.mrf.mxu1 }
 0x2df   :  { %v5757_v17 = vpop.f32.mrf.mxu0 }
 0x2e0   :  { %v4091_v19 = vpop.f32.mrf.mxu1 }
 0x2e1   :  { %5278 = vst.msk [vmem:[%s7022_s3 + $0x78] sm:$0xff] %vm110_vm0, %v4091_v19  ;;  %v4164_v26 = vpop.f32.mrf.mxu0 }
 0x2e2   :  { %5279 = vst.msk [vmem:[%s7022_s3 + $0x80] sm:$0xff] %vm110_vm0, %v4164_v26  ;;  %v5762_v23 = vpop.f32.mrf.mxu1 }
 0x2e3   :  { %v5767_v52 = vpop.f32.mrf.mxu0 }
 0x2e4   :  { %v4237_v1 = vpop.f32.mrf.mxu1 }
 0x2e5   :  { %5280 = vst.msk [vmem:[%s7022_s3 + $0x88] sm:$0xff] %vm110_vm0, %v4237_v1  ;;  %v4310_v57 = vpop.f32.mrf.mxu0 }
 0x2e6   :  { %5281 = vst.msk [vmem:[%s7022_s3 + $0x90] sm:$0xff] %vm110_vm0, %v4310_v57  ;;  %v5772_v6 = vpop.f32.mrf.mxu1 }
 0x2e7   :  { %v5777_v34 = vpop.f32.mrf.mxu0 }
 0x2e8   :  { %v4383_v38 = vpop.f32.mrf.mxu1 }
 0x2e9   :  { %5282 = vst.msk [vmem:[%s7022_s3 + $0x98] sm:$0xff] %vm110_vm0, %v4383_v38  ;;  %v4456_v9 = vpop.f32.mrf.mxu0 }
 0x2ea   :  { %5283 = vst.msk [vmem:[%s7022_s3 + $0xa0] sm:$0xff] %vm110_vm0, %v4456_v9  ;;  %v5782_v42 = vpop.f32.mrf.mxu1 }
 0x2eb   :  { %v5787_v15 = vpop.f32.mrf.mxu0 }
 0x2ec   :  { %v4529_v32 = vpop.f32.mrf.mxu1 }
 0x2ed   :  { %5284 = vst.msk [vmem:[%s7022_s3 + $0xa8] sm:$0xff] %vm110_vm0, %v4529_v32  ;;  %v4602_v33 = vpop.f32.mrf.mxu0 }
 0x2ee   :  { %5285 = vst.msk [vmem:[%s7022_s3 + $0xb0] sm:$0xff] %vm110_vm0, %v4602_v33  ;;  %v5792_v12 = vpop.f32.mrf.mxu1 }
 0x2ef   :  { %v5797_v21 = vpop.f32.mrf.mxu0 }
 0x2f0   :  { %v4675_v35 = vpop.f32.mrf.mxu1 }
 0x2f1   :  { %5286 = vst.msk [vmem:[%s7022_s3 + $0xb8] sm:$0xff] %vm110_vm0, %v4675_v35  ;;  %v4748_v49 = vpop.f32.mrf.mxu0 }
 0x2f2   :  { %5287 = vst.msk [vmem:[%s7022_s3 + $0xc0] sm:$0xff] %vm110_vm0, %v4748_v49  ;;  %v5802_v16 = vpop.f32.mrf.mxu1 }
 0x2f3   :  { %v5807_v63 = vpop.f32.mrf.mxu0 }
 0x2f4   :  { %v4821_v7 = vpop.f32.mrf.mxu1 }
 0x2f5   :  { %5288 = vst.msk [vmem:[%s7022_s3 + $0xc8] sm:$0xff] %vm110_vm0, %v4821_v7  ;;  %v4894_v50 = vpop.f32.mrf.mxu0 }
 0x2f6   :  { %5289 = vst.msk [vmem:[%s7022_s3 + $0xd0] sm:$0xff] %vm110_vm0, %v4894_v50  ;;  %v5812_v11 = vpop.f32.mrf.mxu1 }
 0x2f7   :  { %v5817_v55 = vpop.f32.mrf.mxu0 }
 0x2f8   :  { %v4967_v40 = vpop.f32.mrf.mxu1 }
 0x2f9   :  { %5290 = vst.msk [vmem:[%s7022_s3 + $0xd8] sm:$0xff] %vm110_vm0, %v4967_v40  ;;  %v5040_v20 = vpop.f32.mrf.mxu0 }
 0x2fa   :  { %5291 = vst.msk [vmem:[%s7022_s3 + $0xe0] sm:$0xff] %vm110_vm0, %v5040_v20  ;;  %v5822_v28 = vpop.f32.mrf.mxu1 }
 0x2fb   :  { %v5827_v59 = vpop.f32.mrf.mxu0 }
 0x2fc   :  { %v5113_v25 = vpop.f32.mrf.mxu1 }
 0x2fd   :  { %5292 = vst.msk [vmem:[%s7022_s3 + $0xe8] sm:$0xff] %vm110_vm0, %v5113_v25  ;;  %v5186_v61 = vpop.f32.mrf.mxu0 }
 0x2fe   :  { %5293 = vst.msk [vmem:[%s7022_s3 + $0xf0] sm:$0xff] %vm110_vm0, %v5186_v61  ;;  %v5832_v29 = vpop.f32.mrf.mxu1 }
 0x2ff   :  { %v5837_v43 = vpop.f32.mrf.mxu0 }
 0x300   :  { %v5259_v48 = vpop.f32.mrf.mxu1 }
 0x301   :  { %5294 = vst.msk [vmem:[%s7022_s3 + $0xf8] sm:$0xff] %vm110_vm0, %v5259_v48 }
 0x302   :  { %v5842_v10 = vpop.f32.mrf.mxu1 }

</bundles_post_ra>
